<compile_context>
chip_gen: v5e
topology: v5e:2x2
jax: 0.10.0
libtpu: 0.0.40
codegen_flags: <defaults>
</compile_context>

<pallas_src>
import functools
import math

import jax
import jax.numpy as jnp
from jax import lax
from jax.experimental import pallas as pl
from jax.experimental.pallas import tpu as pltpu

F32 = jnp.float32
MXU_DTYPE = jnp.bfloat16       # MXU operand dtype (f32 accumulation)
W_DTYPE = jnp.bfloat16         # storage dtype of matmul weights in HBM
NEG_INF = -1e9                 # finite stand-in for float('-inf') additive masks

# ----------------------------- small synthetic config -----------------------
EMBED_DIM = 64          # CLIP joint embedding dim
VOCAB_SIZE = 128        # text_cfg.vocab_size (also the text_decoder output dim)
CONTEXT_LEN = 16        # text_cfg.context_length
TEXT_WIDTH = 64
TEXT_HEADS = 2
TEXT_LAYERS = 2
IMAGE_SIZE = 16
PATCH_SIZE = 8
IN_CHANS = 3
VIS_WIDTH = 64
VIS_HEADS = 2
VIS_LAYERS = 2
N_QUERIES = 9           # attentional pooler queries (1 contrastive tok + 8 caption toks)
POOL_HEADS = 2          # multimodal_cfg.attn_pooler_heads
MM_WIDTH = 64           # multimodal_cfg.width  (== text width)
MM_HEADS = 2
MM_LAYERS = 2
MLP_RATIO = 4
PAD_ID = 0
BATCH = 2

_PARALLEL = pltpu.CompilerParams(dimension_semantics=("parallel",))
_PAR_ARB = pltpu.CompilerParams(dimension_semantics=("parallel", "arbitrary"))

# Ordered per-layer weight names (must match the unpack order in the kernels).
SELF_KEYS = ("ln1_g", "ln1_b", "wq", "bq", "wk", "bk", "wv", "bv", "wo", "bo",
             "ln2_g", "ln2_b", "fc_w", "fc_b", "pw", "pb")
CROSS_KEYS = ("ln1_g", "ln1_b", "lnkv_g", "lnkv_b", "wq", "bq", "wk", "bk", "wv", "bv",
              "wo", "bo", "ln2_g", "ln2_b", "fc_w", "fc_b", "pw", "pb")
N_SELF_W = len(SELF_KEYS)
N_CROSS_W = len(CROSS_KEYS)


# ----------------------- in-kernel math helpers (traced) ---------------------
def _mm(a, b):
    """A @ B on the MXU: bf16 operands, f32 accumulation."""
    return jnp.dot(a.astype(MXU_DTYPE), b.astype(MXU_DTYPE),
                   preferred_element_type=jnp.float32)


def _mm_nt(a, b):
    """A @ B^T (contract last dims) on the MXU: bf16 operands, f32 accumulation."""
    return lax.dot_general(a.astype(MXU_DTYPE), b.astype(MXU_DTYPE),
                           (((1,), (1,)), ((), ())),
                           preferred_element_type=jnp.float32)


def _ln(x, g, b):
    """LayerNorm over the last dim, eps=1e-5 (matches torch.nn.LayerNorm), f32 math."""
    mu = jnp.mean(x, axis=-1, keepdims=True)
    var = jnp.mean(jnp.square(x - mu), axis=-1, keepdims=True)
    return (x - mu) * lax.rsqrt(var + 1e-5) * g + b


def _gelu(x):
    """Exact GELU (torch.nn.GELU default, quick_gelu=False), f32 math."""
    return 0.5 * x * (1.0 + lax.erf(x * (1.0 / math.sqrt(2.0))))


def _softmax_rows(s):
    s = s - jnp.max(s, axis=-1, keepdims=True)
    p = jnp.exp(s)
    return p / jnp.sum(p, axis=-1, keepdims=True)


def _mha(yq, yk, heads, wq, bq, wk, bk, wv, bv, wo, bo, mask):
    """Multi-head attention.  yq:(Lq,D) yk:(Lk,D); weight refs are per-head split with a
    leading size-1 layer dim: wq/wk/wv:(1,H,D,Dh), b*: (1,H,1,Dh), wo:(1,H,Dh,D), bo:(1,1,D).
    Per-head outputs are folded into the output projection, so no lane-axis slices/concats."""
    Lq, D = yq.shape
    dh = D // heads
    scale = 1.0 / math.sqrt(dh)
    out = jnp.zeros((Lq, D), F32)
    for h in range(heads):                         # heads is tiny -> static unroll
        q_h = _mm(yq, wq[0, h]) + bq[0, h]
        k_h = _mm(yk, wk[0, h]) + bk[0, h]
        v_h = _mm(yk, wv[0, h]) + bv[0, h]
        s = _mm_nt(q_h, k_h) * scale
        if mask is not None:
            s = s + mask
        out = out + _mm(_mm(_softmax_rows(s), v_h), wo[0, h])
    return out + bo[0]


def _self_residual(x, mask, heads, w):
    """Pre-LN ResidualAttentionBlock (self-attention); w = 16 per-layer weight refs."""
    (ln1g, ln1b, wq, bq, wk, bk, wv, bv, wo, bo,
     ln2g, ln2b, fcw, fcb, pw, pb) = w
    y = _ln(x, ln1g[0], ln1b[0])
    x = x + _mha(y, y, heads, wq, bq, wk, bk, wv, bv, wo, bo, mask)
    y = _ln(x, ln2g[0], ln2b[0])
    return x + _mm(_gelu(_mm(y, fcw[0]) + fcb[0]), pw[0]) + pb[0]


def _cross_residual(x, kv, heads, w):
    """ResidualAttentionBlock with is_cross_attention=True (ln_1_kv on k/v), no mask."""
    (ln1g, ln1b, lnkg, lnkb, wq, bq, wk, bk, wv, bv, wo, bo,
     ln2g, ln2b, fcw, fcb, pw, pb) = w
    yq = _ln(x, ln1g[0], ln1b[0])
    yk = _ln(kv, lnkg[0], lnkb[0])
    x = x + _mha(yq, yk, heads, wq, bq, wk, bk, wv, bv, wo, bo, None)
    y = _ln(x, ln2g[0], ln2b[0])
    return x + _mm(_gelu(_mm(y, fcw[0]) + fcb[0]), pw[0]) + pb[0]


def _causal_mask(L):
    row = lax.broadcasted_iota(jnp.int32, (L, L), 0)
    col = lax.broadcasted_iota(jnp.int32, (L, L), 1)
    return jnp.where(col <= row, 0.0, NEG_INF).astype(F32)


# ------------------------------ fused Pallas kernels --------------------------
def _text_tower_kernel(*refs, heads):
    """Fused text tower: all self-attn layers (causal + key-pad bias), then at the last
    layer: caption tokens out + ln_final('last' pool) @ text_projection."""
    x_ref, kb_ref = refs[0], refs[1]
    lw = refs[2:2 + N_SELF_W]
    lnfg, lnfb, tproj = refs[2 + N_SELF_W:5 + N_SELF_W]
    tok_ref, pool_ref = refs[5 + N_SELF_W], refs[6 + N_SELF_W]
    carry = refs[7 + N_SELF_W]

    l = pl.program_id(1)
    n_layers = pl.num_programs(1)

    @pl.when(l == 0)
    def _():
        carry[...] = x_ref[0].astype(F32)

    x = carry[...]
    L = x.shape[0]
    mask = _causal_mask(L) + kb_ref[0]            # (L,L) + (1,L) key-padding bias
    x = _self_residual(x, mask, heads, lw)
    carry[...] = x

    @pl.when(l == n_layers - 1)
    def _():
        tok_ref[0] = x[:L - 1, :].astype(tok_ref.dtype)          # tokens (no ln_final, CoCa path)
        pooled = _ln(x[L - 1:, :], lnfg[...], lnfb[...])         # appended cls token
        pool_ref[0] = _mm(pooled, tproj[...]).astype(pool_ref.dtype)


def _vision_tower_kernel(*refs, heads):
    """Fused vision tower: (l==0) patch-embed matmul + cls/pos bias + ln_pre, then all
    self-attn layers; writes the token stream at the last layer."""
    patch_ref, convw, tokbias, lpg, lpb = refs[0:5]
    lw = refs[5:5 + N_SELF_W]
    o_ref = refs[5 + N_SELF_W]
    carry = refs[6 + N_SELF_W]

    l = pl.program_id(1)
    n_layers = pl.num_programs(1)

    @pl.when(l == 0)
    def _():
        # row 0 of patch_ref is zeros (cls slot); cls emb + pos emb folded into tokbias.
        x0 = _mm(patch_ref[0].astype(F32), convw[...]) + tokbias[...]
        carry[...] = _ln(x0, lpg[...], lpb[...])

    x = _self_residual(carry[...], None, heads, lw)
    carry[...] = x

    @pl.when(l == n_layers - 1)
    def _():
        o_ref[0] = x.astype(o_ref.dtype)


def _vision_head_kernel(*refs, heads):
    """Fused attentional pooler + ln_post + 'tok' global pool + contrastive projection."""
    x_ref, query, lnqg, lnqb, lnkg, lnkb = refs[0:6]
    wq, bq, wk, bk, wv, bv, wo, bo = refs[6:14]
    lnpg, lnpb, proj = refs[14:17]
    tok_ref, pool_ref = refs[17], refs[18]

    x = x_ref[0].astype(F32)                                      # (Lk, D)
    yq = _ln(query[...].astype(F32), lnqg[...], lnqb[...])        # (NQ, D)
    yk = _ln(x, lnkg[...], lnkb[...])
    out = _mha(yq, yk, heads, wq, bq, wk, bk, wv, bv, wo, bo, None)
    y = _ln(out, lnpg[...], lnpb[...])
    tok_ref[0] = y[1:, :].astype(tok_ref.dtype)                   # image_embs (caption tokens)
    pool_ref[0] = _mm(y[0:1, :], proj[...]).astype(pool_ref.dtype)


def _mm_decoder_kernel(*refs, heads):
    """Fused MultimodalTransformer: per layer a causal self-attn block then a cross-attn
    block against image_embs; at the last layer ln_final + logits projection."""
    t_ref, img_ref = refs[0], refs[1]
    i = 2
    sw = refs[i:i + N_SELF_W]; i += N_SELF_W
    cw = refs[i:i + N_CROSS_W]; i += N_CROSS_W
    lnfg, lnfb, tproj = refs[i:i + 3]
    o_ref = refs[i + 3]
    carry = refs[i + 4]

    l = pl.program_id(1)
    n_layers = pl.num_programs(1)

    @pl.when(l == 0)
    def _():
        carry[...] = t_ref[0].astype(F32)

    x = carry[...]
    L = x.shape[0]
    x = _self_residual(x, _causal_mask(L), heads, sw)
    x = _cross_residual(x, img_ref[0].astype(F32), heads, cw)
    carry[...] = x

    @pl.when(l == n_layers - 1)
    def _():
        o_ref[0] = _mm(_ln(x, lnfg[...], lnfb[...]), tproj[...]).astype(o_ref.dtype)


# ------------------------------ BlockSpec helpers -----------------------------
def _stacked_spec(arr):
    """Stream one layer's weight block per grid step: (b, l) -> (l, 0, ...)."""
    tail = (0,) * (arr.ndim - 1)

    def imap(b, l):
        return (l,) + tail
    return pl.BlockSpec((1,) + arr.shape[1:], imap)


def _const_spec2(arr):
    zeros = (0,) * arr.ndim

    def imap(b, l):
        return zeros
    return pl.BlockSpec(arr.shape, imap)


def _const_spec1(arr):
    zeros = (0,) * arr.ndim

    def imap(b):
        return zeros
    return pl.BlockSpec(arr.shape, imap)


# ------------------------------ tower wrappers --------------------------------
def text_tower_forward(text, p):
    """open_clip TextTransformer with cls_emb (CoCa text encoder) — one pallas_call."""
    B, Lt = text.shape
    D = p["token_emb"].shape[1]
    L = Lt + 1
    x = p["token_emb"][text]                                      # embedding gather (glue)
    cls = jnp.broadcast_to(p["cls_emb"].reshape(1, 1, D), (B, 1, D))
    x = jnp.concatenate([x, cls], axis=1) + p["pos_emb"][:L][None]
    # key-padding bias: pad keys masked out, appended cls token always attendable
    key_ok = jnp.concatenate([text != PAD_ID, jnp.ones((B, 1), dtype=bool)], axis=1)
    key_bias = jnp.where(key_ok, 0.0, NEG_INF).astype(F32).reshape(B, 1, L)

    lw = [p["layers"][k] for k in SELF_KEYS]
    fw = [p["lnf_g"], p["lnf_b"], p["text_proj"]]
    n_layers = p["layers"]["wq"].shape[0]
    E = p["text_proj"].shape[1]

    in_specs = ([pl.BlockSpec((1, L, D), lambda b, l: (b, 0, 0)),
                 pl.BlockSpec((1, 1, L), lambda b, l: (b, 0, 0))]
                + [_stacked_spec(w) for w in lw]
                + [_const_spec2(w) for w in fw])
    tokens, pooled = pl.pallas_call(
        functools.partial(_text_tower_kernel, heads=TEXT_HEADS),
        grid=(B, n_layers),
        in_specs=in_specs,
        out_specs=(pl.BlockSpec((1, Lt, D), lambda b, l: (b, 0, 0)),
                   pl.BlockSpec((1, 1, E), lambda b, l: (b, 0, 0))),
        out_shape=(jax.ShapeDtypeStruct((B, Lt, D), F32),
                   jax.ShapeDtypeStruct((B, 1, E), F32)),
        scratch_shapes=[pltpu.VMEM((L, D), F32)],
        compiler_params=_PAR_ARB,
    )(x, key_bias, *lw, *fw)
    return pooled[:, 0], tokens


def vision_tower_forward(image, p):
    """open_clip VisionTransformer with attn_pool (legacy CoCa path) — two pallas_calls."""
    B, C, H, W = image.shape
    ps = PATCH_SIZE
    nP = (H // ps) * (W // ps)
    Cp = C * ps * ps
    D = p["conv_w"].shape[1]
    # patchify in (C, kh, kw) order to match PyTorch Conv2d weight flattening (glue)
    patches = image.reshape(B, C, H // ps, ps, W // ps, ps)
    patches = patches.transpose(0, 2, 4, 1, 3, 5).reshape(B, nP, Cp)
    # prepend a zero row for the cls slot (avoids an in-kernel sublane concat)
    patches = jnp.concatenate([jnp.zeros((B, 1, Cp), patches.dtype), patches], axis=1)
    L = nP + 1
    # cls embedding (row 0) + positional embedding folded into one additive token bias
    tok_bias = jnp.concatenate([p["class_emb"], jnp.zeros((nP, D), F32)], axis=0) + p["pos_emb"]

    lw = [p["layers"][k] for k in SELF_KEYS]
    n_layers = p["layers"]["wq"].shape[0]
    embed_ws = [p["conv_w"], tok_bias, p["ln_pre_g"], p["ln_pre_b"]]

    in_specs = ([pl.BlockSpec((1, L, Cp), lambda b, l: (b, 0, 0))]
                + [_const_spec2(w) for w in embed_ws]
                + [_stacked_spec(w) for w in lw])
    x = pl.pallas_call(
        functools.partial(_vision_tower_kernel, heads=VIS_HEADS),
        grid=(B, n_layers),
        in_specs=in_specs,
        out_specs=pl.BlockSpec((1, L, D), lambda b, l: (b, 0, 0)),
        out_shape=jax.ShapeDtypeStruct((B, L, D), F32),
        scratch_shapes=[pltpu.VMEM((L, D), F32)],
        compiler_params=_PAR_ARB,
    )(patches, *embed_ws, *lw)

    pool = p["pool"]
    head_ws = [pool["query"], pool["ln_q_g"], pool["ln_q_b"], pool["ln_k_g"], pool["ln_k_b"],
               pool["wq"], pool["bq"], pool["wk"], pool["bk"], pool["wv"], pool["bv"],
               pool["wo"], pool["bo"], p["ln_post_g"], p["ln_post_b"], p["proj"]]
    NQ = pool["query"].shape[0]
    E = p["proj"].shape[1]
    in_specs = ([pl.BlockSpec((1, L, D), lambda b: (b, 0, 0))]
                + [_const_spec1(w) for w in head_ws])
    tokens, pooled = pl.pallas_call(
        functools.partial(_vision_head_kernel, heads=POOL_HEADS),
        grid=(B,),
        in_specs=in_specs,
        out_specs=(pl.BlockSpec((1, NQ - 1, D), lambda b: (b, 0, 0)),
                   pl.BlockSpec((1, 1, E), lambda b: (b, 0, 0))),
        out_shape=(jax.ShapeDtypeStruct((B, NQ - 1, D), F32),
                   jax.ShapeDtypeStruct((B, 1, E), F32)),
        compiler_params=_PARALLEL,
    )(x, *head_ws)
    return pooled[:, 0], tokens


def mm_decoder_forward(image_embs, text_embs, p):
    """open_clip MultimodalTransformer — one pallas_call for all layers + logits head."""
    B, Lt, D = text_embs.shape
    Lk = image_embs.shape[1]
    sw = [p["self_layers"][k] for k in SELF_KEYS]
    cw = [p["cross_layers"][k] for k in CROSS_KEYS]
    fw = [p["lnf_g"], p["lnf_b"], p["text_proj"]]
    n_layers = p["self_layers"]["wq"].shape[0]
    V = p["text_proj"].shape[1]

    in_specs = ([pl.BlockSpec((1, Lt, D), lambda b, l: (b, 0, 0)),
                 pl.BlockSpec((1, Lk, D), lambda b, l: (b, 0, 0))]
                + [_stacked_spec(w) for w in sw]
                + [_stacked_spec(w) for w in cw]
                + [_const_spec2(w) for w in fw])
    return pl.pallas_call(
        functools.partial(_mm_decoder_kernel, heads=MM_HEADS),
        grid=(B, n_layers),
        in_specs=in_specs,
        out_specs=pl.BlockSpec((1, Lt, V), lambda b, l: (b, 0, 0)),
        out_shape=jax.ShapeDtypeStruct((B, Lt, V), F32),
        scratch_shapes=[pltpu.VMEM((Lt, D), F32)],
        compiler_params=_PAR_ARB,
    )(text_embs, image_embs, *sw, *cw, *fw)


def l2_normalize(x, eps=1e-12):
    # F.normalize(dim=-1)
    n = jnp.sqrt(jnp.sum(x * x, axis=-1, keepdims=True))
    return x / jnp.maximum(n, eps)


def coca_forward(params, image, text, embed_cls=True):
    t = text[:, :-1] if embed_cls else text
    text_latent, token_embs = text_tower_forward(t, params["text"])
    text_latent = l2_normalize(text_latent)
    image_latent, image_embs = vision_tower_forward(image, params["visual"])
    image_latent = l2_normalize(image_latent)
    labels = text[:, -token_embs.shape[1]:]
    logits = mm_decoder_forward(image_embs, token_embs, params["mm"])
    return {
        "image_features": image_latent,
        "text_features": text_latent,
        "logits": logits,
        "labels": labels,
        "logit_scale": jnp.exp(params["logit_scale"]),
    }


# ------------------------------- parameter init ------------------------------
def _w(key, shape, dtype=W_DTYPE, scale=0.02):
    return (jax.random.normal(key, shape, F32) * scale).astype(dtype)


def _wf32(key, shape, scale=0.02):
    return _w(key, shape, dtype=F32, scale=scale)


def _ones(shape):
    return jnp.ones(shape, F32)


def _zeros(shape):
    return jnp.zeros(shape, F32)


def init_self_layers(key, n_layers, d, heads, mlp_ratio=MLP_RATIO):
    """Per-layer stacked, per-head split weights; matmul weights in bf16, the rest f32."""
    dh = d // heads
    ff = d * mlp_ratio
    ks = jax.random.split(key, 6)
    return {
        "ln1_g": _ones((n_layers, 1, d)), "ln1_b": _zeros((n_layers, 1, d)),
        "wq": _w(ks[0], (n_layers, heads, d, dh)), "bq": _zeros((n_layers, heads, 1, dh)),
        "wk": _w(ks[1], (n_layers, heads, d, dh)), "bk": _zeros((n_layers, heads, 1, dh)),
        "wv": _w(ks[2], (n_layers, heads, d, dh)), "bv": _zeros((n_layers, heads, 1, dh)),
        "wo": _w(ks[3], (n_layers, heads, dh, d)), "bo": _zeros((n_layers, 1, d)),
        "ln2_g": _ones((n_layers, 1, d)), "ln2_b": _zeros((n_layers, 1, d)),
        "fc_w": _w(ks[4], (n_layers, d, ff)), "fc_b": _zeros((n_layers, 1, ff)),
        "pw": _w(ks[5], (n_layers, ff, d)), "pb": _zeros((n_layers, 1, d)),
    }


def init_cross_layers(key, n_layers, d, heads):
    p = init_self_layers(key, n_layers, d, heads)
    p["lnkv_g"] = _ones((n_layers, 1, d))
    p["lnkv_b"] = _zeros((n_layers, 1, d))
    return p


def init_pooler(key, d, heads, n_queries):
    dh = d // heads
    ks = jax.random.split(key, 5)
    return {
        "query": _wf32(ks[0], (n_queries, d)),
        "ln_q_g": _ones((1, d)), "ln_q_b": _zeros((1, d)),
        "ln_k_g": _ones((1, d)), "ln_k_b": _zeros((1, d)),
        "wq": _w(ks[1], (1, heads, d, dh)), "bq": _zeros((1, heads, 1, dh)),
        "wk": _w(ks[2], (1, heads, d, dh)), "bk": _zeros((1, heads, 1, dh)),
        "wv": _w(ks[3], (1, heads, d, dh)), "bv": _zeros((1, heads, 1, dh)),
        "wo": _w(ks[4], (1, heads, dh, d)), "bo": _zeros((1, 1, d)),
    }


def init_text(key):
    ks = jax.random.split(key, 5)
    return {
        "token_emb": _wf32(ks[0], (VOCAB_SIZE, TEXT_WIDTH)),
        "pos_emb": _wf32(ks[1], (CONTEXT_LEN, TEXT_WIDTH)),
        "cls_emb": _wf32(ks[2], (TEXT_WIDTH,)),
        "layers": init_self_layers(ks[3], TEXT_LAYERS, TEXT_WIDTH, TEXT_HEADS),
        "lnf_g": _ones((1, TEXT_WIDTH)), "lnf_b": _zeros((1, TEXT_WIDTH)),
        "text_proj": _w(ks[4], (TEXT_WIDTH, EMBED_DIM)),
    }


def init_vision(key):
    n_patches = (IMAGE_SIZE // PATCH_SIZE) ** 2
    ks = jax.random.split(key, 6)
    return {
        "conv_w": _w(ks[0], (IN_CHANS * PATCH_SIZE * PATCH_SIZE, VIS_WIDTH)),  # conv bias=False
        "class_emb": _wf32(ks[1], (1, VIS_WIDTH)),
        "pos_emb": _wf32(ks[2], (n_patches + 1, VIS_WIDTH)),
        "ln_pre_g": _ones((1, VIS_WIDTH)), "ln_pre_b": _zeros((1, VIS_WIDTH)),
        "layers": init_self_layers(ks[3], VIS_LAYERS, VIS_WIDTH, VIS_HEADS),
        "pool": init_pooler(ks[4], VIS_WIDTH, POOL_HEADS, N_QUERIES),
        "ln_post_g": _ones((1, VIS_WIDTH)), "ln_post_b": _zeros((1, VIS_WIDTH)),
        "proj": _w(ks[5], (VIS_WIDTH, EMBED_DIM)),
    }


def init_mm(key):
    ks = jax.random.split(key, 3)
    return {
        "self_layers": init_self_layers(ks[0], MM_LAYERS, MM_WIDTH, MM_HEADS),
        "cross_layers": init_cross_layers(ks[1], MM_LAYERS, MM_WIDTH, MM_HEADS),
        "lnf_g": _ones((1, MM_WIDTH)), "lnf_b": _zeros((1, MM_WIDTH)),
        "text_proj": _w(ks[2], (MM_WIDTH, VOCAB_SIZE)),
    }


def init_coca_params(key):
    k1, k2, k3 = jax.random.split(key, 3)
    return {"text": init_text(k1),
            "visual": init_vision(k2),
            "mm": init_mm(k3),
            "logit_scale": jnp.asarray(math.log(1.0 / 0.07), F32)}


# ----------------------------------- main ------------------------------------
if __name__ == "__main__":
    key = jax.random.PRNGKey(0)
    pkey, ikey, tkey = jax.random.split(key, 3)
    params = init_coca_params(pkey)

    image = jax.random.normal(ikey, (BATCH, IN_CHANS, IMAGE_SIZE, IMAGE_SIZE), F32)  # NCHW
    text = jax.random.randint(tkey, (BATCH, CONTEXT_LEN), 1, VOCAB_SIZE, dtype=jnp.int32)

    fwd = jax.jit(coca_forward)
    out = fwd(params, image, text)
    jax.block_until_ready(out)

    assert out["image_features"].shape == (BATCH, EMBED_DIM)
    assert out["text_features"].shape == (BATCH, EMBED_DIM)
    assert out["logits"].shape == (BATCH, CONTEXT_LEN - 1, VOCAB_SIZE)
    assert out["labels"].shape == (BATCH, CONTEXT_LEN - 1)
    assert out["logit_scale"].shape == ()
    print("KERNEL_OK")
</pallas_src>

<mosaic_0001>
module attributes {stable_mosaic.version = 11 : i64} {
  func.func @_text_tower_kernel(%arg0: i32, %arg1: i32, %arg2: memref<1x16x64xf32, #tpu.memory_space<vmem>>, %arg3: memref<1x1x16xf32, #tpu.memory_space<vmem>>, %arg4: memref<1x1x64xf32, #tpu.memory_space<vmem>>, %arg5: memref<1x1x64xf32, #tpu.memory_space<vmem>>, %arg6: memref<1x2x64x32xbf16, #tpu.memory_space<vmem>>, %arg7: memref<1x2x1x32xf32, #tpu.memory_space<vmem>>, %arg8: memref<1x2x64x32xbf16, #tpu.memory_space<vmem>>, %arg9: memref<1x2x1x32xf32, #tpu.memory_space<vmem>>, %arg10: memref<1x2x64x32xbf16, #tpu.memory_space<vmem>>, %arg11: memref<1x2x1x32xf32, #tpu.memory_space<vmem>>, %arg12: memref<1x2x32x64xbf16, #tpu.memory_space<vmem>>, %arg13: memref<1x1x64xf32, #tpu.memory_space<vmem>>, %arg14: memref<1x1x64xf32, #tpu.memory_space<vmem>>, %arg15: memref<1x1x64xf32, #tpu.memory_space<vmem>>, %arg16: memref<1x64x256xbf16, #tpu.memory_space<vmem>>, %arg17: memref<1x1x256xf32, #tpu.memory_space<vmem>>, %arg18: memref<1x256x64xbf16, #tpu.memory_space<vmem>>, %arg19: memref<1x1x64xf32, #tpu.memory_space<vmem>>, %arg20: memref<1x64xf32, #tpu.memory_space<vmem>>, %arg21: memref<1x64xf32, #tpu.memory_space<vmem>>, %arg22: memref<64x64xbf16, #tpu.memory_space<vmem>>, %arg23: memref<1x15x64xf32, #tpu.memory_space<vmem>>, %arg24: memref<1x1x64xf32, #tpu.memory_space<vmem>>, %arg25: memref<16x64xf32, #tpu.memory_space<vmem>>) attributes {dimension_semantics = [#tpu.dimension_semantics<parallel>, #tpu.dimension_semantics<arbitrary>], iteration_bounds = array<i64: 2, 2>, scalar_prefetch = 0 : i64, scratch_operands = 1 : i64, tpu.core_type = #tpu.core_type<tc>, window_params = [{transform_indices = @transform_0, window_bounds = array<i64: 1, 16, 64>}, {transform_indices = @transform_1, window_bounds = array<i64: 1, 1, 16>}, {transform_indices = @transform_2, window_bounds = array<i64: 1, 1, 64>}, {transform_indices = @transform_3, window_bounds = array<i64: 1, 1, 64>}, {transform_indices = @transform_4, window_bounds = array<i64: 1, 2, 64, 32>}, {transform_indices = @transform_5, window_bounds = array<i64: 1, 2, 1, 32>}, {transform_indices = @transform_6, window_bounds = array<i64: 1, 2, 64, 32>}, {transform_indices = @transform_7, window_bounds = array<i64: 1, 2, 1, 32>}, {transform_indices = @transform_8, window_bounds = array<i64: 1, 2, 64, 32>}, {transform_indices = @transform_9, window_bounds = array<i64: 1, 2, 1, 32>}, {transform_indices = @transform_10, window_bounds = array<i64: 1, 2, 32, 64>}, {transform_indices = @transform_11, window_bounds = array<i64: 1, 1, 64>}, {transform_indices = @transform_12, window_bounds = array<i64: 1, 1, 64>}, {transform_indices = @transform_13, window_bounds = array<i64: 1, 1, 64>}, {transform_indices = @transform_14, window_bounds = array<i64: 1, 64, 256>}, {transform_indices = @transform_15, window_bounds = array<i64: 1, 1, 256>}, {transform_indices = @transform_16, window_bounds = array<i64: 1, 256, 64>}, {transform_indices = @transform_17, window_bounds = array<i64: 1, 1, 64>}, {pipeline_mode = #tpu.pipeline_mode<synchronous>, transform_indices = @transform_18, window_bounds = array<i64: 1, 64>}, {pipeline_mode = #tpu.pipeline_mode<synchronous>, transform_indices = @transform_19, window_bounds = array<i64: 1, 64>}, {pipeline_mode = #tpu.pipeline_mode<synchronous>, transform_indices = @transform_20, window_bounds = array<i64: 64, 64>}, {transform_indices = @transform_21, window_bounds = array<i64: 1, 15, 64>}, {transform_indices = @transform_22, window_bounds = array<i64: 1, 1, 64>}]} {
    %c0_i32 = arith.constant 0 : i32
    %0 = arith.cmpi eq, %arg1, %c0_i32 : i32
    %1 = arith.extui %0 : i1 to i32
    %c0_i32_0 = arith.constant 0 : i32
    %2 = arith.cmpi ne, %1, %c0_i32_0 : i32
    scf.if %2 {
      %c0_125 = arith.constant 0 : index
      %c0_126 = arith.constant 0 : index
      %c0_127 = arith.constant 0 : index
      %195 = vector.load %arg2[%c0_125, %c0_126, %c0_127] : memref<1x16x64xf32, #tpu.memory_space<vmem>>, vector<1x16x64xf32>
      %196 = vector.shape_cast %195 : vector<1x16x64xf32> to vector<16x64xf32>
      %c0_128 = arith.constant 0 : index
      %c0_129 = arith.constant 0 : index
      %197 = vector.load %arg25[%c0_128, %c0_129] : memref<16x64xf32, #tpu.memory_space<vmem>>, vector<16x64xf32>
      tpu.vector_store %arg25[%c0_128, %c0_129], %196 {strides = array<i32>} : memref<16x64xf32, #tpu.memory_space<vmem>>, vector<16x64xf32>,
    } else {
    }
    %c0 = arith.constant 0 : index
    %c0_1 = arith.constant 0 : index
    %3 = vector.load %arg25[%c0, %c0_1] : memref<16x64xf32, #tpu.memory_space<vmem>>, vector<16x64xf32>
    %4 = tpu.iota {dimensions = array<i32: 0>} : vector<16x16xi32>
    %5 = tpu.iota {dimensions = array<i32: 1>} : vector<16x16xi32>
    %6 = arith.cmpi sle, %5, %4 : vector<16x16xi32>
    %cst = arith.constant 0.000000e+00 : f32
    %cst_2 = arith.constant -1.000000e+09 : f32
    %7 = vector.broadcast %cst : f32 to vector<16x16xf32>
    %8 = vector.broadcast %cst_2 : f32 to vector<16x16xf32>
    %9 = arith.select %6, %7, %8 : vector<16x16xi1>, vector<16x16xf32>
    %c0_3 = arith.constant 0 : index
    %c0_4 = arith.constant 0 : index
    %c0_5 = arith.constant 0 : index
    %10 = vector.load %arg3[%c0_3, %c0_4, %c0_5] : memref<1x1x16xf32, #tpu.memory_space<vmem>>, vector<1x1x16xf32>
    %11 = vector.shape_cast %10 : vector<1x1x16xf32> to vector<1x16xf32>
    %12 = vector.broadcast %11 : vector<1x16xf32> to vector<16x16xf32>
    %13 = arith.addf %9, %12 : vector<16x16xf32>
    %c0_6 = arith.constant 0 : index
    %c0_7 = arith.constant 0 : index
    %c0_8 = arith.constant 0 : index
    %14 = vector.load %arg4[%c0_6, %c0_7, %c0_8] : memref<1x1x64xf32, #tpu.memory_space<vmem>>, vector<1x1x64xf32>
    %15 = vector.shape_cast %14 : vector<1x1x64xf32> to vector<1x64xf32>
    %c0_9 = arith.constant 0 : index
    %c0_10 = arith.constant 0 : index
    %c0_11 = arith.constant 0 : index
    %16 = vector.load %arg5[%c0_9, %c0_10, %c0_11] : memref<1x1x64xf32, #tpu.memory_space<vmem>>, vector<1x1x64xf32>
    %17 = vector.shape_cast %16 : vector<1x1x64xf32> to vector<1x64xf32>
    %cst_12 = arith.constant dense<0.000000e+00> : vector<16xf32>
    %18 = vector.multi_reduction <add>, %3, %cst_12 [1] : vector<16x64xf32> to vector<16xf32>
    %19 = vector.shape_cast %18 : vector<16xf32> to vector<16x1xf32>
    %cst_13 = arith.constant 6.400000e+01 : f32
    %20 = vector.broadcast %cst_13 : f32 to vector<16x1xf32>
    %21 = arith.divf %19, %20 : vector<16x1xf32>
    %22 = vector.broadcast %21 : vector<16x1xf32> to vector<16x64xf32>
    %23 = arith.subf %3, %22 : vector<16x64xf32>
    %24 = arith.mulf %23, %23 : vector<16x64xf32>
    %cst_14 = arith.constant dense<0.000000e+00> : vector<16xf32>
    %25 = vector.multi_reduction <add>, %24, %cst_14 [1] : vector<16x64xf32> to vector<16xf32>
    %26 = vector.shape_cast %25 : vector<16xf32> to vector<16x1xf32>
    %cst_15 = arith.constant 6.400000e+01 : f32
    %27 = vector.broadcast %cst_15 : f32 to vector<16x1xf32>
    %28 = arith.divf %26, %27 : vector<16x1xf32>
    %29 = vector.broadcast %21 : vector<16x1xf32> to vector<16x64xf32>
    %30 = arith.subf %3, %29 : vector<16x64xf32>
    %cst_16 = arith.constant 9.99999974E-6 : f32
    %31 = vector.broadcast %cst_16 : f32 to vector<16x1xf32>
    %32 = arith.addf %28, %31 : vector<16x1xf32>
    %33 = math.rsqrt %32 : vector<16x1xf32>
    %34 = vector.broadcast %33 : vector<16x1xf32> to vector<16x64xf32>
    %35 = arith.mulf %30, %34 : vector<16x64xf32>
    %36 = vector.broadcast %15 : vector<1x64xf32> to vector<16x64xf32>
    %37 = arith.mulf %35, %36 : vector<16x64xf32>
    %38 = vector.broadcast %17 : vector<1x64xf32> to vector<16x64xf32>
    %39 = arith.addf %37, %38 : vector<16x64xf32>
    %cst_17 = arith.constant 0.000000e+00 : f32
    %40 = vector.broadcast %cst_17 : f32 to vector<16x64xf32>
    %c0_18 = arith.constant 0 : index
    %c0_19 = arith.constant 0 : index
    %c0_20 = arith.constant 0 : index
    %c0_21 = arith.constant 0 : index
    %41 = vector.load %arg6[%c0_18, %c0_19, %c0_20, %c0_21] : memref<1x2x64x32xbf16, #tpu.memory_space<vmem>>, vector<1x1x64x32xbf16>
    %42 = vector.shape_cast %41 : vector<1x1x64x32xbf16> to vector<64x32xbf16>
    %43 = arith.truncf %39 : vector<16x64xf32> to vector<16x64xbf16>
    %cst_22 = arith.constant dense<0.000000e+00> : vector<16x32xf32>
    %44 = tpu.matmul %43, %42, %cst_22 {dimension_numbers = #tpu.dot_dimension_numbers<[1], [0], [0], [1], [0, 0, 1, 1], [], []>} : vector<16x64xbf16>, vector<64x32xbf16>, vector<16x32xf32> -> vector<16x32xf32>
    %c0_23 = arith.constant 0 : index
    %c0_24 = arith.constant 0 : index
    %c0_25 = arith.constant 0 : index
    %c0_26 = arith.constant 0 : index
    %45 = vector.load %arg7[%c0_23, %c0_24, %c0_25, %c0_26] : memref<1x2x1x32xf32, #tpu.memory_space<vmem>>, vector<1x1x1x32xf32>
    %46 = vector.shape_cast %45 : vector<1x1x1x32xf32> to vector<1x32xf32>
    %47 = vector.broadcast %46 : vector<1x32xf32> to vector<16x32xf32>
    %48 = arith.addf %44, %47 : vector<16x32xf32>
    %c0_27 = arith.constant 0 : index
    %c0_28 = arith.constant 0 : index
    %c0_29 = arith.constant 0 : index
    %c0_30 = arith.constant 0 : index
    %49 = vector.load %arg8[%c0_27, %c0_28, %c0_29, %c0_30] : memref<1x2x64x32xbf16, #tpu.memory_space<vmem>>, vector<1x1x64x32xbf16>
    %50 = vector.shape_cast %49 : vector<1x1x64x32xbf16> to vector<64x32xbf16>
    %51 = arith.truncf %39 : vector<16x64xf32> to vector<16x64xbf16>
    %cst_31 = arith.constant dense<0.000000e+00> : vector<16x32xf32>
    %52 = tpu.matmul %51, %50, %cst_31 {dimension_numbers = #tpu.dot_dimension_numbers<[1], [0], [0], [1], [0, 0, 1, 1], [], []>} : vector<16x64xbf16>, vector<64x32xbf16>, vector<16x32xf32> -> vector<16x32xf32>
    %c0_32 = arith.constant 0 : index
    %c0_33 = arith.constant 0 : index
    %c0_34 = arith.constant 0 : index
    %c0_35 = arith.constant 0 : index
    %53 = vector.load %arg9[%c0_32, %c0_33, %c0_34, %c0_35] : memref<1x2x1x32xf32, #tpu.memory_space<vmem>>, vector<1x1x1x32xf32>
    %54 = vector.shape_cast %53 : vector<1x1x1x32xf32> to vector<1x32xf32>
    %55 = vector.broadcast %54 : vector<1x32xf32> to vector<16x32xf32>
    %56 = arith.addf %52, %55 : vector<16x32xf32>
    %c0_36 = arith.constant 0 : index
    %c0_37 = arith.constant 0 : index
    %c0_38 = arith.constant 0 : index
    %c0_39 = arith.constant 0 : index
    %57 = vector.load %arg10[%c0_36, %c0_37, %c0_38, %c0_39] : memref<1x2x64x32xbf16, #tpu.memory_space<vmem>>, vector<1x1x64x32xbf16>
    %58 = vector.shape_cast %57 : vector<1x1x64x32xbf16> to vector<64x32xbf16>
    %59 = arith.truncf %39 : vector<16x64xf32> to vector<16x64xbf16>
    %cst_40 = arith.constant dense<0.000000e+00> : vector<16x32xf32>
    %60 = tpu.matmul %59, %58, %cst_40 {dimension_numbers = #tpu.dot_dimension_numbers<[1], [0], [0], [1], [0, 0, 1, 1], [], []>} : vector<16x64xbf16>, vector<64x32xbf16>, vector<16x32xf32> -> vector<16x32xf32>
    %c0_41 = arith.constant 0 : index
    %c0_42 = arith.constant 0 : index
    %c0_43 = arith.constant 0 : index
    %c0_44 = arith.constant 0 : index
    %61 = vector.load %arg11[%c0_41, %c0_42, %c0_43, %c0_44] : memref<1x2x1x32xf32, #tpu.memory_space<vmem>>, vector<1x1x1x32xf32>
    %62 = vector.shape_cast %61 : vector<1x1x1x32xf32> to vector<1x32xf32>
    %63 = vector.broadcast %62 : vector<1x32xf32> to vector<16x32xf32>
    %64 = arith.addf %60, %63 : vector<16x32xf32>
    %65 = arith.truncf %48 : vector<16x32xf32> to vector<16x32xbf16>
    %66 = arith.truncf %56 : vector<16x32xf32> to vector<16x32xbf16>
    %cst_45 = arith.constant dense<0.000000e+00> : vector<16x16xf32>
    %67 = tpu.matmul %65, %66, %cst_45 {dimension_numbers = #tpu.dot_dimension_numbers<[1], [1], [0], [0], [0, 0, 1, 0], [], []>} : vector<16x32xbf16>, vector<16x32xbf16>, vector<16x16xf32> -> vector<16x16xf32>
    %cst_46 = arith.constant 0.176776692 : f32
    %68 = vector.broadcast %cst_46 : f32 to vector<16x16xf32>
    %69 = arith.mulf %67, %68 : vector<16x16xf32>
    %70 = arith.addf %69, %13 : vector<16x16xf32>
    %cst_47 = arith.constant dense<0xFF800000> : vector<16xf32>
    %71 = vector.multi_reduction <maximumf>, %70, %cst_47 [1] : vector<16x16xf32> to vector<16xf32>
    %72 = vector.shape_cast %71 : vector<16xf32> to vector<16x1xf32>
    %73 = vector.broadcast %72 : vector<16x1xf32> to vector<16x16xf32>
    %74 = arith.subf %70, %73 : vector<16x16xf32>
    %75 = math.exp %74 : vector<16x16xf32>
    %cst_48 = arith.constant dense<0.000000e+00> : vector<16xf32>
    %76 = vector.multi_reduction <add>, %75, %cst_48 [1] : vector<16x16xf32> to vector<16xf32>
    %77 = vector.shape_cast %76 : vector<16xf32> to vector<16x1xf32>
    %78 = vector.broadcast %77 : vector<16x1xf32> to vector<16x16xf32>
    %79 = arith.divf %75, %78 : vector<16x16xf32>
    %80 = arith.truncf %79 : vector<16x16xf32> to vector<16x16xbf16>
    %81 = arith.truncf %64 : vector<16x32xf32> to vector<16x32xbf16>
    %cst_49 = arith.constant dense<0.000000e+00> : vector<16x32xf32>
    %82 = tpu.matmul %80, %81, %cst_49 {dimension_numbers = #tpu.dot_dimension_numbers<[1], [0], [0], [1], [0, 0, 1, 1], [], []>} : vector<16x16xbf16>, vector<16x32xbf16>, vector<16x32xf32> -> vector<16x32xf32>
    %c0_50 = arith.constant 0 : index
    %c0_51 = arith.constant 0 : index
    %c0_52 = arith.constant 0 : index
    %c0_53 = arith.constant 0 : index
    %83 = vector.load %arg12[%c0_50, %c0_51, %c0_52, %c0_53] : memref<1x2x32x64xbf16, #tpu.memory_space<vmem>>, vector<1x1x32x64xbf16>
    %84 = vector.shape_cast %83 : vector<1x1x32x64xbf16> to vector<32x64xbf16>
    %85 = arith.truncf %82 : vector<16x32xf32> to vector<16x32xbf16>
    %cst_54 = arith.constant dense<0.000000e+00> : vector<16x64xf32>
    %86 = tpu.matmul %85, %84, %cst_54 {dimension_numbers = #tpu.dot_dimension_numbers<[1], [0], [0], [1], [0, 0, 1, 1], [], []>} : vector<16x32xbf16>, vector<32x64xbf16>, vector<16x64xf32> -> vector<16x64xf32>
    %87 = arith.addf %40, %86 : vector<16x64xf32>
    %c0_55 = arith.constant 0 : index
    %c1 = arith.constant 1 : index
    %c0_56 = arith.constant 0 : index
    %c0_57 = arith.constant 0 : index
    %88 = vector.load %arg6[%c0_55, %c1, %c0_56, %c0_57] : memref<1x2x64x32xbf16, #tpu.memory_space<vmem>>, vector<1x1x64x32xbf16>
    %89 = vector.shape_cast %88 : vector<1x1x64x32xbf16> to vector<64x32xbf16>
    %90 = arith.truncf %39 : vector<16x64xf32> to vector<16x64xbf16>
    %cst_58 = arith.constant dense<0.000000e+00> : vector<16x32xf32>
    %91 = tpu.matmul %90, %89, %cst_58 {dimension_numbers = #tpu.dot_dimension_numbers<[1], [0], [0], [1], [0, 0, 1, 1], [], []>} : vector<16x64xbf16>, vector<64x32xbf16>, vector<16x32xf32> -> vector<16x32xf32>
    %c0_59 = arith.constant 0 : index
    %c1_60 = arith.constant 1 : index
    %c0_61 = arith.constant 0 : index
    %c0_62 = arith.constant 0 : index
    %92 = vector.load %arg7[%c0_59, %c1_60, %c0_61, %c0_62] : memref<1x2x1x32xf32, #tpu.memory_space<vmem>>, vector<1x1x1x32xf32>
    %93 = vector.shape_cast %92 : vector<1x1x1x32xf32> to vector<1x32xf32>
    %94 = vector.broadcast %93 : vector<1x32xf32> to vector<16x32xf32>
    %95 = arith.addf %91, %94 : vector<16x32xf32>
    %c0_63 = arith.constant 0 : index
    %c1_64 = arith.constant 1 : index
    %c0_65 = arith.constant 0 : index
    %c0_66 = arith.constant 0 : index
    %96 = vector.load %arg8[%c0_63, %c1_64, %c0_65, %c0_66] : memref<1x2x64x32xbf16, #tpu.memory_space<vmem>>, vector<1x1x64x32xbf16>
    %97 = vector.shape_cast %96 : vector<1x1x64x32xbf16> to vector<64x32xbf16>
    %98 = arith.truncf %39 : vector<16x64xf32> to vector<16x64xbf16>
    %cst_67 = arith.constant dense<0.000000e+00> : vector<16x32xf32>
    %99 = tpu.matmul %98, %97, %cst_67 {dimension_numbers = #tpu.dot_dimension_numbers<[1], [0], [0], [1], [0, 0, 1, 1], [], []>} : vector<16x64xbf16>, vector<64x32xbf16>, vector<16x32xf32> -> vector<16x32xf32>
    %c0_68 = arith.constant 0 : index
    %c1_69 = arith.constant 1 : index
    %c0_70 = arith.constant 0 : index
    %c0_71 = arith.constant 0 : index
    %100 = vector.load %arg9[%c0_68, %c1_69, %c0_70, %c0_71] : memref<1x2x1x32xf32, #tpu.memory_space<vmem>>, vector<1x1x1x32xf32>
    %101 = vector.shape_cast %100 : vector<1x1x1x32xf32> to vector<1x32xf32>
    %102 = vector.broadcast %101 : vector<1x32xf32> to vector<16x32xf32>
    %103 = arith.addf %99, %102 : vector<16x32xf32>
    %c0_72 = arith.constant 0 : index
    %c1_73 = arith.constant 1 : index
    %c0_74 = arith.constant 0 : index
    %c0_75 = arith.constant 0 : index
    %104 = vector.load %arg10[%c0_72, %c1_73, %c0_74, %c0_75] : memref<1x2x64x32xbf16, #tpu.memory_space<vmem>>, vector<1x1x64x32xbf16>
    %105 = vector.shape_cast %104 : vector<1x1x64x32xbf16> to vector<64x32xbf16>
    %106 = arith.truncf %39 : vector<16x64xf32> to vector<16x64xbf16>
    %cst_76 = arith.constant dense<0.000000e+00> : vector<16x32xf32>
    %107 = tpu.matmul %106, %105, %cst_76 {dimension_numbers = #tpu.dot_dimension_numbers<[1], [0], [0], [1], [0, 0, 1, 1], [], []>} : vector<16x64xbf16>, vector<64x32xbf16>, vector<16x32xf32> -> vector<16x32xf32>
    %c0_77 = arith.constant 0 : index
    %c1_78 = arith.constant 1 : index
    %c0_79 = arith.constant 0 : index
    %c0_80 = arith.constant 0 : index
    %108 = vector.load %arg11[%c0_77, %c1_78, %c0_79, %c0_80] : memref<1x2x1x32xf32, #tpu.memory_space<vmem>>, vector<1x1x1x32xf32>
    %109 = vector.shape_cast %108 : vector<1x1x1x32xf32> to vector<1x32xf32>
    %110 = vector.broadcast %109 : vector<1x32xf32> to vector<16x32xf32>
    %111 = arith.addf %107, %110 : vector<16x32xf32>
    %112 = arith.truncf %95 : vector<16x32xf32> to vector<16x32xbf16>
    %113 = arith.truncf %103 : vector<16x32xf32> to vector<16x32xbf16>
    %cst_81 = arith.constant dense<0.000000e+00> : vector<16x16xf32>
    %114 = tpu.matmul %112, %113, %cst_81 {dimension_numbers = #tpu.dot_dimension_numbers<[1], [1], [0], [0], [0, 0, 1, 0], [], []>} : vector<16x32xbf16>, vector<16x32xbf16>, vector<16x16xf32> -> vector<16x16xf32>
    %cst_82 = arith.constant 0.176776692 : f32
    %115 = vector.broadcast %cst_82 : f32 to vector<16x16xf32>
    %116 = arith.mulf %114, %115 : vector<16x16xf32>
    %117 = arith.addf %116, %13 : vector<16x16xf32>
    %cst_83 = arith.constant dense<0xFF800000> : vector<16xf32>
    %118 = vector.multi_reduction <maximumf>, %117, %cst_83 [1] : vector<16x16xf32> to vector<16xf32>
    %119 = vector.shape_cast %118 : vector<16xf32> to vector<16x1xf32>
    %120 = vector.broadcast %119 : vector<16x1xf32> to vector<16x16xf32>
    %121 = arith.subf %117, %120 : vector<16x16xf32>
    %122 = math.exp %121 : vector<16x16xf32>
    %cst_84 = arith.constant dense<0.000000e+00> : vector<16xf32>
    %123 = vector.multi_reduction <add>, %122, %cst_84 [1] : vector<16x16xf32> to vector<16xf32>
    %124 = vector.shape_cast %123 : vector<16xf32> to vector<16x1xf32>
    %125 = vector.broadcast %124 : vector<16x1xf32> to vector<16x16xf32>
    %126 = arith.divf %122, %125 : vector<16x16xf32>
    %127 = arith.truncf %126 : vector<16x16xf32> to vector<16x16xbf16>
    %128 = arith.truncf %111 : vector<16x32xf32> to vector<16x32xbf16>
    %cst_85 = arith.constant dense<0.000000e+00> : vector<16x32xf32>
    %129 = tpu.matmul %127, %128, %cst_85 {dimension_numbers = #tpu.dot_dimension_numbers<[1], [0], [0], [1], [0, 0, 1, 1], [], []>} : vector<16x16xbf16>, vector<16x32xbf16>, vector<16x32xf32> -> vector<16x32xf32>
    %c0_86 = arith.constant 0 : index
    %c1_87 = arith.constant 1 : index
    %c0_88 = arith.constant 0 : index
    %c0_89 = arith.constant 0 : index
    %130 = vector.load %arg12[%c0_86, %c1_87, %c0_88, %c0_89] : memref<1x2x32x64xbf16, #tpu.memory_space<vmem>>, vector<1x1x32x64xbf16>
    %131 = vector.shape_cast %130 : vector<1x1x32x64xbf16> to vector<32x64xbf16>
    %132 = arith.truncf %129 : vector<16x32xf32> to vector<16x32xbf16>
    %cst_90 = arith.constant dense<0.000000e+00> : vector<16x64xf32>
    %133 = tpu.matmul %132, %131, %cst_90 {dimension_numbers = #tpu.dot_dimension_numbers<[1], [0], [0], [1], [0, 0, 1, 1], [], []>} : vector<16x32xbf16>, vector<32x64xbf16>, vector<16x64xf32> -> vector<16x64xf32>
    %134 = arith.addf %87, %133 : vector<16x64xf32>
    %c0_91 = arith.constant 0 : index
    %c0_92 = arith.constant 0 : index
    %c0_93 = arith.constant 0 : index
    %135 = vector.load %arg13[%c0_91, %c0_92, %c0_93] : memref<1x1x64xf32, #tpu.memory_space<vmem>>, vector<1x1x64xf32>
    %136 = vector.shape_cast %135 : vector<1x1x64xf32> to vector<1x64xf32>
    %137 = vector.broadcast %136 : vector<1x64xf32> to vector<16x64xf32>
    %138 = arith.addf %134, %137 : vector<16x64xf32>
    %139 = arith.addf %3, %138 : vector<16x64xf32>
    %c0_94 = arith.constant 0 : index
    %c0_95 = arith.constant 0 : index
    %c0_96 = arith.constant 0 : index
    %140 = vector.load %arg14[%c0_94, %c0_95, %c0_96] : memref<1x1x64xf32, #tpu.memory_space<vmem>>, vector<1x1x64xf32>
    %141 = vector.shape_cast %140 : vector<1x1x64xf32> to vector<1x64xf32>
    %c0_97 = arith.constant 0 : index
    %c0_98 = arith.constant 0 : index
    %c0_99 = arith.constant 0 : index
    %142 = vector.load %arg15[%c0_97, %c0_98, %c0_99] : memref<1x1x64xf32, #tpu.memory_space<vmem>>, vector<1x1x64xf32>
    %143 = vector.shape_cast %142 : vector<1x1x64xf32> to vector<1x64xf32>
    %cst_100 = arith.constant dense<0.000000e+00> : vector<16xf32>
    %144 = vector.multi_reduction <add>, %139, %cst_100 [1] : vector<16x64xf32> to vector<16xf32>
    %145 = vector.shape_cast %144 : vector<16xf32> to vector<16x1xf32>
    %cst_101 = arith.constant 6.400000e+01 : f32
    %146 = vector.broadcast %cst_101 : f32 to vector<16x1xf32>
    %147 = arith.divf %145, %146 : vector<16x1xf32>
    %148 = vector.broadcast %147 : vector<16x1xf32> to vector<16x64xf32>
    %149 = arith.subf %139, %148 : vector<16x64xf32>
    %150 = arith.mulf %149, %149 : vector<16x64xf32>
    %cst_102 = arith.constant dense<0.000000e+00> : vector<16xf32>
    %151 = vector.multi_reduction <add>, %150, %cst_102 [1] : vector<16x64xf32> to vector<16xf32>
    %152 = vector.shape_cast %151 : vector<16xf32> to vector<16x1xf32>
    %cst_103 = arith.constant 6.400000e+01 : f32
    %153 = vector.broadcast %cst_103 : f32 to vector<16x1xf32>
    %154 = arith.divf %152, %153 : vector<16x1xf32>
    %155 = vector.broadcast %147 : vector<16x1xf32> to vector<16x64xf32>
    %156 = arith.subf %139, %155 : vector<16x64xf32>
    %cst_104 = arith.constant 9.99999974E-6 : f32
    %157 = vector.broadcast %cst_104 : f32 to vector<16x1xf32>
    %158 = arith.addf %154, %157 : vector<16x1xf32>
    %159 = math.rsqrt %158 : vector<16x1xf32>
    %160 = vector.broadcast %159 : vector<16x1xf32> to vector<16x64xf32>
    %161 = arith.mulf %156, %160 : vector<16x64xf32>
    %162 = vector.broadcast %141 : vector<1x64xf32> to vector<16x64xf32>
    %163 = arith.mulf %161, %162 : vector<16x64xf32>
    %164 = vector.broadcast %143 : vector<1x64xf32> to vector<16x64xf32>
    %165 = arith.addf %163, %164 : vector<16x64xf32>
    %c0_105 = arith.constant 0 : index
    %c0_106 = arith.constant 0 : index
    %c0_107 = arith.constant 0 : index
    %166 = vector.load %arg16[%c0_105, %c0_106, %c0_107] : memref<1x64x256xbf16, #tpu.memory_space<vmem>>, vector<1x64x256xbf16>
    %167 = vector.shape_cast %166 : vector<1x64x256xbf16> to vector<64x256xbf16>
    %168 = arith.truncf %165 : vector<16x64xf32> to vector<16x64xbf16>
    %cst_108 = arith.constant dense<0.000000e+00> : vector<16x256xf32>
    %169 = tpu.matmul %168, %167, %cst_108 {dimension_numbers = #tpu.dot_dimension_numbers<[1], [0], [0], [1], [0, 0, 1, 1], [], []>} : vector<16x64xbf16>, vector<64x256xbf16>, vector<16x256xf32> -> vector<16x256xf32>
    %c0_109 = arith.constant 0 : index
    %c0_110 = arith.constant 0 : index
    %c0_111 = arith.constant 0 : index
    %170 = vector.load %arg17[%c0_109, %c0_110, %c0_111] : memref<1x1x256xf32, #tpu.memory_space<vmem>>, vector<1x1x256xf32>
    %171 = vector.shape_cast %170 : vector<1x1x256xf32> to vector<1x256xf32>
    %172 = vector.broadcast %171 : vector<1x256xf32> to vector<16x256xf32>
    %173 = arith.addf %169, %172 : vector<16x256xf32>
    %cst_112 = arith.constant 5.000000e-01 : f32
    %174 = vector.broadcast %cst_112 : f32 to vector<16x256xf32>
    %175 = arith.mulf %174, %173 : vector<16x256xf32>
    %cst_113 = arith.constant 0.707106769 : f32
    %176 = vector.broadcast %cst_113 : f32 to vector<16x256xf32>
    %177 = arith.mulf %173, %176 : vector<16x256xf32>
    %178 = math.erf %177 : vector<16x256xf32>
    %cst_114 = arith.constant 1.000000e+00 : f32
    %179 = vector.broadcast %cst_114 : f32 to vector<16x256xf32>
    %180 = arith.addf %179, %178 : vector<16x256xf32>
    %181 = arith.mulf %175, %180 : vector<16x256xf32>
    %c0_115 = arith.constant 0 : index
    %c0_116 = arith.constant 0 : index
    %c0_117 = arith.constant 0 : index
    %182 = vector.load %arg18[%c0_115, %c0_116, %c0_117] : memref<1x256x64xbf16, #tpu.memory_space<vmem>>, vector<1x256x64xbf16>
    %183 = vector.shape_cast %182 : vector<1x256x64xbf16> to vector<256x64xbf16>
    %184 = arith.truncf %181 : vector<16x256xf32> to vector<16x256xbf16>
    %cst_118 = arith.constant dense<0.000000e+00> : vector<16x64xf32>
    %185 = tpu.matmul %184, %183, %cst_118 {dimension_numbers = #tpu.dot_dimension_numbers<[1], [0], [0], [1], [0, 0, 1, 1], [], []>} : vector<16x256xbf16>, vector<256x64xbf16>, vector<16x64xf32> -> vector<16x64xf32>
    %186 = arith.addf %139, %185 : vector<16x64xf32>
    %c0_119 = arith.constant 0 : index
    %c0_120 = arith.constant 0 : index
    %c0_121 = arith.constant 0 : index
    %187 = vector.load %arg19[%c0_119, %c0_120, %c0_121] : memref<1x1x64xf32, #tpu.memory_space<vmem>>, vector<1x1x64xf32>
    %188 = vector.shape_cast %187 : vector<1x1x64xf32> to vector<1x64xf32>
    %189 = vector.broadcast %188 : vector<1x64xf32> to vector<16x64xf32>
    %190 = arith.addf %186, %189 : vector<16x64xf32>
    %c0_122 = arith.constant 0 : index
    %c0_123 = arith.constant 0 : index
    %191 = vector.load %arg25[%c0_122, %c0_123] : memref<16x64xf32, #tpu.memory_space<vmem>>, vector<16x64xf32>
    tpu.vector_store %arg25[%c0_122, %c0_123], %190 {strides = array<i32>} : memref<16x64xf32, #tpu.memory_space<vmem>>, vector<16x64xf32>,
    %c1_i32 = arith.constant 1 : i32
    %192 = arith.cmpi eq, %arg1, %c1_i32 : i32
    %193 = arith.extui %192 : i1 to i32
    %c0_i32_124 = arith.constant 0 : i32
    %194 = arith.cmpi ne, %193, %c0_i32_124 : i32
    scf.if %194 {
      %195 = vector.extract_strided_slice %190 {offsets = [0, 0], sizes = [15, 64], strides = [1, 1]} : vector<16x64xf32> to vector<15x64xf32>
      %c0_125 = arith.constant 0 : index
      %c0_126 = arith.constant 0 : index
      %c0_127 = arith.constant 0 : index
      %196 = vector.load %arg23[%c0_125, %c0_126, %c0_127] : memref<1x15x64xf32, #tpu.memory_space<vmem>>, vector<1x15x64xf32>
      %197 = vector.shape_cast %196 : vector<1x15x64xf32> to vector<15x64xf32>
      %198 = vector.shape_cast %195 : vector<15x64xf32> to vector<1x15x64xf32>
      tpu.vector_store %arg23[%c0_125, %c0_126, %c0_127], %198 {strides = array<i32>} : memref<1x15x64xf32, #tpu.memory_space<vmem>>, vector<1x15x64xf32>,
      %199 = vector.extract_strided_slice %190 {offsets = [15, 0], sizes = [1, 64], strides = [1, 1]} : vector<16x64xf32> to vector<1x64xf32>
      %c0_128 = arith.constant 0 : index
      %c0_129 = arith.constant 0 : index
      %200 = vector.load %arg20[%c0_128, %c0_129] : memref<1x64xf32, #tpu.memory_space<vmem>>, vector<1x64xf32>
      %c0_130 = arith.constant 0 : index
      %c0_131 = arith.constant 0 : index
      %201 = vector.load %arg21[%c0_130, %c0_131] : memref<1x64xf32, #tpu.memory_space<vmem>>, vector<1x64xf32>
      %cst_132 = arith.constant dense<0.000000e+00> : vector<1xf32>
      %202 = vector.multi_reduction <add>, %199, %cst_132 [1] : vector<1x64xf32> to vector<1xf32>
      %203 = vector.shape_cast %202 : vector<1xf32> to vector<1x1xf32>
      %cst_133 = arith.constant 6.400000e+01 : f32
      %204 = vector.broadcast %cst_133 : f32 to vector<1x1xf32>
      %205 = arith.divf %203, %204 : vector<1x1xf32>
      %206 = vector.broadcast %205 : vector<1x1xf32> to vector<1x64xf32>
      %207 = arith.subf %199, %206 : vector<1x64xf32>
      %208 = arith.mulf %207, %207 : vector<1x64xf32>
      %cst_134 = arith.constant dense<0.000000e+00> : vector<1xf32>
      %209 = vector.multi_reduction <add>, %208, %cst_134 [1] : vector<1x64xf32> to vector<1xf32>
      %210 = vector.shape_cast %209 : vector<1xf32> to vector<1x1xf32>
      %cst_135 = arith.constant 6.400000e+01 : f32
      %211 = vector.broadcast %cst_135 : f32 to vector<1x1xf32>
      %212 = arith.divf %210, %211 : vector<1x1xf32>
      %213 = vector.broadcast %205 : vector<1x1xf32> to vector<1x64xf32>
      %214 = arith.subf %199, %213 : vector<1x64xf32>
      %cst_136 = arith.constant 9.99999974E-6 : f32
      %215 = vector.broadcast %cst_136 : f32 to vector<1x1xf32>
      %216 = arith.addf %212, %215 : vector<1x1xf32>
      %217 = math.rsqrt %216 : vector<1x1xf32>
      %218 = vector.broadcast %217 : vector<1x1xf32> to vector<1x64xf32>
      %219 = arith.mulf %214, %218 : vector<1x64xf32>
      %220 = arith.mulf %219, %200 : vector<1x64xf32>
      %221 = arith.addf %220, %201 : vector<1x64xf32>
      %c0_137 = arith.constant 0 : index
      %c0_138 = arith.constant 0 : index
      %222 = vector.load %arg22[%c0_137, %c0_138] : memref<64x64xbf16, #tpu.memory_space<vmem>>, vector<64x64xbf16>
      %223 = arith.truncf %221 : vector<1x64xf32> to vector<1x64xbf16>
      %cst_139 = arith.constant dense<0.000000e+00> : vector<1x64xf32>
      %224 = tpu.matmul %223, %222, %cst_139 {dimension_numbers = #tpu.dot_dimension_numbers<[1], [0], [0], [1], [0, 0, 1, 1], [], []>} : vector<1x64xbf16>, vector<64x64xbf16>, vector<1x64xf32> -> vector<1x64xf32>
      %c0_140 = arith.constant 0 : index
      %c0_141 = arith.constant 0 : index
      %c0_142 = arith.constant 0 : index
      %225 = vector.load %arg24[%c0_140, %c0_141, %c0_142] : memref<1x1x64xf32, #tpu.memory_space<vmem>>, vector<1x1x64xf32>
      %226 = vector.shape_cast %225 : vector<1x1x64xf32> to vector<1x64xf32>
      %227 = vector.shape_cast %224 : vector<1x64xf32> to vector<1x1x64xf32>
      tpu.vector_store %arg24[%c0_140, %c0_141, %c0_142], %227 {strides = array<i32>} : memref<1x1x64xf32, #tpu.memory_space<vmem>>, vector<1x1x64xf32>,
    } else {
    }
    return
  }
  func.func @transform_0(%arg0: i32, %arg1: i32) -> (i32, i32, i32) {
    %c0_i32 = arith.constant 0 : i32
    %c0_i32_0 = arith.constant 0 : i32
    %c0_i32_1 = arith.constant 0 : i32
    return %arg0, %c0_i32, %c0_i32_0 : i32, i32, i32
  }
  func.func @transform_1(%arg0: i32, %arg1: i32) -> (i32, i32, i32) {
    %c0_i32 = arith.constant 0 : i32
    %c0_i32_0 = arith.constant 0 : i32
    %c0_i32_1 = arith.constant 0 : i32
    return %arg0, %c0_i32, %c0_i32_0 : i32, i32, i32
  }
  func.func @transform_2(%arg0: i32, %arg1: i32) -> (i32, i32, i32) {
    %c0_i32 = arith.constant 0 : i32
    %c0_i32_0 = arith.constant 0 : i32
    %c0_i32_1 = arith.constant 0 : i32
    return %arg1, %c0_i32, %c0_i32_0 : i32, i32, i32
  }
  func.func @transform_3(%arg0: i32, %arg1: i32) -> (i32, i32, i32) {
    %c0_i32 = arith.constant 0 : i32
    %c0_i32_0 = arith.constant 0 : i32
    %c0_i32_1 = arith.constant 0 : i32
    return %arg1, %c0_i32, %c0_i32_0 : i32, i32, i32
  }
  func.func @transform_4(%arg0: i32, %arg1: i32) -> (i32, i32, i32, i32) {
    %c0_i32 = arith.constant 0 : i32
    %c0_i32_0 = arith.constant 0 : i32
    %c0_i32_1 = arith.constant 0 : i32
    %c0_i32_2 = arith.constant 0 : i32
    return %arg1, %c0_i32, %c0_i32_0, %c0_i32_1 : i32, i32, i32, i32
  }
  func.func @transform_5(%arg0: i32, %arg1: i32) -> (i32, i32, i32, i32) {
    %c0_i32 = arith.constant 0 : i32
    %c0_i32_0 = arith.constant 0 : i32
    %c0_i32_1 = arith.constant 0 : i32
    %c0_i32_2 = arith.constant 0 : i32
    return %arg1, %c0_i32, %c0_i32_0, %c0_i32_1 : i32, i32, i32, i32
  }
  func.func @transform_6(%arg0: i32, %arg1: i32) -> (i32, i32, i32, i32) {
    %c0_i32 = arith.constant 0 : i32
    %c0_i32_0 = arith.constant 0 : i32
    %c0_i32_1 = arith.constant 0 : i32
    %c0_i32_2 = arith.constant 0 : i32
    return %arg1, %c0_i32, %c0_i32_0, %c0_i32_1 : i32, i32, i32, i32
  }
  func.func @transform_7(%arg0: i32, %arg1: i32) -> (i32, i32, i32, i32) {
    %c0_i32 = arith.constant 0 : i32
    %c0_i32_0 = arith.constant 0 : i32
    %c0_i32_1 = arith.constant 0 : i32
    %c0_i32_2 = arith.constant 0 : i32
    return %arg1, %c0_i32, %c0_i32_0, %c0_i32_1 : i32, i32, i32, i32
  }
  func.func @transform_8(%arg0: i32, %arg1: i32) -> (i32, i32, i32, i32) {
    %c0_i32 = arith.constant 0 : i32
    %c0_i32_0 = arith.constant 0 : i32
    %c0_i32_1 = arith.constant 0 : i32
    %c0_i32_2 = arith.constant 0 : i32
    return %arg1, %c0_i32, %c0_i32_0, %c0_i32_1 : i32, i32, i32, i32
  }
  func.func @transform_9(%arg0: i32, %arg1: i32) -> (i32, i32, i32, i32) {
    %c0_i32 = arith.constant 0 : i32
    %c0_i32_0 = arith.constant 0 : i32
    %c0_i32_1 = arith.constant 0 : i32
    %c0_i32_2 = arith.constant 0 : i32
    return %arg1, %c0_i32, %c0_i32_0, %c0_i32_1 : i32, i32, i32, i32
  }
  func.func @transform_10(%arg0: i32, %arg1: i32) -> (i32, i32, i32, i32) {
    %c0_i32 = arith.constant 0 : i32
    %c0_i32_0 = arith.constant 0 : i32
    %c0_i32_1 = arith.constant 0 : i32
    %c0_i32_2 = arith.constant 0 : i32
    return %arg1, %c0_i32, %c0_i32_0, %c0_i32_1 : i32, i32, i32, i32
  }
  func.func @transform_11(%arg0: i32, %arg1: i32) -> (i32, i32, i32) {
    %c0_i32 = arith.constant 0 : i32
    %c0_i32_0 = arith.constant 0 : i32
    %c0_i32_1 = arith.constant 0 : i32
    return %arg1, %c0_i32, %c0_i32_0 : i32, i32, i32
  }
  func.func @transform_12(%arg0: i32, %arg1: i32) -> (i32, i32, i32) {
    %c0_i32 = arith.constant 0 : i32
    %c0_i32_0 = arith.constant 0 : i32
    %c0_i32_1 = arith.constant 0 : i32
    return %arg1, %c0_i32, %c0_i32_0 : i32, i32, i32
  }
  func.func @transform_13(%arg0: i32, %arg1: i32) -> (i32, i32, i32) {
    %c0_i32 = arith.constant 0 : i32
    %c0_i32_0 = arith.constant 0 : i32
    %c0_i32_1 = arith.constant 0 : i32
    return %arg1, %c0_i32, %c0_i32_0 : i32, i32, i32
  }
  func.func @transform_14(%arg0: i32, %arg1: i32) -> (i32, i32, i32) {
    %c0_i32 = arith.constant 0 : i32
    %c0_i32_0 = arith.constant 0 : i32
    %c0_i32_1 = arith.constant 0 : i32
    return %arg1, %c0_i32, %c0_i32_0 : i32, i32, i32
  }
  func.func @transform_15(%arg0: i32, %arg1: i32) -> (i32, i32, i32) {
    %c0_i32 = arith.constant 0 : i32
    %c0_i32_0 = arith.constant 0 : i32
    %c0_i32_1 = arith.constant 0 : i32
    return %arg1, %c0_i32, %c0_i32_0 : i32, i32, i32
  }
  func.func @transform_16(%arg0: i32, %arg1: i32) -> (i32, i32, i32) {
    %c0_i32 = arith.constant 0 : i32
    %c0_i32_0 = arith.constant 0 : i32
    %c0_i32_1 = arith.constant 0 : i32
    return %arg1, %c0_i32, %c0_i32_0 : i32, i32, i32
  }
  func.func @transform_17(%arg0: i32, %arg1: i32) -> (i32, i32, i32) {
    %c0_i32 = arith.constant 0 : i32
    %c0_i32_0 = arith.constant 0 : i32
    %c0_i32_1 = arith.constant 0 : i32
    return %arg1, %c0_i32, %c0_i32_0 : i32, i32, i32
  }
  func.func @transform_18(%arg0: i32, %arg1: i32) -> (i32, i32) {
    %c0_i32 = arith.constant 0 : i32
    %c0_i32_0 = arith.constant 0 : i32
    %c0_i32_1 = arith.constant 0 : i32
    return %c0_i32, %c0_i32_0 : i32, i32
  }
  func.func @transform_19(%arg0: i32, %arg1: i32) -> (i32, i32) {
    %c0_i32 = arith.constant 0 : i32
    %c0_i32_0 = arith.constant 0 : i32
    %c0_i32_1 = arith.constant 0 : i32
    return %c0_i32, %c0_i32_0 : i32, i32
  }
  func.func @transform_20(%arg0: i32, %arg1: i32) -> (i32, i32) {
    %c0_i32 = arith.constant 0 : i32
    %c0_i32_0 = arith.constant 0 : i32
    %c0_i32_1 = arith.constant 0 : i32
    return %c0_i32, %c0_i32_0 : i32, i32
  }
  func.func @transform_21(%arg0: i32, %arg1: i32) -> (i32, i32, i32) {
    %c0_i32 = arith.constant 0 : i32
    %c0_i32_0 = arith.constant 0 : i32
    %c0_i32_1 = arith.constant 0 : i32
    return %arg0, %c0_i32, %c0_i32_0 : i32, i32, i32
  }
  func.func @transform_22(%arg0: i32, %arg1: i32) -> (i32, i32, i32) {
    %c0_i32 = arith.constant 0 : i32
    %c0_i32_0 = arith.constant 0 : i32
    %c0_i32_1 = arith.constant 0 : i32
    return %arg0, %c0_i32, %c0_i32_0 : i32, i32, i32
  }
}

module attributes {stable_mosaic.version = 11 : i64} {
  func.func @_vision_tower_kernel(%arg0: i32, %arg1: i32, %arg2: memref<1x5x192xf32, #tpu.memory_space<vmem>>, %arg3: memref<192x64xbf16, #tpu.memory_space<vmem>>, %arg4: memref<5x64xf32, #tpu.memory_space<vmem>>, %arg5: memref<1x64xf32, #tpu.memory_space<vmem>>, %arg6: memref<1x64xf32, #tpu.memory_space<vmem>>, %arg7: memref<1x1x64xf32, #tpu.memory_space<vmem>>, %arg8: memref<1x1x64xf32, #tpu.memory_space<vmem>>, %arg9: memref<1x2x64x32xbf16, #tpu.memory_space<vmem>>, %arg10: memref<1x2x1x32xf32, #tpu.memory_space<vmem>>, %arg11: memref<1x2x64x32xbf16, #tpu.memory_space<vmem>>, %arg12: memref<1x2x1x32xf32, #tpu.memory_space<vmem>>, %arg13: memref<1x2x64x32xbf16, #tpu.memory_space<vmem>>, %arg14: memref<1x2x1x32xf32, #tpu.memory_space<vmem>>, %arg15: memref<1x2x32x64xbf16, #tpu.memory_space<vmem>>, %arg16: memref<1x1x64xf32, #tpu.memory_space<vmem>>, %arg17: memref<1x1x64xf32, #tpu.memory_space<vmem>>, %arg18: memref<1x1x64xf32, #tpu.memory_space<vmem>>, %arg19: memref<1x64x256xbf16, #tpu.memory_space<vmem>>, %arg20: memref<1x1x256xf32, #tpu.memory_space<vmem>>, %arg21: memref<1x256x64xbf16, #tpu.memory_space<vmem>>, %arg22: memref<1x1x64xf32, #tpu.memory_space<vmem>>, %arg23: memref<1x5x64xf32, #tpu.memory_space<vmem>>, %arg24: memref<5x64xf32, #tpu.memory_space<vmem>>) attributes {dimension_semantics = [#tpu.dimension_semantics<parallel>, #tpu.dimension_semantics<arbitrary>], iteration_bounds = array<i64: 2, 2>, scalar_prefetch = 0 : i64, scratch_operands = 1 : i64, tpu.core_type = #tpu.core_type<tc>, window_params = [{transform_indices = @transform_0, window_bounds = array<i64: 1, 5, 192>}, {pipeline_mode = #tpu.pipeline_mode<synchronous>, transform_indices = @transform_1, window_bounds = array<i64: 192, 64>}, {pipeline_mode = #tpu.pipeline_mode<synchronous>, transform_indices = @transform_2, window_bounds = array<i64: 5, 64>}, {pipeline_mode = #tpu.pipeline_mode<synchronous>, transform_indices = @transform_3, window_bounds = array<i64: 1, 64>}, {pipeline_mode = #tpu.pipeline_mode<synchronous>, transform_indices = @transform_4, window_bounds = array<i64: 1, 64>}, {transform_indices = @transform_5, window_bounds = array<i64: 1, 1, 64>}, {transform_indices = @transform_6, window_bounds = array<i64: 1, 1, 64>}, {transform_indices = @transform_7, window_bounds = array<i64: 1, 2, 64, 32>}, {transform_indices = @transform_8, window_bounds = array<i64: 1, 2, 1, 32>}, {transform_indices = @transform_9, window_bounds = array<i64: 1, 2, 64, 32>}, {transform_indices = @transform_10, window_bounds = array<i64: 1, 2, 1, 32>}, {transform_indices = @transform_11, window_bounds = array<i64: 1, 2, 64, 32>}, {transform_indices = @transform_12, window_bounds = array<i64: 1, 2, 1, 32>}, {transform_indices = @transform_13, window_bounds = array<i64: 1, 2, 32, 64>}, {transform_indices = @transform_14, window_bounds = array<i64: 1, 1, 64>}, {transform_indices = @transform_15, window_bounds = array<i64: 1, 1, 64>}, {transform_indices = @transform_16, window_bounds = array<i64: 1, 1, 64>}, {transform_indices = @transform_17, window_bounds = array<i64: 1, 64, 256>}, {transform_indices = @transform_18, window_bounds = array<i64: 1, 1, 256>}, {transform_indices = @transform_19, window_bounds = array<i64: 1, 256, 64>}, {transform_indices = @transform_20, window_bounds = array<i64: 1, 1, 64>}, {transform_indices = @transform_21, window_bounds = array<i64: 1, 5, 64>}]} {
    %c0_i32 = arith.constant 0 : i32
    %0 = arith.cmpi eq, %arg1, %c0_i32 : i32
    %1 = arith.extui %0 : i1 to i32
    %c0_i32_0 = arith.constant 0 : i32
    %2 = arith.cmpi ne, %1, %c0_i32_0 : i32
    scf.if %2 {
      %c0_120 = arith.constant 0 : index
      %c0_121 = arith.constant 0 : index
      %c0_122 = arith.constant 0 : index
      %183 = vector.load %arg2[%c0_120, %c0_121, %c0_122] : memref<1x5x192xf32, #tpu.memory_space<vmem>>, vector<1x5x192xf32>
      %184 = vector.shape_cast %183 : vector<1x5x192xf32> to vector<5x192xf32>
      %c0_123 = arith.constant 0 : index
      %c0_124 = arith.constant 0 : index
      %185 = vector.load %arg3[%c0_123, %c0_124] : memref<192x64xbf16, #tpu.memory_space<vmem>>, vector<192x64xbf16>
      %186 = arith.truncf %184 : vector<5x192xf32> to vector<5x192xbf16>
      %cst_125 = arith.constant dense<0.000000e+00> : vector<5x64xf32>
      %187 = tpu.matmul %186, %185, %cst_125 {dimension_numbers = #tpu.dot_dimension_numbers<[1], [0], [0], [1], [0, 0, 1, 1], [], []>} : vector<5x192xbf16>, vector<192x64xbf16>, vector<5x64xf32> -> vector<5x64xf32>
      %c0_126 = arith.constant 0 : index
      %c0_127 = arith.constant 0 : index
      %188 = vector.load %arg4[%c0_126, %c0_127] : memref<5x64xf32, #tpu.memory_space<vmem>>, vector<5x64xf32>
      %189 = arith.addf %187, %188 : vector<5x64xf32>
      %c0_128 = arith.constant 0 : index
      %c0_129 = arith.constant 0 : index
      %190 = vector.load %arg5[%c0_128, %c0_129] : memref<1x64xf32, #tpu.memory_space<vmem>>, vector<1x64xf32>
      %c0_130 = arith.constant 0 : index
      %c0_131 = arith.constant 0 : index
      %191 = vector.load %arg6[%c0_130, %c0_131] : memref<1x64xf32, #tpu.memory_space<vmem>>, vector<1x64xf32>
      %cst_132 = arith.constant dense<0.000000e+00> : vector<5xf32>
      %192 = vector.multi_reduction <add>, %189, %cst_132 [1] : vector<5x64xf32> to vector<5xf32>
      %193 = vector.shape_cast %192 : vector<5xf32> to vector<5x1xf32>
      %cst_133 = arith.constant 6.400000e+01 : f32
      %194 = vector.broadcast %cst_133 : f32 to vector<5x1xf32>
      %195 = arith.divf %193, %194 : vector<5x1xf32>
      %196 = vector.broadcast %195 : vector<5x1xf32> to vector<5x64xf32>
      %197 = arith.subf %189, %196 : vector<5x64xf32>
      %198 = arith.mulf %197, %197 : vector<5x64xf32>
      %cst_134 = arith.constant dense<0.000000e+00> : vector<5xf32>
      %199 = vector.multi_reduction <add>, %198, %cst_134 [1] : vector<5x64xf32> to vector<5xf32>
      %200 = vector.shape_cast %199 : vector<5xf32> to vector<5x1xf32>
      %cst_135 = arith.constant 6.400000e+01 : f32
      %201 = vector.broadcast %cst_135 : f32 to vector<5x1xf32>
      %202 = arith.divf %200, %201 : vector<5x1xf32>
      %203 = vector.broadcast %195 : vector<5x1xf32> to vector<5x64xf32>
      %204 = arith.subf %189, %203 : vector<5x64xf32>
      %cst_136 = arith.constant 9.99999974E-6 : f32
      %205 = vector.broadcast %cst_136 : f32 to vector<5x1xf32>
      %206 = arith.addf %202, %205 : vector<5x1xf32>
      %207 = math.rsqrt %206 : vector<5x1xf32>
      %208 = vector.broadcast %207 : vector<5x1xf32> to vector<5x64xf32>
      %209 = arith.mulf %204, %208 : vector<5x64xf32>
      %210 = vector.broadcast %190 : vector<1x64xf32> to vector<5x64xf32>
      %211 = arith.mulf %209, %210 : vector<5x64xf32>
      %212 = vector.broadcast %191 : vector<1x64xf32> to vector<5x64xf32>
      %213 = arith.addf %211, %212 : vector<5x64xf32>
      %c0_137 = arith.constant 0 : index
      %c0_138 = arith.constant 0 : index
      %214 = vector.load %arg24[%c0_137, %c0_138] : memref<5x64xf32, #tpu.memory_space<vmem>>, vector<5x64xf32>
      tpu.vector_store %arg24[%c0_137, %c0_138], %213 {strides = array<i32>} : memref<5x64xf32, #tpu.memory_space<vmem>>, vector<5x64xf32>,
    } else {
    }
    %c0 = arith.constant 0 : index
    %c0_1 = arith.constant 0 : index
    %3 = vector.load %arg24[%c0, %c0_1] : memref<5x64xf32, #tpu.memory_space<vmem>>, vector<5x64xf32>
    %c0_2 = arith.constant 0 : index
    %c0_3 = arith.constant 0 : index
    %c0_4 = arith.constant 0 : index
    %4 = vector.load %arg7[%c0_2, %c0_3, %c0_4] : memref<1x1x64xf32, #tpu.memory_space<vmem>>, vector<1x1x64xf32>
    %5 = vector.shape_cast %4 : vector<1x1x64xf32> to vector<1x64xf32>
    %c0_5 = arith.constant 0 : index
    %c0_6 = arith.constant 0 : index
    %c0_7 = arith.constant 0 : index
    %6 = vector.load %arg8[%c0_5, %c0_6, %c0_7] : memref<1x1x64xf32, #tpu.memory_space<vmem>>, vector<1x1x64xf32>
    %7 = vector.shape_cast %6 : vector<1x1x64xf32> to vector<1x64xf32>
    %cst = arith.constant dense<0.000000e+00> : vector<5xf32>
    %8 = vector.multi_reduction <add>, %3, %cst [1] : vector<5x64xf32> to vector<5xf32>
    %9 = vector.shape_cast %8 : vector<5xf32> to vector<5x1xf32>
    %cst_8 = arith.constant 6.400000e+01 : f32
    %10 = vector.broadcast %cst_8 : f32 to vector<5x1xf32>
    %11 = arith.divf %9, %10 : vector<5x1xf32>
    %12 = vector.broadcast %11 : vector<5x1xf32> to vector<5x64xf32>
    %13 = arith.subf %3, %12 : vector<5x64xf32>
    %14 = arith.mulf %13, %13 : vector<5x64xf32>
    %cst_9 = arith.constant dense<0.000000e+00> : vector<5xf32>
    %15 = vector.multi_reduction <add>, %14, %cst_9 [1] : vector<5x64xf32> to vector<5xf32>
    %16 = vector.shape_cast %15 : vector<5xf32> to vector<5x1xf32>
    %cst_10 = arith.constant 6.400000e+01 : f32
    %17 = vector.broadcast %cst_10 : f32 to vector<5x1xf32>
    %18 = arith.divf %16, %17 : vector<5x1xf32>
    %19 = vector.broadcast %11 : vector<5x1xf32> to vector<5x64xf32>
    %20 = arith.subf %3, %19 : vector<5x64xf32>
    %cst_11 = arith.constant 9.99999974E-6 : f32
    %21 = vector.broadcast %cst_11 : f32 to vector<5x1xf32>
    %22 = arith.addf %18, %21 : vector<5x1xf32>
    %23 = math.rsqrt %22 : vector<5x1xf32>
    %24 = vector.broadcast %23 : vector<5x1xf32> to vector<5x64xf32>
    %25 = arith.mulf %20, %24 : vector<5x64xf32>
    %26 = vector.broadcast %5 : vector<1x64xf32> to vector<5x64xf32>
    %27 = arith.mulf %25, %26 : vector<5x64xf32>
    %28 = vector.broadcast %7 : vector<1x64xf32> to vector<5x64xf32>
    %29 = arith.addf %27, %28 : vector<5x64xf32>
    %cst_12 = arith.constant 0.000000e+00 : f32
    %30 = vector.broadcast %cst_12 : f32 to vector<5x64xf32>
    %c0_13 = arith.constant 0 : index
    %c0_14 = arith.constant 0 : index
    %c0_15 = arith.constant 0 : index
    %c0_16 = arith.constant 0 : index
    %31 = vector.load %arg9[%c0_13, %c0_14, %c0_15, %c0_16] : memref<1x2x64x32xbf16, #tpu.memory_space<vmem>>, vector<1x1x64x32xbf16>
    %32 = vector.shape_cast %31 : vector<1x1x64x32xbf16> to vector<64x32xbf16>
    %33 = arith.truncf %29 : vector<5x64xf32> to vector<5x64xbf16>
    %cst_17 = arith.constant dense<0.000000e+00> : vector<5x32xf32>
    %34 = tpu.matmul %33, %32, %cst_17 {dimension_numbers = #tpu.dot_dimension_numbers<[1], [0], [0], [1], [0, 0, 1, 1], [], []>} : vector<5x64xbf16>, vector<64x32xbf16>, vector<5x32xf32> -> vector<5x32xf32>
    %c0_18 = arith.constant 0 : index
    %c0_19 = arith.constant 0 : index
    %c0_20 = arith.constant 0 : index
    %c0_21 = arith.constant 0 : index
    %35 = vector.load %arg10[%c0_18, %c0_19, %c0_20, %c0_21] : memref<1x2x1x32xf32, #tpu.memory_space<vmem>>, vector<1x1x1x32xf32>
    %36 = vector.shape_cast %35 : vector<1x1x1x32xf32> to vector<1x32xf32>
    %37 = vector.broadcast %36 : vector<1x32xf32> to vector<5x32xf32>
    %38 = arith.addf %34, %37 : vector<5x32xf32>
    %c0_22 = arith.constant 0 : index
    %c0_23 = arith.constant 0 : index
    %c0_24 = arith.constant 0 : index
    %c0_25 = arith.constant 0 : index
    %39 = vector.load %arg11[%c0_22, %c0_23, %c0_24, %c0_25] : memref<1x2x64x32xbf16, #tpu.memory_space<vmem>>, vector<1x1x64x32xbf16>
    %40 = vector.shape_cast %39 : vector<1x1x64x32xbf16> to vector<64x32xbf16>
    %41 = arith.truncf %29 : vector<5x64xf32> to vector<5x64xbf16>
    %cst_26 = arith.constant dense<0.000000e+00> : vector<5x32xf32>
    %42 = tpu.matmul %41, %40, %cst_26 {dimension_numbers = #tpu.dot_dimension_numbers<[1], [0], [0], [1], [0, 0, 1, 1], [], []>} : vector<5x64xbf16>, vector<64x32xbf16>, vector<5x32xf32> -> vector<5x32xf32>
    %c0_27 = arith.constant 0 : index
    %c0_28 = arith.constant 0 : index
    %c0_29 = arith.constant 0 : index
    %c0_30 = arith.constant 0 : index
    %43 = vector.load %arg12[%c0_27, %c0_28, %c0_29, %c0_30] : memref<1x2x1x32xf32, #tpu.memory_space<vmem>>, vector<1x1x1x32xf32>
    %44 = vector.shape_cast %43 : vector<1x1x1x32xf32> to vector<1x32xf32>
    %45 = vector.broadcast %44 : vector<1x32xf32> to vector<5x32xf32>
    %46 = arith.addf %42, %45 : vector<5x32xf32>
    %c0_31 = arith.constant 0 : index
    %c0_32 = arith.constant 0 : index
    %c0_33 = arith.constant 0 : index
    %c0_34 = arith.constant 0 : index
    %47 = vector.load %arg13[%c0_31, %c0_32, %c0_33, %c0_34] : memref<1x2x64x32xbf16, #tpu.memory_space<vmem>>, vector<1x1x64x32xbf16>
    %48 = vector.shape_cast %47 : vector<1x1x64x32xbf16> to vector<64x32xbf16>
    %49 = arith.truncf %29 : vector<5x64xf32> to vector<5x64xbf16>
    %cst_35 = arith.constant dense<0.000000e+00> : vector<5x32xf32>
    %50 = tpu.matmul %49, %48, %cst_35 {dimension_numbers = #tpu.dot_dimension_numbers<[1], [0], [0], [1], [0, 0, 1, 1], [], []>} : vector<5x64xbf16>, vector<64x32xbf16>, vector<5x32xf32> -> vector<5x32xf32>
    %c0_36 = arith.constant 0 : index
    %c0_37 = arith.constant 0 : index
    %c0_38 = arith.constant 0 : index
    %c0_39 = arith.constant 0 : index
    %51 = vector.load %arg14[%c0_36, %c0_37, %c0_38, %c0_39] : memref<1x2x1x32xf32, #tpu.memory_space<vmem>>, vector<1x1x1x32xf32>
    %52 = vector.shape_cast %51 : vector<1x1x1x32xf32> to vector<1x32xf32>
    %53 = vector.broadcast %52 : vector<1x32xf32> to vector<5x32xf32>
    %54 = arith.addf %50, %53 : vector<5x32xf32>
    %55 = arith.truncf %38 : vector<5x32xf32> to vector<5x32xbf16>
    %56 = arith.truncf %46 : vector<5x32xf32> to vector<5x32xbf16>
    %cst_40 = arith.constant dense<0.000000e+00> : vector<5x5xf32>
    %57 = tpu.matmul %55, %56, %cst_40 {dimension_numbers = #tpu.dot_dimension_numbers<[1], [1], [0], [0], [0, 0, 1, 0], [], []>} : vector<5x32xbf16>, vector<5x32xbf16>, vector<5x5xf32> -> vector<5x5xf32>
    %cst_41 = arith.constant 0.176776692 : f32
    %58 = vector.broadcast %cst_41 : f32 to vector<5x5xf32>
    %59 = arith.mulf %57, %58 : vector<5x5xf32>
    %cst_42 = arith.constant dense<0xFF800000> : vector<5xf32>
    %60 = vector.multi_reduction <maximumf>, %59, %cst_42 [1] : vector<5x5xf32> to vector<5xf32>
    %61 = vector.shape_cast %60 : vector<5xf32> to vector<5x1xf32>
    %62 = vector.broadcast %61 : vector<5x1xf32> to vector<5x5xf32>
    %63 = arith.subf %59, %62 : vector<5x5xf32>
    %64 = math.exp %63 : vector<5x5xf32>
    %cst_43 = arith.constant dense<0.000000e+00> : vector<5xf32>
    %65 = vector.multi_reduction <add>, %64, %cst_43 [1] : vector<5x5xf32> to vector<5xf32>
    %66 = vector.shape_cast %65 : vector<5xf32> to vector<5x1xf32>
    %67 = vector.broadcast %66 : vector<5x1xf32> to vector<5x5xf32>
    %68 = arith.divf %64, %67 : vector<5x5xf32>
    %69 = arith.truncf %68 : vector<5x5xf32> to vector<5x5xbf16>
    %70 = arith.truncf %54 : vector<5x32xf32> to vector<5x32xbf16>
    %cst_44 = arith.constant dense<0.000000e+00> : vector<5x32xf32>
    %71 = tpu.matmul %69, %70, %cst_44 {dimension_numbers = #tpu.dot_dimension_numbers<[1], [0], [0], [1], [0, 0, 1, 1], [], []>} : vector<5x5xbf16>, vector<5x32xbf16>, vector<5x32xf32> -> vector<5x32xf32>
    %c0_45 = arith.constant 0 : index
    %c0_46 = arith.constant 0 : index
    %c0_47 = arith.constant 0 : index
    %c0_48 = arith.constant 0 : index
    %72 = vector.load %arg15[%c0_45, %c0_46, %c0_47, %c0_48] : memref<1x2x32x64xbf16, #tpu.memory_space<vmem>>, vector<1x1x32x64xbf16>
    %73 = vector.shape_cast %72 : vector<1x1x32x64xbf16> to vector<32x64xbf16>
    %74 = arith.truncf %71 : vector<5x32xf32> to vector<5x32xbf16>
    %cst_49 = arith.constant dense<0.000000e+00> : vector<5x64xf32>
    %75 = tpu.matmul %74, %73, %cst_49 {dimension_numbers = #tpu.dot_dimension_numbers<[1], [0], [0], [1], [0, 0, 1, 1], [], []>} : vector<5x32xbf16>, vector<32x64xbf16>, vector<5x64xf32> -> vector<5x64xf32>
    %76 = arith.addf %30, %75 : vector<5x64xf32>
    %c0_50 = arith.constant 0 : index
    %c1 = arith.constant 1 : index
    %c0_51 = arith.constant 0 : index
    %c0_52 = arith.constant 0 : index
    %77 = vector.load %arg9[%c0_50, %c1, %c0_51, %c0_52] : memref<1x2x64x32xbf16, #tpu.memory_space<vmem>>, vector<1x1x64x32xbf16>
    %78 = vector.shape_cast %77 : vector<1x1x64x32xbf16> to vector<64x32xbf16>
    %79 = arith.truncf %29 : vector<5x64xf32> to vector<5x64xbf16>
    %cst_53 = arith.constant dense<0.000000e+00> : vector<5x32xf32>
    %80 = tpu.matmul %79, %78, %cst_53 {dimension_numbers = #tpu.dot_dimension_numbers<[1], [0], [0], [1], [0, 0, 1, 1], [], []>} : vector<5x64xbf16>, vector<64x32xbf16>, vector<5x32xf32> -> vector<5x32xf32>
    %c0_54 = arith.constant 0 : index
    %c1_55 = arith.constant 1 : index
    %c0_56 = arith.constant 0 : index
    %c0_57 = arith.constant 0 : index
    %81 = vector.load %arg10[%c0_54, %c1_55, %c0_56, %c0_57] : memref<1x2x1x32xf32, #tpu.memory_space<vmem>>, vector<1x1x1x32xf32>
    %82 = vector.shape_cast %81 : vector<1x1x1x32xf32> to vector<1x32xf32>
    %83 = vector.broadcast %82 : vector<1x32xf32> to vector<5x32xf32>
    %84 = arith.addf %80, %83 : vector<5x32xf32>
    %c0_58 = arith.constant 0 : index
    %c1_59 = arith.constant 1 : index
    %c0_60 = arith.constant 0 : index
    %c0_61 = arith.constant 0 : index
    %85 = vector.load %arg11[%c0_58, %c1_59, %c0_60, %c0_61] : memref<1x2x64x32xbf16, #tpu.memory_space<vmem>>, vector<1x1x64x32xbf16>
    %86 = vector.shape_cast %85 : vector<1x1x64x32xbf16> to vector<64x32xbf16>
    %87 = arith.truncf %29 : vector<5x64xf32> to vector<5x64xbf16>
    %cst_62 = arith.constant dense<0.000000e+00> : vector<5x32xf32>
    %88 = tpu.matmul %87, %86, %cst_62 {dimension_numbers = #tpu.dot_dimension_numbers<[1], [0], [0], [1], [0, 0, 1, 1], [], []>} : vector<5x64xbf16>, vector<64x32xbf16>, vector<5x32xf32> -> vector<5x32xf32>
    %c0_63 = arith.constant 0 : index
    %c1_64 = arith.constant 1 : index
    %c0_65 = arith.constant 0 : index
    %c0_66 = arith.constant 0 : index
    %89 = vector.load %arg12[%c0_63, %c1_64, %c0_65, %c0_66] : memref<1x2x1x32xf32, #tpu.memory_space<vmem>>, vector<1x1x1x32xf32>
    %90 = vector.shape_cast %89 : vector<1x1x1x32xf32> to vector<1x32xf32>
    %91 = vector.broadcast %90 : vector<1x32xf32> to vector<5x32xf32>
    %92 = arith.addf %88, %91 : vector<5x32xf32>
    %c0_67 = arith.constant 0 : index
    %c1_68 = arith.constant 1 : index
    %c0_69 = arith.constant 0 : index
    %c0_70 = arith.constant 0 : index
    %93 = vector.load %arg13[%c0_67, %c1_68, %c0_69, %c0_70] : memref<1x2x64x32xbf16, #tpu.memory_space<vmem>>, vector<1x1x64x32xbf16>
    %94 = vector.shape_cast %93 : vector<1x1x64x32xbf16> to vector<64x32xbf16>
    %95 = arith.truncf %29 : vector<5x64xf32> to vector<5x64xbf16>
    %cst_71 = arith.constant dense<0.000000e+00> : vector<5x32xf32>
    %96 = tpu.matmul %95, %94, %cst_71 {dimension_numbers = #tpu.dot_dimension_numbers<[1], [0], [0], [1], [0, 0, 1, 1], [], []>} : vector<5x64xbf16>, vector<64x32xbf16>, vector<5x32xf32> -> vector<5x32xf32>
    %c0_72 = arith.constant 0 : index
    %c1_73 = arith.constant 1 : index
    %c0_74 = arith.constant 0 : index
    %c0_75 = arith.constant 0 : index
    %97 = vector.load %arg14[%c0_72, %c1_73, %c0_74, %c0_75] : memref<1x2x1x32xf32, #tpu.memory_space<vmem>>, vector<1x1x1x32xf32>
    %98 = vector.shape_cast %97 : vector<1x1x1x32xf32> to vector<1x32xf32>
    %99 = vector.broadcast %98 : vector<1x32xf32> to vector<5x32xf32>
    %100 = arith.addf %96, %99 : vector<5x32xf32>
    %101 = arith.truncf %84 : vector<5x32xf32> to vector<5x32xbf16>
    %102 = arith.truncf %92 : vector<5x32xf32> to vector<5x32xbf16>
    %cst_76 = arith.constant dense<0.000000e+00> : vector<5x5xf32>
    %103 = tpu.matmul %101, %102, %cst_76 {dimension_numbers = #tpu.dot_dimension_numbers<[1], [1], [0], [0], [0, 0, 1, 0], [], []>} : vector<5x32xbf16>, vector<5x32xbf16>, vector<5x5xf32> -> vector<5x5xf32>
    %cst_77 = arith.constant 0.176776692 : f32
    %104 = vector.broadcast %cst_77 : f32 to vector<5x5xf32>
    %105 = arith.mulf %103, %104 : vector<5x5xf32>
    %cst_78 = arith.constant dense<0xFF800000> : vector<5xf32>
    %106 = vector.multi_reduction <maximumf>, %105, %cst_78 [1] : vector<5x5xf32> to vector<5xf32>
    %107 = vector.shape_cast %106 : vector<5xf32> to vector<5x1xf32>
    %108 = vector.broadcast %107 : vector<5x1xf32> to vector<5x5xf32>
    %109 = arith.subf %105, %108 : vector<5x5xf32>
    %110 = math.exp %109 : vector<5x5xf32>
    %cst_79 = arith.constant dense<0.000000e+00> : vector<5xf32>
    %111 = vector.multi_reduction <add>, %110, %cst_79 [1] : vector<5x5xf32> to vector<5xf32>
    %112 = vector.shape_cast %111 : vector<5xf32> to vector<5x1xf32>
    %113 = vector.broadcast %112 : vector<5x1xf32> to vector<5x5xf32>
    %114 = arith.divf %110, %113 : vector<5x5xf32>
    %115 = arith.truncf %114 : vector<5x5xf32> to vector<5x5xbf16>
    %116 = arith.truncf %100 : vector<5x32xf32> to vector<5x32xbf16>
    %cst_80 = arith.constant dense<0.000000e+00> : vector<5x32xf32>
    %117 = tpu.matmul %115, %116, %cst_80 {dimension_numbers = #tpu.dot_dimension_numbers<[1], [0], [0], [1], [0, 0, 1, 1], [], []>} : vector<5x5xbf16>, vector<5x32xbf16>, vector<5x32xf32> -> vector<5x32xf32>
    %c0_81 = arith.constant 0 : index
    %c1_82 = arith.constant 1 : index
    %c0_83 = arith.constant 0 : index
    %c0_84 = arith.constant 0 : index
    %118 = vector.load %arg15[%c0_81, %c1_82, %c0_83, %c0_84] : memref<1x2x32x64xbf16, #tpu.memory_space<vmem>>, vector<1x1x32x64xbf16>
    %119 = vector.shape_cast %118 : vector<1x1x32x64xbf16> to vector<32x64xbf16>
    %120 = arith.truncf %117 : vector<5x32xf32> to vector<5x32xbf16>
    %cst_85 = arith.constant dense<0.000000e+00> : vector<5x64xf32>
    %121 = tpu.matmul %120, %119, %cst_85 {dimension_numbers = #tpu.dot_dimension_numbers<[1], [0], [0], [1], [0, 0, 1, 1], [], []>} : vector<5x32xbf16>, vector<32x64xbf16>, vector<5x64xf32> -> vector<5x64xf32>
    %122 = arith.addf %76, %121 : vector<5x64xf32>
    %c0_86 = arith.constant 0 : index
    %c0_87 = arith.constant 0 : index
    %c0_88 = arith.constant 0 : index
    %123 = vector.load %arg16[%c0_86, %c0_87, %c0_88] : memref<1x1x64xf32, #tpu.memory_space<vmem>>, vector<1x1x64xf32>
    %124 = vector.shape_cast %123 : vector<1x1x64xf32> to vector<1x64xf32>
    %125 = vector.broadcast %124 : vector<1x64xf32> to vector<5x64xf32>
    %126 = arith.addf %122, %125 : vector<5x64xf32>
    %127 = arith.addf %3, %126 : vector<5x64xf32>
    %c0_89 = arith.constant 0 : index
    %c0_90 = arith.constant 0 : index
    %c0_91 = arith.constant 0 : index
    %128 = vector.load %arg17[%c0_89, %c0_90, %c0_91] : memref<1x1x64xf32, #tpu.memory_space<vmem>>, vector<1x1x64xf32>
    %129 = vector.shape_cast %128 : vector<1x1x64xf32> to vector<1x64xf32>
    %c0_92 = arith.constant 0 : index
    %c0_93 = arith.constant 0 : index
    %c0_94 = arith.constant 0 : index
    %130 = vector.load %arg18[%c0_92, %c0_93, %c0_94] : memref<1x1x64xf32, #tpu.memory_space<vmem>>, vector<1x1x64xf32>
    %131 = vector.shape_cast %130 : vector<1x1x64xf32> to vector<1x64xf32>
    %cst_95 = arith.constant dense<0.000000e+00> : vector<5xf32>
    %132 = vector.multi_reduction <add>, %127, %cst_95 [1] : vector<5x64xf32> to vector<5xf32>
    %133 = vector.shape_cast %132 : vector<5xf32> to vector<5x1xf32>
    %cst_96 = arith.constant 6.400000e+01 : f32
    %134 = vector.broadcast %cst_96 : f32 to vector<5x1xf32>
    %135 = arith.divf %133, %134 : vector<5x1xf32>
    %136 = vector.broadcast %135 : vector<5x1xf32> to vector<5x64xf32>
    %137 = arith.subf %127, %136 : vector<5x64xf32>
    %138 = arith.mulf %137, %137 : vector<5x64xf32>
    %cst_97 = arith.constant dense<0.000000e+00> : vector<5xf32>
    %139 = vector.multi_reduction <add>, %138, %cst_97 [1] : vector<5x64xf32> to vector<5xf32>
    %140 = vector.shape_cast %139 : vector<5xf32> to vector<5x1xf32>
    %cst_98 = arith.constant 6.400000e+01 : f32
    %141 = vector.broadcast %cst_98 : f32 to vector<5x1xf32>
    %142 = arith.divf %140, %141 : vector<5x1xf32>
    %143 = vector.broadcast %135 : vector<5x1xf32> to vector<5x64xf32>
    %144 = arith.subf %127, %143 : vector<5x64xf32>
    %cst_99 = arith.constant 9.99999974E-6 : f32
    %145 = vector.broadcast %cst_99 : f32 to vector<5x1xf32>
    %146 = arith.addf %142, %145 : vector<5x1xf32>
    %147 = math.rsqrt %146 : vector<5x1xf32>
    %148 = vector.broadcast %147 : vector<5x1xf32> to vector<5x64xf32>
    %149 = arith.mulf %144, %148 : vector<5x64xf32>
    %150 = vector.broadcast %129 : vector<1x64xf32> to vector<5x64xf32>
    %151 = arith.mulf %149, %150 : vector<5x64xf32>
    %152 = vector.broadcast %131 : vector<1x64xf32> to vector<5x64xf32>
    %153 = arith.addf %151, %152 : vector<5x64xf32>
    %c0_100 = arith.constant 0 : index
    %c0_101 = arith.constant 0 : index
    %c0_102 = arith.constant 0 : index
    %154 = vector.load %arg19[%c0_100, %c0_101, %c0_102] : memref<1x64x256xbf16, #tpu.memory_space<vmem>>, vector<1x64x256xbf16>
    %155 = vector.shape_cast %154 : vector<1x64x256xbf16> to vector<64x256xbf16>
    %156 = arith.truncf %153 : vector<5x64xf32> to vector<5x64xbf16>
    %cst_103 = arith.constant dense<0.000000e+00> : vector<5x256xf32>
    %157 = tpu.matmul %156, %155, %cst_103 {dimension_numbers = #tpu.dot_dimension_numbers<[1], [0], [0], [1], [0, 0, 1, 1], [], []>} : vector<5x64xbf16>, vector<64x256xbf16>, vector<5x256xf32> -> vector<5x256xf32>
    %c0_104 = arith.constant 0 : index
    %c0_105 = arith.constant 0 : index
    %c0_106 = arith.constant 0 : index
    %158 = vector.load %arg20[%c0_104, %c0_105, %c0_106] : memref<1x1x256xf32, #tpu.memory_space<vmem>>, vector<1x1x256xf32>
    %159 = vector.shape_cast %158 : vector<1x1x256xf32> to vector<1x256xf32>
    %160 = vector.broadcast %159 : vector<1x256xf32> to vector<5x256xf32>
    %161 = arith.addf %157, %160 : vector<5x256xf32>
    %cst_107 = arith.constant 5.000000e-01 : f32
    %162 = vector.broadcast %cst_107 : f32 to vector<5x256xf32>
    %163 = arith.mulf %162, %161 : vector<5x256xf32>
    %cst_108 = arith.constant 0.707106769 : f32
    %164 = vector.broadcast %cst_108 : f32 to vector<5x256xf32>
    %165 = arith.mulf %161, %164 : vector<5x256xf32>
    %166 = math.erf %165 : vector<5x256xf32>
    %cst_109 = arith.constant 1.000000e+00 : f32
    %167 = vector.broadcast %cst_109 : f32 to vector<5x256xf32>
    %168 = arith.addf %167, %166 : vector<5x256xf32>
    %169 = arith.mulf %163, %168 : vector<5x256xf32>
    %c0_110 = arith.constant 0 : index
    %c0_111 = arith.constant 0 : index
    %c0_112 = arith.constant 0 : index
    %170 = vector.load %arg21[%c0_110, %c0_111, %c0_112] : memref<1x256x64xbf16, #tpu.memory_space<vmem>>, vector<1x256x64xbf16>
    %171 = vector.shape_cast %170 : vector<1x256x64xbf16> to vector<256x64xbf16>
    %172 = arith.truncf %169 : vector<5x256xf32> to vector<5x256xbf16>
    %cst_113 = arith.constant dense<0.000000e+00> : vector<5x64xf32>
    %173 = tpu.matmul %172, %171, %cst_113 {dimension_numbers = #tpu.dot_dimension_numbers<[1], [0], [0], [1], [0, 0, 1, 1], [], []>} : vector<5x256xbf16>, vector<256x64xbf16>, vector<5x64xf32> -> vector<5x64xf32>
    %174 = arith.addf %127, %173 : vector<5x64xf32>
    %c0_114 = arith.constant 0 : index
    %c0_115 = arith.constant 0 : index
    %c0_116 = arith.constant 0 : index
    %175 = vector.load %arg22[%c0_114, %c0_115, %c0_116] : memref<1x1x64xf32, #tpu.memory_space<vmem>>, vector<1x1x64xf32>
    %176 = vector.shape_cast %175 : vector<1x1x64xf32> to vector<1x64xf32>
    %177 = vector.broadcast %176 : vector<1x64xf32> to vector<5x64xf32>
    %178 = arith.addf %174, %177 : vector<5x64xf32>
    %c0_117 = arith.constant 0 : index
    %c0_118 = arith.constant 0 : index
    %179 = vector.load %arg24[%c0_117, %c0_118] : memref<5x64xf32, #tpu.memory_space<vmem>>, vector<5x64xf32>
    tpu.vector_store %arg24[%c0_117, %c0_118], %178 {strides = array<i32>} : memref<5x64xf32, #tpu.memory_space<vmem>>, vector<5x64xf32>,
    %c1_i32 = arith.constant 1 : i32
    %180 = arith.cmpi eq, %arg1, %c1_i32 : i32
    %181 = arith.extui %180 : i1 to i32
    %c0_i32_119 = arith.constant 0 : i32
    %182 = arith.cmpi ne, %181, %c0_i32_119 : i32
    scf.if %182 {
      %c0_120 = arith.constant 0 : index
      %c0_121 = arith.constant 0 : index
      %c0_122 = arith.constant 0 : index
      %183 = vector.load %arg23[%c0_120, %c0_121, %c0_122] : memref<1x5x64xf32, #tpu.memory_space<vmem>>, vector<1x5x64xf32>
      %184 = vector.shape_cast %183 : vector<1x5x64xf32> to vector<5x64xf32>
      %185 = vector.shape_cast %178 : vector<5x64xf32> to vector<1x5x64xf32>
      tpu.vector_store %arg23[%c0_120, %c0_121, %c0_122], %185 {strides = array<i32>} : memref<1x5x64xf32, #tpu.memory_space<vmem>>, vector<1x5x64xf32>,
    } else {
    }
    return
  }
  func.func @transform_0(%arg0: i32, %arg1: i32) -> (i32, i32, i32) {
    %c0_i32 = arith.constant 0 : i32
    %c0_i32_0 = arith.constant 0 : i32
    %c0_i32_1 = arith.constant 0 : i32
    return %arg0, %c0_i32, %c0_i32_0 : i32, i32, i32
  }
  func.func @transform_1(%arg0: i32, %arg1: i32) -> (i32, i32) {
    %c0_i32 = arith.constant 0 : i32
    %c0_i32_0 = arith.constant 0 : i32
    %c0_i32_1 = arith.constant 0 : i32
    return %c0_i32, %c0_i32_0 : i32, i32
  }
  func.func @transform_2(%arg0: i32, %arg1: i32) -> (i32, i32) {
    %c0_i32 = arith.constant 0 : i32
    %c0_i32_0 = arith.constant 0 : i32
    %c0_i32_1 = arith.constant 0 : i32
    return %c0_i32, %c0_i32_0 : i32, i32
  }
  func.func @transform_3(%arg0: i32, %arg1: i32) -> (i32, i32) {
    %c0_i32 = arith.constant 0 : i32
    %c0_i32_0 = arith.constant 0 : i32
    %c0_i32_1 = arith.constant 0 : i32
    return %c0_i32, %c0_i32_0 : i32, i32
  }
  func.func @transform_4(%arg0: i32, %arg1: i32) -> (i32, i32) {
    %c0_i32 = arith.constant 0 : i32
    %c0_i32_0 = arith.constant 0 : i32
    %c0_i32_1 = arith.constant 0 : i32
    return %c0_i32, %c0_i32_0 : i32, i32
  }
  func.func @transform_5(%arg0: i32, %arg1: i32) -> (i32, i32, i32) {
    %c0_i32 = arith.constant 0 : i32
    %c0_i32_0 = arith.constant 0 : i32
    %c0_i32_1 = arith.constant 0 : i32
    return %arg1, %c0_i32, %c0_i32_0 : i32, i32, i32
  }
  func.func @transform_6(%arg0: i32, %arg1: i32) -> (i32, i32, i32) {
    %c0_i32 = arith.constant 0 : i32
    %c0_i32_0 = arith.constant 0 : i32
    %c0_i32_1 = arith.constant 0 : i32
    return %arg1, %c0_i32, %c0_i32_0 : i32, i32, i32
  }
  func.func @transform_7(%arg0: i32, %arg1: i32) -> (i32, i32, i32, i32) {
    %c0_i32 = arith.constant 0 : i32
    %c0_i32_0 = arith.constant 0 : i32
    %c0_i32_1 = arith.constant 0 : i32
    %c0_i32_2 = arith.constant 0 : i32
    return %arg1, %c0_i32, %c0_i32_0, %c0_i32_1 : i32, i32, i32, i32
  }
  func.func @transform_8(%arg0: i32, %arg1: i32) -> (i32, i32, i32, i32) {
    %c0_i32 = arith.constant 0 : i32
    %c0_i32_0 = arith.constant 0 : i32
    %c0_i32_1 = arith.constant 0 : i32
    %c0_i32_2 = arith.constant 0 : i32
    return %arg1, %c0_i32, %c0_i32_0, %c0_i32_1 : i32, i32, i32, i32
  }
  func.func @transform_9(%arg0: i32, %arg1: i32) -> (i32, i32, i32, i32) {
    %c0_i32 = arith.constant 0 : i32
    %c0_i32_0 = arith.constant 0 : i32
    %c0_i32_1 = arith.constant 0 : i32
    %c0_i32_2 = arith.constant 0 : i32
    return %arg1, %c0_i32, %c0_i32_0, %c0_i32_1 : i32, i32, i32, i32
  }
  func.func @transform_10(%arg0: i32, %arg1: i32) -> (i32, i32, i32, i32) {
    %c0_i32 = arith.constant 0 : i32
    %c0_i32_0 = arith.constant 0 : i32
    %c0_i32_1 = arith.constant 0 : i32
    %c0_i32_2 = arith.constant 0 : i32
    return %arg1, %c0_i32, %c0_i32_0, %c0_i32_1 : i32, i32, i32, i32
  }
  func.func @transform_11(%arg0: i32, %arg1: i32) -> (i32, i32, i32, i32) {
    %c0_i32 = arith.constant 0 : i32
    %c0_i32_0 = arith.constant 0 : i32
    %c0_i32_1 = arith.constant 0 : i32
    %c0_i32_2 = arith.constant 0 : i32
    return %arg1, %c0_i32, %c0_i32_0, %c0_i32_1 : i32, i32, i32, i32
  }
  func.func @transform_12(%arg0: i32, %arg1: i32) -> (i32, i32, i32, i32) {
    %c0_i32 = arith.constant 0 : i32
    %c0_i32_0 = arith.constant 0 : i32
    %c0_i32_1 = arith.constant 0 : i32
    %c0_i32_2 = arith.constant 0 : i32
    return %arg1, %c0_i32, %c0_i32_0, %c0_i32_1 : i32, i32, i32, i32
  }
  func.func @transform_13(%arg0: i32, %arg1: i32) -> (i32, i32, i32, i32) {
    %c0_i32 = arith.constant 0 : i32
    %c0_i32_0 = arith.constant 0 : i32
    %c0_i32_1 = arith.constant 0 : i32
    %c0_i32_2 = arith.constant 0 : i32
    return %arg1, %c0_i32, %c0_i32_0, %c0_i32_1 : i32, i32, i32, i32
  }
  func.func @transform_14(%arg0: i32, %arg1: i32) -> (i32, i32, i32) {
    %c0_i32 = arith.constant 0 : i32
    %c0_i32_0 = arith.constant 0 : i32
    %c0_i32_1 = arith.constant 0 : i32
    return %arg1, %c0_i32, %c0_i32_0 : i32, i32, i32
  }
  func.func @transform_15(%arg0: i32, %arg1: i32) -> (i32, i32, i32) {
    %c0_i32 = arith.constant 0 : i32
    %c0_i32_0 = arith.constant 0 : i32
    %c0_i32_1 = arith.constant 0 : i32
    return %arg1, %c0_i32, %c0_i32_0 : i32, i32, i32
  }
  func.func @transform_16(%arg0: i32, %arg1: i32) -> (i32, i32, i32) {
    %c0_i32 = arith.constant 0 : i32
    %c0_i32_0 = arith.constant 0 : i32
    %c0_i32_1 = arith.constant 0 : i32
    return %arg1, %c0_i32, %c0_i32_0 : i32, i32, i32
  }
  func.func @transform_17(%arg0: i32, %arg1: i32) -> (i32, i32, i32) {
    %c0_i32 = arith.constant 0 : i32
    %c0_i32_0 = arith.constant 0 : i32
    %c0_i32_1 = arith.constant 0 : i32
    return %arg1, %c0_i32, %c0_i32_0 : i32, i32, i32
  }
  func.func @transform_18(%arg0: i32, %arg1: i32) -> (i32, i32, i32) {
    %c0_i32 = arith.constant 0 : i32
    %c0_i32_0 = arith.constant 0 : i32
    %c0_i32_1 = arith.constant 0 : i32
    return %arg1, %c0_i32, %c0_i32_0 : i32, i32, i32
  }
  func.func @transform_19(%arg0: i32, %arg1: i32) -> (i32, i32, i32) {
    %c0_i32 = arith.constant 0 : i32
    %c0_i32_0 = arith.constant 0 : i32
    %c0_i32_1 = arith.constant 0 : i32
    return %arg1, %c0_i32, %c0_i32_0 : i32, i32, i32
  }
  func.func @transform_20(%arg0: i32, %arg1: i32) -> (i32, i32, i32) {
    %c0_i32 = arith.constant 0 : i32
    %c0_i32_0 = arith.constant 0 : i32
    %c0_i32_1 = arith.constant 0 : i32
    return %arg1, %c0_i32, %c0_i32_0 : i32, i32, i32
  }
  func.func @transform_21(%arg0: i32, %arg1: i32) -> (i32, i32, i32) {
    %c0_i32 = arith.constant 0 : i32
    %c0_i32_0 = arith.constant 0 : i32
    %c0_i32_1 = arith.constant 0 : i32
    return %arg0, %c0_i32, %c0_i32_0 : i32, i32, i32
  }
}

module attributes {stable_mosaic.version = 11 : i64} {
  func.func @_vision_head_kernel(%arg0: i32, %arg1: memref<1x5x64xf32, #tpu.memory_space<vmem>>, %arg2: memref<9x64xf32, #tpu.memory_space<vmem>>, %arg3: memref<1x64xf32, #tpu.memory_space<vmem>>, %arg4: memref<1x64xf32, #tpu.memory_space<vmem>>, %arg5: memref<1x64xf32, #tpu.memory_space<vmem>>, %arg6: memref<1x64xf32, #tpu.memory_space<vmem>>, %arg7: memref<1x2x64x32xbf16, #tpu.memory_space<vmem>>, %arg8: memref<1x2x1x32xf32, #tpu.memory_space<vmem>>, %arg9: memref<1x2x64x32xbf16, #tpu.memory_space<vmem>>, %arg10: memref<1x2x1x32xf32, #tpu.memory_space<vmem>>, %arg11: memref<1x2x64x32xbf16, #tpu.memory_space<vmem>>, %arg12: memref<1x2x1x32xf32, #tpu.memory_space<vmem>>, %arg13: memref<1x2x32x64xbf16, #tpu.memory_space<vmem>>, %arg14: memref<1x1x64xf32, #tpu.memory_space<vmem>>, %arg15: memref<1x64xf32, #tpu.memory_space<vmem>>, %arg16: memref<1x64xf32, #tpu.memory_space<vmem>>, %arg17: memref<64x64xbf16, #tpu.memory_space<vmem>>, %arg18: memref<1x8x64xf32, #tpu.memory_space<vmem>>, %arg19: memref<1x1x64xf32, #tpu.memory_space<vmem>>) attributes {dimension_semantics = [#tpu.dimension_semantics<parallel>], iteration_bounds = array<i64: 2>, scalar_prefetch = 0 : i64, scratch_operands = 0 : i64, tpu.core_type = #tpu.core_type<tc>, window_params = [{transform_indices = @transform_0, window_bounds = array<i64: 1, 5, 64>}, {pipeline_mode = #tpu.pipeline_mode<synchronous>, transform_indices = @transform_1, window_bounds = array<i64: 9, 64>}, {pipeline_mode = #tpu.pipeline_mode<synchronous>, transform_indices = @transform_2, window_bounds = array<i64: 1, 64>}, {pipeline_mode = #tpu.pipeline_mode<synchronous>, transform_indices = @transform_3, window_bounds = array<i64: 1, 64>}, {pipeline_mode = #tpu.pipeline_mode<synchronous>, transform_indices = @transform_4, window_bounds = array<i64: 1, 64>}, {pipeline_mode = #tpu.pipeline_mode<synchronous>, transform_indices = @transform_5, window_bounds = array<i64: 1, 64>}, {pipeline_mode = #tpu.pipeline_mode<synchronous>, transform_indices = @transform_6, window_bounds = array<i64: 1, 2, 64, 32>}, {pipeline_mode = #tpu.pipeline_mode<synchronous>, transform_indices = @transform_7, window_bounds = array<i64: 1, 2, 1, 32>}, {pipeline_mode = #tpu.pipeline_mode<synchronous>, transform_indices = @transform_8, window_bounds = array<i64: 1, 2, 64, 32>}, {pipeline_mode = #tpu.pipeline_mode<synchronous>, transform_indices = @transform_9, window_bounds = array<i64: 1, 2, 1, 32>}, {pipeline_mode = #tpu.pipeline_mode<synchronous>, transform_indices = @transform_10, window_bounds = array<i64: 1, 2, 64, 32>}, {pipeline_mode = #tpu.pipeline_mode<synchronous>, transform_indices = @transform_11, window_bounds = array<i64: 1, 2, 1, 32>}, {pipeline_mode = #tpu.pipeline_mode<synchronous>, transform_indices = @transform_12, window_bounds = array<i64: 1, 2, 32, 64>}, {pipeline_mode = #tpu.pipeline_mode<synchronous>, transform_indices = @transform_13, window_bounds = array<i64: 1, 1, 64>}, {pipeline_mode = #tpu.pipeline_mode<synchronous>, transform_indices = @transform_14, window_bounds = array<i64: 1, 64>}, {pipeline_mode = #tpu.pipeline_mode<synchronous>, transform_indices = @transform_15, window_bounds = array<i64: 1, 64>}, {pipeline_mode = #tpu.pipeline_mode<synchronous>, transform_indices = @transform_16, window_bounds = array<i64: 64, 64>}, {transform_indices = @transform_17, window_bounds = array<i64: 1, 8, 64>}, {transform_indices = @transform_18, window_bounds = array<i64: 1, 1, 64>}]} {
    %c0 = arith.constant 0 : index
    %c0_0 = arith.constant 0 : index
    %c0_1 = arith.constant 0 : index
    %0 = vector.load %arg1[%c0, %c0_0, %c0_1] : memref<1x5x64xf32, #tpu.memory_space<vmem>>, vector<1x5x64xf32>
    %1 = vector.shape_cast %0 : vector<1x5x64xf32> to vector<5x64xf32>
    %c0_2 = arith.constant 0 : index
    %c0_3 = arith.constant 0 : index
    %2 = vector.load %arg2[%c0_2, %c0_3] : memref<9x64xf32, #tpu.memory_space<vmem>>, vector<9x64xf32>
    %c0_4 = arith.constant 0 : index
    %c0_5 = arith.constant 0 : index
    %3 = vector.load %arg3[%c0_4, %c0_5] : memref<1x64xf32, #tpu.memory_space<vmem>>, vector<1x64xf32>
    %c0_6 = arith.constant 0 : index
    %c0_7 = arith.constant 0 : index
    %4 = vector.load %arg4[%c0_6, %c0_7] : memref<1x64xf32, #tpu.memory_space<vmem>>, vector<1x64xf32>
    %cst = arith.constant dense<0.000000e+00> : vector<9xf32>
    %5 = vector.multi_reduction <add>, %2, %cst [1] : vector<9x64xf32> to vector<9xf32>
    %6 = vector.shape_cast %5 : vector<9xf32> to vector<9x1xf32>
    %cst_8 = arith.constant 6.400000e+01 : f32
    %7 = vector.broadcast %cst_8 : f32 to vector<9x1xf32>
    %8 = arith.divf %6, %7 : vector<9x1xf32>
    %9 = vector.broadcast %8 : vector<9x1xf32> to vector<9x64xf32>
    %10 = arith.subf %2, %9 : vector<9x64xf32>
    %11 = arith.mulf %10, %10 : vector<9x64xf32>
    %cst_9 = arith.constant dense<0.000000e+00> : vector<9xf32>
    %12 = vector.multi_reduction <add>, %11, %cst_9 [1] : vector<9x64xf32> to vector<9xf32>
    %13 = vector.shape_cast %12 : vector<9xf32> to vector<9x1xf32>
    %cst_10 = arith.constant 6.400000e+01 : f32
    %14 = vector.broadcast %cst_10 : f32 to vector<9x1xf32>
    %15 = arith.divf %13, %14 : vector<9x1xf32>
    %16 = vector.broadcast %8 : vector<9x1xf32> to vector<9x64xf32>
    %17 = arith.subf %2, %16 : vector<9x64xf32>
    %cst_11 = arith.constant 9.99999974E-6 : f32
    %18 = vector.broadcast %cst_11 : f32 to vector<9x1xf32>
    %19 = arith.addf %15, %18 : vector<9x1xf32>
    %20 = math.rsqrt %19 : vector<9x1xf32>
    %21 = vector.broadcast %20 : vector<9x1xf32> to vector<9x64xf32>
    %22 = arith.mulf %17, %21 : vector<9x64xf32>
    %23 = vector.broadcast %3 : vector<1x64xf32> to vector<9x64xf32>
    %24 = arith.mulf %22, %23 : vector<9x64xf32>
    %25 = vector.broadcast %4 : vector<1x64xf32> to vector<9x64xf32>
    %26 = arith.addf %24, %25 : vector<9x64xf32>
    %c0_12 = arith.constant 0 : index
    %c0_13 = arith.constant 0 : index
    %27 = vector.load %arg5[%c0_12, %c0_13] : memref<1x64xf32, #tpu.memory_space<vmem>>, vector<1x64xf32>
    %c0_14 = arith.constant 0 : index
    %c0_15 = arith.constant 0 : index
    %28 = vector.load %arg6[%c0_14, %c0_15] : memref<1x64xf32, #tpu.memory_space<vmem>>, vector<1x64xf32>
    %cst_16 = arith.constant dense<0.000000e+00> : vector<5xf32>
    %29 = vector.multi_reduction <add>, %1, %cst_16 [1] : vector<5x64xf32> to vector<5xf32>
    %30 = vector.shape_cast %29 : vector<5xf32> to vector<5x1xf32>
    %cst_17 = arith.constant 6.400000e+01 : f32
    %31 = vector.broadcast %cst_17 : f32 to vector<5x1xf32>
    %32 = arith.divf %30, %31 : vector<5x1xf32>
    %33 = vector.broadcast %32 : vector<5x1xf32> to vector<5x64xf32>
    %34 = arith.subf %1, %33 : vector<5x64xf32>
    %35 = arith.mulf %34, %34 : vector<5x64xf32>
    %cst_18 = arith.constant dense<0.000000e+00> : vector<5xf32>
    %36 = vector.multi_reduction <add>, %35, %cst_18 [1] : vector<5x64xf32> to vector<5xf32>
    %37 = vector.shape_cast %36 : vector<5xf32> to vector<5x1xf32>
    %cst_19 = arith.constant 6.400000e+01 : f32
    %38 = vector.broadcast %cst_19 : f32 to vector<5x1xf32>
    %39 = arith.divf %37, %38 : vector<5x1xf32>
    %40 = vector.broadcast %32 : vector<5x1xf32> to vector<5x64xf32>
    %41 = arith.subf %1, %40 : vector<5x64xf32>
    %cst_20 = arith.constant 9.99999974E-6 : f32
    %42 = vector.broadcast %cst_20 : f32 to vector<5x1xf32>
    %43 = arith.addf %39, %42 : vector<5x1xf32>
    %44 = math.rsqrt %43 : vector<5x1xf32>
    %45 = vector.broadcast %44 : vector<5x1xf32> to vector<5x64xf32>
    %46 = arith.mulf %41, %45 : vector<5x64xf32>
    %47 = vector.broadcast %27 : vector<1x64xf32> to vector<5x64xf32>
    %48 = arith.mulf %46, %47 : vector<5x64xf32>
    %49 = vector.broadcast %28 : vector<1x64xf32> to vector<5x64xf32>
    %50 = arith.addf %48, %49 : vector<5x64xf32>
    %cst_21 = arith.constant 0.000000e+00 : f32
    %51 = vector.broadcast %cst_21 : f32 to vector<9x64xf32>
    %c0_22 = arith.constant 0 : index
    %c0_23 = arith.constant 0 : index
    %c0_24 = arith.constant 0 : index
    %c0_25 = arith.constant 0 : index
    %52 = vector.load %arg7[%c0_22, %c0_23, %c0_24, %c0_25] : memref<1x2x64x32xbf16, #tpu.memory_space<vmem>>, vector<1x1x64x32xbf16>
    %53 = vector.shape_cast %52 : vector<1x1x64x32xbf16> to vector<64x32xbf16>
    %54 = arith.truncf %26 : vector<9x64xf32> to vector<9x64xbf16>
    %cst_26 = arith.constant dense<0.000000e+00> : vector<9x32xf32>
    %55 = tpu.matmul %54, %53, %cst_26 {dimension_numbers = #tpu.dot_dimension_numbers<[1], [0], [0], [1], [0, 0, 1, 1], [], []>} : vector<9x64xbf16>, vector<64x32xbf16>, vector<9x32xf32> -> vector<9x32xf32>
    %c0_27 = arith.constant 0 : index
    %c0_28 = arith.constant 0 : index
    %c0_29 = arith.constant 0 : index
    %c0_30 = arith.constant 0 : index
    %56 = vector.load %arg8[%c0_27, %c0_28, %c0_29, %c0_30] : memref<1x2x1x32xf32, #tpu.memory_space<vmem>>, vector<1x1x1x32xf32>
    %57 = vector.shape_cast %56 : vector<1x1x1x32xf32> to vector<1x32xf32>
    %58 = vector.broadcast %57 : vector<1x32xf32> to vector<9x32xf32>
    %59 = arith.addf %55, %58 : vector<9x32xf32>
    %c0_31 = arith.constant 0 : index
    %c0_32 = arith.constant 0 : index
    %c0_33 = arith.constant 0 : index
    %c0_34 = arith.constant 0 : index
    %60 = vector.load %arg9[%c0_31, %c0_32, %c0_33, %c0_34] : memref<1x2x64x32xbf16, #tpu.memory_space<vmem>>, vector<1x1x64x32xbf16>
    %61 = vector.shape_cast %60 : vector<1x1x64x32xbf16> to vector<64x32xbf16>
    %62 = arith.truncf %50 : vector<5x64xf32> to vector<5x64xbf16>
    %cst_35 = arith.constant dense<0.000000e+00> : vector<5x32xf32>
    %63 = tpu.matmul %62, %61, %cst_35 {dimension_numbers = #tpu.dot_dimension_numbers<[1], [0], [0], [1], [0, 0, 1, 1], [], []>} : vector<5x64xbf16>, vector<64x32xbf16>, vector<5x32xf32> -> vector<5x32xf32>
    %c0_36 = arith.constant 0 : index
    %c0_37 = arith.constant 0 : index
    %c0_38 = arith.constant 0 : index
    %c0_39 = arith.constant 0 : index
    %64 = vector.load %arg10[%c0_36, %c0_37, %c0_38, %c0_39] : memref<1x2x1x32xf32, #tpu.memory_space<vmem>>, vector<1x1x1x32xf32>
    %65 = vector.shape_cast %64 : vector<1x1x1x32xf32> to vector<1x32xf32>
    %66 = vector.broadcast %65 : vector<1x32xf32> to vector<5x32xf32>
    %67 = arith.addf %63, %66 : vector<5x32xf32>
    %c0_40 = arith.constant 0 : index
    %c0_41 = arith.constant 0 : index
    %c0_42 = arith.constant 0 : index
    %c0_43 = arith.constant 0 : index
    %68 = vector.load %arg11[%c0_40, %c0_41, %c0_42, %c0_43] : memref<1x2x64x32xbf16, #tpu.memory_space<vmem>>, vector<1x1x64x32xbf16>
    %69 = vector.shape_cast %68 : vector<1x1x64x32xbf16> to vector<64x32xbf16>
    %70 = arith.truncf %50 : vector<5x64xf32> to vector<5x64xbf16>
    %cst_44 = arith.constant dense<0.000000e+00> : vector<5x32xf32>
    %71 = tpu.matmul %70, %69, %cst_44 {dimension_numbers = #tpu.dot_dimension_numbers<[1], [0], [0], [1], [0, 0, 1, 1], [], []>} : vector<5x64xbf16>, vector<64x32xbf16>, vector<5x32xf32> -> vector<5x32xf32>
    %c0_45 = arith.constant 0 : index
    %c0_46 = arith.constant 0 : index
    %c0_47 = arith.constant 0 : index
    %c0_48 = arith.constant 0 : index
    %72 = vector.load %arg12[%c0_45, %c0_46, %c0_47, %c0_48] : memref<1x2x1x32xf32, #tpu.memory_space<vmem>>, vector<1x1x1x32xf32>
    %73 = vector.shape_cast %72 : vector<1x1x1x32xf32> to vector<1x32xf32>
    %74 = vector.broadcast %73 : vector<1x32xf32> to vector<5x32xf32>
    %75 = arith.addf %71, %74 : vector<5x32xf32>
    %76 = arith.truncf %59 : vector<9x32xf32> to vector<9x32xbf16>
    %77 = arith.truncf %67 : vector<5x32xf32> to vector<5x32xbf16>
    %cst_49 = arith.constant dense<0.000000e+00> : vector<9x5xf32>
    %78 = tpu.matmul %76, %77, %cst_49 {dimension_numbers = #tpu.dot_dimension_numbers<[1], [1], [0], [0], [0, 0, 1, 0], [], []>} : vector<9x32xbf16>, vector<5x32xbf16>, vector<9x5xf32> -> vector<9x5xf32>
    %cst_50 = arith.constant 0.176776692 : f32
    %79 = vector.broadcast %cst_50 : f32 to vector<9x5xf32>
    %80 = arith.mulf %78, %79 : vector<9x5xf32>
    %cst_51 = arith.constant dense<0xFF800000> : vector<9xf32>
    %81 = vector.multi_reduction <maximumf>, %80, %cst_51 [1] : vector<9x5xf32> to vector<9xf32>
    %82 = vector.shape_cast %81 : vector<9xf32> to vector<9x1xf32>
    %83 = vector.broadcast %82 : vector<9x1xf32> to vector<9x5xf32>
    %84 = arith.subf %80, %83 : vector<9x5xf32>
    %85 = math.exp %84 : vector<9x5xf32>
    %cst_52 = arith.constant dense<0.000000e+00> : vector<9xf32>
    %86 = vector.multi_reduction <add>, %85, %cst_52 [1] : vector<9x5xf32> to vector<9xf32>
    %87 = vector.shape_cast %86 : vector<9xf32> to vector<9x1xf32>
    %88 = vector.broadcast %87 : vector<9x1xf32> to vector<9x5xf32>
    %89 = arith.divf %85, %88 : vector<9x5xf32>
    %90 = arith.truncf %89 : vector<9x5xf32> to vector<9x5xbf16>
    %91 = arith.truncf %75 : vector<5x32xf32> to vector<5x32xbf16>
    %cst_53 = arith.constant dense<0.000000e+00> : vector<9x32xf32>
    %92 = tpu.matmul %90, %91, %cst_53 {dimension_numbers = #tpu.dot_dimension_numbers<[1], [0], [0], [1], [0, 0, 1, 1], [], []>} : vector<9x5xbf16>, vector<5x32xbf16>, vector<9x32xf32> -> vector<9x32xf32>
    %c0_54 = arith.constant 0 : index
    %c0_55 = arith.constant 0 : index
    %c0_56 = arith.constant 0 : index
    %c0_57 = arith.constant 0 : index
    %93 = vector.load %arg13[%c0_54, %c0_55, %c0_56, %c0_57] : memref<1x2x32x64xbf16, #tpu.memory_space<vmem>>, vector<1x1x32x64xbf16>
    %94 = vector.shape_cast %93 : vector<1x1x32x64xbf16> to vector<32x64xbf16>
    %95 = arith.truncf %92 : vector<9x32xf32> to vector<9x32xbf16>
    %cst_58 = arith.constant dense<0.000000e+00> : vector<9x64xf32>
    %96 = tpu.matmul %95, %94, %cst_58 {dimension_numbers = #tpu.dot_dimension_numbers<[1], [0], [0], [1], [0, 0, 1, 1], [], []>} : vector<9x32xbf16>, vector<32x64xbf16>, vector<9x64xf32> -> vector<9x64xf32>
    %97 = arith.addf %51, %96 : vector<9x64xf32>
    %c0_59 = arith.constant 0 : index
    %c1 = arith.constant 1 : index
    %c0_60 = arith.constant 0 : index
    %c0_61 = arith.constant 0 : index
    %98 = vector.load %arg7[%c0_59, %c1, %c0_60, %c0_61] : memref<1x2x64x32xbf16, #tpu.memory_space<vmem>>, vector<1x1x64x32xbf16>
    %99 = vector.shape_cast %98 : vector<1x1x64x32xbf16> to vector<64x32xbf16>
    %100 = arith.truncf %26 : vector<9x64xf32> to vector<9x64xbf16>
    %cst_62 = arith.constant dense<0.000000e+00> : vector<9x32xf32>
    %101 = tpu.matmul %100, %99, %cst_62 {dimension_numbers = #tpu.dot_dimension_numbers<[1], [0], [0], [1], [0, 0, 1, 1], [], []>} : vector<9x64xbf16>, vector<64x32xbf16>, vector<9x32xf32> -> vector<9x32xf32>
    %c0_63 = arith.constant 0 : index
    %c1_64 = arith.constant 1 : index
    %c0_65 = arith.constant 0 : index
    %c0_66 = arith.constant 0 : index
    %102 = vector.load %arg8[%c0_63, %c1_64, %c0_65, %c0_66] : memref<1x2x1x32xf32, #tpu.memory_space<vmem>>, vector<1x1x1x32xf32>
    %103 = vector.shape_cast %102 : vector<1x1x1x32xf32> to vector<1x32xf32>
    %104 = vector.broadcast %103 : vector<1x32xf32> to vector<9x32xf32>
    %105 = arith.addf %101, %104 : vector<9x32xf32>
    %c0_67 = arith.constant 0 : index
    %c1_68 = arith.constant 1 : index
    %c0_69 = arith.constant 0 : index
    %c0_70 = arith.constant 0 : index
    %106 = vector.load %arg9[%c0_67, %c1_68, %c0_69, %c0_70] : memref<1x2x64x32xbf16, #tpu.memory_space<vmem>>, vector<1x1x64x32xbf16>
    %107 = vector.shape_cast %106 : vector<1x1x64x32xbf16> to vector<64x32xbf16>
    %108 = arith.truncf %50 : vector<5x64xf32> to vector<5x64xbf16>
    %cst_71 = arith.constant dense<0.000000e+00> : vector<5x32xf32>
    %109 = tpu.matmul %108, %107, %cst_71 {dimension_numbers = #tpu.dot_dimension_numbers<[1], [0], [0], [1], [0, 0, 1, 1], [], []>} : vector<5x64xbf16>, vector<64x32xbf16>, vector<5x32xf32> -> vector<5x32xf32>
    %c0_72 = arith.constant 0 : index
    %c1_73 = arith.constant 1 : index
    %c0_74 = arith.constant 0 : index
    %c0_75 = arith.constant 0 : index
    %110 = vector.load %arg10[%c0_72, %c1_73, %c0_74, %c0_75] : memref<1x2x1x32xf32, #tpu.memory_space<vmem>>, vector<1x1x1x32xf32>
    %111 = vector.shape_cast %110 : vector<1x1x1x32xf32> to vector<1x32xf32>
    %112 = vector.broadcast %111 : vector<1x32xf32> to vector<5x32xf32>
    %113 = arith.addf %109, %112 : vector<5x32xf32>
    %c0_76 = arith.constant 0 : index
    %c1_77 = arith.constant 1 : index
    %c0_78 = arith.constant 0 : index
    %c0_79 = arith.constant 0 : index
    %114 = vector.load %arg11[%c0_76, %c1_77, %c0_78, %c0_79] : memref<1x2x64x32xbf16, #tpu.memory_space<vmem>>, vector<1x1x64x32xbf16>
    %115 = vector.shape_cast %114 : vector<1x1x64x32xbf16> to vector<64x32xbf16>
    %116 = arith.truncf %50 : vector<5x64xf32> to vector<5x64xbf16>
    %cst_80 = arith.constant dense<0.000000e+00> : vector<5x32xf32>
    %117 = tpu.matmul %116, %115, %cst_80 {dimension_numbers = #tpu.dot_dimension_numbers<[1], [0], [0], [1], [0, 0, 1, 1], [], []>} : vector<5x64xbf16>, vector<64x32xbf16>, vector<5x32xf32> -> vector<5x32xf32>
    %c0_81 = arith.constant 0 : index
    %c1_82 = arith.constant 1 : index
    %c0_83 = arith.constant 0 : index
    %c0_84 = arith.constant 0 : index
    %118 = vector.load %arg12[%c0_81, %c1_82, %c0_83, %c0_84] : memref<1x2x1x32xf32, #tpu.memory_space<vmem>>, vector<1x1x1x32xf32>
    %119 = vector.shape_cast %118 : vector<1x1x1x32xf32> to vector<1x32xf32>
    %120 = vector.broadcast %119 : vector<1x32xf32> to vector<5x32xf32>
    %121 = arith.addf %117, %120 : vector<5x32xf32>
    %122 = arith.truncf %105 : vector<9x32xf32> to vector<9x32xbf16>
    %123 = arith.truncf %113 : vector<5x32xf32> to vector<5x32xbf16>
    %cst_85 = arith.constant dense<0.000000e+00> : vector<9x5xf32>
    %124 = tpu.matmul %122, %123, %cst_85 {dimension_numbers = #tpu.dot_dimension_numbers<[1], [1], [0], [0], [0, 0, 1, 0], [], []>} : vector<9x32xbf16>, vector<5x32xbf16>, vector<9x5xf32> -> vector<9x5xf32>
    %cst_86 = arith.constant 0.176776692 : f32
    %125 = vector.broadcast %cst_86 : f32 to vector<9x5xf32>
    %126 = arith.mulf %124, %125 : vector<9x5xf32>
    %cst_87 = arith.constant dense<0xFF800000> : vector<9xf32>
    %127 = vector.multi_reduction <maximumf>, %126, %cst_87 [1] : vector<9x5xf32> to vector<9xf32>
    %128 = vector.shape_cast %127 : vector<9xf32> to vector<9x1xf32>
    %129 = vector.broadcast %128 : vector<9x1xf32> to vector<9x5xf32>
    %130 = arith.subf %126, %129 : vector<9x5xf32>
    %131 = math.exp %130 : vector<9x5xf32>
    %cst_88 = arith.constant dense<0.000000e+00> : vector<9xf32>
    %132 = vector.multi_reduction <add>, %131, %cst_88 [1] : vector<9x5xf32> to vector<9xf32>
    %133 = vector.shape_cast %132 : vector<9xf32> to vector<9x1xf32>
    %134 = vector.broadcast %133 : vector<9x1xf32> to vector<9x5xf32>
    %135 = arith.divf %131, %134 : vector<9x5xf32>
    %136 = arith.truncf %135 : vector<9x5xf32> to vector<9x5xbf16>
    %137 = arith.truncf %121 : vector<5x32xf32> to vector<5x32xbf16>
    %cst_89 = arith.constant dense<0.000000e+00> : vector<9x32xf32>
    %138 = tpu.matmul %136, %137, %cst_89 {dimension_numbers = #tpu.dot_dimension_numbers<[1], [0], [0], [1], [0, 0, 1, 1], [], []>} : vector<9x5xbf16>, vector<5x32xbf16>, vector<9x32xf32> -> vector<9x32xf32>
    %c0_90 = arith.constant 0 : index
    %c1_91 = arith.constant 1 : index
    %c0_92 = arith.constant 0 : index
    %c0_93 = arith.constant 0 : index
    %139 = vector.load %arg13[%c0_90, %c1_91, %c0_92, %c0_93] : memref<1x2x32x64xbf16, #tpu.memory_space<vmem>>, vector<1x1x32x64xbf16>
    %140 = vector.shape_cast %139 : vector<1x1x32x64xbf16> to vector<32x64xbf16>
    %141 = arith.truncf %138 : vector<9x32xf32> to vector<9x32xbf16>
    %cst_94 = arith.constant dense<0.000000e+00> : vector<9x64xf32>
    %142 = tpu.matmul %141, %140, %cst_94 {dimension_numbers = #tpu.dot_dimension_numbers<[1], [0], [0], [1], [0, 0, 1, 1], [], []>} : vector<9x32xbf16>, vector<32x64xbf16>, vector<9x64xf32> -> vector<9x64xf32>
    %143 = arith.addf %97, %142 : vector<9x64xf32>
    %c0_95 = arith.constant 0 : index
    %c0_96 = arith.constant 0 : index
    %c0_97 = arith.constant 0 : index
    %144 = vector.load %arg14[%c0_95, %c0_96, %c0_97] : memref<1x1x64xf32, #tpu.memory_space<vmem>>, vector<1x1x64xf32>
    %145 = vector.shape_cast %144 : vector<1x1x64xf32> to vector<1x64xf32>
    %146 = vector.broadcast %145 : vector<1x64xf32> to vector<9x64xf32>
    %147 = arith.addf %143, %146 : vector<9x64xf32>
    %c0_98 = arith.constant 0 : index
    %c0_99 = arith.constant 0 : index
    %148 = vector.load %arg15[%c0_98, %c0_99] : memref<1x64xf32, #tpu.memory_space<vmem>>, vector<1x64xf32>
    %c0_100 = arith.constant 0 : index
    %c0_101 = arith.constant 0 : index
    %149 = vector.load %arg16[%c0_100, %c0_101] : memref<1x64xf32, #tpu.memory_space<vmem>>, vector<1x64xf32>
    %cst_102 = arith.constant dense<0.000000e+00> : vector<9xf32>
    %150 = vector.multi_reduction <add>, %147, %cst_102 [1] : vector<9x64xf32> to vector<9xf32>
    %151 = vector.shape_cast %150 : vector<9xf32> to vector<9x1xf32>
    %cst_103 = arith.constant 6.400000e+01 : f32
    %152 = vector.broadcast %cst_103 : f32 to vector<9x1xf32>
    %153 = arith.divf %151, %152 : vector<9x1xf32>
    %154 = vector.broadcast %153 : vector<9x1xf32> to vector<9x64xf32>
    %155 = arith.subf %147, %154 : vector<9x64xf32>
    %156 = arith.mulf %155, %155 : vector<9x64xf32>
    %cst_104 = arith.constant dense<0.000000e+00> : vector<9xf32>
    %157 = vector.multi_reduction <add>, %156, %cst_104 [1] : vector<9x64xf32> to vector<9xf32>
    %158 = vector.shape_cast %157 : vector<9xf32> to vector<9x1xf32>
    %cst_105 = arith.constant 6.400000e+01 : f32
    %159 = vector.broadcast %cst_105 : f32 to vector<9x1xf32>
    %160 = arith.divf %158, %159 : vector<9x1xf32>
    %161 = vector.broadcast %153 : vector<9x1xf32> to vector<9x64xf32>
    %162 = arith.subf %147, %161 : vector<9x64xf32>
    %cst_106 = arith.constant 9.99999974E-6 : f32
    %163 = vector.broadcast %cst_106 : f32 to vector<9x1xf32>
    %164 = arith.addf %160, %163 : vector<9x1xf32>
    %165 = math.rsqrt %164 : vector<9x1xf32>
    %166 = vector.broadcast %165 : vector<9x1xf32> to vector<9x64xf32>
    %167 = arith.mulf %162, %166 : vector<9x64xf32>
    %168 = vector.broadcast %148 : vector<1x64xf32> to vector<9x64xf32>
    %169 = arith.mulf %167, %168 : vector<9x64xf32>
    %170 = vector.broadcast %149 : vector<1x64xf32> to vector<9x64xf32>
    %171 = arith.addf %169, %170 : vector<9x64xf32>
    %172 = vector.extract_strided_slice %171 {offsets = [1, 0], sizes = [8, 64], strides = [1, 1]} : vector<9x64xf32> to vector<8x64xf32>
    %c0_107 = arith.constant 0 : index
    %c0_108 = arith.constant 0 : index
    %c0_109 = arith.constant 0 : index
    %173 = vector.load %arg18[%c0_107, %c0_108, %c0_109] : memref<1x8x64xf32, #tpu.memory_space<vmem>>, vector<1x8x64xf32>
    %174 = vector.shape_cast %173 : vector<1x8x64xf32> to vector<8x64xf32>
    %175 = vector.shape_cast %172 : vector<8x64xf32> to vector<1x8x64xf32>
    tpu.vector_store %arg18[%c0_107, %c0_108, %c0_109], %175 {strides = array<i32>} : memref<1x8x64xf32, #tpu.memory_space<vmem>>, vector<1x8x64xf32>,
    %176 = vector.extract_strided_slice %171 {offsets = [0, 0], sizes = [1, 64], strides = [1, 1]} : vector<9x64xf32> to vector<1x64xf32>
    %c0_110 = arith.constant 0 : index
    %c0_111 = arith.constant 0 : index
    %177 = vector.load %arg17[%c0_110, %c0_111] : memref<64x64xbf16, #tpu.memory_space<vmem>>, vector<64x64xbf16>
    %178 = arith.truncf %176 : vector<1x64xf32> to vector<1x64xbf16>
    %cst_112 = arith.constant dense<0.000000e+00> : vector<1x64xf32>
    %179 = tpu.matmul %178, %177, %cst_112 {dimension_numbers = #tpu.dot_dimension_numbers<[1], [0], [0], [1], [0, 0, 1, 1], [], []>} : vector<1x64xbf16>, vector<64x64xbf16>, vector<1x64xf32> -> vector<1x64xf32>
    %c0_113 = arith.constant 0 : index
    %c0_114 = arith.constant 0 : index
    %c0_115 = arith.constant 0 : index
    %180 = vector.load %arg19[%c0_113, %c0_114, %c0_115] : memref<1x1x64xf32, #tpu.memory_space<vmem>>, vector<1x1x64xf32>
    %181 = vector.shape_cast %180 : vector<1x1x64xf32> to vector<1x64xf32>
    %182 = vector.shape_cast %179 : vector<1x64xf32> to vector<1x1x64xf32>
    tpu.vector_store %arg19[%c0_113, %c0_114, %c0_115], %182 {strides = array<i32>} : memref<1x1x64xf32, #tpu.memory_space<vmem>>, vector<1x1x64xf32>,
    return
  }
  func.func @transform_0(%arg0: i32) -> (i32, i32, i32) {
    %c0_i32 = arith.constant 0 : i32
    %c0_i32_0 = arith.constant 0 : i32
    %c0_i32_1 = arith.constant 0 : i32
    return %arg0, %c0_i32, %c0_i32_0 : i32, i32, i32
  }
  func.func @transform_1(%arg0: i32) -> (i32, i32) {
    %c0_i32 = arith.constant 0 : i32
    %c0_i32_0 = arith.constant 0 : i32
    %c0_i32_1 = arith.constant 0 : i32
    return %c0_i32, %c0_i32_0 : i32, i32
  }
  func.func @transform_2(%arg0: i32) -> (i32, i32) {
    %c0_i32 = arith.constant 0 : i32
    %c0_i32_0 = arith.constant 0 : i32
    %c0_i32_1 = arith.constant 0 : i32
    return %c0_i32, %c0_i32_0 : i32, i32
  }
  func.func @transform_3(%arg0: i32) -> (i32, i32) {
    %c0_i32 = arith.constant 0 : i32
    %c0_i32_0 = arith.constant 0 : i32
    %c0_i32_1 = arith.constant 0 : i32
    return %c0_i32, %c0_i32_0 : i32, i32
  }
  func.func @transform_4(%arg0: i32) -> (i32, i32) {
    %c0_i32 = arith.constant 0 : i32
    %c0_i32_0 = arith.constant 0 : i32
    %c0_i32_1 = arith.constant 0 : i32
    return %c0_i32, %c0_i32_0 : i32, i32
  }
  func.func @transform_5(%arg0: i32) -> (i32, i32) {
    %c0_i32 = arith.constant 0 : i32
    %c0_i32_0 = arith.constant 0 : i32
    %c0_i32_1 = arith.constant 0 : i32
    return %c0_i32, %c0_i32_0 : i32, i32
  }
  func.func @transform_6(%arg0: i32) -> (i32, i32, i32, i32) {
    %c0_i32 = arith.constant 0 : i32
    %c0_i32_0 = arith.constant 0 : i32
    %c0_i32_1 = arith.constant 0 : i32
    %c0_i32_2 = arith.constant 0 : i32
    %c0_i32_3 = arith.constant 0 : i32
    return %c0_i32, %c0_i32_0, %c0_i32_1, %c0_i32_2 : i32, i32, i32, i32
  }
  func.func @transform_7(%arg0: i32) -> (i32, i32, i32, i32) {
    %c0_i32 = arith.constant 0 : i32
    %c0_i32_0 = arith.constant 0 : i32
    %c0_i32_1 = arith.constant 0 : i32
    %c0_i32_2 = arith.constant 0 : i32
    %c0_i32_3 = arith.constant 0 : i32
    return %c0_i32, %c0_i32_0, %c0_i32_1, %c0_i32_2 : i32, i32, i32, i32
  }
  func.func @transform_8(%arg0: i32) -> (i32, i32, i32, i32) {
    %c0_i32 = arith.constant 0 : i32
    %c0_i32_0 = arith.constant 0 : i32
    %c0_i32_1 = arith.constant 0 : i32
    %c0_i32_2 = arith.constant 0 : i32
    %c0_i32_3 = arith.constant 0 : i32
    return %c0_i32, %c0_i32_0, %c0_i32_1, %c0_i32_2 : i32, i32, i32, i32
  }
  func.func @transform_9(%arg0: i32) -> (i32, i32, i32, i32) {
    %c0_i32 = arith.constant 0 : i32
    %c0_i32_0 = arith.constant 0 : i32
    %c0_i32_1 = arith.constant 0 : i32
    %c0_i32_2 = arith.constant 0 : i32
    %c0_i32_3 = arith.constant 0 : i32
    return %c0_i32, %c0_i32_0, %c0_i32_1, %c0_i32_2 : i32, i32, i32, i32
  }
  func.func @transform_10(%arg0: i32) -> (i32, i32, i32, i32) {
    %c0_i32 = arith.constant 0 : i32
    %c0_i32_0 = arith.constant 0 : i32
    %c0_i32_1 = arith.constant 0 : i32
    %c0_i32_2 = arith.constant 0 : i32
    %c0_i32_3 = arith.constant 0 : i32
    return %c0_i32, %c0_i32_0, %c0_i32_1, %c0_i32_2 : i32, i32, i32, i32
  }
  func.func @transform_11(%arg0: i32) -> (i32, i32, i32, i32) {
    %c0_i32 = arith.constant 0 : i32
    %c0_i32_0 = arith.constant 0 : i32
    %c0_i32_1 = arith.constant 0 : i32
    %c0_i32_2 = arith.constant 0 : i32
    %c0_i32_3 = arith.constant 0 : i32
    return %c0_i32, %c0_i32_0, %c0_i32_1, %c0_i32_2 : i32, i32, i32, i32
  }
  func.func @transform_12(%arg0: i32) -> (i32, i32, i32, i32) {
    %c0_i32 = arith.constant 0 : i32
    %c0_i32_0 = arith.constant 0 : i32
    %c0_i32_1 = arith.constant 0 : i32
    %c0_i32_2 = arith.constant 0 : i32
    %c0_i32_3 = arith.constant 0 : i32
    return %c0_i32, %c0_i32_0, %c0_i32_1, %c0_i32_2 : i32, i32, i32, i32
  }
  func.func @transform_13(%arg0: i32) -> (i32, i32, i32) {
    %c0_i32 = arith.constant 0 : i32
    %c0_i32_0 = arith.constant 0 : i32
    %c0_i32_1 = arith.constant 0 : i32
    %c0_i32_2 = arith.constant 0 : i32
    return %c0_i32, %c0_i32_0, %c0_i32_1 : i32, i32, i32
  }
  func.func @transform_14(%arg0: i32) -> (i32, i32) {
    %c0_i32 = arith.constant 0 : i32
    %c0_i32_0 = arith.constant 0 : i32
    %c0_i32_1 = arith.constant 0 : i32
    return %c0_i32, %c0_i32_0 : i32, i32
  }
  func.func @transform_15(%arg0: i32) -> (i32, i32) {
    %c0_i32 = arith.constant 0 : i32
    %c0_i32_0 = arith.constant 0 : i32
    %c0_i32_1 = arith.constant 0 : i32
    return %c0_i32, %c0_i32_0 : i32, i32
  }
  func.func @transform_16(%arg0: i32) -> (i32, i32) {
    %c0_i32 = arith.constant 0 : i32
    %c0_i32_0 = arith.constant 0 : i32
    %c0_i32_1 = arith.constant 0 : i32
    return %c0_i32, %c0_i32_0 : i32, i32
  }
  func.func @transform_17(%arg0: i32) -> (i32, i32, i32) {
    %c0_i32 = arith.constant 0 : i32
    %c0_i32_0 = arith.constant 0 : i32
    %c0_i32_1 = arith.constant 0 : i32
    return %arg0, %c0_i32, %c0_i32_0 : i32, i32, i32
  }
  func.func @transform_18(%arg0: i32) -> (i32, i32, i32) {
    %c0_i32 = arith.constant 0 : i32
    %c0_i32_0 = arith.constant 0 : i32
    %c0_i32_1 = arith.constant 0 : i32
    return %arg0, %c0_i32, %c0_i32_0 : i32, i32, i32
  }
}

module attributes {stable_mosaic.version = 11 : i64} {
  func.func @_mm_decoder_kernel(%arg0: i32, %arg1: i32, %arg2: memref<1x15x64xf32, #tpu.memory_space<vmem>>, %arg3: memref<1x8x64xf32, #tpu.memory_space<vmem>>, %arg4: memref<1x1x64xf32, #tpu.memory_space<vmem>>, %arg5: memref<1x1x64xf32, #tpu.memory_space<vmem>>, %arg6: memref<1x2x64x32xbf16, #tpu.memory_space<vmem>>, %arg7: memref<1x2x1x32xf32, #tpu.memory_space<vmem>>, %arg8: memref<1x2x64x32xbf16, #tpu.memory_space<vmem>>, %arg9: memref<1x2x1x32xf32, #tpu.memory_space<vmem>>, %arg10: memref<1x2x64x32xbf16, #tpu.memory_space<vmem>>, %arg11: memref<1x2x1x32xf32, #tpu.memory_space<vmem>>, %arg12: memref<1x2x32x64xbf16, #tpu.memory_space<vmem>>, %arg13: memref<1x1x64xf32, #tpu.memory_space<vmem>>, %arg14: memref<1x1x64xf32, #tpu.memory_space<vmem>>, %arg15: memref<1x1x64xf32, #tpu.memory_space<vmem>>, %arg16: memref<1x64x256xbf16, #tpu.memory_space<vmem>>, %arg17: memref<1x1x256xf32, #tpu.memory_space<vmem>>, %arg18: memref<1x256x64xbf16, #tpu.memory_space<vmem>>, %arg19: memref<1x1x64xf32, #tpu.memory_space<vmem>>, %arg20: memref<1x1x64xf32, #tpu.memory_space<vmem>>, %arg21: memref<1x1x64xf32, #tpu.memory_space<vmem>>, %arg22: memref<1x1x64xf32, #tpu.memory_space<vmem>>, %arg23: memref<1x1x64xf32, #tpu.memory_space<vmem>>, %arg24: memref<1x2x64x32xbf16, #tpu.memory_space<vmem>>, %arg25: memref<1x2x1x32xf32, #tpu.memory_space<vmem>>, %arg26: memref<1x2x64x32xbf16, #tpu.memory_space<vmem>>, %arg27: memref<1x2x1x32xf32, #tpu.memory_space<vmem>>, %arg28: memref<1x2x64x32xbf16, #tpu.memory_space<vmem>>, %arg29: memref<1x2x1x32xf32, #tpu.memory_space<vmem>>, %arg30: memref<1x2x32x64xbf16, #tpu.memory_space<vmem>>, %arg31: memref<1x1x64xf32, #tpu.memory_space<vmem>>, %arg32: memref<1x1x64xf32, #tpu.memory_space<vmem>>, %arg33: memref<1x1x64xf32, #tpu.memory_space<vmem>>, %arg34: memref<1x64x256xbf16, #tpu.memory_space<vmem>>, %arg35: memref<1x1x256xf32, #tpu.memory_space<vmem>>, %arg36: memref<1x256x64xbf16, #tpu.memory_space<vmem>>, %arg37: memref<1x1x64xf32, #tpu.memory_space<vmem>>, %arg38: memref<1x64xf32, #tpu.memory_space<vmem>>, %arg39: memref<1x64xf32, #tpu.memory_space<vmem>>, %arg40: memref<64x128xbf16, #tpu.memory_space<vmem>>, %arg41: memref<1x15x128xf32, #tpu.memory_space<vmem>>, %arg42: memref<15x64xf32, #tpu.memory_space<vmem>>) attributes {dimension_semantics = [#tpu.dimension_semantics<parallel>, #tpu.dimension_semantics<arbitrary>], iteration_bounds = array<i64: 2, 2>, scalar_prefetch = 0 : i64, scratch_operands = 1 : i64, tpu.core_type = #tpu.core_type<tc>, window_params = [{transform_indices = @transform_0, window_bounds = array<i64: 1, 15, 64>}, {transform_indices = @transform_1, window_bounds = array<i64: 1, 8, 64>}, {transform_indices = @transform_2, window_bounds = array<i64: 1, 1, 64>}, {transform_indices = @transform_3, window_bounds = array<i64: 1, 1, 64>}, {transform_indices = @transform_4, window_bounds = array<i64: 1, 2, 64, 32>}, {transform_indices = @transform_5, window_bounds = array<i64: 1, 2, 1, 32>}, {transform_indices = @transform_6, window_bounds = array<i64: 1, 2, 64, 32>}, {transform_indices = @transform_7, window_bounds = array<i64: 1, 2, 1, 32>}, {transform_indices = @transform_8, window_bounds = array<i64: 1, 2, 64, 32>}, {transform_indices = @transform_9, window_bounds = array<i64: 1, 2, 1, 32>}, {transform_indices = @transform_10, window_bounds = array<i64: 1, 2, 32, 64>}, {transform_indices = @transform_11, window_bounds = array<i64: 1, 1, 64>}, {transform_indices = @transform_12, window_bounds = array<i64: 1, 1, 64>}, {transform_indices = @transform_13, window_bounds = array<i64: 1, 1, 64>}, {transform_indices = @transform_14, window_bounds = array<i64: 1, 64, 256>}, {transform_indices = @transform_15, window_bounds = array<i64: 1, 1, 256>}, {transform_indices = @transform_16, window_bounds = array<i64: 1, 256, 64>}, {transform_indices = @transform_17, window_bounds = array<i64: 1, 1, 64>}, {transform_indices = @transform_18, window_bounds = array<i64: 1, 1, 64>}, {transform_indices = @transform_19, window_bounds = array<i64: 1, 1, 64>}, {transform_indices = @transform_20, window_bounds = array<i64: 1, 1, 64>}, {transform_indices = @transform_21, window_bounds = array<i64: 1, 1, 64>}, {transform_indices = @transform_22, window_bounds = array<i64: 1, 2, 64, 32>}, {transform_indices = @transform_23, window_bounds = array<i64: 1, 2, 1, 32>}, {transform_indices = @transform_24, window_bounds = array<i64: 1, 2, 64, 32>}, {transform_indices = @transform_25, window_bounds = array<i64: 1, 2, 1, 32>}, {transform_indices = @transform_26, window_bounds = array<i64: 1, 2, 64, 32>}, {transform_indices = @transform_27, window_bounds = array<i64: 1, 2, 1, 32>}, {transform_indices = @transform_28, window_bounds = array<i64: 1, 2, 32, 64>}, {transform_indices = @transform_29, window_bounds = array<i64: 1, 1, 64>}, {transform_indices = @transform_30, window_bounds = array<i64: 1, 1, 64>}, {transform_indices = @transform_31, window_bounds = array<i64: 1, 1, 64>}, {transform_indices = @transform_32, window_bounds = array<i64: 1, 64, 256>}, {transform_indices = @transform_33, window_bounds = array<i64: 1, 1, 256>}, {transform_indices = @transform_34, window_bounds = array<i64: 1, 256, 64>}, {transform_indices = @transform_35, window_bounds = array<i64: 1, 1, 64>}, {pipeline_mode = #tpu.pipeline_mode<synchronous>, transform_indices = @transform_36, window_bounds = array<i64: 1, 64>}, {pipeline_mode = #tpu.pipeline_mode<synchronous>, transform_indices = @transform_37, window_bounds = array<i64: 1, 64>}, {pipeline_mode = #tpu.pipeline_mode<synchronous>, transform_indices = @transform_38, window_bounds = array<i64: 64, 128>}, {transform_indices = @transform_39, window_bounds = array<i64: 1, 15, 128>}]} {
    %c0_i32 = arith.constant 0 : i32
    %0 = arith.cmpi eq, %arg1, %c0_i32 : i32
    %1 = arith.extui %0 : i1 to i32
    %c0_i32_0 = arith.constant 0 : i32
    %2 = arith.cmpi ne, %1, %c0_i32_0 : i32
    scf.if %2 {
      %c0_253 = arith.constant 0 : index
      %c0_254 = arith.constant 0 : index
      %c0_255 = arith.constant 0 : index
      %394 = vector.load %arg2[%c0_253, %c0_254, %c0_255] : memref<1x15x64xf32, #tpu.memory_space<vmem>>, vector<1x15x64xf32>
      %395 = vector.shape_cast %394 : vector<1x15x64xf32> to vector<15x64xf32>
      %c0_256 = arith.constant 0 : index
      %c0_257 = arith.constant 0 : index
      %396 = vector.load %arg42[%c0_256, %c0_257] : memref<15x64xf32, #tpu.memory_space<vmem>>, vector<15x64xf32>
      tpu.vector_store %arg42[%c0_256, %c0_257], %395 {strides = array<i32>} : memref<15x64xf32, #tpu.memory_space<vmem>>, vector<15x64xf32>,
    } else {
    }
    %c0 = arith.constant 0 : index
    %c0_1 = arith.constant 0 : index
    %3 = vector.load %arg42[%c0, %c0_1] : memref<15x64xf32, #tpu.memory_space<vmem>>, vector<15x64xf32>
    %4 = tpu.iota {dimensions = array<i32: 0>} : vector<15x15xi32>
    %5 = tpu.iota {dimensions = array<i32: 1>} : vector<15x15xi32>
    %6 = arith.cmpi sle, %5, %4 : vector<15x15xi32>
    %cst = arith.constant 0.000000e+00 : f32
    %cst_2 = arith.constant -1.000000e+09 : f32
    %7 = vector.broadcast %cst : f32 to vector<15x15xf32>
    %8 = vector.broadcast %cst_2 : f32 to vector<15x15xf32>
    %9 = arith.select %6, %7, %8 : vector<15x15xi1>, vector<15x15xf32>
    %c0_3 = arith.constant 0 : index
    %c0_4 = arith.constant 0 : index
    %c0_5 = arith.constant 0 : index
    %10 = vector.load %arg4[%c0_3, %c0_4, %c0_5] : memref<1x1x64xf32, #tpu.memory_space<vmem>>, vector<1x1x64xf32>
    %11 = vector.shape_cast %10 : vector<1x1x64xf32> to vector<1x64xf32>
    %c0_6 = arith.constant 0 : index
    %c0_7 = arith.constant 0 : index
    %c0_8 = arith.constant 0 : index
    %12 = vector.load %arg5[%c0_6, %c0_7, %c0_8] : memref<1x1x64xf32, #tpu.memory_space<vmem>>, vector<1x1x64xf32>
    %13 = vector.shape_cast %12 : vector<1x1x64xf32> to vector<1x64xf32>
    %cst_9 = arith.constant dense<0.000000e+00> : vector<15xf32>
    %14 = vector.multi_reduction <add>, %3, %cst_9 [1] : vector<15x64xf32> to vector<15xf32>
    %15 = vector.shape_cast %14 : vector<15xf32> to vector<15x1xf32>
    %cst_10 = arith.constant 6.400000e+01 : f32
    %16 = vector.broadcast %cst_10 : f32 to vector<15x1xf32>
    %17 = arith.divf %15, %16 : vector<15x1xf32>
    %18 = vector.broadcast %17 : vector<15x1xf32> to vector<15x64xf32>
    %19 = arith.subf %3, %18 : vector<15x64xf32>
    %20 = arith.mulf %19, %19 : vector<15x64xf32>
    %cst_11 = arith.constant dense<0.000000e+00> : vector<15xf32>
    %21 = vector.multi_reduction <add>, %20, %cst_11 [1] : vector<15x64xf32> to vector<15xf32>
    %22 = vector.shape_cast %21 : vector<15xf32> to vector<15x1xf32>
    %cst_12 = arith.constant 6.400000e+01 : f32
    %23 = vector.broadcast %cst_12 : f32 to vector<15x1xf32>
    %24 = arith.divf %22, %23 : vector<15x1xf32>
    %25 = vector.broadcast %17 : vector<15x1xf32> to vector<15x64xf32>
    %26 = arith.subf %3, %25 : vector<15x64xf32>
    %cst_13 = arith.constant 9.99999974E-6 : f32
    %27 = vector.broadcast %cst_13 : f32 to vector<15x1xf32>
    %28 = arith.addf %24, %27 : vector<15x1xf32>
    %29 = math.rsqrt %28 : vector<15x1xf32>
    %30 = vector.broadcast %29 : vector<15x1xf32> to vector<15x64xf32>
    %31 = arith.mulf %26, %30 : vector<15x64xf32>
    %32 = vector.broadcast %11 : vector<1x64xf32> to vector<15x64xf32>
    %33 = arith.mulf %31, %32 : vector<15x64xf32>
    %34 = vector.broadcast %13 : vector<1x64xf32> to vector<15x64xf32>
    %35 = arith.addf %33, %34 : vector<15x64xf32>
    %cst_14 = arith.constant 0.000000e+00 : f32
    %36 = vector.broadcast %cst_14 : f32 to vector<15x64xf32>
    %c0_15 = arith.constant 0 : index
    %c0_16 = arith.constant 0 : index
    %c0_17 = arith.constant 0 : index
    %c0_18 = arith.constant 0 : index
    %37 = vector.load %arg6[%c0_15, %c0_16, %c0_17, %c0_18] : memref<1x2x64x32xbf16, #tpu.memory_space<vmem>>, vector<1x1x64x32xbf16>
    %38 = vector.shape_cast %37 : vector<1x1x64x32xbf16> to vector<64x32xbf16>
    %39 = arith.truncf %35 : vector<15x64xf32> to vector<15x64xbf16>
    %cst_19 = arith.constant dense<0.000000e+00> : vector<15x32xf32>
    %40 = tpu.matmul %39, %38, %cst_19 {dimension_numbers = #tpu.dot_dimension_numbers<[1], [0], [0], [1], [0, 0, 1, 1], [], []>} : vector<15x64xbf16>, vector<64x32xbf16>, vector<15x32xf32> -> vector<15x32xf32>
    %c0_20 = arith.constant 0 : index
    %c0_21 = arith.constant 0 : index
    %c0_22 = arith.constant 0 : index
    %c0_23 = arith.constant 0 : index
    %41 = vector.load %arg7[%c0_20, %c0_21, %c0_22, %c0_23] : memref<1x2x1x32xf32, #tpu.memory_space<vmem>>, vector<1x1x1x32xf32>
    %42 = vector.shape_cast %41 : vector<1x1x1x32xf32> to vector<1x32xf32>
    %43 = vector.broadcast %42 : vector<1x32xf32> to vector<15x32xf32>
    %44 = arith.addf %40, %43 : vector<15x32xf32>
    %c0_24 = arith.constant 0 : index
    %c0_25 = arith.constant 0 : index
    %c0_26 = arith.constant 0 : index
    %c0_27 = arith.constant 0 : index
    %45 = vector.load %arg8[%c0_24, %c0_25, %c0_26, %c0_27] : memref<1x2x64x32xbf16, #tpu.memory_space<vmem>>, vector<1x1x64x32xbf16>
    %46 = vector.shape_cast %45 : vector<1x1x64x32xbf16> to vector<64x32xbf16>
    %47 = arith.truncf %35 : vector<15x64xf32> to vector<15x64xbf16>
    %cst_28 = arith.constant dense<0.000000e+00> : vector<15x32xf32>
    %48 = tpu.matmul %47, %46, %cst_28 {dimension_numbers = #tpu.dot_dimension_numbers<[1], [0], [0], [1], [0, 0, 1, 1], [], []>} : vector<15x64xbf16>, vector<64x32xbf16>, vector<15x32xf32> -> vector<15x32xf32>
    %c0_29 = arith.constant 0 : index
    %c0_30 = arith.constant 0 : index
    %c0_31 = arith.constant 0 : index
    %c0_32 = arith.constant 0 : index
    %49 = vector.load %arg9[%c0_29, %c0_30, %c0_31, %c0_32] : memref<1x2x1x32xf32, #tpu.memory_space<vmem>>, vector<1x1x1x32xf32>
    %50 = vector.shape_cast %49 : vector<1x1x1x32xf32> to vector<1x32xf32>
    %51 = vector.broadcast %50 : vector<1x32xf32> to vector<15x32xf32>
    %52 = arith.addf %48, %51 : vector<15x32xf32>
    %c0_33 = arith.constant 0 : index
    %c0_34 = arith.constant 0 : index
    %c0_35 = arith.constant 0 : index
    %c0_36 = arith.constant 0 : index
    %53 = vector.load %arg10[%c0_33, %c0_34, %c0_35, %c0_36] : memref<1x2x64x32xbf16, #tpu.memory_space<vmem>>, vector<1x1x64x32xbf16>
    %54 = vector.shape_cast %53 : vector<1x1x64x32xbf16> to vector<64x32xbf16>
    %55 = arith.truncf %35 : vector<15x64xf32> to vector<15x64xbf16>
    %cst_37 = arith.constant dense<0.000000e+00> : vector<15x32xf32>
    %56 = tpu.matmul %55, %54, %cst_37 {dimension_numbers = #tpu.dot_dimension_numbers<[1], [0], [0], [1], [0, 0, 1, 1], [], []>} : vector<15x64xbf16>, vector<64x32xbf16>, vector<15x32xf32> -> vector<15x32xf32>
    %c0_38 = arith.constant 0 : index
    %c0_39 = arith.constant 0 : index
    %c0_40 = arith.constant 0 : index
    %c0_41 = arith.constant 0 : index
    %57 = vector.load %arg11[%c0_38, %c0_39, %c0_40, %c0_41] : memref<1x2x1x32xf32, #tpu.memory_space<vmem>>, vector<1x1x1x32xf32>
    %58 = vector.shape_cast %57 : vector<1x1x1x32xf32> to vector<1x32xf32>
    %59 = vector.broadcast %58 : vector<1x32xf32> to vector<15x32xf32>
    %60 = arith.addf %56, %59 : vector<15x32xf32>
    %61 = arith.truncf %44 : vector<15x32xf32> to vector<15x32xbf16>
    %62 = arith.truncf %52 : vector<15x32xf32> to vector<15x32xbf16>
    %cst_42 = arith.constant dense<0.000000e+00> : vector<15x15xf32>
    %63 = tpu.matmul %61, %62, %cst_42 {dimension_numbers = #tpu.dot_dimension_numbers<[1], [1], [0], [0], [0, 0, 1, 0], [], []>} : vector<15x32xbf16>, vector<15x32xbf16>, vector<15x15xf32> -> vector<15x15xf32>
    %cst_43 = arith.constant 0.176776692 : f32
    %64 = vector.broadcast %cst_43 : f32 to vector<15x15xf32>
    %65 = arith.mulf %63, %64 : vector<15x15xf32>
    %66 = arith.addf %65, %9 : vector<15x15xf32>
    %cst_44 = arith.constant dense<0xFF800000> : vector<15xf32>
    %67 = vector.multi_reduction <maximumf>, %66, %cst_44 [1] : vector<15x15xf32> to vector<15xf32>
    %68 = vector.shape_cast %67 : vector<15xf32> to vector<15x1xf32>
    %69 = vector.broadcast %68 : vector<15x1xf32> to vector<15x15xf32>
    %70 = arith.subf %66, %69 : vector<15x15xf32>
    %71 = math.exp %70 : vector<15x15xf32>
    %cst_45 = arith.constant dense<0.000000e+00> : vector<15xf32>
    %72 = vector.multi_reduction <add>, %71, %cst_45 [1] : vector<15x15xf32> to vector<15xf32>
    %73 = vector.shape_cast %72 : vector<15xf32> to vector<15x1xf32>
    %74 = vector.broadcast %73 : vector<15x1xf32> to vector<15x15xf32>
    %75 = arith.divf %71, %74 : vector<15x15xf32>
    %76 = arith.truncf %75 : vector<15x15xf32> to vector<15x15xbf16>
    %77 = arith.truncf %60 : vector<15x32xf32> to vector<15x32xbf16>
    %cst_46 = arith.constant dense<0.000000e+00> : vector<15x32xf32>
    %78 = tpu.matmul %76, %77, %cst_46 {dimension_numbers = #tpu.dot_dimension_numbers<[1], [0], [0], [1], [0, 0, 1, 1], [], []>} : vector<15x15xbf16>, vector<15x32xbf16>, vector<15x32xf32> -> vector<15x32xf32>
    %c0_47 = arith.constant 0 : index
    %c0_48 = arith.constant 0 : index
    %c0_49 = arith.constant 0 : index
    %c0_50 = arith.constant 0 : index
    %79 = vector.load %arg12[%c0_47, %c0_48, %c0_49, %c0_50] : memref<1x2x32x64xbf16, #tpu.memory_space<vmem>>, vector<1x1x32x64xbf16>
    %80 = vector.shape_cast %79 : vector<1x1x32x64xbf16> to vector<32x64xbf16>
    %81 = arith.truncf %78 : vector<15x32xf32> to vector<15x32xbf16>
    %cst_51 = arith.constant dense<0.000000e+00> : vector<15x64xf32>
    %82 = tpu.matmul %81, %80, %cst_51 {dimension_numbers = #tpu.dot_dimension_numbers<[1], [0], [0], [1], [0, 0, 1, 1], [], []>} : vector<15x32xbf16>, vector<32x64xbf16>, vector<15x64xf32> -> vector<15x64xf32>
    %83 = arith.addf %36, %82 : vector<15x64xf32>
    %c0_52 = arith.constant 0 : index
    %c1 = arith.constant 1 : index
    %c0_53 = arith.constant 0 : index
    %c0_54 = arith.constant 0 : index
    %84 = vector.load %arg6[%c0_52, %c1, %c0_53, %c0_54] : memref<1x2x64x32xbf16, #tpu.memory_space<vmem>>, vector<1x1x64x32xbf16>
    %85 = vector.shape_cast %84 : vector<1x1x64x32xbf16> to vector<64x32xbf16>
    %86 = arith.truncf %35 : vector<15x64xf32> to vector<15x64xbf16>
    %cst_55 = arith.constant dense<0.000000e+00> : vector<15x32xf32>
    %87 = tpu.matmul %86, %85, %cst_55 {dimension_numbers = #tpu.dot_dimension_numbers<[1], [0], [0], [1], [0, 0, 1, 1], [], []>} : vector<15x64xbf16>, vector<64x32xbf16>, vector<15x32xf32> -> vector<15x32xf32>
    %c0_56 = arith.constant 0 : index
    %c1_57 = arith.constant 1 : index
    %c0_58 = arith.constant 0 : index
    %c0_59 = arith.constant 0 : index
    %88 = vector.load %arg7[%c0_56, %c1_57, %c0_58, %c0_59] : memref<1x2x1x32xf32, #tpu.memory_space<vmem>>, vector<1x1x1x32xf32>
    %89 = vector.shape_cast %88 : vector<1x1x1x32xf32> to vector<1x32xf32>
    %90 = vector.broadcast %89 : vector<1x32xf32> to vector<15x32xf32>
    %91 = arith.addf %87, %90 : vector<15x32xf32>
    %c0_60 = arith.constant 0 : index
    %c1_61 = arith.constant 1 : index
    %c0_62 = arith.constant 0 : index
    %c0_63 = arith.constant 0 : index
    %92 = vector.load %arg8[%c0_60, %c1_61, %c0_62, %c0_63] : memref<1x2x64x32xbf16, #tpu.memory_space<vmem>>, vector<1x1x64x32xbf16>
    %93 = vector.shape_cast %92 : vector<1x1x64x32xbf16> to vector<64x32xbf16>
    %94 = arith.truncf %35 : vector<15x64xf32> to vector<15x64xbf16>
    %cst_64 = arith.constant dense<0.000000e+00> : vector<15x32xf32>
    %95 = tpu.matmul %94, %93, %cst_64 {dimension_numbers = #tpu.dot_dimension_numbers<[1], [0], [0], [1], [0, 0, 1, 1], [], []>} : vector<15x64xbf16>, vector<64x32xbf16>, vector<15x32xf32> -> vector<15x32xf32>
    %c0_65 = arith.constant 0 : index
    %c1_66 = arith.constant 1 : index
    %c0_67 = arith.constant 0 : index
    %c0_68 = arith.constant 0 : index
    %96 = vector.load %arg9[%c0_65, %c1_66, %c0_67, %c0_68] : memref<1x2x1x32xf32, #tpu.memory_space<vmem>>, vector<1x1x1x32xf32>
    %97 = vector.shape_cast %96 : vector<1x1x1x32xf32> to vector<1x32xf32>
    %98 = vector.broadcast %97 : vector<1x32xf32> to vector<15x32xf32>
    %99 = arith.addf %95, %98 : vector<15x32xf32>
    %c0_69 = arith.constant 0 : index
    %c1_70 = arith.constant 1 : index
    %c0_71 = arith.constant 0 : index
    %c0_72 = arith.constant 0 : index
    %100 = vector.load %arg10[%c0_69, %c1_70, %c0_71, %c0_72] : memref<1x2x64x32xbf16, #tpu.memory_space<vmem>>, vector<1x1x64x32xbf16>
    %101 = vector.shape_cast %100 : vector<1x1x64x32xbf16> to vector<64x32xbf16>
    %102 = arith.truncf %35 : vector<15x64xf32> to vector<15x64xbf16>
    %cst_73 = arith.constant dense<0.000000e+00> : vector<15x32xf32>
    %103 = tpu.matmul %102, %101, %cst_73 {dimension_numbers = #tpu.dot_dimension_numbers<[1], [0], [0], [1], [0, 0, 1, 1], [], []>} : vector<15x64xbf16>, vector<64x32xbf16>, vector<15x32xf32> -> vector<15x32xf32>
    %c0_74 = arith.constant 0 : index
    %c1_75 = arith.constant 1 : index
    %c0_76 = arith.constant 0 : index
    %c0_77 = arith.constant 0 : index
    %104 = vector.load %arg11[%c0_74, %c1_75, %c0_76, %c0_77] : memref<1x2x1x32xf32, #tpu.memory_space<vmem>>, vector<1x1x1x32xf32>
    %105 = vector.shape_cast %104 : vector<1x1x1x32xf32> to vector<1x32xf32>
    %106 = vector.broadcast %105 : vector<1x32xf32> to vector<15x32xf32>
    %107 = arith.addf %103, %106 : vector<15x32xf32>
    %108 = arith.truncf %91 : vector<15x32xf32> to vector<15x32xbf16>
    %109 = arith.truncf %99 : vector<15x32xf32> to vector<15x32xbf16>
    %cst_78 = arith.constant dense<0.000000e+00> : vector<15x15xf32>
    %110 = tpu.matmul %108, %109, %cst_78 {dimension_numbers = #tpu.dot_dimension_numbers<[1], [1], [0], [0], [0, 0, 1, 0], [], []>} : vector<15x32xbf16>, vector<15x32xbf16>, vector<15x15xf32> -> vector<15x15xf32>
    %cst_79 = arith.constant 0.176776692 : f32
    %111 = vector.broadcast %cst_79 : f32 to vector<15x15xf32>
    %112 = arith.mulf %110, %111 : vector<15x15xf32>
    %113 = arith.addf %112, %9 : vector<15x15xf32>
    %cst_80 = arith.constant dense<0xFF800000> : vector<15xf32>
    %114 = vector.multi_reduction <maximumf>, %113, %cst_80 [1] : vector<15x15xf32> to vector<15xf32>
    %115 = vector.shape_cast %114 : vector<15xf32> to vector<15x1xf32>
    %116 = vector.broadcast %115 : vector<15x1xf32> to vector<15x15xf32>
    %117 = arith.subf %113, %116 : vector<15x15xf32>
    %118 = math.exp %117 : vector<15x15xf32>
    %cst_81 = arith.constant dense<0.000000e+00> : vector<15xf32>
    %119 = vector.multi_reduction <add>, %118, %cst_81 [1] : vector<15x15xf32> to vector<15xf32>
    %120 = vector.shape_cast %119 : vector<15xf32> to vector<15x1xf32>
    %121 = vector.broadcast %120 : vector<15x1xf32> to vector<15x15xf32>
    %122 = arith.divf %118, %121 : vector<15x15xf32>
    %123 = arith.truncf %122 : vector<15x15xf32> to vector<15x15xbf16>
    %124 = arith.truncf %107 : vector<15x32xf32> to vector<15x32xbf16>
    %cst_82 = arith.constant dense<0.000000e+00> : vector<15x32xf32>
    %125 = tpu.matmul %123, %124, %cst_82 {dimension_numbers = #tpu.dot_dimension_numbers<[1], [0], [0], [1], [0, 0, 1, 1], [], []>} : vector<15x15xbf16>, vector<15x32xbf16>, vector<15x32xf32> -> vector<15x32xf32>
    %c0_83 = arith.constant 0 : index
    %c1_84 = arith.constant 1 : index
    %c0_85 = arith.constant 0 : index
    %c0_86 = arith.constant 0 : index
    %126 = vector.load %arg12[%c0_83, %c1_84, %c0_85, %c0_86] : memref<1x2x32x64xbf16, #tpu.memory_space<vmem>>, vector<1x1x32x64xbf16>
    %127 = vector.shape_cast %126 : vector<1x1x32x64xbf16> to vector<32x64xbf16>
    %128 = arith.truncf %125 : vector<15x32xf32> to vector<15x32xbf16>
    %cst_87 = arith.constant dense<0.000000e+00> : vector<15x64xf32>
    %129 = tpu.matmul %128, %127, %cst_87 {dimension_numbers = #tpu.dot_dimension_numbers<[1], [0], [0], [1], [0, 0, 1, 1], [], []>} : vector<15x32xbf16>, vector<32x64xbf16>, vector<15x64xf32> -> vector<15x64xf32>
    %130 = arith.addf %83, %129 : vector<15x64xf32>
    %c0_88 = arith.constant 0 : index
    %c0_89 = arith.constant 0 : index
    %c0_90 = arith.constant 0 : index
    %131 = vector.load %arg13[%c0_88, %c0_89, %c0_90] : memref<1x1x64xf32, #tpu.memory_space<vmem>>, vector<1x1x64xf32>
    %132 = vector.shape_cast %131 : vector<1x1x64xf32> to vector<1x64xf32>
    %133 = vector.broadcast %132 : vector<1x64xf32> to vector<15x64xf32>
    %134 = arith.addf %130, %133 : vector<15x64xf32>
    %135 = arith.addf %3, %134 : vector<15x64xf32>
    %c0_91 = arith.constant 0 : index
    %c0_92 = arith.constant 0 : index
    %c0_93 = arith.constant 0 : index
    %136 = vector.load %arg14[%c0_91, %c0_92, %c0_93] : memref<1x1x64xf32, #tpu.memory_space<vmem>>, vector<1x1x64xf32>
    %137 = vector.shape_cast %136 : vector<1x1x64xf32> to vector<1x64xf32>
    %c0_94 = arith.constant 0 : index
    %c0_95 = arith.constant 0 : index
    %c0_96 = arith.constant 0 : index
    %138 = vector.load %arg15[%c0_94, %c0_95, %c0_96] : memref<1x1x64xf32, #tpu.memory_space<vmem>>, vector<1x1x64xf32>
    %139 = vector.shape_cast %138 : vector<1x1x64xf32> to vector<1x64xf32>
    %cst_97 = arith.constant dense<0.000000e+00> : vector<15xf32>
    %140 = vector.multi_reduction <add>, %135, %cst_97 [1] : vector<15x64xf32> to vector<15xf32>
    %141 = vector.shape_cast %140 : vector<15xf32> to vector<15x1xf32>
    %cst_98 = arith.constant 6.400000e+01 : f32
    %142 = vector.broadcast %cst_98 : f32 to vector<15x1xf32>
    %143 = arith.divf %141, %142 : vector<15x1xf32>
    %144 = vector.broadcast %143 : vector<15x1xf32> to vector<15x64xf32>
    %145 = arith.subf %135, %144 : vector<15x64xf32>
    %146 = arith.mulf %145, %145 : vector<15x64xf32>
    %cst_99 = arith.constant dense<0.000000e+00> : vector<15xf32>
    %147 = vector.multi_reduction <add>, %146, %cst_99 [1] : vector<15x64xf32> to vector<15xf32>
    %148 = vector.shape_cast %147 : vector<15xf32> to vector<15x1xf32>
    %cst_100 = arith.constant 6.400000e+01 : f32
    %149 = vector.broadcast %cst_100 : f32 to vector<15x1xf32>
    %150 = arith.divf %148, %149 : vector<15x1xf32>
    %151 = vector.broadcast %143 : vector<15x1xf32> to vector<15x64xf32>
    %152 = arith.subf %135, %151 : vector<15x64xf32>
    %cst_101 = arith.constant 9.99999974E-6 : f32
    %153 = vector.broadcast %cst_101 : f32 to vector<15x1xf32>
    %154 = arith.addf %150, %153 : vector<15x1xf32>
    %155 = math.rsqrt %154 : vector<15x1xf32>
    %156 = vector.broadcast %155 : vector<15x1xf32> to vector<15x64xf32>
    %157 = arith.mulf %152, %156 : vector<15x64xf32>
    %158 = vector.broadcast %137 : vector<1x64xf32> to vector<15x64xf32>
    %159 = arith.mulf %157, %158 : vector<15x64xf32>
    %160 = vector.broadcast %139 : vector<1x64xf32> to vector<15x64xf32>
    %161 = arith.addf %159, %160 : vector<15x64xf32>
    %c0_102 = arith.constant 0 : index
    %c0_103 = arith.constant 0 : index
    %c0_104 = arith.constant 0 : index
    %162 = vector.load %arg16[%c0_102, %c0_103, %c0_104] : memref<1x64x256xbf16, #tpu.memory_space<vmem>>, vector<1x64x256xbf16>
    %163 = vector.shape_cast %162 : vector<1x64x256xbf16> to vector<64x256xbf16>
    %164 = arith.truncf %161 : vector<15x64xf32> to vector<15x64xbf16>
    %cst_105 = arith.constant dense<0.000000e+00> : vector<15x256xf32>
    %165 = tpu.matmul %164, %163, %cst_105 {dimension_numbers = #tpu.dot_dimension_numbers<[1], [0], [0], [1], [0, 0, 1, 1], [], []>} : vector<15x64xbf16>, vector<64x256xbf16>, vector<15x256xf32> -> vector<15x256xf32>
    %c0_106 = arith.constant 0 : index
    %c0_107 = arith.constant 0 : index
    %c0_108 = arith.constant 0 : index
    %166 = vector.load %arg17[%c0_106, %c0_107, %c0_108] : memref<1x1x256xf32, #tpu.memory_space<vmem>>, vector<1x1x256xf32>
    %167 = vector.shape_cast %166 : vector<1x1x256xf32> to vector<1x256xf32>
    %168 = vector.broadcast %167 : vector<1x256xf32> to vector<15x256xf32>
    %169 = arith.addf %165, %168 : vector<15x256xf32>
    %cst_109 = arith.constant 5.000000e-01 : f32
    %170 = vector.broadcast %cst_109 : f32 to vector<15x256xf32>
    %171 = arith.mulf %170, %169 : vector<15x256xf32>
    %cst_110 = arith.constant 0.707106769 : f32
    %172 = vector.broadcast %cst_110 : f32 to vector<15x256xf32>
    %173 = arith.mulf %169, %172 : vector<15x256xf32>
    %174 = math.erf %173 : vector<15x256xf32>
    %cst_111 = arith.constant 1.000000e+00 : f32
    %175 = vector.broadcast %cst_111 : f32 to vector<15x256xf32>
    %176 = arith.addf %175, %174 : vector<15x256xf32>
    %177 = arith.mulf %171, %176 : vector<15x256xf32>
    %c0_112 = arith.constant 0 : index
    %c0_113 = arith.constant 0 : index
    %c0_114 = arith.constant 0 : index
    %178 = vector.load %arg18[%c0_112, %c0_113, %c0_114] : memref<1x256x64xbf16, #tpu.memory_space<vmem>>, vector<1x256x64xbf16>
    %179 = vector.shape_cast %178 : vector<1x256x64xbf16> to vector<256x64xbf16>
    %180 = arith.truncf %177 : vector<15x256xf32> to vector<15x256xbf16>
    %cst_115 = arith.constant dense<0.000000e+00> : vector<15x64xf32>
    %181 = tpu.matmul %180, %179, %cst_115 {dimension_numbers = #tpu.dot_dimension_numbers<[1], [0], [0], [1], [0, 0, 1, 1], [], []>} : vector<15x256xbf16>, vector<256x64xbf16>, vector<15x64xf32> -> vector<15x64xf32>
    %182 = arith.addf %135, %181 : vector<15x64xf32>
    %c0_116 = arith.constant 0 : index
    %c0_117 = arith.constant 0 : index
    %c0_118 = arith.constant 0 : index
    %183 = vector.load %arg19[%c0_116, %c0_117, %c0_118] : memref<1x1x64xf32, #tpu.memory_space<vmem>>, vector<1x1x64xf32>
    %184 = vector.shape_cast %183 : vector<1x1x64xf32> to vector<1x64xf32>
    %185 = vector.broadcast %184 : vector<1x64xf32> to vector<15x64xf32>
    %186 = arith.addf %182, %185 : vector<15x64xf32>
    %c0_119 = arith.constant 0 : index
    %c0_120 = arith.constant 0 : index
    %c0_121 = arith.constant 0 : index
    %187 = vector.load %arg3[%c0_119, %c0_120, %c0_121] : memref<1x8x64xf32, #tpu.memory_space<vmem>>, vector<1x8x64xf32>
    %188 = vector.shape_cast %187 : vector<1x8x64xf32> to vector<8x64xf32>
    %c0_122 = arith.constant 0 : index
    %c0_123 = arith.constant 0 : index
    %c0_124 = arith.constant 0 : index
    %189 = vector.load %arg20[%c0_122, %c0_123, %c0_124] : memref<1x1x64xf32, #tpu.memory_space<vmem>>, vector<1x1x64xf32>
    %190 = vector.shape_cast %189 : vector<1x1x64xf32> to vector<1x64xf32>
    %c0_125 = arith.constant 0 : index
    %c0_126 = arith.constant 0 : index
    %c0_127 = arith.constant 0 : index
    %191 = vector.load %arg21[%c0_125, %c0_126, %c0_127] : memref<1x1x64xf32, #tpu.memory_space<vmem>>, vector<1x1x64xf32>
    %192 = vector.shape_cast %191 : vector<1x1x64xf32> to vector<1x64xf32>
    %cst_128 = arith.constant dense<0.000000e+00> : vector<15xf32>
    %193 = vector.multi_reduction <add>, %186, %cst_128 [1] : vector<15x64xf32> to vector<15xf32>
    %194 = vector.shape_cast %193 : vector<15xf32> to vector<15x1xf32>
    %cst_129 = arith.constant 6.400000e+01 : f32
    %195 = vector.broadcast %cst_129 : f32 to vector<15x1xf32>
    %196 = arith.divf %194, %195 : vector<15x1xf32>
    %197 = vector.broadcast %196 : vector<15x1xf32> to vector<15x64xf32>
    %198 = arith.subf %186, %197 : vector<15x64xf32>
    %199 = arith.mulf %198, %198 : vector<15x64xf32>
    %cst_130 = arith.constant dense<0.000000e+00> : vector<15xf32>
    %200 = vector.multi_reduction <add>, %199, %cst_130 [1] : vector<15x64xf32> to vector<15xf32>
    %201 = vector.shape_cast %200 : vector<15xf32> to vector<15x1xf32>
    %cst_131 = arith.constant 6.400000e+01 : f32
    %202 = vector.broadcast %cst_131 : f32 to vector<15x1xf32>
    %203 = arith.divf %201, %202 : vector<15x1xf32>
    %204 = vector.broadcast %196 : vector<15x1xf32> to vector<15x64xf32>
    %205 = arith.subf %186, %204 : vector<15x64xf32>
    %cst_132 = arith.constant 9.99999974E-6 : f32
    %206 = vector.broadcast %cst_132 : f32 to vector<15x1xf32>
    %207 = arith.addf %203, %206 : vector<15x1xf32>
    %208 = math.rsqrt %207 : vector<15x1xf32>
    %209 = vector.broadcast %208 : vector<15x1xf32> to vector<15x64xf32>
    %210 = arith.mulf %205, %209 : vector<15x64xf32>
    %211 = vector.broadcast %190 : vector<1x64xf32> to vector<15x64xf32>
    %212 = arith.mulf %210, %211 : vector<15x64xf32>
    %213 = vector.broadcast %192 : vector<1x64xf32> to vector<15x64xf32>
    %214 = arith.addf %212, %213 : vector<15x64xf32>
    %c0_133 = arith.constant 0 : index
    %c0_134 = arith.constant 0 : index
    %c0_135 = arith.constant 0 : index
    %215 = vector.load %arg22[%c0_133, %c0_134, %c0_135] : memref<1x1x64xf32, #tpu.memory_space<vmem>>, vector<1x1x64xf32>
    %216 = vector.shape_cast %215 : vector<1x1x64xf32> to vector<1x64xf32>
    %c0_136 = arith.constant 0 : index
    %c0_137 = arith.constant 0 : index
    %c0_138 = arith.constant 0 : index
    %217 = vector.load %arg23[%c0_136, %c0_137, %c0_138] : memref<1x1x64xf32, #tpu.memory_space<vmem>>, vector<1x1x64xf32>
    %218 = vector.shape_cast %217 : vector<1x1x64xf32> to vector<1x64xf32>
    %cst_139 = arith.constant dense<0.000000e+00> : vector<8xf32>
    %219 = vector.multi_reduction <add>, %188, %cst_139 [1] : vector<8x64xf32> to vector<8xf32>
    %220 = vector.shape_cast %219 : vector<8xf32> to vector<8x1xf32>
    %cst_140 = arith.constant 6.400000e+01 : f32
    %221 = vector.broadcast %cst_140 : f32 to vector<8x1xf32>
    %222 = arith.divf %220, %221 : vector<8x1xf32>
    %223 = vector.broadcast %222 : vector<8x1xf32> to vector<8x64xf32>
    %224 = arith.subf %188, %223 : vector<8x64xf32>
    %225 = arith.mulf %224, %224 : vector<8x64xf32>
    %cst_141 = arith.constant dense<0.000000e+00> : vector<8xf32>
    %226 = vector.multi_reduction <add>, %225, %cst_141 [1] : vector<8x64xf32> to vector<8xf32>
    %227 = vector.shape_cast %226 : vector<8xf32> to vector<8x1xf32>
    %cst_142 = arith.constant 6.400000e+01 : f32
    %228 = vector.broadcast %cst_142 : f32 to vector<8x1xf32>
    %229 = arith.divf %227, %228 : vector<8x1xf32>
    %230 = vector.broadcast %222 : vector<8x1xf32> to vector<8x64xf32>
    %231 = arith.subf %188, %230 : vector<8x64xf32>
    %cst_143 = arith.constant 9.99999974E-6 : f32
    %232 = vector.broadcast %cst_143 : f32 to vector<8x1xf32>
    %233 = arith.addf %229, %232 : vector<8x1xf32>
    %234 = math.rsqrt %233 : vector<8x1xf32>
    %235 = vector.broadcast %234 : vector<8x1xf32> to vector<8x64xf32>
    %236 = arith.mulf %231, %235 : vector<8x64xf32>
    %237 = vector.broadcast %216 : vector<1x64xf32> to vector<8x64xf32>
    %238 = arith.mulf %236, %237 : vector<8x64xf32>
    %239 = vector.broadcast %218 : vector<1x64xf32> to vector<8x64xf32>
    %240 = arith.addf %238, %239 : vector<8x64xf32>
    %cst_144 = arith.constant 0.000000e+00 : f32
    %241 = vector.broadcast %cst_144 : f32 to vector<15x64xf32>
    %c0_145 = arith.constant 0 : index
    %c0_146 = arith.constant 0 : index
    %c0_147 = arith.constant 0 : index
    %c0_148 = arith.constant 0 : index
    %242 = vector.load %arg24[%c0_145, %c0_146, %c0_147, %c0_148] : memref<1x2x64x32xbf16, #tpu.memory_space<vmem>>, vector<1x1x64x32xbf16>
    %243 = vector.shape_cast %242 : vector<1x1x64x32xbf16> to vector<64x32xbf16>
    %244 = arith.truncf %214 : vector<15x64xf32> to vector<15x64xbf16>
    %cst_149 = arith.constant dense<0.000000e+00> : vector<15x32xf32>
    %245 = tpu.matmul %244, %243, %cst_149 {dimension_numbers = #tpu.dot_dimension_numbers<[1], [0], [0], [1], [0, 0, 1, 1], [], []>} : vector<15x64xbf16>, vector<64x32xbf16>, vector<15x32xf32> -> vector<15x32xf32>
    %c0_150 = arith.constant 0 : index
    %c0_151 = arith.constant 0 : index
    %c0_152 = arith.constant 0 : index
    %c0_153 = arith.constant 0 : index
    %246 = vector.load %arg25[%c0_150, %c0_151, %c0_152, %c0_153] : memref<1x2x1x32xf32, #tpu.memory_space<vmem>>, vector<1x1x1x32xf32>
    %247 = vector.shape_cast %246 : vector<1x1x1x32xf32> to vector<1x32xf32>
    %248 = vector.broadcast %247 : vector<1x32xf32> to vector<15x32xf32>
    %249 = arith.addf %245, %248 : vector<15x32xf32>
    %c0_154 = arith.constant 0 : index
    %c0_155 = arith.constant 0 : index
    %c0_156 = arith.constant 0 : index
    %c0_157 = arith.constant 0 : index
    %250 = vector.load %arg26[%c0_154, %c0_155, %c0_156, %c0_157] : memref<1x2x64x32xbf16, #tpu.memory_space<vmem>>, vector<1x1x64x32xbf16>
    %251 = vector.shape_cast %250 : vector<1x1x64x32xbf16> to vector<64x32xbf16>
    %252 = arith.truncf %240 : vector<8x64xf32> to vector<8x64xbf16>
    %cst_158 = arith.constant dense<0.000000e+00> : vector<8x32xf32>
    %253 = tpu.matmul %252, %251, %cst_158 {dimension_numbers = #tpu.dot_dimension_numbers<[1], [0], [0], [1], [0, 0, 1, 1], [], []>} : vector<8x64xbf16>, vector<64x32xbf16>, vector<8x32xf32> -> vector<8x32xf32>
    %c0_159 = arith.constant 0 : index
    %c0_160 = arith.constant 0 : index
    %c0_161 = arith.constant 0 : index
    %c0_162 = arith.constant 0 : index
    %254 = vector.load %arg27[%c0_159, %c0_160, %c0_161, %c0_162] : memref<1x2x1x32xf32, #tpu.memory_space<vmem>>, vector<1x1x1x32xf32>
    %255 = vector.shape_cast %254 : vector<1x1x1x32xf32> to vector<1x32xf32>
    %256 = vector.broadcast %255 : vector<1x32xf32> to vector<8x32xf32>
    %257 = arith.addf %253, %256 : vector<8x32xf32>
    %c0_163 = arith.constant 0 : index
    %c0_164 = arith.constant 0 : index
    %c0_165 = arith.constant 0 : index
    %c0_166 = arith.constant 0 : index
    %258 = vector.load %arg28[%c0_163, %c0_164, %c0_165, %c0_166] : memref<1x2x64x32xbf16, #tpu.memory_space<vmem>>, vector<1x1x64x32xbf16>
    %259 = vector.shape_cast %258 : vector<1x1x64x32xbf16> to vector<64x32xbf16>
    %260 = arith.truncf %240 : vector<8x64xf32> to vector<8x64xbf16>
    %cst_167 = arith.constant dense<0.000000e+00> : vector<8x32xf32>
    %261 = tpu.matmul %260, %259, %cst_167 {dimension_numbers = #tpu.dot_dimension_numbers<[1], [0], [0], [1], [0, 0, 1, 1], [], []>} : vector<8x64xbf16>, vector<64x32xbf16>, vector<8x32xf32> -> vector<8x32xf32>
    %c0_168 = arith.constant 0 : index
    %c0_169 = arith.constant 0 : index
    %c0_170 = arith.constant 0 : index
    %c0_171 = arith.constant 0 : index
    %262 = vector.load %arg29[%c0_168, %c0_169, %c0_170, %c0_171] : memref<1x2x1x32xf32, #tpu.memory_space<vmem>>, vector<1x1x1x32xf32>
    %263 = vector.shape_cast %262 : vector<1x1x1x32xf32> to vector<1x32xf32>
    %264 = vector.broadcast %263 : vector<1x32xf32> to vector<8x32xf32>
    %265 = arith.addf %261, %264 : vector<8x32xf32>
    %266 = arith.truncf %249 : vector<15x32xf32> to vector<15x32xbf16>
    %267 = arith.truncf %257 : vector<8x32xf32> to vector<8x32xbf16>
    %cst_172 = arith.constant dense<0.000000e+00> : vector<15x8xf32>
    %268 = tpu.matmul %266, %267, %cst_172 {dimension_numbers = #tpu.dot_dimension_numbers<[1], [1], [0], [0], [0, 0, 1, 0], [], []>} : vector<15x32xbf16>, vector<8x32xbf16>, vector<15x8xf32> -> vector<15x8xf32>
    %cst_173 = arith.constant 0.176776692 : f32
    %269 = vector.broadcast %cst_173 : f32 to vector<15x8xf32>
    %270 = arith.mulf %268, %269 : vector<15x8xf32>
    %cst_174 = arith.constant dense<0xFF800000> : vector<15xf32>
    %271 = vector.multi_reduction <maximumf>, %270, %cst_174 [1] : vector<15x8xf32> to vector<15xf32>
    %272 = vector.shape_cast %271 : vector<15xf32> to vector<15x1xf32>
    %273 = vector.broadcast %272 : vector<15x1xf32> to vector<15x8xf32>
    %274 = arith.subf %270, %273 : vector<15x8xf32>
    %275 = math.exp %274 : vector<15x8xf32>
    %cst_175 = arith.constant dense<0.000000e+00> : vector<15xf32>
    %276 = vector.multi_reduction <add>, %275, %cst_175 [1] : vector<15x8xf32> to vector<15xf32>
    %277 = vector.shape_cast %276 : vector<15xf32> to vector<15x1xf32>
    %278 = vector.broadcast %277 : vector<15x1xf32> to vector<15x8xf32>
    %279 = arith.divf %275, %278 : vector<15x8xf32>
    %280 = arith.truncf %279 : vector<15x8xf32> to vector<15x8xbf16>
    %281 = arith.truncf %265 : vector<8x32xf32> to vector<8x32xbf16>
    %cst_176 = arith.constant dense<0.000000e+00> : vector<15x32xf32>
    %282 = tpu.matmul %280, %281, %cst_176 {dimension_numbers = #tpu.dot_dimension_numbers<[1], [0], [0], [1], [0, 0, 1, 1], [], []>} : vector<15x8xbf16>, vector<8x32xbf16>, vector<15x32xf32> -> vector<15x32xf32>
    %c0_177 = arith.constant 0 : index
    %c0_178 = arith.constant 0 : index
    %c0_179 = arith.constant 0 : index
    %c0_180 = arith.constant 0 : index
    %283 = vector.load %arg30[%c0_177, %c0_178, %c0_179, %c0_180] : memref<1x2x32x64xbf16, #tpu.memory_space<vmem>>, vector<1x1x32x64xbf16>
    %284 = vector.shape_cast %283 : vector<1x1x32x64xbf16> to vector<32x64xbf16>
    %285 = arith.truncf %282 : vector<15x32xf32> to vector<15x32xbf16>
    %cst_181 = arith.constant dense<0.000000e+00> : vector<15x64xf32>
    %286 = tpu.matmul %285, %284, %cst_181 {dimension_numbers = #tpu.dot_dimension_numbers<[1], [0], [0], [1], [0, 0, 1, 1], [], []>} : vector<15x32xbf16>, vector<32x64xbf16>, vector<15x64xf32> -> vector<15x64xf32>
    %287 = arith.addf %241, %286 : vector<15x64xf32>
    %c0_182 = arith.constant 0 : index
    %c1_183 = arith.constant 1 : index
    %c0_184 = arith.constant 0 : index
    %c0_185 = arith.constant 0 : index
    %288 = vector.load %arg24[%c0_182, %c1_183, %c0_184, %c0_185] : memref<1x2x64x32xbf16, #tpu.memory_space<vmem>>, vector<1x1x64x32xbf16>
    %289 = vector.shape_cast %288 : vector<1x1x64x32xbf16> to vector<64x32xbf16>
    %290 = arith.truncf %214 : vector<15x64xf32> to vector<15x64xbf16>
    %cst_186 = arith.constant dense<0.000000e+00> : vector<15x32xf32>
    %291 = tpu.matmul %290, %289, %cst_186 {dimension_numbers = #tpu.dot_dimension_numbers<[1], [0], [0], [1], [0, 0, 1, 1], [], []>} : vector<15x64xbf16>, vector<64x32xbf16>, vector<15x32xf32> -> vector<15x32xf32>
    %c0_187 = arith.constant 0 : index
    %c1_188 = arith.constant 1 : index
    %c0_189 = arith.constant 0 : index
    %c0_190 = arith.constant 0 : index
    %292 = vector.load %arg25[%c0_187, %c1_188, %c0_189, %c0_190] : memref<1x2x1x32xf32, #tpu.memory_space<vmem>>, vector<1x1x1x32xf32>
    %293 = vector.shape_cast %292 : vector<1x1x1x32xf32> to vector<1x32xf32>
    %294 = vector.broadcast %293 : vector<1x32xf32> to vector<15x32xf32>
    %295 = arith.addf %291, %294 : vector<15x32xf32>
    %c0_191 = arith.constant 0 : index
    %c1_192 = arith.constant 1 : index
    %c0_193 = arith.constant 0 : index
    %c0_194 = arith.constant 0 : index
    %296 = vector.load %arg26[%c0_191, %c1_192, %c0_193, %c0_194] : memref<1x2x64x32xbf16, #tpu.memory_space<vmem>>, vector<1x1x64x32xbf16>
    %297 = vector.shape_cast %296 : vector<1x1x64x32xbf16> to vector<64x32xbf16>
    %298 = arith.truncf %240 : vector<8x64xf32> to vector<8x64xbf16>
    %cst_195 = arith.constant dense<0.000000e+00> : vector<8x32xf32>
    %299 = tpu.matmul %298, %297, %cst_195 {dimension_numbers = #tpu.dot_dimension_numbers<[1], [0], [0], [1], [0, 0, 1, 1], [], []>} : vector<8x64xbf16>, vector<64x32xbf16>, vector<8x32xf32> -> vector<8x32xf32>
    %c0_196 = arith.constant 0 : index
    %c1_197 = arith.constant 1 : index
    %c0_198 = arith.constant 0 : index
    %c0_199 = arith.constant 0 : index
    %300 = vector.load %arg27[%c0_196, %c1_197, %c0_198, %c0_199] : memref<1x2x1x32xf32, #tpu.memory_space<vmem>>, vector<1x1x1x32xf32>
    %301 = vector.shape_cast %300 : vector<1x1x1x32xf32> to vector<1x32xf32>
    %302 = vector.broadcast %301 : vector<1x32xf32> to vector<8x32xf32>
    %303 = arith.addf %299, %302 : vector<8x32xf32>
    %c0_200 = arith.constant 0 : index
    %c1_201 = arith.constant 1 : index
    %c0_202 = arith.constant 0 : index
    %c0_203 = arith.constant 0 : index
    %304 = vector.load %arg28[%c0_200, %c1_201, %c0_202, %c0_203] : memref<1x2x64x32xbf16, #tpu.memory_space<vmem>>, vector<1x1x64x32xbf16>
    %305 = vector.shape_cast %304 : vector<1x1x64x32xbf16> to vector<64x32xbf16>
    %306 = arith.truncf %240 : vector<8x64xf32> to vector<8x64xbf16>
    %cst_204 = arith.constant dense<0.000000e+00> : vector<8x32xf32>
    %307 = tpu.matmul %306, %305, %cst_204 {dimension_numbers = #tpu.dot_dimension_numbers<[1], [0], [0], [1], [0, 0, 1, 1], [], []>} : vector<8x64xbf16>, vector<64x32xbf16>, vector<8x32xf32> -> vector<8x32xf32>
    %c0_205 = arith.constant 0 : index
    %c1_206 = arith.constant 1 : index
    %c0_207 = arith.constant 0 : index
    %c0_208 = arith.constant 0 : index
    %308 = vector.load %arg29[%c0_205, %c1_206, %c0_207, %c0_208] : memref<1x2x1x32xf32, #tpu.memory_space<vmem>>, vector<1x1x1x32xf32>
    %309 = vector.shape_cast %308 : vector<1x1x1x32xf32> to vector<1x32xf32>
    %310 = vector.broadcast %309 : vector<1x32xf32> to vector<8x32xf32>
    %311 = arith.addf %307, %310 : vector<8x32xf32>
    %312 = arith.truncf %295 : vector<15x32xf32> to vector<15x32xbf16>
    %313 = arith.truncf %303 : vector<8x32xf32> to vector<8x32xbf16>
    %cst_209 = arith.constant dense<0.000000e+00> : vector<15x8xf32>
    %314 = tpu.matmul %312, %313, %cst_209 {dimension_numbers = #tpu.dot_dimension_numbers<[1], [1], [0], [0], [0, 0, 1, 0], [], []>} : vector<15x32xbf16>, vector<8x32xbf16>, vector<15x8xf32> -> vector<15x8xf32>
    %cst_210 = arith.constant 0.176776692 : f32
    %315 = vector.broadcast %cst_210 : f32 to vector<15x8xf32>
    %316 = arith.mulf %314, %315 : vector<15x8xf32>
    %cst_211 = arith.constant dense<0xFF800000> : vector<15xf32>
    %317 = vector.multi_reduction <maximumf>, %316, %cst_211 [1] : vector<15x8xf32> to vector<15xf32>
    %318 = vector.shape_cast %317 : vector<15xf32> to vector<15x1xf32>
    %319 = vector.broadcast %318 : vector<15x1xf32> to vector<15x8xf32>
    %320 = arith.subf %316, %319 : vector<15x8xf32>
    %321 = math.exp %320 : vector<15x8xf32>
    %cst_212 = arith.constant dense<0.000000e+00> : vector<15xf32>
    %322 = vector.multi_reduction <add>, %321, %cst_212 [1] : vector<15x8xf32> to vector<15xf32>
    %323 = vector.shape_cast %322 : vector<15xf32> to vector<15x1xf32>
    %324 = vector.broadcast %323 : vector<15x1xf32> to vector<15x8xf32>
    %325 = arith.divf %321, %324 : vector<15x8xf32>
    %326 = arith.truncf %325 : vector<15x8xf32> to vector<15x8xbf16>
    %327 = arith.truncf %311 : vector<8x32xf32> to vector<8x32xbf16>
    %cst_213 = arith.constant dense<0.000000e+00> : vector<15x32xf32>
    %328 = tpu.matmul %326, %327, %cst_213 {dimension_numbers = #tpu.dot_dimension_numbers<[1], [0], [0], [1], [0, 0, 1, 1], [], []>} : vector<15x8xbf16>, vector<8x32xbf16>, vector<15x32xf32> -> vector<15x32xf32>
    %c0_214 = arith.constant 0 : index
    %c1_215 = arith.constant 1 : index
    %c0_216 = arith.constant 0 : index
    %c0_217 = arith.constant 0 : index
    %329 = vector.load %arg30[%c0_214, %c1_215, %c0_216, %c0_217] : memref<1x2x32x64xbf16, #tpu.memory_space<vmem>>, vector<1x1x32x64xbf16>
    %330 = vector.shape_cast %329 : vector<1x1x32x64xbf16> to vector<32x64xbf16>
    %331 = arith.truncf %328 : vector<15x32xf32> to vector<15x32xbf16>
    %cst_218 = arith.constant dense<0.000000e+00> : vector<15x64xf32>
    %332 = tpu.matmul %331, %330, %cst_218 {dimension_numbers = #tpu.dot_dimension_numbers<[1], [0], [0], [1], [0, 0, 1, 1], [], []>} : vector<15x32xbf16>, vector<32x64xbf16>, vector<15x64xf32> -> vector<15x64xf32>
    %333 = arith.addf %287, %332 : vector<15x64xf32>
    %c0_219 = arith.constant 0 : index
    %c0_220 = arith.constant 0 : index
    %c0_221 = arith.constant 0 : index
    %334 = vector.load %arg31[%c0_219, %c0_220, %c0_221] : memref<1x1x64xf32, #tpu.memory_space<vmem>>, vector<1x1x64xf32>
    %335 = vector.shape_cast %334 : vector<1x1x64xf32> to vector<1x64xf32>
    %336 = vector.broadcast %335 : vector<1x64xf32> to vector<15x64xf32>
    %337 = arith.addf %333, %336 : vector<15x64xf32>
    %338 = arith.addf %186, %337 : vector<15x64xf32>
    %c0_222 = arith.constant 0 : index
    %c0_223 = arith.constant 0 : index
    %c0_224 = arith.constant 0 : index
    %339 = vector.load %arg32[%c0_222, %c0_223, %c0_224] : memref<1x1x64xf32, #tpu.memory_space<vmem>>, vector<1x1x64xf32>
    %340 = vector.shape_cast %339 : vector<1x1x64xf32> to vector<1x64xf32>
    %c0_225 = arith.constant 0 : index
    %c0_226 = arith.constant 0 : index
    %c0_227 = arith.constant 0 : index
    %341 = vector.load %arg33[%c0_225, %c0_226, %c0_227] : memref<1x1x64xf32, #tpu.memory_space<vmem>>, vector<1x1x64xf32>
    %342 = vector.shape_cast %341 : vector<1x1x64xf32> to vector<1x64xf32>
    %cst_228 = arith.constant dense<0.000000e+00> : vector<15xf32>
    %343 = vector.multi_reduction <add>, %338, %cst_228 [1] : vector<15x64xf32> to vector<15xf32>
    %344 = vector.shape_cast %343 : vector<15xf32> to vector<15x1xf32>
    %cst_229 = arith.constant 6.400000e+01 : f32
    %345 = vector.broadcast %cst_229 : f32 to vector<15x1xf32>
    %346 = arith.divf %344, %345 : vector<15x1xf32>
    %347 = vector.broadcast %346 : vector<15x1xf32> to vector<15x64xf32>
    %348 = arith.subf %338, %347 : vector<15x64xf32>
    %349 = arith.mulf %348, %348 : vector<15x64xf32>
    %cst_230 = arith.constant dense<0.000000e+00> : vector<15xf32>
    %350 = vector.multi_reduction <add>, %349, %cst_230 [1] : vector<15x64xf32> to vector<15xf32>
    %351 = vector.shape_cast %350 : vector<15xf32> to vector<15x1xf32>
    %cst_231 = arith.constant 6.400000e+01 : f32
    %352 = vector.broadcast %cst_231 : f32 to vector<15x1xf32>
    %353 = arith.divf %351, %352 : vector<15x1xf32>
    %354 = vector.broadcast %346 : vector<15x1xf32> to vector<15x64xf32>
    %355 = arith.subf %338, %354 : vector<15x64xf32>
    %cst_232 = arith.constant 9.99999974E-6 : f32
    %356 = vector.broadcast %cst_232 : f32 to vector<15x1xf32>
    %357 = arith.addf %353, %356 : vector<15x1xf32>
    %358 = math.rsqrt %357 : vector<15x1xf32>
    %359 = vector.broadcast %358 : vector<15x1xf32> to vector<15x64xf32>
    %360 = arith.mulf %355, %359 : vector<15x64xf32>
    %361 = vector.broadcast %340 : vector<1x64xf32> to vector<15x64xf32>
    %362 = arith.mulf %360, %361 : vector<15x64xf32>
    %363 = vector.broadcast %342 : vector<1x64xf32> to vector<15x64xf32>
    %364 = arith.addf %362, %363 : vector<15x64xf32>
    %c0_233 = arith.constant 0 : index
    %c0_234 = arith.constant 0 : index
    %c0_235 = arith.constant 0 : index
    %365 = vector.load %arg34[%c0_233, %c0_234, %c0_235] : memref<1x64x256xbf16, #tpu.memory_space<vmem>>, vector<1x64x256xbf16>
    %366 = vector.shape_cast %365 : vector<1x64x256xbf16> to vector<64x256xbf16>
    %367 = arith.truncf %364 : vector<15x64xf32> to vector<15x64xbf16>
    %cst_236 = arith.constant dense<0.000000e+00> : vector<15x256xf32>
    %368 = tpu.matmul %367, %366, %cst_236 {dimension_numbers = #tpu.dot_dimension_numbers<[1], [0], [0], [1], [0, 0, 1, 1], [], []>} : vector<15x64xbf16>, vector<64x256xbf16>, vector<15x256xf32> -> vector<15x256xf32>
    %c0_237 = arith.constant 0 : index
    %c0_238 = arith.constant 0 : index
    %c0_239 = arith.constant 0 : index
    %369 = vector.load %arg35[%c0_237, %c0_238, %c0_239] : memref<1x1x256xf32, #tpu.memory_space<vmem>>, vector<1x1x256xf32>
    %370 = vector.shape_cast %369 : vector<1x1x256xf32> to vector<1x256xf32>
    %371 = vector.broadcast %370 : vector<1x256xf32> to vector<15x256xf32>
    %372 = arith.addf %368, %371 : vector<15x256xf32>
    %cst_240 = arith.constant 5.000000e-01 : f32
    %373 = vector.broadcast %cst_240 : f32 to vector<15x256xf32>
    %374 = arith.mulf %373, %372 : vector<15x256xf32>
    %cst_241 = arith.constant 0.707106769 : f32
    %375 = vector.broadcast %cst_241 : f32 to vector<15x256xf32>
    %376 = arith.mulf %372, %375 : vector<15x256xf32>
    %377 = math.erf %376 : vector<15x256xf32>
    %cst_242 = arith.constant 1.000000e+00 : f32
    %378 = vector.broadcast %cst_242 : f32 to vector<15x256xf32>
    %379 = arith.addf %378, %377 : vector<15x256xf32>
    %380 = arith.mulf %374, %379 : vector<15x256xf32>
    %c0_243 = arith.constant 0 : index
    %c0_244 = arith.constant 0 : index
    %c0_245 = arith.constant 0 : index
    %381 = vector.load %arg36[%c0_243, %c0_244, %c0_245] : memref<1x256x64xbf16, #tpu.memory_space<vmem>>, vector<1x256x64xbf16>
    %382 = vector.shape_cast %381 : vector<1x256x64xbf16> to vector<256x64xbf16>
    %383 = arith.truncf %380 : vector<15x256xf32> to vector<15x256xbf16>
    %cst_246 = arith.constant dense<0.000000e+00> : vector<15x64xf32>
    %384 = tpu.matmul %383, %382, %cst_246 {dimension_numbers = #tpu.dot_dimension_numbers<[1], [0], [0], [1], [0, 0, 1, 1], [], []>} : vector<15x256xbf16>, vector<256x64xbf16>, vector<15x64xf32> -> vector<15x64xf32>
    %385 = arith.addf %338, %384 : vector<15x64xf32>
    %c0_247 = arith.constant 0 : index
    %c0_248 = arith.constant 0 : index
    %c0_249 = arith.constant 0 : index
    %386 = vector.load %arg37[%c0_247, %c0_248, %c0_249] : memref<1x1x64xf32, #tpu.memory_space<vmem>>, vector<1x1x64xf32>
    %387 = vector.shape_cast %386 : vector<1x1x64xf32> to vector<1x64xf32>
    %388 = vector.broadcast %387 : vector<1x64xf32> to vector<15x64xf32>
    %389 = arith.addf %385, %388 : vector<15x64xf32>
    %c0_250 = arith.constant 0 : index
    %c0_251 = arith.constant 0 : index
    %390 = vector.load %arg42[%c0_250, %c0_251] : memref<15x64xf32, #tpu.memory_space<vmem>>, vector<15x64xf32>
    tpu.vector_store %arg42[%c0_250, %c0_251], %389 {strides = array<i32>} : memref<15x64xf32, #tpu.memory_space<vmem>>, vector<15x64xf32>,
    %c1_i32 = arith.constant 1 : i32
    %391 = arith.cmpi eq, %arg1, %c1_i32 : i32
    %392 = arith.extui %391 : i1 to i32
    %c0_i32_252 = arith.constant 0 : i32
    %393 = arith.cmpi ne, %392, %c0_i32_252 : i32
    scf.if %393 {
      %c0_253 = arith.constant 0 : index
      %c0_254 = arith.constant 0 : index
      %394 = vector.load %arg38[%c0_253, %c0_254] : memref<1x64xf32, #tpu.memory_space<vmem>>, vector<1x64xf32>
      %c0_255 = arith.constant 0 : index
      %c0_256 = arith.constant 0 : index
      %395 = vector.load %arg39[%c0_255, %c0_256] : memref<1x64xf32, #tpu.memory_space<vmem>>, vector<1x64xf32>
      %cst_257 = arith.constant dense<0.000000e+00> : vector<15xf32>
      %396 = vector.multi_reduction <add>, %389, %cst_257 [1] : vector<15x64xf32> to vector<15xf32>
      %397 = vector.shape_cast %396 : vector<15xf32> to vector<15x1xf32>
      %cst_258 = arith.constant 6.400000e+01 : f32
      %398 = vector.broadcast %cst_258 : f32 to vector<15x1xf32>
      %399 = arith.divf %397, %398 : vector<15x1xf32>
      %400 = vector.broadcast %399 : vector<15x1xf32> to vector<15x64xf32>
      %401 = arith.subf %389, %400 : vector<15x64xf32>
      %402 = arith.mulf %401, %401 : vector<15x64xf32>
      %cst_259 = arith.constant dense<0.000000e+00> : vector<15xf32>
      %403 = vector.multi_reduction <add>, %402, %cst_259 [1] : vector<15x64xf32> to vector<15xf32>
      %404 = vector.shape_cast %403 : vector<15xf32> to vector<15x1xf32>
      %cst_260 = arith.constant 6.400000e+01 : f32
      %405 = vector.broadcast %cst_260 : f32 to vector<15x1xf32>
      %406 = arith.divf %404, %405 : vector<15x1xf32>
      %407 = vector.broadcast %399 : vector<15x1xf32> to vector<15x64xf32>
      %408 = arith.subf %389, %407 : vector<15x64xf32>
      %cst_261 = arith.constant 9.99999974E-6 : f32
      %409 = vector.broadcast %cst_261 : f32 to vector<15x1xf32>
      %410 = arith.addf %406, %409 : vector<15x1xf32>
      %411 = math.rsqrt %410 : vector<15x1xf32>
      %412 = vector.broadcast %411 : vector<15x1xf32> to vector<15x64xf32>
      %413 = arith.mulf %408, %412 : vector<15x64xf32>
      %414 = vector.broadcast %394 : vector<1x64xf32> to vector<15x64xf32>
      %415 = arith.mulf %413, %414 : vector<15x64xf32>
      %416 = vector.broadcast %395 : vector<1x64xf32> to vector<15x64xf32>
      %417 = arith.addf %415, %416 : vector<15x64xf32>
      %c0_262 = arith.constant 0 : index
      %c0_263 = arith.constant 0 : index
      %418 = vector.load %arg40[%c0_262, %c0_263] : memref<64x128xbf16, #tpu.memory_space<vmem>>, vector<64x128xbf16>
      %419 = arith.truncf %417 : vector<15x64xf32> to vector<15x64xbf16>
      %cst_264 = arith.constant dense<0.000000e+00> : vector<15x128xf32>
      %420 = tpu.matmul %419, %418, %cst_264 {dimension_numbers = #tpu.dot_dimension_numbers<[1], [0], [0], [1], [0, 0, 1, 1], [], []>} : vector<15x64xbf16>, vector<64x128xbf16>, vector<15x128xf32> -> vector<15x128xf32>
      %c0_265 = arith.constant 0 : index
      %c0_266 = arith.constant 0 : index
      %c0_267 = arith.constant 0 : index
      %421 = vector.load %arg41[%c0_265, %c0_266, %c0_267] : memref<1x15x128xf32, #tpu.memory_space<vmem>>, vector<1x15x128xf32>
      %422 = vector.shape_cast %421 : vector<1x15x128xf32> to vector<15x128xf32>
      %423 = vector.shape_cast %420 : vector<15x128xf32> to vector<1x15x128xf32>
      tpu.vector_store %arg41[%c0_265, %c0_266, %c0_267], %423 {strides = array<i32>} : memref<1x15x128xf32, #tpu.memory_space<vmem>>, vector<1x15x128xf32>,
    } else {
    }
    return
  }
  func.func @transform_0(%arg0: i32, %arg1: i32) -> (i32, i32, i32) {
    %c0_i32 = arith.constant 0 : i32
    %c0_i32_0 = arith.constant 0 : i32
    %c0_i32_1 = arith.constant 0 : i32
    return %arg0, %c0_i32, %c0_i32_0 : i32, i32, i32
  }
  func.func @transform_1(%arg0: i32, %arg1: i32) -> (i32, i32, i32) {
    %c0_i32 = arith.constant 0 : i32
    %c0_i32_0 = arith.constant 0 : i32
    %c0_i32_1 = arith.constant 0 : i32
    return %arg0, %c0_i32, %c0_i32_0 : i32, i32, i32
  }
  func.func @transform_2(%arg0: i32, %arg1: i32) -> (i32, i32, i32) {
    %c0_i32 = arith.constant 0 : i32
    %c0_i32_0 = arith.constant 0 : i32
    %c0_i32_1 = arith.constant 0 : i32
    return %arg1, %c0_i32, %c0_i32_0 : i32, i32, i32
  }
  func.func @transform_3(%arg0: i32, %arg1: i32) -> (i32, i32, i32) {
    %c0_i32 = arith.constant 0 : i32
    %c0_i32_0 = arith.constant 0 : i32
    %c0_i32_1 = arith.constant 0 : i32
    return %arg1, %c0_i32, %c0_i32_0 : i32, i32, i32
  }
  func.func @transform_4(%arg0: i32, %arg1: i32) -> (i32, i32, i32, i32) {
    %c0_i32 = arith.constant 0 : i32
    %c0_i32_0 = arith.constant 0 : i32
    %c0_i32_1 = arith.constant 0 : i32
    %c0_i32_2 = arith.constant 0 : i32
    return %arg1, %c0_i32, %c0_i32_0, %c0_i32_1 : i32, i32, i32, i32
  }
  func.func @transform_5(%arg0: i32, %arg1: i32) -> (i32, i32, i32, i32) {
    %c0_i32 = arith.constant 0 : i32
    %c0_i32_0 = arith.constant 0 : i32
    %c0_i32_1 = arith.constant 0 : i32
    %c0_i32_2 = arith.constant 0 : i32
    return %arg1, %c0_i32, %c0_i32_0, %c0_i32_1 : i32, i32, i32, i32
  }
  func.func @transform_6(%arg0: i32, %arg1: i32) -> (i32, i32, i32, i32) {
    %c0_i32 = arith.constant 0 : i32
    %c0_i32_0 = arith.constant 0 : i32
    %c0_i32_1 = arith.constant 0 : i32
    %c0_i32_2 = arith.constant 0 : i32
    return %arg1, %c0_i32, %c0_i32_0, %c0_i32_1 : i32, i32, i32, i32
  }
  func.func @transform_7(%arg0: i32, %arg1: i32) -> (i32, i32, i32, i32) {
    %c0_i32 = arith.constant 0 : i32
    %c0_i32_0 = arith.constant 0 : i32
    %c0_i32_1 = arith.constant 0 : i32
    %c0_i32_2 = arith.constant 0 : i32
    return %arg1, %c0_i32, %c0_i32_0, %c0_i32_1 : i32, i32, i32, i32
  }
  func.func @transform_8(%arg0: i32, %arg1: i32) -> (i32, i32, i32, i32) {
    %c0_i32 = arith.constant 0 : i32
    %c0_i32_0 = arith.constant 0 : i32
    %c0_i32_1 = arith.constant 0 : i32
    %c0_i32_2 = arith.constant 0 : i32
    return %arg1, %c0_i32, %c0_i32_0, %c0_i32_1 : i32, i32, i32, i32
  }
  func.func @transform_9(%arg0: i32, %arg1: i32) -> (i32, i32, i32, i32) {
    %c0_i32 = arith.constant 0 : i32
    %c0_i32_0 = arith.constant 0 : i32
    %c0_i32_1 = arith.constant 0 : i32
    %c0_i32_2 = arith.constant 0 : i32
    return %arg1, %c0_i32, %c0_i32_0, %c0_i32_1 : i32, i32, i32, i32
  }
  func.func @transform_10(%arg0: i32, %arg1: i32) -> (i32, i32, i32, i32) {
    %c0_i32 = arith.constant 0 : i32
    %c0_i32_0 = arith.constant 0 : i32
    %c0_i32_1 = arith.constant 0 : i32
    %c0_i32_2 = arith.constant 0 : i32
    return %arg1, %c0_i32, %c0_i32_0, %c0_i32_1 : i32, i32, i32, i32
  }
  func.func @transform_11(%arg0: i32, %arg1: i32) -> (i32, i32, i32) {
    %c0_i32 = arith.constant 0 : i32
    %c0_i32_0 = arith.constant 0 : i32
    %c0_i32_1 = arith.constant 0 : i32
    return %arg1, %c0_i32, %c0_i32_0 : i32, i32, i32
  }
  func.func @transform_12(%arg0: i32, %arg1: i32) -> (i32, i32, i32) {
    %c0_i32 = arith.constant 0 : i32
    %c0_i32_0 = arith.constant 0 : i32
    %c0_i32_1 = arith.constant 0 : i32
    return %arg1, %c0_i32, %c0_i32_0 : i32, i32, i32
  }
  func.func @transform_13(%arg0: i32, %arg1: i32) -> (i32, i32, i32) {
    %c0_i32 = arith.constant 0 : i32
    %c0_i32_0 = arith.constant 0 : i32
    %c0_i32_1 = arith.constant 0 : i32
    return %arg1, %c0_i32, %c0_i32_0 : i32, i32, i32
  }
  func.func @transform_14(%arg0: i32, %arg1: i32) -> (i32, i32, i32) {
    %c0_i32 = arith.constant 0 : i32
    %c0_i32_0 = arith.constant 0 : i32
    %c0_i32_1 = arith.constant 0 : i32
    return %arg1, %c0_i32, %c0_i32_0 : i32, i32, i32
  }
  func.func @transform_15(%arg0: i32, %arg1: i32) -> (i32, i32, i32) {
    %c0_i32 = arith.constant 0 : i32
    %c0_i32_0 = arith.constant 0 : i32
    %c0_i32_1 = arith.constant 0 : i32
    return %arg1, %c0_i32, %c0_i32_0 : i32, i32, i32
  }
  func.func @transform_16(%arg0: i32, %arg1: i32) -> (i32, i32, i32) {
    %c0_i32 = arith.constant 0 : i32
    %c0_i32_0 = arith.constant 0 : i32
    %c0_i32_1 = arith.constant 0 : i32
    return %arg1, %c0_i32, %c0_i32_0 : i32, i32, i32
  }
  func.func @transform_17(%arg0: i32, %arg1: i32) -> (i32, i32, i32) {
    %c0_i32 = arith.constant 0 : i32
    %c0_i32_0 = arith.constant 0 : i32
    %c0_i32_1 = arith.constant 0 : i32
    return %arg1, %c0_i32, %c0_i32_0 : i32, i32, i32
  }
  func.func @transform_18(%arg0: i32, %arg1: i32) -> (i32, i32, i32) {
    %c0_i32 = arith.constant 0 : i32
    %c0_i32_0 = arith.constant 0 : i32
    %c0_i32_1 = arith.constant 0 : i32
    return %arg1, %c0_i32, %c0_i32_0 : i32, i32, i32
  }
  func.func @transform_19(%arg0: i32, %arg1: i32) -> (i32, i32, i32) {
    %c0_i32 = arith.constant 0 : i32
    %c0_i32_0 = arith.constant 0 : i32
    %c0_i32_1 = arith.constant 0 : i32
    return %arg1, %c0_i32, %c0_i32_0 : i32, i32, i32
  }
  func.func @transform_20(%arg0: i32, %arg1: i32) -> (i32, i32, i32) {
    %c0_i32 = arith.constant 0 : i32
    %c0_i32_0 = arith.constant 0 : i32
    %c0_i32_1 = arith.constant 0 : i32
    return %arg1, %c0_i32, %c0_i32_0 : i32, i32, i32
  }
  func.func @transform_21(%arg0: i32, %arg1: i32) -> (i32, i32, i32) {
    %c0_i32 = arith.constant 0 : i32
    %c0_i32_0 = arith.constant 0 : i32
    %c0_i32_1 = arith.constant 0 : i32
    return %arg1, %c0_i32, %c0_i32_0 : i32, i32, i32
  }
  func.func @transform_22(%arg0: i32, %arg1: i32) -> (i32, i32, i32, i32) {
    %c0_i32 = arith.constant 0 : i32
    %c0_i32_0 = arith.constant 0 : i32
    %c0_i32_1 = arith.constant 0 : i32
    %c0_i32_2 = arith.constant 0 : i32
    return %arg1, %c0_i32, %c0_i32_0, %c0_i32_1 : i32, i32, i32, i32
  }
  func.func @transform_23(%arg0: i32, %arg1: i32) -> (i32, i32, i32, i32) {
    %c0_i32 = arith.constant 0 : i32
    %c0_i32_0 = arith.constant 0 : i32
    %c0_i32_1 = arith.constant 0 : i32
    %c0_i32_2 = arith.constant 0 : i32
    return %arg1, %c0_i32, %c0_i32_0, %c0_i32_1 : i32, i32, i32, i32
  }
  func.func @transform_24(%arg0: i32, %arg1: i32) -> (i32, i32, i32, i32) {
    %c0_i32 = arith.constant 0 : i32
    %c0_i32_0 = arith.constant 0 : i32
    %c0_i32_1 = arith.constant 0 : i32
    %c0_i32_2 = arith.constant 0 : i32
    return %arg1, %c0_i32, %c0_i32_0, %c0_i32_1 : i32, i32, i32, i32
  }
  func.func @transform_25(%arg0: i32, %arg1: i32) -> (i32, i32, i32, i32) {
    %c0_i32 = arith.constant 0 : i32
    %c0_i32_0 = arith.constant 0 : i32
    %c0_i32_1 = arith.constant 0 : i32
    %c0_i32_2 = arith.constant 0 : i32
    return %arg1, %c0_i32, %c0_i32_0, %c0_i32_1 : i32, i32, i32, i32
  }
  func.func @transform_26(%arg0: i32, %arg1: i32) -> (i32, i32, i32, i32) {
    %c0_i32 = arith.constant 0 : i32
    %c0_i32_0 = arith.constant 0 : i32
    %c0_i32_1 = arith.constant 0 : i32
    %c0_i32_2 = arith.constant 0 : i32
    return %arg1, %c0_i32, %c0_i32_0, %c0_i32_1 : i32, i32, i32, i32
  }
  func.func @transform_27(%arg0: i32, %arg1: i32) -> (i32, i32, i32, i32) {
    %c0_i32 = arith.constant 0 : i32
    %c0_i32_0 = arith.constant 0 : i32
    %c0_i32_1 = arith.constant 0 : i32
    %c0_i32_2 = arith.constant 0 : i32
    return %arg1, %c0_i32, %c0_i32_0, %c0_i32_1 : i32, i32, i32, i32
  }
  func.func @transform_28(%arg0: i32, %arg1: i32) -> (i32, i32, i32, i32) {
    %c0_i32 = arith.constant 0 : i32
    %c0_i32_0 = arith.constant 0 : i32
    %c0_i32_1 = arith.constant 0 : i32
    %c0_i32_2 = arith.constant 0 : i32
    return %arg1, %c0_i32, %c0_i32_0, %c0_i32_1 : i32, i32, i32, i32
  }
  func.func @transform_29(%arg0: i32, %arg1: i32) -> (i32, i32, i32) {
    %c0_i32 = arith.constant 0 : i32
    %c0_i32_0 = arith.constant 0 : i32
    %c0_i32_1 = arith.constant 0 : i32
    return %arg1, %c0_i32, %c0_i32_0 : i32, i32, i32
  }
  func.func @transform_30(%arg0: i32, %arg1: i32) -> (i32, i32, i32) {
    %c0_i32 = arith.constant 0 : i32
    %c0_i32_0 = arith.constant 0 : i32
    %c0_i32_1 = arith.constant 0 : i32
    return %arg1, %c0_i32, %c0_i32_0 : i32, i32, i32
  }
  func.func @transform_31(%arg0: i32, %arg1: i32) -> (i32, i32, i32) {
    %c0_i32 = arith.constant 0 : i32
    %c0_i32_0 = arith.constant 0 : i32
    %c0_i32_1 = arith.constant 0 : i32
    return %arg1, %c0_i32, %c0_i32_0 : i32, i32, i32
  }
  func.func @transform_32(%arg0: i32, %arg1: i32) -> (i32, i32, i32) {
    %c0_i32 = arith.constant 0 : i32
    %c0_i32_0 = arith.constant 0 : i32
    %c0_i32_1 = arith.constant 0 : i32
    return %arg1, %c0_i32, %c0_i32_0 : i32, i32, i32
  }
  func.func @transform_33(%arg0: i32, %arg1: i32) -> (i32, i32, i32) {
    %c0_i32 = arith.constant 0 : i32
    %c0_i32_0 = arith.constant 0 : i32
    %c0_i32_1 = arith.constant 0 : i32
    return %arg1, %c0_i32, %c0_i32_0 : i32, i32, i32
  }
  func.func @transform_34(%arg0: i32, %arg1: i32) -> (i32, i32, i32) {
    %c0_i32 = arith.constant 0 : i32
    %c0_i32_0 = arith.constant 0 : i32
    %c0_i32_1 = arith.constant 0 : i32
    return %arg1, %c0_i32, %c0_i32_0 : i32, i32, i32
  }
  func.func @transform_35(%arg0: i32, %arg1: i32) -> (i32, i32, i32) {
    %c0_i32 = arith.constant 0 : i32
    %c0_i32_0 = arith.constant 0 : i32
    %c0_i32_1 = arith.constant 0 : i32
    return %arg1, %c0_i32, %c0_i32_0 : i32, i32, i32
  }
  func.func @transform_36(%arg0: i32, %arg1: i32) -> (i32, i32) {
    %c0_i32 = arith.constant 0 : i32
    %c0_i32_0 = arith.constant 0 : i32
    %c0_i32_1 = arith.constant 0 : i32
    return %c0_i32, %c0_i32_0 : i32, i32
  }
  func.func @transform_37(%arg0: i32, %arg1: i32) -> (i32, i32) {
    %c0_i32 = arith.constant 0 : i32
    %c0_i32_0 = arith.constant 0 : i32
    %c0_i32_1 = arith.constant 0 : i32
    return %c0_i32, %c0_i32_0 : i32, i32
  }
  func.func @transform_38(%arg0: i32, %arg1: i32) -> (i32, i32) {
    %c0_i32 = arith.constant 0 : i32
    %c0_i32_0 = arith.constant 0 : i32
    %c0_i32_1 = arith.constant 0 : i32
    return %c0_i32, %c0_i32_0 : i32, i32
  }
  func.func @transform_39(%arg0: i32, %arg1: i32) -> (i32, i32, i32) {
    %c0_i32 = arith.constant 0 : i32
    %c0_i32_0 = arith.constant 0 : i32
    %c0_i32_1 = arith.constant 0 : i32
    return %arg0, %c0_i32, %c0_i32_0 : i32, i32, i32
  }
}

</mosaic_0001>

<bundles_post_ra>
// kernel: coca_forward.4
= control target key start
LH: loop header
LB: loop body
LE: loop exit
PB: predicated region body
PF: predicated region fallthrough
CT: control target
= control target key end

     0   :  { %s3131_s28 = smov 0   ;;  %s3133_s29 = smov 0   ;;  %s3631_s0 = inlined_call_operand.vmem [shape: f32[2,16,64], index: 0, kind: input, shape index: {}]   ;;  %s3632_s1 = inlined_call_operand.vmem [shape: f32[2,1,16], index: 1, kind: input, shape index: {}]   ;;  %s3633_s2 = inlined_call_operand.vmem [shape: f32[2,1,64], index: 2, kind: input, shape index: {}]   ;;  %s3634_s3 = inlined_call_operand.vmem [shape: f32[2,1,64], index: 3, kind: input, shape index: {}]   ;;  %s3635_s4 = inlined_call_operand.vmem [shape: bf16[2,2,64,32], index: 4, kind: input, shape index: {}]   ;;  %s3636_s5 = inlined_call_operand.vmem [shape: f32[2,2,1,32], index: 5, kind: input, shape index: {}]   ;;  %s3637_s6 = inlined_call_operand.vmem [shape: bf16[2,2,64,32], index: 6, kind: input, shape index: {}]   ;;  %s3638_s7 = inlined_call_operand.vmem [shape: f32[2,2,1,32], index: 7, kind: input, shape index: {}]   ;;  %s3639_s8 = inlined_call_operand.vmem [shape: bf16[2,2,64,32], index: 8, kind: input, shape index: {}]   ;;  %s3640_s9 = inlined_call_operand.vmem [shape: f32[2,2,1,32], index: 9, kind: input, shape index: {}]   ;;  %s3641_s10 = inlined_call_operand.vmem [shape: bf16[2,2,32,64], index: 10, kind: input, shape index: {}]   ;;  %s3642_s11 = inlined_call_operand.vmem [shape: f32[2,1,64], index: 11, kind: input, shape index: {}]   ;;  %s3643_s12 = inlined_call_operand.vmem [shape: f32[2,1,64], index: 12, kind: input, shape index: {}]   ;;  %s3644_s13 = inlined_call_operand.vmem [shape: f32[2,1,64], index: 13, kind: input, shape index: {}]   ;;  %s3645_s14 = inlined_call_operand.vmem [shape: bf16[2,64,256], index: 14, kind: input, shape index: {}]   ;;  %s3646_s15 = inlined_call_operand.vmem [shape: f32[2,1,256], index: 15, kind: input, shape index: {}]   ;;  %s3647_s16 = inlined_call_operand.vmem [shape: bf16[2,256,64], index: 16, kind: input, shape index: {}]   ;;  %s3648_s17 = inlined_call_operand.vmem [shape: f32[2,1,64], index: 17, kind: input, shape index: {}]   ;;  %s3649_s18 = inlined_call_operand.vmem [shape: f32[1,64], index: 18, kind: input, shape index: {}]   ;;  %s3650_s19 = inlined_call_operand.vmem [shape: f32[1,64], index: 19, kind: input, shape index: {}]   ;;  %s3651_s20 = inlined_call_operand.vmem [shape: bf16[64,64], index: 20, kind: input, shape index: {}]   ;;  %s3652_s21 = inlined_call_operand.vmem [shape: f32[2,15,64], index: 21, kind: output, shape index: {0}]   ;;  %s3653_s22 = inlined_call_operand.vmem [shape: f32[2,1,64], index: 22, kind: output, shape index: {1}]  }
   0x1   :  { %3662 = sst [smem:[#allocation12_spill]] %s3631_s0  ;;  %s3135_s30 = smov 0  }
   0x2   :  { %3663 = sst [smem:[#allocation13_spill]] %s3632_s1 }
   0x3   :  { %3664 = sst [smem:[#allocation14_spill]] %s3633_s2 }
   0x4   :  { %3665 = sst [smem:[#allocation15_spill]] %s3634_s3  ;;  %s3129_s3 = smov 0  }
   0x5   :  { %3666 = sst [smem:[#allocation16_spill]] %s3635_s4  ;;  %s3137_s4 = smov 0  }
   0x6   :  { %3667 = sst [smem:[#allocation17_spill]] %s3636_s5 }
   0x7   :  { %3668 = sst [smem:[#allocation18_spill]] %s3637_s6 }
   0x8   :  { %3669 = sst [smem:[#allocation19_spill]] %s3638_s7 }
   0x9   :  { %3670 = sst [smem:[#allocation20_spill]] %s3639_s8 }
   0xa   :  { %3671 = sst [smem:[#allocation21_spill]] %s3640_s9 }
   0xb   :  { %3672 = sst [smem:[#allocation22_spill]] %s3641_s10 }
   0xc   :  { %3673 = sst [smem:[#allocation23_spill]] %s3642_s11 }
   0xd   :  { %3674 = sst [smem:[#allocation24_spill]] %s3643_s12 }
   0xe   :  { %3675 = sst [smem:[#allocation25_spill]] %s3645_s14 }
   0xf   :  { %3676 = sst [smem:[#allocation26_spill]] %s3647_s16 }
  0x10   :  { %3677 = sst [smem:[#allocation27_spill]] %s3648_s17 }
  0x11   :  { %3678 = sst [smem:[#allocation28_spill]] %s3649_s18 }
  0x12   :  { %3679 = sst [smem:[#allocation29_spill]] %s3650_s19 }
  0x13   :  { %3680 = sst [smem:[#allocation30_spill]] %s3651_s20 }
  0x14   :  { %3681 = sst [smem:[#allocation31_spill]] %s3652_s21 }
  0x15   :  { %3682 = sst [smem:[#allocation32_spill]] %s3653_s22 }
  0x16 LB: > { %3683 = sst [smem:[#allocation3_spill]] %s2994_s3  ;;  %s42_s0 = sadd.s32 1, %s3002_s29  ;;  %s3010_s4 = sphi %s3137_s4, %s33_s4   ;;  %s3006_s30 = sphi %s3135_s30, %s3737_s30   ;;  %s3002_s29 = sphi %s3133_s29, %s3736_s29   ;;  %s2998_s28 = sphi %s3131_s28, %s3735_s28   ;;  %s2994_s3 = sphi %s3129_s3, %s3734_s3  }
  0x17   : > { %3684 = sst [smem:[#allocation4_spill]] %s3002_s29  ;;  %s45_s23 = sadd.s32 1, %s3006_s30 }
  0x18   : > { %3685 = sst [smem:[#allocation5_spill]] %s3006_s30  ;;  %p43_p0 = scmp.ge.s32.totalorder %s42_s0, 2 }
  0x19   : > { %3686 = sst [smem:[#allocation6_spill]] %s3010_s4  ;;  %p2516_p1 = scmp.ge.s32.totalorder %s3010_s4, 1 }
  0x1a   : > { %p779_p2 = scmp.lt.s32.totalorder %s3010_s4, 5  ;;  %s3739_s0 = smov (%p43_p0, %s42_s0), 0 }
  0x1b   : > { %3687 = sst [smem:[#allocation7_spill]] %s3739_s0  ;;  %s3741_s23 = smov (!%p43_p0, %s45_s23), %s3006_s30 }
  0x1c   : > { %p780_p3 = pnand %p2516_p1, %p779_p2  ;;  %p47_p4 = scmp.ge.s32.totalorder %s3741_s23, 2 }
  0x1e   : > { %s3743_s23 = smov (%p47_p4, %s3741_s23), 0  ;;  %783 = sbr.rel (%p780_p3) target bundleno = 2780 (0xadc), region = 104 }
  0x1f   : > { %3688 = sst [smem:[#allocation8_spill]] %s3743_s23 }
  0x23   : > { %p911_p5 = scmp.lt.s32.totalorder %s2998_s28, 1  ;;  %p919_p6 = scmp.lt.s32.totalorder %s2994_s3, 1 }
  0x24   : > { %s3690_s23 = sld [smem:[#allocation12_spill]] }
  0x25   : > { %s3745_s28 = smov (!%p911_p5, %s2998_s28), 1  ;;  %s3693_s24 = sld [smem:[#allocation16_spill]] }
  0x26   : > { %s3165_s1 = scalar_select %p919_p6, %s2994_s3, 1 }
  0x27   : > { %s2815_s5 = sshll.u32 %s3745_s28, 4  ;;  %s3694_s27 = sld [smem:[#allocation17_spill]] }
  0x28   : > { %s2816_s21 = sshll.u32 %s3165_s1, 6  ;;  %s3190_s25 = sshll.u32 %s3165_s1, 1 }
  0x29   : > { %s3696_s3 = sld [smem:[#allocation18_spill]]  ;;  %s2819_s19 = sshll.u32 %s3165_s1, 5 }
  0x2a   : > { %s915_s0 = scalar_lea.vmem %s3690_s23, %s2815_s5  ;;  %s3697_s7 = sld [smem:[#allocation19_spill]] }
  0x2b   : > { %s3187_s6 = scalar_lea.vmem %s3693_s24, %s2816_s21  ;;  %s3699_s8 = sld [smem:[#allocation20_spill]] }
  0x2c   : > { %s3700_s9 = sld [smem:[#allocation21_spill]]  ;;  %s974_s20 = scalar_lea.vmem %s3646_s15, %s3190_s25 }
  0x2d   : > { %s3196_s29 = scalar_lea.vmem %s3694_s27, %s3190_s25  ;;  %s3702_s10 = sld [smem:[#allocation22_spill]] }
  0x2e   : > { %3695 = sst [smem:[#allocation9_spill]] %s3196_s29 }
  0x2f   : > { %s3201_s30 = scalar_lea.vmem %s3696_s3, %s2816_s21  ;;  %s3705_s14 = sld [smem:[#allocation25_spill]] }
  0x30   : > { %s3207_s4 = scalar_lea.vmem %s3697_s7, %s3190_s25  ;;  %s3706_s17 = sld [smem:[#allocation27_spill]] }
  0x31   : > { %3698 = sst [smem:[#allocation10_spill]] %s3207_s4  ;;  %s3212_s23 = scalar_lea.vmem %s3699_s8, %s2816_s21 }
  0x32   : > { %s3218_s27 = scalar_lea.vmem %s3700_s9, %s3190_s25  ;;  %s3707_s26 = sld [smem:[#allocation26_spill]] }
  0x33   : > { %3701 = sst [smem:[#allocation11_spill]] %s3218_s27  ;;  %s3224_s3 = scalar_lea.vmem %s3702_s10, %s2819_s19 }
  0x34   : > { %s2821_s10 = sshll.u32 %s3165_s1, 7  ;;  %s3708_s22 = sld [smem:[#allocation31_spill]] }
  0x35   : > { %s3241_s27 = scalar_lea.vmem %s3705_s14, %s2816_s21  ;;  %s3709_s14 = sld [smem:[#allocation32_spill]] }
  0x36   : > { %s982_s11 = scalar_lea.vmem %s3706_s17, %s3165_s1  ;;  %s3710_s19 = sld [smem:[#allocation3_spill]] }
  0x38   : > { %s3255_s12 = scalar_lea.vmem %s3707_s26, %s2821_s10 }
  0x3a   : > { %s3260_s9 = scalar_lea.vmem %s3708_s22, %s2815_s5 }
  0x3b   : > { %s990_s18 = scalar_lea.vmem %s3709_s14, %s3745_s28 }
  0x3c   : > { %p2537_p7 = scmp.ne.s32.totalorder %s3710_s19, 0 }
  0x3e   : > { %995 = sbr.rel (%p2537_p7) target bundleno = 70 (0x46), region = 108 }
  0x43   : > { %v996_v0 = vld [vmem:[%s915_s0] sm:$0xff]  ;;  %vm998_vm0 = vcmask 523264   ;;  %v997_v1 = vld [vmem:[%s915_s0 + $0x8] sm:$0xff] }
  0x44   : > { %999 = vst.msk [vmem:[#allocation2] sm:$0xff] %vm998_vm0, %v996_v0 }
  0x45   : > { %1000 = vst.msk [vmem:[#allocation2 + $0x8] sm:$0xff] %vm998_vm0, %v997_v1 }
  0x46 PF: > { %vm1020_vm1 = vcmask 523264   ;;  %v3012_v6 = vmov 64.0   ;;  %v2826_v23 = vld [vmem:[%s3187_s6 + $0x18] sm:$0xff]  ;;  %v2825_v26 = vld [vmem:[%s3187_s6 + $0x10] sm:$0xff]  ;;  %v2824_v29 = vld [vmem:[%s3187_s6 + $0x8] sm:$0xff]  ;;  %s3711_s0 = sld [smem:[#allocation14_spill]] }
  0x47   : > { %2934 = vrcp.f32 %v3012_v6  ;;  %v2830_v24 = vld [vmem:[%s3201_s30 + $0x18] sm:$0xff]  ;;  %1126 = vmatpush.bf16.msra.mxu0 %v2826_v23  ;;  %v2829_v27 = vld [vmem:[%s3201_s30 + $0x10] sm:$0xff]  ;;  %v2828_v30 = vld [vmem:[%s3201_s30 + $0x8] sm:$0xff]  ;;  %s3714_s26 = sld [smem:[#allocation15_spill]]  ;;  %vm1238_vm9 = vcmask 261120   ;;  %vm1263_vm12 = vcmask 130048  }
  0x48   : > { %v2834_v25 = vld [vmem:[%s3212_s23 + $0x18] sm:$0xff]  ;;  %1176 = vmatpush.bf16.msra.mxu1 %v2830_v24  ;;  %v2833_v28 = vld [vmem:[%s3212_s23 + $0x10] sm:$0xff]  ;;  %v2832_v31 = vld [vmem:[%s3212_s23 + $0x8] sm:$0xff]  ;;  %s3716_s29 = sld [smem:[#allocation11_spill]] }
  0x49   : > { %1226 = vmatpush.bf16.msra.mxu2 %v2834_v25  ;;  %v2823_v34 = vld [vmem:[%s3187_s6] sm:$0xff]  ;;  %v2840_v38 = vld [vmem:[%s3187_s6 + $0x38] sm:$0xff]  ;;  %v2839_v42 = vld [vmem:[%s3187_s6 + $0x30] sm:$0xff]  ;;  %s3717_s16 = sld [smem:[#allocation9_spill]] }
  0x4a   : > { %v2827_v35 = vld [vmem:[%s3201_s30] sm:$0xff]  ;;  %v2848_v39 = vld [vmem:[%s3212_s23 + $0x38] sm:$0xff]  ;;  %v2847_v43 = vld [vmem:[%s3212_s23 + $0x30] sm:$0xff]  ;;  %s3718_s8 = sld [smem:[#allocation13_spill]] }
  0x4b   : > { %v3267_v2 = vld [vmem:[#allocation2] sm:$0xff]  ;;  %1127 = vmatpush.bf16.msra.mxu0 %v2825_v26  ;;  %v2838_v47 = vld [vmem:[%s3187_s6 + $0x28] sm:$0xff]  ;;  %s3720_s2 = sld [smem:[#allocation23_spill]] }
  0x4c   : > { %v1021_v3 = vsel %vm1020_vm1, %v3267_v2, 0.0  ;;  %v3271_v4 = vld [vmem:[#allocation2 + $0x8] sm:$0xff]  ;;  %1177 = vmatpush.bf16.msra.mxu1 %v2829_v27  ;;  %v2831_v36 = vld [vmem:[%s3212_s23] sm:$0xff]  ;;  %s3712_s5 = scalar_lea.vmem %s3711_s0, %s3165_s1  ;;  %s3722_s10 = sld [smem:[#allocation24_spill]] }
  0x4d   : > { %1022 = vadd.xlane.f32.xlu0 %v1021_v3  ;;  %v1024_v5 = vsel %vm1020_vm1, %v3271_v4, 0.0  ;;  %v2935_v7 = vpop.eup %2934  ;;  %1227 = vmatpush.bf16.msra.mxu2 %v2833_v28  ;;  %v2846_v48 = vld [vmem:[%s3212_s23 + $0x28] sm:$0xff]  ;;  %v2837_v51 = vld [vmem:[%s3187_s6 + $0x20] sm:$0xff]  ;;  %s3713_s6 = sld [smem:[#allocation10_spill]]  ;;  %s3715_s22 = scalar_lea.vmem %s3714_s26, %s3165_s1 }
  0x4e   : > { %v1028_v8 = vmul.f32 64.0, %v2935_v7  ;;  %vm1032_vm2 = vweird.f32 %v2935_v7  ;;  %v2845_v52 = vld [vmem:[%s3212_s23 + $0x20] sm:$0xff]  ;;  %s3728_s26 = sld [smem:[#allocation3_spill]] }
  0x4f   : > { %1128 = vmatpush.bf16.msra.mxu0 %v2824_v29  ;;  %v2921_v61 = vld [vmem:[%s3712_s5] ss:$0 sm:$0xff] }
  0x50   : > { %v1029_v9 = vsub.f32 1.0, %v1028_v8  ;;  %1178 = vmatpush.bf16.msra.mxu1 %v2828_v30  ;;  %v2922_v1 = vld [vmem:[%s3715_s22] ss:$0 sm:$0xff]  ;;  %s3719_s24 = scalar_lea.vmem %s3718_s8, %s3745_s28 }
  0x51   : > { %1228 = vmatpush.bf16.msra.mxu2 %v2832_v31  ;;  %v2927_v31 = vld [vmem:[%s3716_s29 + $0x1] ss:$0 sm:$0xff]  ;;  %s3721_s19 = scalar_lea.vmem %s3720_s2, %s3165_s1 }
  0x52   : > { %v1030_v10 = vmul.f32 %v2935_v7, %v1029_v9  ;;  %s3723_s14 = scalar_lea.vmem %s3722_s10, %s3165_s1 }
  0x53   : > { %1129 = vmatpush.bf16.msra.mxu0 %v2823_v34 }
  0x54   : > { %v1031_v11 = vadd.f32 %v2935_v7, %v1030_v10  ;;  %1179 = vmatpush.bf16.msra.mxu1 %v2827_v35  ;;  %p2795_p8 = scmp.ne.s32.totalorder %s3728_s26, 1 }
  0x55   : > { %1025 = vadd.xlane.f32.xlu0 %v1024_v5  ;;  %1229 = vmatpush.bf16.msra.mxu2 %v2831_v36  ;;  %v1003_v36 = vlaneseq  ;;  %s3729_s22 = sld [smem:[#allocation30_spill]] (!%p2795_p8) }
  0x56   : > { %v3275_v12 = vsel %vm1032_vm2, %v2935_v7, %v1031_v11  ;;  %s3730_s21 = sld [smem:[#allocation28_spill]] (!%p2795_p8) }
  0x57   : > { %1378 = vmatpush.bf16.msrb.mxu0 %v2840_v38  ;;  %v1007_v38 = vand.u32 127, %v1003_v36 }
  0x59   : > { %1482 = vmatpush.bf16.msrb.mxu2 %v2848_v39  ;;  %v2928_v39 = vld [vmem:[%s3719_s24] ss:$0 sm:$0xff] }
  0x5b   : > { %1379 = vmatpush.bf16.msrb.mxu0 %v2839_v42 }
  0x5d   : > { %1483 = vmatpush.bf16.msrb.mxu2 %v2847_v43 }
  0x5f   : > { %1380 = vmatpush.bf16.msrb.mxu0 %v2838_v47 }
  0x61   : > { %1484 = vmatpush.bf16.msrb.mxu2 %v2846_v48 }
  0x63   : > { %1381 = vmatpush.bf16.msrb.mxu0 %v2837_v51 }
  0x65   : > { %1485 = vmatpush.bf16.msrb.mxu2 %v2845_v52 }
  0xc0   : > { %v1023_v13 = vpop.xlane.xlu0 %1022 }
  0xc1   : > { %v1034_v14 = vmul.f32 %v3275_v12, %v1023_v13  ;;  %v2924_v13 = vld [vmem:[%s3713_s6] ss:$0 sm:$0xff] }
  0xc3   : > { %v3279_v15 = vsub.f32 %v3267_v2, %v1034_v14 }
  0xc5   : > { %v1038_v16 = vmul.f32 %v3279_v15, %v3279_v15 }
  0xc7   : > { %v1040_v17 = vsel %vm1020_vm1, %v1038_v16, 0.0 }
  0xc8   : > { %1041 = vadd.xlane.f32.xlu1 %v1040_v17  ;;  %v1026_v18 = vpop.xlane.xlu0 %1025 }
  0xc9   : > { %v1035_v19 = vmul.f32 %v3275_v12, %v1026_v18 }
  0xcb   : > { %v3286_v20 = vsub.f32 %v3271_v4, %v1035_v19  ;;  %v2925_v19 = vld [vmem:[%s3716_s29] ss:$0 sm:$0xff] }
  0xcd   : > { %v1039_v21 = vmul.f32 %v3286_v20, %v3286_v20 }
  0xcf   : > { %v1043_v22 = vsel %vm1020_vm1, %v1039_v21, 0.0  ;;  %v2923_v21 = vld [vmem:[%s3717_s16] ss:$0 sm:$0xff] }
  0xd0   : > { %1044 = vadd.xlane.f32.xlu1 %v1043_v22 }
 0x13b   : > { %v1042_v32 = vpop.xlane.xlu1 %1041 }
 0x13c   : > { %v1046_v33 = vmul.f32 %v1042_v32, %v3275_v12 }
 0x13e   : > { %v1048_v37 = vadd.f32 1e-05, %v1046_v33 }
 0x140   : > { %2936 = vrsqrt.f32 %v1048_v37  ;;  %vm1056_vm4 = vweird.f32 %v1048_v37 }
 0x143   : > { %v1045_v40 = vpop.xlane.xlu1 %1044 }
 0x144   : > { %v1047_v41 = vmul.f32 %v1045_v40, %v3275_v12  ;;  %v3013_v40 = vmov -1e+09  }
 0x146   : > { %v2937_v44 = vpop.eup %2936  ;;  %v1049_v45 = vadd.f32 1e-05, %v1047_v41 }
 0x147   : > { %v1051_v46 = vmul.f32 %v2937_v44, %v1048_v37  ;;  %vm1057_vm3 = vweird.f32 %v2937_v44  ;;  %v1004_v37 = vshrl.u32 %v1003_v36, 7 }
 0x148   : > { %2938 = vrsqrt.f32 %v1049_v45  ;;  %vm1058_vm5 = vmor %vm1056_vm4, %vm1057_vm3  ;;  %vm1066_vm7 = vweird.f32 %v1049_v45 }
 0x149   : > { %v1052_v49 = vmul.f32 %v2937_v44, %v1051_v46  ;;  %vm1008_vm10 = vcmp.le.s32.totalorder %v1007_v38, %v1004_v37  ;;  %v1005_v42 = vadd.s32 8, %v1004_v37 }
 0x14a   : > { %v1010_v41 = vsel %vm1008_vm10, 0.0, %v3013_v40 }
 0x14b   : > { %v1053_v50 = vmul.f32 0.5, %v1052_v49  ;;  %v3348_v43 = vadd.f32 %v2928_v39, %v1010_v41  ;;  %vm1009_vm11 = vcmp.le.s32.totalorder %v1007_v38, %v1005_v42 }
 0x14c   : > { %v1011_v47 = vsel %vm1009_vm11, 0.0, %v3013_v40  ;;  %v2929_v40 = vld [vmem:[%s3713_s6 + $0x1] ss:$0 sm:$0xff]  ;;  %s3724_s6 = scalar_lea.vmem %s3644_s13, %s3165_s1 }
 0x14d   : > { %v1054_v53 = vsub.f32 1.5, %v1053_v50  ;;  %v3352_v49 = vadd.f32 %v2928_v39, %v1011_v47  ;;  %v2926_v47 = vld [vmem:[%s3717_s16 + $0x1] ss:$0 sm:$0xff] }
 0x14e   : > { %v2939_v54 = vpop.eup %2938 }
 0x14f   : > { %v1055_v55 = vmul.f32 %v2937_v44, %v1054_v53  ;;  %v1061_v56 = vmul.f32 %v2939_v54, %v1049_v45  ;;  %vm1067_vm6 = vweird.f32 %v2939_v54 }
 0x150   : > { %vm1068_vm8 = vmor %vm1066_vm7, %vm1067_vm6 }
 0x151   : > { %v1062_v57 = vmul.f32 %v2939_v54, %v1061_v56  ;;  %v1059_v58 = vsel %vm1058_vm5, %v2937_v44, %v1055_v55 }
 0x152   : > { %v1070_v62 = vmul.f32 %v1059_v58, %v3279_v15 }
 0x153   : > { %v1063_v59 = vmul.f32 0.5, %v1062_v57 }
 0x154   : > { %v1075_v3 = vmul.f32 %v2921_v61, %v1070_v62 }
 0x155   : > { %v1064_v60 = vsub.f32 1.5, %v1063_v59 }
 0x156   : > { %v1080_v7 = vadd.f32 %v2922_v1, %v1075_v3  ;;  %v2843_v3 = vld [vmem:[%s3201_s30 + $0x30] sm:$0xff] }
 0x157   : > { %v1065_v63 = vmul.f32 %v2939_v54, %v1064_v60 }
 0x159   : > { %v1069_v0 = vsel %vm1068_vm8, %v2939_v54, %v1065_v63 }
 0x15a   : > { %v1071_v5 = vmul.f32 %v1069_v0, %v3286_v20  ;;  %v2844_v0 = vld [vmem:[%s3201_s30 + $0x38] sm:$0xff] }
 0x15c   : > { %v1076_v6 = vmul.f32 %v2921_v61, %v1071_v5  ;;  %v2842_v5 = vld [vmem:[%s3201_s30 + $0x28] sm:$0xff] }
 0x15e   : > { %v1081_v8 = vadd.f32 %v2922_v1, %v1076_v6 }
 0x160   : > { %v3325_v9 = vpack.c.bf16 %v1081_v8, %v1080_v7 }
 0x162   : > { %2554 = vmatmul.msk.bf16.vlgmr.msra.gmra.mxu0 %vm1020_vm1, %v3325_v9  ;;  %2571 = vmatmul.msk.bf16.vlgmr.msra.gmra.mxu1 %vm1020_vm1, %v3325_v9 }
 0x163   : > { %2588 = vmatmul.msk.bf16.vlgmr.msra.gmra.mxu2 %vm1020_vm1, %v3325_v9 }
 0x172   : > { %2616 = vmatmul.msk.bf16.vlgmr.msrb.gmra.mxu0 %vm1020_vm1, %v3325_v9 }
 0x173   : > { %2668 = vmatmul.msk.bf16.vlgmr.msrb.gmra.mxu2 %vm1020_vm1, %v3325_v9 }
 0x1df   : > { %v1181_v10 = vpop.f32.mrf.mxu1  ;;  %v1131_v11 = vpop.f32.mrf.mxu0 }
 0x1e0   : > { %v1182_v16 = vadd.f32 %v2924_v13, %v1181_v10  ;;  %v1132_v27 = vadd.f32 %v2923_v21, %v1131_v11  ;;  %v2841_v10 = vld [vmem:[%s3201_s30 + $0x20] sm:$0xff] }
 0x1e6   : > { %v1231_v14 = vpop.f32.mrf.mxu2 }
 0x1e7   : > { %v1183_v15 = vpop.f32.mrf.mxu1  ;;  %v1133_v20 = vpop.f32.mrf.mxu0  ;;  %v1232_v25 = vadd.f32 %v2925_v19, %v1231_v14 }
 0x1e8   : > { %v1184_v17 = vadd.f32 %v2924_v13, %v1183_v15  ;;  %v1134_v23 = vadd.f32 %v2923_v21, %v1133_v20 }
 0x1ea   : > { %v1237_v18 = vpack.c.bf16 %v1184_v17, %v1182_v16  ;;  %v1236_v29 = vpack.c.bf16 %v1134_v23, %v1132_v27 }
 0x1ec   : > { %v1243_v22 = vsel %vm1238_vm9, %v1237_v18, 0 }
 0x1ed   : > { %1252 = vmatpush.bf16.xpose.msra.mxu3 %v1243_v22 }
 0x1ee   : > { %v1233_v24 = vpop.f32.mrf.mxu2 }
 0x1ef   : > { %v1234_v26 = vadd.f32 %v2925_v19, %v1233_v24  ;;  %v1383_v39 = vpop.f32.mrf.mxu0 }
 0x1f1   : > { %v1313_v28 = vpack.c.bf16 %v1234_v26, %v1232_v25 }
 0x1f4   : > { %2589 = vmatmul.msk.bf16.vlgmr.msra.gmra.mxu3 %vm1238_vm9, %v1236_v29 }
 0x1f5   : > { %1324 = vmatpush.bf16.msrb.mxu3 %v1313_v28 }
 0x1f6   : > { %v1487_v30 = vpop.f32.mrf.mxu2 }
 0x1f7   : > { %v1488_v33 = vadd.f32 %v2927_v31, %v1487_v30 }
 0x1f9   : > { %1430 = vmatpush.bf16.msra.mxu3 %v2844_v0 }
 0x1fd   : > { %1431 = vmatpush.bf16.msra.mxu3 %v2843_v3 }
 0x1fe   : > { %v1489_v32 = vpop.f32.mrf.mxu2 }
 0x1ff   : > { %v1490_v34 = vadd.f32 %v2927_v31, %v1489_v32 }
 0x201   : > { %v1567_v35 = vpack.c.bf16 %v1490_v34, %v1488_v33  ;;  %1432 = vmatpush.bf16.msra.mxu3 %v2842_v5  ;;  %v2836_v33 = vld [vmem:[%s3224_s3 + $0x8] sm:$0xff]  ;;  %v2835_v34 = vld [vmem:[%s3224_s3] sm:$0xff] }
 0x202   : > { %1641 = vmatpush.bf16.msra.mxu2 %v2836_v33  ;;  %v2850_v33 = vld [vmem:[%s3224_s3 + $0x18] sm:$0xff] }
 0x203   : > { %1578 = vmatpush.bf16.msra.mxu0 %v1567_v35  ;;  %1612 = vmatpush.bf16.msrb.mxu1 %v2850_v33 }
 0x205   : > { %1433 = vmatpush.bf16.msra.mxu3 %v2841_v10 }
 0x206   : > { %1642 = vmatpush.bf16.msra.mxu2 %v2835_v34  ;;  %v2849_v34 = vld [vmem:[%s3224_s3 + $0x10] sm:$0xff] }
 0x207   : > { %1613 = vmatpush.bf16.msrb.mxu1 %v2849_v34 }
 0x277   : > { %v1254_v44 = vpop.f32.mrf.mxu3 }
 0x278   : > { %v1259_v45 = vmul.f32 0.17677669, %v1254_v44 }
 0x27a   : > { %v1261_v46 = vadd.f32 %v1259_v45, %v3348_v43 }
 0x27c   : > { %v1264_v48 = vsel %vm1263_vm12, %v1261_v46, -inf }
 0x27d   : > { %1265 = vmax.xlane.f32.xlu2 %v1264_v48 }
 0x27f   : > { %v1256_v50 = vpop.f32.mrf.mxu3 }
 0x280   : > { %v1260_v51 = vmul.f32 0.17677669, %v1256_v50  ;;  %v1384_v50 = vadd.f32 %v2926_v47, %v1383_v39  ;;  %v2930_v39 = vld [vmem:[%s3721_s19] ss:$0 sm:$0xff] }
 0x282   : > { %v1262_v52 = vadd.f32 %v1260_v51, %v3352_v49 }
 0x284   : > { %v1267_v53 = vsel %vm1263_vm12, %v1262_v52, -inf }
 0x285   : > { %1268 = vmax.xlane.f32.xlu2 %v1267_v53 }
 0x2f0   : > { %v1266_v54 = vpop.xlane.xlu2 %1265 }
 0x2f1   : > { %v1270_v55 = vsub.f32 %v1261_v46, %v1266_v54  ;;  %v1385_v46 = vpop.f32.mrf.mxu0 }
 0x2f2   : > { %v1386_v48 = vadd.f32 %v2926_v47, %v1385_v46 }
 0x2f3   : > { %v1272_v56 = vmul.f32 1.442695, %v1270_v55 }
 0x2f4   : > { %v1492_v51 = vpack.c.bf16 %v1386_v48, %v1384_v50 }
 0x2f5   : > { %2940 = vpow2.f32 %v1272_v56 }
 0x2f8   : > { %v1269_v57 = vpop.xlane.xlu2 %1268 }
 0x2f9   : > { %v1271_v58 = vsub.f32 %v1262_v52, %v1269_v57 }
 0x2fb   : > { %v2941_v59 = vpop.eup %2940  ;;  %v1274_v60 = vmul.f32 1.442695, %v1271_v58 }
 0x2fc   : > { %v1276_v61 = vsel %vm1263_vm12, %v2941_v59, 0.0 }
 0x2fd   : > { %2942 = vpow2.f32 %v1274_v60  ;;  %1277 = vadd.xlane.f32.xlu0 %v1276_v61 }
 0x303   : > { %v2943_v62 = vpop.eup %2942 }
 0x304   : > { %v1279_v63 = vsel %vm1263_vm12, %v2943_v62, 0.0 }
 0x305   : > { %1280 = vadd.xlane.f32.xlu1 %v1279_v63 }
 0x370   : > { %v1278_v1 = vpop.xlane.xlu0 %1277 }
 0x371   : > { %2944 = vrcp.f32 %v1278_v1  ;;  %v1293_v17 = vand.u32 2147483648, %v1278_v1  ;;  %vm1287_vm14 = vweird.f32 %v1278_v1  ;;  %v1291_v18 = vand.u32 2147483647, %v1278_v1 }
 0x373   : > { %v1294_v24 = vor.u32 1.1754944e-38, %v1293_v17  ;;  %vm1292_vm2 = vcmp.eq.f32.partialorder %v1291_v18, 8.507059e+37 }
 0x377   : > { %v2945_v6 = vpop.eup %2944 }
 0x378   : > { %v1283_v7 = vmul.f32 %v2945_v6, %v1278_v1  ;;  %v1281_v8 = vpop.xlane.xlu1 %1280  ;;  %vm1288_vm13 = vweird.f32 %v2945_v6 }
 0x379   : > { %2946 = vrcp.f32 %v1281_v8  ;;  %vm1289_vm15 = vmor %vm1287_vm14, %vm1288_vm13  ;;  %v1308_v20 = vand.u32 2147483648, %v1281_v8  ;;  %v1306_v23 = vand.u32 2147483647, %v1281_v8  ;;  %vm1302_vm3 = vweird.f32 %v1281_v8 }
 0x37a   : > { %v1284_v11 = vsub.f32 1.0, %v1283_v7 }
 0x37b   : > { %v1309_v26 = vor.u32 1.1754944e-38, %v1308_v20  ;;  %vm1307_vm5 = vcmp.eq.f32.partialorder %v1306_v23, 8.507059e+37 }
 0x37c   : > { %v1285_v13 = vmul.f32 %v2945_v6, %v1284_v11 }
 0x37e   : > { %v1286_v15 = vadd.f32 %v2945_v6, %v1285_v13 }
 0x37f   : > { %v2947_v14 = vpop.eup %2946 }
 0x380   : > { %v1298_v16 = vmul.f32 %v2947_v14, %v1281_v8  ;;  %v1290_v21 = vsel %vm1289_vm15, %v2945_v6, %v1286_v15  ;;  %vm1303_vm0 = vweird.f32 %v2947_v14 }
 0x381   : > { %vm1304_vm4 = vmor %vm1302_vm3, %vm1303_vm0  ;;  %v1295_v27 = vsel %vm1292_vm2, %v1294_v24, %v1290_v21 }
 0x382   : > { %v1299_v19 = vsub.f32 1.0, %v1298_v16  ;;  %v1296_v30 = vmul.f32 %v2941_v59, %v1295_v27 }
 0x384   : > { %v1300_v22 = vmul.f32 %v2947_v14, %v1299_v19 }
 0x386   : > { %v1301_v25 = vadd.f32 %v2947_v14, %v1300_v22 }
 0x388   : > { %v1305_v28 = vsel %vm1304_vm4, %v2947_v14, %v1301_v25 }
 0x389   : > { %v1310_v29 = vsel %vm1307_vm5, %v1309_v26, %v1305_v28 }
 0x38a   : > { %v1311_v31 = vmul.f32 %v2943_v62, %v1310_v29 }
 0x38c   : > { %v1312_v32 = vpack.c.bf16 %v1311_v31, %v1296_v30 }
 0x38e   : > { %2590 = vmatmul.msk.bf16.vlgmr.msrb.gmra.mxu3 %vm1263_vm12, %v1312_v32 }
 0x39e   : > { %2642 = vmatmul.msk.bf16.vlgmr.msra.gmra.mxu3 %vm1020_vm1, %v3325_v9 }
 0x411   : > { %v1326_v35 = vpop.f32.mrf.mxu3 }
 0x419   : > { %v1328_v36 = vpop.f32.mrf.mxu3 }
 0x41a   : > { %v1335_v37 = vpack.c.bf16 %v1328_v36, %v1326_v35 }
 0x41c   : > { %2692 = vmatmul.msk.bf16.vlgmr.msra.gmra.mxu2 %vm1238_vm9, %v1335_v37 }
 0x421   : > { %v1435_v38 = vpop.f32.mrf.mxu3 }
 0x422   : > { %v1436_v42 = vadd.f32 %v2929_v40, %v1435_v38 }
 0x429   : > { %v1437_v41 = vpop.f32.mrf.mxu3 }
 0x42a   : > { %v1438_v44 = vadd.f32 %v2929_v40, %v1437_v41 }
 0x42c   : > { %v1493_v45 = vpack.c.bf16 %v1438_v44, %v1436_v42 }
 0x42e   : > { %v1498_v9 = vsel %vm1238_vm9, %v1493_v45, 0 }
 0x42f   : > { %1507 = vmatpush.bf16.xpose.msrb.mxu3 %v1498_v9 }
 0x436   : > { %2669 = vmatmul.msk.bf16.vlgmr.msrb.gmra.mxu3 %vm1238_vm9, %v1492_v51 }
 0x49f   : > { %v1644_v38 = vpop.f32.mrf.mxu2 }
 0x4a7   : > { %v1646_v46 = vpop.f32.mrf.mxu2 }
 0x4b9   : > { %v1509_v52 = vpop.f32.mrf.mxu3 }
 0x4ba   : > { %v1514_v53 = vmul.f32 0.17677669, %v1509_v52 }
 0x4bc   : > { %v1516_v54 = vadd.f32 %v1514_v53, %v3348_v43 }
 0x4be   : > { %v1518_v55 = vsel %vm1263_vm12, %v1516_v54, -inf }
 0x4bf   : > { %1519 = vmax.xlane.f32.xlu2 %v1518_v55 }
 0x4c1   : > { %v1511_v56 = vpop.f32.mrf.mxu3 }
 0x4c2   : > { %v1515_v57 = vmul.f32 0.17677669, %v1511_v56 }
 0x4c4   : > { %v1517_v58 = vadd.f32 %v1515_v57, %v3352_v49 }
 0x4c6   : > { %v1521_v59 = vsel %vm1263_vm12, %v1517_v58, -inf }
 0x4c7   : > { %1522 = vmax.xlane.f32.xlu0 %v1521_v59 }
 0x532   : > { %v1520_v60 = vpop.xlane.xlu2 %1519 }
 0x533   : > { %v1524_v61 = vsub.f32 %v1516_v54, %v1520_v60  ;;  %v2719_v60 = vld [vmem:[%s3241_s27 + $0x30] sm:$0xf] }
 0x535   : > { %v1526_v62 = vmul.f32 1.442695, %v1524_v61  ;;  %v2858_v61 = vld [vmem:[%s3241_s27 + $0x34] sm:$0xf0] }
 0x537   : > { %2948 = vpow2.f32 %v1526_v62  ;;  %v2857_v62 = vld [vmem:[%s3241_s27 + $0x34] sm:$0xf] }
 0x53a   : > { %v1523_v63 = vpop.xlane.xlu0 %1522 }
 0x53b   : > { %v1525_v0 = vsub.f32 %v1517_v58, %v1523_v63  ;;  %v2720_v63 = vor.u32 %v2858_v61, %v2719_v60 }
 0x53d   : > { %v2949_v1 = vpop.eup %2948  ;;  %v1528_v3 = vmul.f32 1.442695, %v1525_v0  ;;  %v2721_v0 = vld [vmem:[%s3241_s27 + $0x38] sm:$0xf0]  ;;  %1775 = vmatpush.bf16.msra.mxu3 %v2720_v63 }
 0x53e   : > { %v1530_v43 = vsel %vm1263_vm12, %v2949_v1, 0.0 }
 0x53f   : > { %2950 = vpow2.f32 %v1528_v3  ;;  %1531 = vadd.xlane.f32.xlu1 %v1530_v43  ;;  %v2711_v3 = vld [vmem:[%s3241_s27 + $0x20] sm:$0xf]  ;;  %v2856_v43 = vld [vmem:[%s3241_s27 + $0x24] sm:$0xf0] }
 0x545   : > { %v2951_v5 = vpop.eup %2950 }
 0x546   : > { %v1533_v6 = vsel %vm1263_vm12, %v2951_v5, 0.0 }
 0x547   : > { %1534 = vadd.xlane.f32.xlu2 %v1533_v6  ;;  %v2712_v6 = vor.u32 %v2856_v43, %v2711_v3 }
 0x549   : > { %1776 = vmatpush.bf16.msra.mxu3 %v2712_v6  ;;  %v2873_v6 = vld [vmem:[%s3255_s12 + $0x70] sm:$0xff] }
 0x5b2   : > { %v1532_v49 = vpop.xlane.xlu1 %1531 }
 0x5b3   : > { %2952 = vrcp.f32 %v1532_v49  ;;  %v1547_v17 = vand.u32 2147483648, %v1532_v49  ;;  %vm1541_vm7 = vweird.f32 %v1532_v49  ;;  %v1545_v18 = vand.u32 2147483647, %v1532_v49 }
 0x5b5   : > { %v1548_v24 = vor.u32 1.1754944e-38, %v1547_v17  ;;  %vm1546_vm11 = vcmp.eq.f32.partialorder %v1545_v18, 8.507059e+37  ;;  %v2695_v18 = vld [vmem:[%s3241_s27] sm:$0xf] }
 0x5b9   : > { %v2953_v7 = vpop.eup %2952 }
 0x5ba   : > { %v1537_v8 = vmul.f32 %v2953_v7, %v1532_v49  ;;  %v1535_v10 = vpop.xlane.xlu2 %1534  ;;  %vm1542_vm6 = vweird.f32 %v2953_v7  ;;  %v2713_v49 = vld [vmem:[%s3241_s27 + $0x28] sm:$0xf0] }
 0x5bb   : > { %2954 = vrcp.f32 %v1535_v10  ;;  %vm1543_vm8 = vmor %vm1541_vm7, %vm1542_vm6  ;;  %v1562_v20 = vand.u32 2147483648, %v1535_v10  ;;  %v1560_v23 = vand.u32 2147483647, %v1535_v10  ;;  %vm1556_vm13 = vweird.f32 %v1535_v10 }
 0x5bc   : > { %v1538_v11 = vsub.f32 1.0, %v1537_v8  ;;  %v2703_v8 = vld [vmem:[%s3241_s27 + $0x10] sm:$0xf] }
 0x5bd   : > { %v1563_v27 = vor.u32 1.1754944e-38, %v1562_v20  ;;  %vm1561_vm15 = vcmp.eq.f32.partialorder %v1560_v23, 8.507059e+37  ;;  %v2851_v20 = vld [vmem:[%s3241_s27 + $0x4] sm:$0xf]  ;;  %v2697_v23 = vld [vmem:[%s3241_s27 + $0x8] sm:$0xf0] }
 0x5be   : > { %v1539_v13 = vmul.f32 %v2953_v7, %v1538_v11  ;;  %v2853_v11 = vld [vmem:[%s3241_s27 + $0x14] sm:$0xf] }
 0x5c0   : > { %v1540_v15 = vadd.f32 %v2953_v7, %v1539_v13 }
 0x5c1   : > { %v2955_v14 = vpop.eup %2954 }
 0x5c2   : > { %v1552_v16 = vmul.f32 %v2955_v14, %v1535_v10  ;;  %v1544_v21 = vsel %vm1543_vm8, %v2953_v7, %v1540_v15  ;;  %vm1557_vm10 = vweird.f32 %v2955_v14  ;;  %v2854_v10 = vld [vmem:[%s3241_s27 + $0x14] sm:$0xf0] }
 0x5c3   : > { %v1549_v26 = vsel %vm1546_vm11, %v1548_v24, %v1544_v21  ;;  %vm1558_vm14 = vmor %vm1556_vm13, %vm1557_vm10  ;;  %v2704_v13 = vor.u32 %v2854_v10, %v2703_v8  ;;  %v2700_v24 = vor.u32 %v2851_v20, %v2697_v23 }
 0x5c4   : > { %v1553_v19 = vsub.f32 1.0, %v1552_v16  ;;  %v1550_v30 = vmul.f32 %v2949_v1, %v1549_v26  ;;  %v2724_v1 = vor.u32 %v2857_v62, %v2721_v0  ;;  %v2874_v62 = vld [vmem:[%s3255_s12 + $0x78] sm:$0xff] }
 0x5c5   : > { %1777 = vmatpush.bf16.msra.mxu3 %v2704_v13  ;;  %2119 = vmatpush.bf16.msrb.mxu2 %v2874_v62  ;;  %v2869_v62 = vld [vmem:[%s3255_s12 + $0x50] sm:$0xff] }
 0x5c6   : > { %v1554_v22 = vmul.f32 %v2955_v14, %v1553_v19  ;;  %1789 = vmatpush.bf16.msrb.mxu0 %v2724_v1  ;;  %v2852_v19 = vld [vmem:[%s3241_s27 + $0x4] sm:$0xf0] }
 0x5c8   : > { %v1555_v25 = vadd.f32 %v2955_v14, %v1554_v22  ;;  %v2696_v22 = vor.u32 %v2852_v19, %v2695_v18  ;;  %v2872_v18 = vld [vmem:[%s3255_s12 + $0x68] sm:$0xff] }
 0x5c9   : > { %2120 = vmatpush.bf16.msrb.mxu2 %v2873_v6 }
 0x5ca   : > { %v1559_v28 = vsel %vm1558_vm14, %v2955_v14, %v1555_v25  ;;  %v2705_v14 = vld [vmem:[%s3241_s27 + $0x18] sm:$0xf0]  ;;  %1778 = vmatpush.bf16.msra.mxu3 %v2696_v22 }
 0x5cb   : > { %v1564_v29 = vsel %vm1561_vm15, %v1563_v27, %v1559_v28  ;;  %v2708_v16 = vor.u32 %v2853_v11, %v2705_v14  ;;  %v2866_v11 = vld [vmem:[%s3255_s12 + $0x38] sm:$0xff] }
 0x5cc   : > { %v1565_v31 = vmul.f32 %v2951_v5, %v1564_v29  ;;  %v2855_v5 = vld [vmem:[%s3241_s27 + $0x24] sm:$0xf]  ;;  %2105 = vmatpush.bf16.msra.mxu1 %v2866_v11  ;;  %s3731_s27 = sld [smem:[#allocation29_spill]] (!%p2795_p8) }
 0x5cd   : > { %v2716_v7 = vor.u32 %v2855_v5, %v2713_v49  ;;  %2121 = vmatpush.bf16.msrb.mxu2 %v2872_v18 }
 0x5ce   : > { %v1566_v32 = vpack.c.bf16 %v1565_v31, %v1550_v30 }
 0x5cf   : > { %1790 = vmatpush.bf16.msrb.mxu0 %v2716_v7 }
 0x5d0   : > { %2670 = vmatmul.msk.bf16.vlgmr.msra.gmra.mxu0 %vm1263_vm12, %v1566_v32 }
 0x5d3   : > { %1791 = vmatpush.bf16.msrb.mxu0 %v2708_v16 }
 0x5d7   : > { %1792 = vmatpush.bf16.msrb.mxu0 %v2700_v24  ;;  %v2865_v24 = vld [vmem:[%s3255_s12 + $0x30] sm:$0xff] }
 0x5d8   : > { %2106 = vmatpush.bf16.msra.mxu1 %v2865_v24  ;;  %v2861_v24 = vld [vmem:[%s3255_s12 + $0x10] sm:$0xff] }
 0x64d   : > { %v1580_v35 = vpop.f32.mrf.mxu0 }
 0x655   : > { %v1582_v36 = vpop.f32.mrf.mxu0 }
 0x656   : > { %v1590_v37 = vpack.c.bf16 %v1582_v36, %v1580_v35 }
 0x658   : > { %2683 = vmatmul.msk.bf16.vlgmr.msrb.gmra.mxu1 %vm1238_vm9, %v1590_v37 }
 0x6d5   : > { %v1615_v40 = vpop.f32.mrf.mxu1 }
 0x6d6   : > { %v1645_v41 = vadd.f32 %v1644_v38, %v1615_v40  ;;  %v2931_v40 = vld [vmem:[%s3723_s14] ss:$0 sm:$0xff] }
 0x6d8   : > { %v1653_v42 = vadd.f32 %v2930_v39, %v1645_v41 }
 0x6da   : > { %v3388_v44 = vadd.f32 %v1653_v42, %v3267_v2 }
 0x6dc   : > { %v1659_v45 = vsel %vm1020_vm1, %v3388_v44, 0.0 }
 0x6dd   : > { %v1617_v47 = vpop.f32.mrf.mxu1  ;;  %1660 = vadd.xlane.f32.xlu0 %v1659_v45 }
 0x6de   : > { %v1647_v9 = vadd.f32 %v1646_v46, %v1617_v47  ;;  %v2932_v46 = vld [vmem:[%s3724_s6] ss:$0 sm:$0xff] }
 0x6e0   : > { %v1654_v48 = vadd.f32 %v2930_v39, %v1647_v9 }
 0x6e2   : > { %v3393_v50 = vadd.f32 %v1654_v48, %v3271_v4 }
 0x6e4   : > { %v1662_v51 = vsel %vm1020_vm1, %v3393_v50, 0.0 }
 0x6e5   : > { %1663 = vadd.xlane.f32.xlu1 %v1662_v51 }
 0x750   : > { %v1661_v2 = vpop.xlane.xlu0 %1660 }
 0x751   : > { %v1665_v52 = vmul.f32 %v1661_v2, %v3275_v12 }
 0x753   : > { %v3399_v53 = vsub.f32 %v3388_v44, %v1665_v52 }
 0x755   : > { %v1669_v54 = vmul.f32 %v3399_v53, %v3399_v53 }
 0x757   : > { %v1671_v55 = vsel %vm1020_vm1, %v1669_v54, 0.0 }
 0x758   : > { %v1664_v4 = vpop.xlane.xlu1 %1663  ;;  %1672 = vadd.xlane.f32.xlu2 %v1671_v55 }
 0x759   : > { %v1666_v56 = vmul.f32 %v1664_v4, %v3275_v12 }
 0x75b   : > { %v3406_v57 = vsub.f32 %v3393_v50, %v1666_v56 }
 0x75d   : > { %v1670_v58 = vmul.f32 %v3406_v57, %v3406_v57 }
 0x75f   : > { %v1674_v59 = vsel %vm1020_vm1, %v1670_v58, 0.0 }
 0x760   : > { %1675 = vadd.xlane.f32.xlu0 %v1674_v59 }
 0x7cb   : > { %v1673_v15 = vpop.xlane.xlu2 %1672 }
 0x7cc   : > { %v1677_v17 = vmul.f32 %v1673_v15, %v3275_v12 }
 0x7ce   : > { %v1679_v21 = vadd.f32 1e-05, %v1677_v17 }
 0x7d0   : > { %2956 = vrsqrt.f32 %v1679_v21  ;;  %vm1687_vm12 = vweird.f32 %v1679_v21 }
 0x7d3   : > { %v1676_v25 = vpop.xlane.xlu0 %1675 }
 0x7d4   : > { %v1678_v26 = vmul.f32 %v1676_v25, %v3275_v12 }
 0x7d6   : > { %v2957_v27 = vpop.eup %2956  ;;  %v1680_v28 = vadd.f32 1e-05, %v1678_v26 }
 0x7d7   : > { %v1682_v29 = vmul.f32 %v2957_v27, %v1679_v21  ;;  %vm1688_vm9 = vweird.f32 %v2957_v27 }
 0x7d8   : > { %2958 = vrsqrt.f32 %v1680_v28  ;;  %vm1689_vm0 = vmor %vm1687_vm12, %vm1688_vm9  ;;  %vm1697_vm3 = vweird.f32 %v1680_v28 }
 0x7d9   : > { %v1683_v30 = vmul.f32 %v2957_v27, %v1682_v29 }
 0x7db   : > { %v1684_v31 = vmul.f32 0.5, %v1683_v30 }
 0x7dd   : > { %v1685_v32 = vsub.f32 1.5, %v1684_v31 }
 0x7de   : > { %v2959_v33 = vpop.eup %2958 }
 0x7df   : > { %v1686_v34 = vmul.f32 %v2957_v27, %v1685_v32  ;;  %v1692_v35 = vmul.f32 %v2959_v33, %v1680_v28  ;;  %vm1698_vm2 = vweird.f32 %v2959_v33 }
 0x7e0   : > { %vm1699_vm4 = vmor %vm1697_vm3, %vm1698_vm2 }
 0x7e1   : > { %v1693_v36 = vmul.f32 %v2959_v33, %v1692_v35  ;;  %v1690_v37 = vsel %vm1689_vm0, %v2957_v27, %v1686_v34 }
 0x7e2   : > { %v1701_v41 = vmul.f32 %v1690_v37, %v3399_v53  ;;  %v1722_v53 = vld [vmem:[%s974_s20] sm:$0x3] }
 0x7e3   : > { %v1694_v38 = vmul.f32 0.5, %v1693_v36  ;;  %v1725_v54 = vperm.slane %v1722_v53, 1 }
 0x7e4   : > { %v1706_v47 = vmul.f32 %v2931_v40, %v1701_v41 }
 0x7e5   : > { %v1695_v39 = vsub.f32 1.5, %v1694_v38  ;;  %v2864_v38 = vld [vmem:[%s3255_s12 + $0x28] sm:$0xff] }
 0x7e6   : > { %v1711_v51 = vadd.f32 %v2932_v46, %v1706_v47  ;;  %2107 = vmatpush.bf16.msra.mxu1 %v2864_v38 }
 0x7e7   : > { %v1696_v42 = vmul.f32 %v2959_v33, %v1695_v39 }
 0x7e9   : > { %v1700_v45 = vsel %vm1699_vm4, %v2959_v33, %v1696_v42  ;;  %v2871_v33 = vld [vmem:[%s3255_s12 + $0x60] sm:$0xff] }
 0x7ea   : > { %v1702_v9 = vmul.f32 %v1700_v45, %v3406_v57  ;;  %v1724_v57 = vperm.slane %v1722_v53, 0  ;;  %2122 = vmatpush.bf16.msrb.mxu2 %v2871_v33  ;;  %v2863_v53 = vld [vmem:[%s3255_s12 + $0x20] sm:$0xff] }
 0x7eb   : > { %2108 = vmatpush.bf16.msra.mxu1 %v2863_v53 }
 0x7ec   : > { %v1707_v48 = vmul.f32 %v2931_v40, %v1702_v9  ;;  %v2870_v9 = vld [vmem:[%s3255_s12 + $0x58] sm:$0xff] }
 0x7ee   : > { %v1712_v2 = vadd.f32 %v2932_v46, %v1707_v48  ;;  %2123 = vmatpush.bf16.msrb.mxu2 %v2870_v9 }
 0x7f0   : > { %v1721_v52 = vpack.c.bf16 %v1712_v2, %v1711_v51 }
 0x7f2   : > { %2725 = vmatmul.msk.bf16.vlgmr.msra.gmra.mxu3 %vm1020_vm1, %v1721_v52  ;;  %2726 = vmatmul.msk.bf16.vlgmr.msrb.gmra.mxu0 %vm1020_vm1, %v1721_v52 }
 0x7f3   : > { %2124 = vmatpush.bf16.msrb.mxu2 %v2869_v62 }
 0x86f   : > { %v1794_v55 = vpop.f32.mrf.mxu0 }
 0x870   : > { %v3448_v4 = vadd.f32 %v1794_v55, %v1725_v54 }
 0x872   : > { %v3451_v56 = vmul.f32 0.70710677, %v3448_v4 }
 0x874   : > { %v1847_v58 = vmul.f32 %v3451_v56, %v3451_v56 }
 0x875   : > { %v1780_v59 = vpop.f32.mrf.mxu3 }
 0x876   : > { %v3455_v60 = vmin.f32 %v1847_v58, 16.0  ;;  %v3457_v61 = vadd.f32 %v1780_v59, %v1724_v57 }
 0x877   : > { %v1796_v63 = vpop.f32.mrf.mxu0 }
 0x878   : > { %v1849_v0 = vmul.f32 2.1237322e-06, %v3455_v60  ;;  %v1860_v1 = vmul.f32 3.8918573e-05, %v3455_v60  ;;  %v3462_v3 = vadd.f32 %v1796_v63, %v1725_v54  ;;  %v3465_v43 = vmul.f32 0.70710677, %v3457_v61 }
 0x87a   : > { %v1861_v5 = vadd.f32 0.001143296, %v1860_v1  ;;  %v1850_v49 = vadd.f32 0.00028619796, %v1849_v0  ;;  %v1807_v7 = vmul.f32 %v3465_v43, %v3465_v43  ;;  %v3471_v8 = vmul.f32 0.70710677, %v3462_v3 }
 0x87c   : > { %v1862_v10 = vmul.f32 %v1861_v5, %v3455_v60  ;;  %v3475_v13 = vmin.f32 %v1807_v7, 16.0  ;;  %v1927_v14 = vmul.f32 %v3471_v8, %v3471_v8  ;;  %v1851_v19 = vmul.f32 %v1850_v49, %v3455_v60  ;;  %v2862_v49 = vld [vmem:[%s3255_s12 + $0x18] sm:$0xff] }
 0x87d   : > { %v1782_v15 = vpop.f32.mrf.mxu3  ;;  %2109 = vmatpush.bf16.msra.mxu1 %v2862_v49 }
 0x87e   : > { %v1863_v16 = vadd.f32 0.014752088, %v1862_v10  ;;  %v3479_v17 = vadd.f32 %v1782_v15, %v1724_v57  ;;  %v1820_v20 = vmul.f32 3.8918573e-05, %v3475_v13  ;;  %v3484_v21 = vmin.f32 %v1927_v14, 16.0  ;;  %v2868_v14 = vld [vmem:[%s3255_s12 + $0x48] sm:$0xff] }
 0x87f   : > { %v1809_v25 = vmul.f32 2.1237322e-06, %v3475_v13  ;;  %v1852_v31 = vadd.f32 0.0036580483, %v1851_v19  ;;  %2125 = vmatpush.bf16.msrb.mxu2 %v2868_v14 }
 0x880   : > { %v1864_v22 = vmul.f32 %v1863_v16, %v3455_v60  ;;  %v3488_v23 = vmul.f32 0.70710677, %v3479_v17  ;;  %v1821_v26 = vadd.f32 0.001143296, %v1820_v20  ;;  %v1929_v27 = vmul.f32 2.1237322e-06, %v3484_v21 }
 0x881   : > { %v1940_v29 = vmul.f32 3.8918573e-05, %v3484_v21  ;;  %v1810_v39 = vadd.f32 0.00028619796, %v1809_v25  ;;  %v1853_v48 = vmul.f32 %v1852_v31, %v3455_v60  ;;  %2110 = vmatpush.bf16.msra.mxu1 %v2861_v24 }
 0x882   : > { %v1865_v28 = vadd.f32 0.112945676, %v1864_v22  ;;  %v1887_v30 = vmul.f32 %v3488_v23, %v3488_v23  ;;  %v1822_v32 = vmul.f32 %v1821_v26, %v3475_v13  ;;  %v1930_v35 = vadd.f32 0.00028619796, %v1929_v27 }
 0x883   : > { %v1941_v36 = vadd.f32 0.001143296, %v1940_v29  ;;  %v1811_v54 = vmul.f32 %v1810_v39, %v3475_v13  ;;  %v1854_v1 = vadd.f32 0.05243302, %v1853_v48  ;;  %v2859_v48 = vld [vmem:[%s3255_s12] sm:$0xff] }
 0x884   : > { %v1866_v34 = vmul.f32 %v1865_v28, %v3455_v60  ;;  %v3499_v37 = vmin.f32 %v1887_v30, 16.0  ;;  %v1823_v40 = vadd.f32 0.014752088, %v1822_v32  ;;  %v1931_v2 = vmul.f32 %v1930_v35, %v3484_v21  ;;  %v2867_v30 = vld [vmem:[%s3255_s12 + $0x40] sm:$0xff]  ;;  %v2860_v35 = vld [vmem:[%s3255_s12 + $0x8] sm:$0xff] }
 0x885   : > { %v1942_v42 = vmul.f32 %v1941_v36, %v3484_v21  ;;  %v1812_v7 = vadd.f32 0.0036580483, %v1811_v54  ;;  %v1855_v18 = vmul.f32 %v1854_v1, %v3455_v60  ;;  %2126 = vmatpush.bf16.msrb.mxu2 %v2867_v30  ;;  %2111 = vmatpush.bf16.msra.mxu1 %v2860_v35 }
 0x886   : > { %v1867_v41 = vadd.f32 0.4994258, %v1866_v34  ;;  %v1824_v45 = vmul.f32 %v1823_v40, %v3475_v13  ;;  %v1889_v46 = vmul.f32 2.1237322e-06, %v3499_v37  ;;  %v1900_v47 = vmul.f32 3.8918573e-05, %v3499_v37 }
 0x887   : > { %v1943_v52 = vadd.f32 0.014752088, %v1942_v42  ;;  %v1932_v5 = vadd.f32 0.0036580483, %v1931_v2  ;;  %v1813_v25 = vmul.f32 %v1812_v7, %v3475_v13  ;;  %v1856_v33 = vadd.f32 0.18741608, %v1855_v18 }
 0x888   : > { %v1868_v51 = vmul.f32 %v1867_v41, %v3455_v60  ;;  %v1825_v55 = vadd.f32 0.112945676, %v1824_v45  ;;  %v1901_v57 = vadd.f32 0.001143296, %v1900_v47  ;;  %v1890_v0 = vadd.f32 0.00028619796, %v1889_v46 }
 0x889   : > { %v1944_v59 = vmul.f32 %v1943_v52, %v3484_v21  ;;  %v1933_v19 = vmul.f32 %v1932_v5, %v3484_v21  ;;  %v1814_v38 = vadd.f32 0.05243302, %v1813_v25  ;;  %v1857_v47 = vmul.f32 %v1856_v33, %v3455_v60  ;;  %2112 = vmatpush.bf16.msra.mxu1 %v2859_v48 }
 0x88a   : > { %v3512_v58 = vadd.f32 1.0, %v1868_v51  ;;  %v1826_v63 = vmul.f32 %v1825_v55, %v3475_v13  ;;  %v1902_v6 = vmul.f32 %v1901_v57, %v3499_v37  ;;  %v1891_v16 = vmul.f32 %v1890_v0, %v3499_v37 }
 0x88b   : > { %v1945_v11 = vadd.f32 0.112945676, %v1944_v59  ;;  %v1934_v34 = vadd.f32 0.05243302, %v1933_v19  ;;  %v1815_v52 = vmul.f32 %v1814_v38, %v3475_v13 }
 0x88c   : > { %2960 = vrcp.f32 %v3512_v58  ;;  %v1827_v10 = vadd.f32 0.4994258, %v1826_v63  ;;  %v1903_v22 = vadd.f32 0.014752088, %v1902_v6  ;;  %v1892_v32 = vadd.f32 0.0036580483, %v1891_v16 }
 0x88d   : > { %v1946_v20 = vmul.f32 %v1945_v11, %v3484_v21  ;;  %v1935_v9 = vmul.f32 %v1934_v34, %v3484_v21  ;;  %v1881_v53 = vand.u32 2147483648, %v3512_v58  ;;  %vm1875_vm6 = vweird.f32 %v3512_v58 }
 0x88e   : > { %v1828_v15 = vmul.f32 %v1827_v10, %v3475_v13  ;;  %v1904_v29 = vmul.f32 %v1903_v22, %v3499_v37  ;;  %v1893_v45 = vmul.f32 %v1892_v32, %v3499_v37  ;;  %v1879_v55 = vand.u32 2147483647, %v3512_v58 }
 0x88f   : > { %v1947_v28 = vadd.f32 0.4994258, %v1946_v20  ;;  %v1936_v62 = vadd.f32 0.18741608, %v1935_v9  ;;  %v1858_v63 = vadd.f32 1.1283791, %v1857_v47 }
 0x890   : > { %v3528_v26 = vadd.f32 1.0, %v1828_v15  ;;  %v1905_v40 = vadd.f32 0.112945676, %v1904_v29  ;;  %v1894_v60 = vadd.f32 0.05243302, %v1893_v45  ;;  %v1882_v6 = vor.u32 1.1754944e-38, %v1881_v53 }
 0x891   : > { %v1948_v39 = vmul.f32 %v1947_v28, %v3484_v21  ;;  %v1816_v1 = vadd.f32 0.18741608, %v1815_v52  ;;  %vm1880_vm8 = vcmp.eq.f32.partialorder %v1879_v55, 8.507059e+37  ;;  %v1859_v16 = vmul.f32 %v1858_v63, %v3451_v56 }
 0x892   : > { %v2961_v27 = vpop.eup %2960  ;;  %2962 = vrcp.f32 %v3528_v26  ;;  %v1906_v46 = vmul.f32 %v1905_v40, %v3499_v37  ;;  %v1895_v10 = vmul.f32 %v1894_v60, %v3499_v37  ;;  %vm1835_vm10 = vweird.f32 %v3528_v26 }
 0x893   : > { %v1871_v31 = vmul.f32 %v2961_v27, %v3512_v58  ;;  %v3536_v42 = vadd.f32 1.0, %v1948_v39  ;;  %vm1876_vm5 = vweird.f32 %v2961_v27  ;;  %v1937_v58 = vmul.f32 %v1936_v62, %v3484_v21 }
 0x894   : > { %v1907_v57 = vadd.f32 0.4994258, %v1906_v46  ;;  %vm1877_vm7 = vmor %vm1875_vm6, %vm1876_vm5  ;;  %v1817_v18 = vmul.f32 %v1816_v1, %v3475_v13  ;;  %v1839_v20 = vand.u32 2147483647, %v3528_v26  ;;  %v1841_v25 = vand.u32 2147483648, %v3528_v26 }
 0x895   : > { %v1872_v36 = vsub.f32 1.0, %v1871_v31  ;;  %2964 = vrcp.f32 %v3536_v42  ;;  %v1896_v21 = vadd.f32 0.18741608, %v1895_v10  ;;  %v1938_v28 = vadd.f32 1.1283791, %v1937_v58 }
 0x896   : > { %v1908_v5 = vmul.f32 %v1907_v57, %v3499_v37  ;;  %v1959_v56 = vand.u32 2147483647, %v3536_v42  ;;  %v1818_v13 = vadd.f32 1.1283791, %v1817_v18  ;;  %vm1840_vm15 = vcmp.eq.f32.partialorder %v1839_v20, 8.507059e+37 }
 0x897   : > { %v1873_v41 = vmul.f32 %v2961_v27, %v1872_v36  ;;  %vm1955_vm9 = vweird.f32 %v3536_v42  ;;  %v1842_v35 = vor.u32 1.1754944e-38, %v1841_v25  ;;  %v1897_v38 = vmul.f32 %v1896_v21, %v3499_v37  ;;  %v2933_v18 = vld [vmem:[%s982_s11] ss:$0 sm:$0xff] }
 0x898   : > { %v2963_v51 = vpop.eup %2962  ;;  %v1909_v11 = vadd.f32 1.0, %v1908_v5  ;;  %vm1960_vm0 = vcmp.eq.f32.partialorder %v1959_v56, 8.507059e+37  ;;  %v1819_v46 = vmul.f32 %v1818_v13, %v3465_v43  ;;  %v1800_v37 = vmul.f32 0.5, %v3448_v4 }
 0x899   : > { %v1874_v2 = vadd.f32 %v2961_v27, %v1873_v41  ;;  %v1831_v54 = vmul.f32 %v2963_v51, %v3528_v26  ;;  %vm1836_vm11 = vweird.f32 %v2963_v51  ;;  %v1939_v26 = vmul.f32 %v1938_v28, %v3471_v8 }
 0x89a   : > { %2966 = vrcp.f32 %v1909_v11  ;;  %vm3562_vm14 = vmor %vm1835_vm10, %vm1836_vm11  ;;  %v1802_v8 = vmul.f32 0.5, %v3462_v3  ;;  %vm1915_vm3 = vweird.f32 %v1909_v11  ;;  %v1799_v3 = vmul.f32 0.5, %v3457_v61 }
 0x89b   : > { %v1832_v59 = vsub.f32 1.0, %v1831_v54  ;;  %v1878_v0 = vsel %vm1877_vm7, %v2961_v27, %v1874_v2  ;;  %v2965_v7 = vpop.eup %2964  ;;  %v1961_v27 = vand.u32 2147483648, %v3536_v42  ;;  %v1921_v2 = vand.u32 2147483648, %v1909_v11 }
 0x89c   : > { %v1883_v14 = vsel %vm1880_vm8, %v1882_v6, %v1878_v0  ;;  %v1951_v15 = vmul.f32 %v2965_v7, %v3536_v42  ;;  %vm1956_vm13 = vweird.f32 %v2965_v7  ;;  %v1898_v42 = vadd.f32 1.1283791, %v1897_v38 }
 0x89d   : > { %v1833_v49 = vmul.f32 %v2963_v51, %v1832_v59  ;;  %v1884_v24 = vmul.f32 %v1883_v14, %v1859_v16  ;;  %vm1957_vm12 = vmor %vm1955_vm9, %vm1956_vm13  ;;  %v1962_v36 = vor.u32 1.1754944e-38, %v1961_v27  ;;  %v1922_v59 = vor.u32 1.1754944e-38, %v1921_v2 }
 0x89e   : > { %v1952_v22 = vsub.f32 1.0, %v1951_v15  ;;  %v1899_v43 = vmul.f32 %v1898_v42, %v3488_v23 }
 0x89f   : > { %v1834_v19 = vadd.f32 %v2963_v51, %v1833_v49  ;;  %v2728_v34 = vclamps-f32 %v1884_v24, 1.0 }
 0x8a0   : > { %v1953_v29 = vmul.f32 %v2965_v7, %v1952_v22  ;;  %v2967_v33 = vpop.eup %2966 }
 0x8a1   : > { %v1838_v31 = vsel %vm3562_vm14, %v2963_v51, %v1834_v19  ;;  %v1911_v40 = vmul.f32 %v2967_v33, %v1909_v11  ;;  %v1968_v48 = vadd.f32 1.0, %v2728_v34  ;;  %v1919_v51 = vand.u32 2147483647, %v1909_v11 }
 0x8a2   : > { %v1954_v32 = vadd.f32 %v2965_v7, %v1953_v29  ;;  %v1843_v41 = vsel %vm1840_vm15, %v1842_v35, %v1838_v31  ;;  %vm1916_vm2 = vweird.f32 %v2967_v33 }
 0x8a3   : > { %v1912_v9 = vsub.f32 1.0, %v1911_v40  ;;  %v1844_v52 = vmul.f32 %v1843_v41, %v1819_v46  ;;  %v1972_v57 = vmul.f32 %v1968_v48, %v1800_v37  ;;  %vm1917_vm4 = vmor %vm1915_vm3, %vm1916_vm2  ;;  %vm1920_vm5 = vcmp.eq.f32.partialorder %v1919_v51, 8.507059e+37 }
 0x8a4   : > { %v1958_v39 = vsel %vm1957_vm12, %v2965_v7, %v1954_v32  ;;  %v1801_v7 = vmul.f32 0.5, %v3479_v17 }
 0x8a5   : > { %v1963_v45 = vsel %vm1960_vm0, %v1962_v36, %v1958_v39  ;;  %v1913_v54 = vmul.f32 %v2967_v33, %v1912_v9  ;;  %v2727_v62 = vclamps-f32 %v1844_v52, 1.0 }
 0x8a6   : > { %v1964_v47 = vmul.f32 %v1963_v45, %v1939_v26 }
 0x8a7   : > { %v1914_v60 = vadd.f32 %v2967_v33, %v1913_v54  ;;  %v1967_v49 = vadd.f32 1.0, %v2727_v62 }
 0x8a8   : > { %v2730_v53 = vclamps-f32 %v1964_v47, 1.0 }
 0x8a9   : > { %v1918_v0 = vsel %vm1917_vm4, %v2967_v33, %v1914_v60  ;;  %v1971_v11 = vmul.f32 %v1967_v49, %v1799_v3 }
 0x8aa   : > { %v1970_v55 = vadd.f32 1.0, %v2730_v53  ;;  %v1923_v1 = vsel %vm1920_vm5, %v1922_v59, %v1918_v0 }
 0x8ab   : > { %v1924_v6 = vmul.f32 %v1923_v1, %v1899_v43 }
 0x8ac   : > { %v1974_v63 = vmul.f32 %v1970_v55, %v1802_v8 }
 0x8ad   : > { %v2729_v4 = vclamps-f32 %v1924_v6, 1.0 }
 0x8ae   : > { %v2008_v5 = vpack.c.bf16 %v1974_v63, %v1972_v57 }
 0x8af   : > { %v1969_v10 = vadd.f32 1.0, %v2729_v4 }
 0x8b0   : > { %2127 = vmatmul.bf16.vlgmr.msrb.gmra.mxu2 %v2008_v5 }
 0x8b1   : > { %v1973_v23 = vmul.f32 %v1969_v10, %v1801_v7 }
 0x8b3   : > { %v2007_v14 = vpack.c.bf16 %v1973_v23, %v1971_v11 }
 0x8b5   : > { %2113 = vmatmul.bf16.vlgmr.msra.gmra.mxu1 %v2007_v14 }
 0x932   : > { %v2114_v15 = vpop.f32.mrf.mxu1 }
 0x933   : > { %v2128_v58 = vpop.f32.mrf.mxu2 }
 0x934   : > { %v2129_v16 = vadd.f32 %v2128_v58, %v2114_v15 }
 0x936   : > { %v2133_v19 = vadd.f32 %v2129_v16, %v3388_v44 }
 0x938   : > { %v2139_v20 = vadd.f32 %v2933_v18, %v2133_v19 }
 0x93a   : > { %2141 = vst.msk [vmem:[#allocation2] sm:$0xff] %vm1020_vm1, %v2139_v20  ;;  %v2116_v61 = vpop.f32.mrf.mxu1 }
 0x93b   : > { %v2130_v22 = vpop.f32.mrf.mxu2 }
 0x93c   : > { %v2131_v17 = vadd.f32 %v2130_v22, %v2116_v61 }
 0x93e   : > { %v2134_v24 = vadd.f32 %v2131_v17, %v3393_v50  ;;  %2146 = sbr.rel (%p2795_p8) target bundleno = 2780 (0xadc), region = 112 }
 0x940   : > { %v2140_v25 = vadd.f32 %v2933_v18, %v2134_v24 }
 0x942   : > { %2142 = vst.msk [vmem:[#allocation2 + $0x8] sm:$0xff] %vm1020_vm1, %v2140_v25 }
 0x943   : > { %vm2152_vm6 = vcmask 523271   ;;  %2147 = vst.msk [vmem:[%s3260_s9] sm:$0xff] %vm1020_vm1, %v2139_v20  ;;  %v2878_v50 = vld [vmem:[%s3729_s22 + $0x18] sm:$0xff]  ;;  %vm2148_vm7 = vcmask 522240   ;;  %v2877_v13 = vld [vmem:[%s3729_s22 + $0x10] sm:$0xff]  ;;  %v2876_v30 = vld [vmem:[%s3729_s22 + $0x8] sm:$0xff] }
 0x944   : > { %v2153_v44 = vsel %vm2152_vm6, %v2140_v25, 0.0  ;;  %2227 = vmatpush.bf16.msra.mxu0 %v2878_v50  ;;  %2149 = vst.msk [vmem:[%s3260_s9 + $0x8] sm:$0x7f] %vm2148_vm7, %v2140_v25  ;;  %v2875_v31 = vld [vmem:[%s3729_s22] sm:$0xff]  ;;  %vm2236_vm13 = vcmask 516096  }
 0x945   : > { %2154 = vadd.xlane.f32.xlu0 %v2153_v44  ;;  %v2968_v41 = vld [vmem:[%s3730_s21] ss:$0 sm:$0xff] }
 0x948   : > { %2228 = vmatpush.bf16.msra.mxu0 %v2877_v13 }
 0x94c   : > { %2229 = vmatpush.bf16.msra.mxu0 %v2876_v30 }
 0x950   : > { %2230 = vmatpush.bf16.msra.mxu0 %v2875_v31 }
 0x9b8   : > { %v2155_v27 = vpop.xlane.xlu0 %2154 }
 0x9b9   : > { %v2156_v21 = vmul.f32 %v2155_v27, %v3275_v12 }
 0x9bb   : > { %v2157_v28 = vsub.f32 %v2140_v25, %v2156_v21 }
 0x9bd   : > { %v2158_v29 = vmul.f32 %v2157_v28, %v2157_v28 }
 0x9bf   : > { %v2159_v56 = vsel %vm2152_vm6, %v2158_v29, 0.0 }
 0x9c0   : > { %2160 = vadd.xlane.f32.xlu0 %v2159_v56 }
 0xa33   : > { %v2161_v32 = vpop.xlane.xlu0 %2160 }
 0xa34   : > { %v2162_v33 = vmul.f32 %v2161_v32, %v3275_v12  ;;  %v2969_v12 = vld [vmem:[%s3731_s27] ss:$0 sm:$0xff] }
 0xa36   : > { %v2163_v34 = vadd.f32 1e-05, %v2162_v33 }
 0xa38   : > { %2970 = vrsqrt.f32 %v2163_v34  ;;  %vm2170_vm10 = vweird.f32 %v2163_v34 }
 0xa3e   : > { %v2971_v35 = vpop.eup %2970 }
 0xa3f   : > { %v2165_v36 = vmul.f32 %v2971_v35, %v2163_v34  ;;  %vm2171_vm8 = vweird.f32 %v2971_v35 }
 0xa40   : > { %vm2172_vm11 = vmor %vm2170_vm10, %vm2171_vm8 }
 0xa41   : > { %v2166_v38 = vmul.f32 %v2971_v35, %v2165_v36 }
 0xa43   : > { %v2167_v26 = vmul.f32 0.5, %v2166_v38 }
 0xa45   : > { %v2168_v39 = vsub.f32 1.5, %v2167_v26 }
 0xa47   : > { %v2169_v40 = vmul.f32 %v2971_v35, %v2168_v39 }
 0xa49   : > { %v2173_v45 = vsel %vm2172_vm11, %v2971_v35, %v2169_v40 }
 0xa4a   : > { %v2174_v46 = vmul.f32 %v2173_v45, %v2157_v28 }
 0xa4c   : > { %v2178_v47 = vmul.f32 %v2968_v41, %v2174_v46 }
 0xa4e   : > { %v2182_v9 = vadd.f32 %v2969_v12, %v2178_v47 }
 0xa50   : > { %v2191_v48 = vpack.c.bf16 %v2182_v9, %v2182_v9 }
 0xa52   : > { %v2193_v42 = vshrl.u32 %v2191_v48, 16 }
 0xa54   : > { %v2195_v51 = vrot.slane %v2193_v42, 3 }
 0xa56   : > { %2812 = vmatmul.msk.bf16.vlgmr.msra.gmra.mxu0 %vm1020_vm1, %v2195_v51 }
 0xad3   : > { %v2232_v2 = vpop.f32.mrf.mxu0 }
 0xad4   : > { %2237 = vst.msk [vmem:[%s990_s18] sm:$0x1] %vm2236_vm13, %v2232_v2 }
 0xadb   : > { %v2234_v52 = vpop.f32.mrf.mxu0 }
 0xadc PF: > { %s3733_s0 = sld [smem:[#allocation6_spill]] }
 0xadd   : > { %s3734_s3 = sld [smem:[#allocation4_spill]] }
 0xade   : > { %s3735_s28 = sld [smem:[#allocation5_spill]] }
 0xadf   : > { %s3736_s29 = sld [smem:[#allocation7_spill]] }
 0xae0   : > { %s3737_s30 = sld [smem:[#allocation8_spill]] }
 0xae2   : > { %s33_s4 = sadd.s32 1, %s3733_s0  }
 0xae3   : > { %p30_p9 = scmp.ge.s32.totalorder %s33_s4, 6  }
 0xae5   :  { %32 = sbr.rel (!%p30_p9) target bundleno = 22 (0x16), region = 212 }

// kernel: coca_forward.6
= control target key start
LH: loop header
LB: loop body
LE: loop exit
PB: predicated region body
PF: predicated region fallthrough
CT: control target
= control target key end

     0   :  { %s1818_s27 = smov 0   ;;  %s2049_s0 = inlined_call_operand.vmem [shape: f32[2,5,64], index: 0, kind: input, shape index: {}]   ;;  %s2050_s1 = inlined_call_operand.vmem [shape: f32[9,64], index: 1, kind: input, shape index: {}]   ;;  %s2051_s2 = inlined_call_operand.vmem [shape: f32[1,64], index: 2, kind: input, shape index: {}]   ;;  %s2052_s3 = inlined_call_operand.vmem [shape: f32[1,64], index: 3, kind: input, shape index: {}]   ;;  %s2053_s4 = inlined_call_operand.vmem [shape: f32[1,64], index: 4, kind: input, shape index: {}]   ;;  %s2054_s5 = inlined_call_operand.vmem [shape: f32[1,64], index: 5, kind: input, shape index: {}]   ;;  %s2055_s6 = inlined_call_operand.vmem [shape: bf16[1,2,64,32], index: 6, kind: input, shape index: {}]   ;;  %s2056_s7 = inlined_call_operand.vmem [shape: f32[1,2,1,32], index: 7, kind: input, shape index: {}]   ;;  %s2057_s8 = inlined_call_operand.vmem [shape: bf16[1,2,64,32], index: 8, kind: input, shape index: {}]   ;;  %s2058_s9 = inlined_call_operand.vmem [shape: f32[1,2,1,32], index: 9, kind: input, shape index: {}]   ;;  %s2059_s10 = inlined_call_operand.vmem [shape: bf16[1,2,64,32], index: 10, kind: input, shape index: {}]   ;;  %s2060_s11 = inlined_call_operand.vmem [shape: f32[1,2,1,32], index: 11, kind: input, shape index: {}]   ;;  %s2061_s12 = inlined_call_operand.vmem [shape: bf16[1,2,32,64], index: 12, kind: input, shape index: {}]   ;;  %s2062_s13 = inlined_call_operand.vmem [shape: f32[1,1,64], index: 13, kind: input, shape index: {}]   ;;  %s2063_s14 = inlined_call_operand.vmem [shape: f32[1,64], index: 14, kind: input, shape index: {}]   ;;  %s2064_s15 = inlined_call_operand.vmem [shape: f32[1,64], index: 15, kind: input, shape index: {}]   ;;  %s2065_s16 = inlined_call_operand.vmem [shape: bf16[64,64], index: 16, kind: input, shape index: {}]   ;;  %s2066_s17 = inlined_call_operand.vmem [shape: f32[2,8,64], index: 17, kind: output, shape index: {0}]   ;;  %s2067_s18 = inlined_call_operand.vmem [shape: f32[2,1,64], index: 18, kind: output, shape index: {1}]  }
   0x1   :  { %2069 = sst [smem:[#allocation2_spill]] %s2049_s0 }
   0x2   :  { %2070 = sst [smem:[#allocation3_spill]] %s2050_s1 }
   0x3   :  { %2071 = sst [smem:[#allocation4_spill]] %s2051_s2 }
   0x4 LB: > { %s1449_s28 = sadd.s32 4294967295, %s1719_s27   ;;  %p1453_p0 = scmp.ge.s32.totalorder %s1719_s27, 1  ;;  %s1719_s27 = sphi %s1818_s27, %s29_s27  }
   0x5   : > { %p514_p1 = scmp.lt.s32.totalorder %s1719_s27, 3 }
   0x7   : > { %p515_p2 = pnand %p1453_p0, %p514_p1 }
   0x8   : > { %s2072_s0 = sld [smem:[#allocation3_spill]] (!%p515_p2)  ;;  %p569_p3 = scmp.lt.s32.totalorder (!%p515_p2), %s1449_s28, 1 }
   0x9   : > { %518 = sbr.rel (%p515_p2) target bundleno = 1947 (0x79b), region = 88  ;;  %s2073_s2 = sld [smem:[#allocation2_spill]] (!%p515_p2) }
   0xa   : > { %s2074_s1 = sld [smem:[#allocation4_spill]] (!%p515_p2) }
   0xe   : > { %v582_v0 = vld [vmem:[%s2072_s0] sm:$0xff]  ;;  %vm586_vm0 = vcmask 523264   ;;  %v583_v2 = vld [vmem:[%s2072_s0 + $0x8] sm:$0x1]  ;;  %vm590_vm1 = vcmask 516096   ;;  %s2076_s28 = smov (!%p569_p3, %s1449_s28), 1 }
   0xf   : > { %v587_v1 = vsel %vm586_vm0, %v582_v0, 0.0  ;;  %s1454_s20 = sshll.u32 %s2076_s28, 3  ;;  %vm651_vm2 = vcmask 520192   ;;  %v591_v4 = vsel %vm590_vm1, %v583_v2, 0.0  ;;  %v1721_v6 = vmov 64.0   ;;  %v1633_v28 = vld [vmem:[%s2055_s6 + $0x18] sm:$0xff]  ;;  %s579_s21 = scalar_lea.vmem %s2067_s18, %s2076_s28 }
  0x10   : > { %588 = vadd.xlane.f32.xlu0 %v587_v1  ;;  %s572_s23 = scalar_lea.vmem %s2073_s2, %s1454_s20  ;;  %1685 = vrcp.f32 %v1721_v6  ;;  %726 = vmatpush.bf16.msra.mxu0 %v1633_v28  ;;  %v1632_v29 = vld [vmem:[%s2055_s6 + $0x10] sm:$0xff]  ;;  %v1631_v30 = vld [vmem:[%s2055_s6 + $0x8] sm:$0xff]  ;;  %v1637_v31 = vld [vmem:[%s2057_s8 + $0x18] sm:$0xff]  ;;  %vm840_vm13 = vcmask 261120   ;;  %vm918_vm14 = vcmask 1041408   ;;  %vm919_vm15 = vcmask 1042432   ;;  %s576_s19 = scalar_lea.vmem %s2066_s17, %s1454_s20 }
  0x11   : > { %v581_v3 = vld [vmem:[%s572_s23] sm:$0x1f]  ;;  %v1641_v32 = vld [vmem:[%s2059_s10 + $0x18] sm:$0xff]  ;;  %780 = vmatpush.bf16.msra.mxu1 %v1637_v31  ;;  %v1636_v36 = vld [vmem:[%s2057_s8 + $0x10] sm:$0xff] }
  0x12   : > { %v652_v5 = vsel %vm651_vm2, %v581_v3, 0.0  ;;  %829 = vmatpush.bf16.msra.mxu2 %v1641_v32  ;;  %v1630_v35 = vld [vmem:[%s2055_s6] sm:$0xff]  ;;  %v1640_v37 = vld [vmem:[%s2059_s10 + $0x10] sm:$0xff]  ;;  %v1635_v39 = vld [vmem:[%s2057_s8 + $0x8] sm:$0xff] }
  0x13   : > { %653 = vadd.xlane.f32.xlu1 %v652_v5  ;;  %v1639_v40 = vld [vmem:[%s2059_s10 + $0x8] sm:$0xff]  ;;  %v1647_v41 = vld [vmem:[%s2055_s6 + $0x38] sm:$0xff]  ;;  %v1634_v43 = vld [vmem:[%s2057_s8] sm:$0xff] }
  0x14   : > { %727 = vmatpush.bf16.msra.mxu0 %v1632_v29  ;;  %v1646_v44 = vld [vmem:[%s2055_s6 + $0x30] sm:$0xff]  ;;  %v1638_v46 = vld [vmem:[%s2059_s10] sm:$0xff]  ;;  %v1645_v51 = vld [vmem:[%s2055_s6 + $0x28] sm:$0xff] }
  0x15   : > { %781 = vmatpush.bf16.msra.mxu1 %v1636_v36  ;;  %v1651_v52 = vld [vmem:[%s2057_s8 + $0x38] sm:$0xff]  ;;  %v1644_v56 = vld [vmem:[%s2055_s6 + $0x20] sm:$0xff]  ;;  %v1650_v57 = vld [vmem:[%s2057_s8 + $0x30] sm:$0xff] }
  0x16   : > { %v1686_v7 = vpop.eup %1685  ;;  %830 = vmatpush.bf16.msra.mxu2 %v1640_v37  ;;  %v1655_v53 = vld [vmem:[%s2059_s10 + $0x38] sm:$0xff]  ;;  %v1654_v59 = vld [vmem:[%s2059_s10 + $0x30] sm:$0xff]  ;;  %v1648_v6 = vld [vmem:[%s2057_s8 + $0x20] sm:$0xff] }
  0x17   : > { %v595_v8 = vmul.f32 64.0, %v1686_v7  ;;  %vm599_vm3 = vweird.f32 %v1686_v7  ;;  %v1674_v29 = vld [vmem:[%s2053_s4] ss:$0 sm:$0xff] }
  0x18   : > { %592 = vadd.xlane.f32.xlu0 %v591_v4  ;;  %728 = vmatpush.bf16.msra.mxu0 %v1631_v30  ;;  %v1675_v31 = vld [vmem:[%s2054_s5] ss:$0 sm:$0xff] }
  0x19   : > { %v596_v9 = vsub.f32 1.0, %v595_v8  ;;  %782 = vmatpush.bf16.msra.mxu1 %v1635_v39  ;;  %v1678_v39 = vld [vmem:[%s2060_s11] ss:$0 sm:$0xff] }
  0x1a   : > { %831 = vmatpush.bf16.msra.mxu2 %v1639_v40 }
  0x1b   : > { %v597_v10 = vmul.f32 %v1686_v7, %v596_v9 }
  0x1c   : > { %729 = vmatpush.bf16.msra.mxu0 %v1630_v35  ;;  %v1677_v35 = vld [vmem:[%s2058_s9] ss:$0 sm:$0xff] }
  0x1d   : > { %v598_v11 = vadd.f32 %v1686_v7, %v597_v10  ;;  %783 = vmatpush.bf16.msra.mxu1 %v1634_v43  ;;  %v1722_v43 = vmov 65535  }
  0x1e   : > { %832 = vmatpush.bf16.msra.mxu2 %v1638_v46 }
  0x1f   : > { %v1843_v12 = vsel %vm599_vm3, %v1686_v7, %v598_v11  ;;  %v1652_v7 = vld [vmem:[%s2059_s10 + $0x20] sm:$0xff]  ;;  %vm867_vm3 = vcmask 32768  }
  0x20   : > { %986 = vmatpush.bf16.msrb.mxu0 %v1647_v41  ;;  %v1672_v11 = vld [vmem:[%s2074_s1] ss:$0 sm:$0xff] }
  0x21   : > { %1038 = vmatpush.bf16.msrb.mxu1 %v1651_v52  ;;  %v1676_v41 = vld [vmem:[%s2056_s7] ss:$0 sm:$0xff] }
  0x22   : > { %1089 = vmatpush.bf16.msrb.mxu2 %v1655_v53 }
  0x24   : > { %987 = vmatpush.bf16.msrb.mxu0 %v1646_v44  ;;  %v920_v44 = vsel %vm918_vm14, 4294967295, %v1722_v43 }
  0x25   : > { %1039 = vmatpush.bf16.msrb.mxu1 %v1650_v57 }
  0x26   : > { %1090 = vmatpush.bf16.msrb.mxu2 %v1654_v59  ;;  %v1681_v59 = vld [vmem:[%s2060_s11 + $0x1] ss:$0 sm:$0xff] }
  0x28   : > { %988 = vmatpush.bf16.msrb.mxu0 %v1645_v51 }
  0x2c   : > { %989 = vmatpush.bf16.msrb.mxu0 %v1644_v56 }
  0x83   : > { %v589_v13 = vpop.xlane.xlu0 %588 }
  0x84   : > { %v601_v14 = vmul.f32 %v1843_v12, %v589_v13 }
  0x86   : > { %v1846_v15 = vsub.f32 %v582_v0, %v601_v14  ;;  %v654_v17 = vpop.xlane.xlu1 %653 }
  0x87   : > { %v655_v21 = vmul.f32 %v654_v17, %v1843_v12 }
  0x88   : > { %v605_v16 = vmul.f32 %v1846_v15, %v1846_v15 }
  0x89   : > { %v1857_v24 = vsub.f32 %v581_v3, %v655_v21  ;;  %v1653_v3 = vld [vmem:[%s2059_s10 + $0x28] sm:$0xff] }
  0x8a   : > { %v607_v18 = vsel %vm586_vm0, %v605_v16, 0.0  ;;  %1091 = vmatpush.bf16.msrb.mxu2 %v1653_v3 }
  0x8b   : > { %v593_v19 = vpop.xlane.xlu0 %592  ;;  %608 = vadd.xlane.f32.xlu1 %v607_v18  ;;  %v657_v26 = vmul.f32 %v1857_v24, %v1857_v24 }
  0x8c   : > { %v602_v20 = vmul.f32 %v1843_v12, %v593_v19 }
  0x8d   : > { %v658_v27 = vsel %vm651_vm2, %v657_v26, 0.0  ;;  %vm863_vm2 = vcmask 39936  }
  0x8e   : > { %v1853_v22 = vsub.f32 %v583_v2, %v602_v20  ;;  %v1649_v2 = vld [vmem:[%s2057_s8 + $0x28] sm:$0xff]  ;;  %1092 = vmatpush.bf16.msrb.mxu2 %v1652_v7  ;;  %v1673_v20 = vld [vmem:[%s2052_s3] ss:$0 sm:$0xff] }
  0x8f   : > { %1040 = vmatpush.bf16.msrb.mxu1 %v1649_v2 }
  0x90   : > { %v606_v23 = vmul.f32 %v1853_v22, %v1853_v22 }
  0x92   : > { %v610_v25 = vsel %vm590_vm1, %v606_v23, 0.0 }
  0x93   : > { %611 = vadd.xlane.f32.xlu2 %v610_v25  ;;  %1041 = vmatpush.bf16.msrb.mxu1 %v1648_v6 }
  0x9b   : > { %659 = vadd.xlane.f32.xlu2 %v658_v27 }
  0xfe   : > { %v609_v33 = vpop.xlane.xlu1 %608 }
  0xff   : > { %v613_v34 = vmul.f32 %v609_v33, %v1843_v12 }
 0x101   : > { %v615_v38 = vadd.f32 1e-05, %v613_v34 }
 0x103   : > { %1687 = vrsqrt.f32 %v615_v38  ;;  %vm623_vm5 = vweird.f32 %v615_v38 }
 0x106   : > { %v612_v42 = vpop.xlane.xlu2 %611 }
 0x107   : > { %v614_v45 = vmul.f32 %v612_v42, %v1843_v12 }
 0x109   : > { %v1688_v47 = vpop.eup %1687  ;;  %v616_v48 = vadd.f32 1e-05, %v614_v45 }
 0x10a   : > { %v618_v49 = vmul.f32 %v1688_v47, %v615_v38  ;;  %vm624_vm4 = vweird.f32 %v1688_v47 }
 0x10b   : > { %1689 = vrsqrt.f32 %v616_v48  ;;  %vm625_vm6 = vmor %vm623_vm5, %vm624_vm4  ;;  %vm633_vm8 = vweird.f32 %v616_v48 }
 0x10c   : > { %v619_v50 = vmul.f32 %v1688_v47, %v618_v49  ;;  %v921_v49 = vsel %vm919_vm15, %v920_v44, 0 }
 0x10e   : > { %v620_v54 = vmul.f32 0.5, %v619_v50  ;;  %v660_v55 = vpop.xlane.xlu2 %659 }
 0x10f   : > { %v661_v58 = vmul.f32 %v660_v55, %v1843_v12 }
 0x110   : > { %v621_v60 = vsub.f32 1.5, %v620_v54  ;;  %v1680_v54 = vld [vmem:[%s2058_s9 + $0x1] ss:$0 sm:$0xff] }
 0x111   : > { %v1690_v61 = vpop.eup %1689  ;;  %v662_v62 = vadd.f32 1e-05, %v661_v58 }
 0x112   : > { %v622_v63 = vmul.f32 %v1688_v47, %v621_v60  ;;  %v628_v0 = vmul.f32 %v1690_v61, %v616_v48  ;;  %vm634_vm7 = vweird.f32 %v1690_v61 }
 0x113   : > { %1691 = vrsqrt.f32 %v662_v62  ;;  %vm635_vm9 = vmor %vm633_vm8, %vm634_vm7  ;;  %vm669_vm11 = vweird.f32 %v662_v62 }
 0x114   : > { %v629_v1 = vmul.f32 %v1690_v61, %v628_v0  ;;  %v626_v4 = vsel %vm625_vm6, %v1688_v47, %v622_v63 }
 0x115   : > { %v637_v10 = vmul.f32 %v626_v4, %v1846_v15 }
 0x116   : > { %v630_v5 = vmul.f32 0.5, %v629_v1 }
 0x117   : > { %v642_v19 = vmul.f32 %v1672_v11, %v637_v10 }
 0x118   : > { %v631_v8 = vsub.f32 1.5, %v630_v5 }
 0x119   : > { %v1692_v9 = vpop.eup %1691  ;;  %v647_v25 = vadd.f32 %v1673_v20, %v642_v19 }
 0x11a   : > { %v632_v13 = vmul.f32 %v1690_v61, %v631_v8  ;;  %v664_v14 = vmul.f32 %v1692_v9, %v662_v62  ;;  %vm670_vm10 = vweird.f32 %v1692_v9 }
 0x11b   : > { %vm671_vm12 = vmor %vm669_vm11, %vm670_vm10 }
 0x11c   : > { %v636_v16 = vsel %vm635_vm9, %v1690_v61, %v632_v13  ;;  %v665_v17 = vmul.f32 %v1692_v9, %v664_v14 }
 0x11d   : > { %v638_v18 = vmul.f32 %v636_v16, %v1853_v22 }
 0x11e   : > { %v666_v15 = vmul.f32 0.5, %v665_v17 }
 0x11f   : > { %v643_v21 = vmul.f32 %v1672_v11, %v638_v18 }
 0x120   : > { %v667_v23 = vsub.f32 1.5, %v666_v15 }
 0x121   : > { %v648_v26 = vadd.f32 %v1673_v20, %v643_v21 }
 0x122   : > { %v668_v27 = vmul.f32 %v1692_v9, %v667_v23 }
 0x123   : > { %v690_v28 = vpack.c.bf16 %v648_v26, %v647_v25 }
 0x124   : > { %v672_v22 = vsel %vm671_vm12, %v1692_v9, %v668_v27 }
 0x125   : > { %v673_v30 = vmul.f32 %v672_v22, %v1857_v24  ;;  %1472 = vmatmul.msk.bf16.vlgmr.msra.gmra.mxu0 %vm586_vm0, %v690_v28 }
 0x127   : > { %v677_v32 = vmul.f32 %v1674_v29, %v673_v30 }
 0x129   : > { %v681_v33 = vadd.f32 %v1675_v31, %v677_v32 }
 0x12b   : > { %v744_v34 = vpack.c.bf16 %v681_v33, %v681_v33 }
 0x12d   : > { %1489 = vmatmul.msk.bf16.vlgmr.msra.gmra.mxu1 %vm586_vm0, %v744_v34  ;;  %1506 = vmatmul.msk.bf16.vlgmr.msra.gmra.mxu2 %vm586_vm0, %v744_v34 }
 0x135   : > { %1534 = vmatmul.msk.bf16.vlgmr.msrb.gmra.mxu0 %vm586_vm0, %v690_v28 }
 0x13d   : > { %1560 = vmatmul.msk.bf16.vlgmr.msrb.gmra.mxu1 %vm586_vm0, %v744_v34  ;;  %1586 = vmatmul.msk.bf16.vlgmr.msrb.gmra.mxu2 %vm586_vm0, %v744_v34 }
 0x1a2   : > { %v731_v24 = vpop.f32.mrf.mxu0 }
 0x1a3   : > { %v732_v50 = vadd.f32 %v1676_v41, %v731_v24 }
 0x1aa   : > { %v785_v36 = vpop.f32.mrf.mxu1  ;;  %v733_v40 = vpop.f32.mrf.mxu0 }
 0x1ab   : > { %v786_v37 = vadd.f32 %v1677_v35, %v785_v36  ;;  %v734_v46 = vadd.f32 %v1676_v41, %v733_v40 }
 0x1ad   : > { %v839_v38 = vpack.c.bf16 %v786_v37, %v786_v37  ;;  %v838_v52 = vpack.c.bf16 %v734_v46, %v732_v50 }
 0x1af   : > { %v845_v42 = vsel %vm840_vm13, %v839_v38, 0 }
 0x1b0   : > { %v834_v45 = vpop.f32.mrf.mxu2  ;;  %854 = vmatpush.bf16.xpose.msra.mxu3 %v845_v42 }
 0x1b1   : > { %v835_v47 = vadd.f32 %v1678_v39, %v834_v45 }
 0x1b2   : > { %v787_v48 = vpop.f32.mrf.mxu1  ;;  %v991_v44 = vpop.f32.mrf.mxu0 }
 0x1b3   : > { %v914_v51 = vpack.c.bf16 %v835_v47, %v835_v47  ;;  %v1679_v47 = vld [vmem:[%s2056_s7 + $0x1] ss:$0 sm:$0xff] }
 0x1b5   : > { %v923_v53 = vand.u32 %v921_v49, %v914_v51  ;;  %v1643_v51 = vld [vmem:[%s2061_s12 + $0x8] sm:$0xff] }
 0x1b6   : > { %1248 = vmatpush.bf16.msra.mxu2 %v1643_v51 }
 0x1b7   : > { %1507 = vmatmul.msk.bf16.vlgmr.msra.gmra.mxu3 %vm840_vm13, %v838_v52  ;;  %v1642_v52 = vld [vmem:[%s2061_s12] sm:$0xff] }
 0x1b8   : > { %932 = vmatpush.bf16.msrb.mxu3 %v923_v53  ;;  %v836_v55 = vpop.f32.mrf.mxu2 }
 0x1ba   : > { %v1043_v56 = vpop.f32.mrf.mxu1  ;;  %v993_v46 = vpop.f32.mrf.mxu0  ;;  %1249 = vmatpush.bf16.msra.mxu2 %v1642_v52 }
 0x1bb   : > { %v1044_v57 = vadd.f32 %v1680_v54, %v1043_v56  ;;  %v994_v48 = vadd.f32 %v1679_v47, %v993_v46 }
 0x1bd   : > { %v1099_v58 = vpack.c.bf16 %v1044_v57, %v1044_v57 }
 0x1bf   : > { %v1104_v60 = vsel %vm840_vm13, %v1099_v58, 0 }
 0x1c0   : > { %v1094_v61 = vpop.f32.mrf.mxu2  ;;  %1113 = vmatpush.bf16.xpose.msra.mxu3 %v1104_v60 }
 0x1c1   : > { %v1095_v62 = vadd.f32 %v1681_v59, %v1094_v61 }
 0x1c2   : > { %v1045_v63 = vpop.f32.mrf.mxu1 }
 0x1c3   : > { %v1171_v0 = vpack.c.bf16 %v1095_v62, %v1095_v62 }
 0x1c5   : > { %v1176_v1 = vand.u32 %v1171_v0, %v921_v49  ;;  %v992_v49 = vadd.f32 %v1679_v47, %v991_v44 }
 0x1c7   : > { %1185 = vmatpush.bf16.msra.mxu0 %v1176_v1  ;;  %v1098_v50 = vpack.c.bf16 %v994_v48, %v992_v49 }
 0x1c8   : > { %v1096_v2 = vpop.f32.mrf.mxu2 }
 0x23a   : > { %v856_v3 = vpop.f32.mrf.mxu3 }
 0x23b   : > { %v861_v4 = vmul.f32 0.17677669, %v856_v3 }
 0x23d   : > { %v864_v5 = vsel %vm863_vm2, %v861_v4, -inf }
 0x23e   : > { %865 = vmax.xlane.f32.xlu0 %v864_v5 }
 0x242   : > { %v858_v6 = vpop.f32.mrf.mxu3 }
 0x243   : > { %v862_v7 = vmul.f32 0.17677669, %v858_v6 }
 0x245   : > { %v868_v8 = vsel %vm867_vm3, %v862_v7, -inf }
 0x246   : > { %869 = vmax.xlane.f32.xlu1 %v868_v8  ;;  %v1657_v8 = vld [vmem:[%s2061_s12 + $0x18] sm:$0xff] }
 0x247   : > { %1219 = vmatpush.bf16.msra.mxu1 %v1657_v8 }
 0x2b1   : > { %v866_v9 = vpop.xlane.xlu0 %865 }
 0x2b2   : > { %v871_v10 = vsub.f32 %v861_v4, %v866_v9 }
 0x2b4   : > { %v873_v11 = vmul.f32 1.442695, %v871_v10 }
 0x2b6   : > { %1693 = vpow2.f32 %v873_v11 }
 0x2b9   : > { %v870_v13 = vpop.xlane.xlu1 %869 }
 0x2ba   : > { %v872_v14 = vsub.f32 %v862_v7, %v870_v13 }
 0x2bc   : > { %v1694_v16 = vpop.eup %1693  ;;  %v875_v17 = vmul.f32 1.442695, %v872_v14 }
 0x2bd   : > { %v877_v18 = vsel %vm863_vm2, %v1694_v16, 0.0 }
 0x2be   : > { %1695 = vpow2.f32 %v875_v17  ;;  %878 = vadd.xlane.f32.xlu2 %v877_v18 }
 0x2c4   : > { %v1696_v19 = vpop.eup %1695 }
 0x2c5   : > { %v880_v20 = vsel %vm867_vm3, %v1696_v19, 0.0 }
 0x2c6   : > { %881 = vadd.xlane.f32.xlu0 %v880_v20 }
 0x331   : > { %v879_v15 = vpop.xlane.xlu2 %878 }
 0x332   : > { %1697 = vrcp.f32 %v879_v15  ;;  %v894_v30 = vand.u32 2147483648, %v879_v15  ;;  %vm888_vm5 = vweird.f32 %v879_v15  ;;  %v892_v31 = vand.u32 2147483647, %v879_v15 }
 0x334   : > { %v895_v36 = vor.u32 1.1754944e-38, %v894_v30  ;;  %vm893_vm8 = vcmp.eq.f32.partialorder %v892_v31, 8.507059e+37 }
 0x338   : > { %v1698_v21 = vpop.eup %1697 }
 0x339   : > { %v884_v23 = vmul.f32 %v1698_v21, %v879_v15  ;;  %v882_v25 = vpop.xlane.xlu0 %881  ;;  %vm889_vm4 = vweird.f32 %v1698_v21 }
 0x33a   : > { %1699 = vrcp.f32 %v882_v25  ;;  %vm890_vm6 = vmor %vm888_vm5, %vm889_vm4  ;;  %v909_v33 = vand.u32 2147483648, %v882_v25  ;;  %v907_v35 = vand.u32 2147483647, %v882_v25  ;;  %vm903_vm9 = vweird.f32 %v882_v25 }
 0x33b   : > { %v885_v26 = vsub.f32 1.0, %v884_v23 }
 0x33c   : > { %v910_v38 = vor.u32 1.1754944e-38, %v909_v33  ;;  %vm908_vm11 = vcmp.eq.f32.partialorder %v907_v35, 8.507059e+37  ;;  %v1656_v35 = vld [vmem:[%s2061_s12 + $0x10] sm:$0xff] }
 0x33d   : > { %v886_v27 = vmul.f32 %v1698_v21, %v885_v26  ;;  %1220 = vmatpush.bf16.msra.mxu1 %v1656_v35 }
 0x33f   : > { %v887_v29 = vadd.f32 %v1698_v21, %v886_v27 }
 0x340   : > { %v1700_v28 = vpop.eup %1699 }
 0x341   : > { %v899_v22 = vmul.f32 %v1700_v28, %v882_v25  ;;  %v891_v34 = vsel %vm890_vm6, %v1698_v21, %v887_v29  ;;  %vm904_vm7 = vweird.f32 %v1700_v28 }
 0x342   : > { %vm905_vm10 = vmor %vm903_vm9, %vm904_vm7  ;;  %v896_v39 = vsel %vm893_vm8, %v895_v36, %v891_v34  ;;  %vm1318_vm9 = vcmask 523265  }
 0x343   : > { %v900_v32 = vsub.f32 1.0, %v899_v22  ;;  %v897_v42 = vmul.f32 %v1694_v16, %v896_v39 }
 0x345   : > { %v901_v24 = vmul.f32 %v1700_v28, %v900_v32 }
 0x347   : > { %v902_v37 = vadd.f32 %v1700_v28, %v901_v24 }
 0x349   : > { %v906_v40 = vsel %vm905_vm10, %v1700_v28, %v902_v37 }
 0x34a   : > { %v911_v41 = vsel %vm908_vm11, %v910_v38, %v906_v40  ;;  %v1682_v40 = vld [vmem:[%s2062_s13] ss:$0 sm:$0xff] }
 0x34b   : > { %v912_v43 = vmul.f32 %v1696_v19, %v911_v41 }
 0x34d   : > { %v913_v45 = vpack.c.bf16 %v912_v43, %v897_v42 }
 0x34f   : > { %1508 = vmatmul.msk.bf16.vlgmr.msrb.gmra.mxu3 %vm863_vm2, %v913_v45 }
 0x35f   : > { %1587 = vmatmul.msk.bf16.vlgmr.msra.gmra.mxu3 %vm840_vm13, %v1098_v50 }
 0x3d2   : > { %v934_v53 = vpop.f32.mrf.mxu3 }
 0x3da   : > { %v936_v54 = vpop.f32.mrf.mxu3 }
 0x3db   : > { %v943_v55 = vpack.c.bf16 %v936_v54, %v934_v53 }
 0x3dd   : > { %1610 = vmatmul.msk.bf16.vlgmr.msra.gmra.mxu2 %vm840_vm13, %v943_v55 }
 0x3e2   : > { %v1115_v56 = vpop.f32.mrf.mxu3 }
 0x3e3   : > { %v1120_v57 = vmul.f32 0.17677669, %v1115_v56 }
 0x3e5   : > { %v1122_v58 = vsel %vm863_vm2, %v1120_v57, -inf }
 0x3e6   : > { %1123 = vmax.xlane.f32.xlu1 %v1122_v58 }
 0x3ea   : > { %v1117_v59 = vpop.f32.mrf.mxu3 }
 0x3eb   : > { %v1121_v60 = vmul.f32 0.17677669, %v1117_v59 }
 0x3ed   : > { %v1125_v61 = vsel %vm867_vm3, %v1121_v60, -inf }
 0x3ee   : > { %1126 = vmax.xlane.f32.xlu2 %v1125_v61  ;;  %v1660_v61 = vld [vmem:[%s2065_s16 + $0x10] sm:$0xff] }
 0x459   : > { %v1124_v62 = vpop.xlane.xlu1 %1123 }
 0x45a   : > { %v1128_v63 = vsub.f32 %v1120_v57, %v1124_v62  ;;  %v1659_v62 = vld [vmem:[%s2065_s16 + $0x8] sm:$0xff] }
 0x45c   : > { %v1130_v0 = vmul.f32 1.442695, %v1128_v63  ;;  %v1658_v63 = vld [vmem:[%s2065_s16] sm:$0xff] }
 0x45e   : > { %1701 = vpow2.f32 %v1130_v0 }
 0x460   : > { %v1251_v39 = vpop.f32.mrf.mxu2 }
 0x461   : > { %v1127_v1 = vpop.xlane.xlu2 %1126 }
 0x462   : > { %v1129_v2 = vsub.f32 %v1121_v60, %v1127_v1  ;;  %v1661_v60 = vld [vmem:[%s2065_s16 + $0x18] sm:$0xff] }
 0x463   : > { %1361 = vmatpush.bf16.msrb.mxu3 %v1661_v60 }
 0x464   : > { %v1702_v3 = vpop.eup %1701  ;;  %v1132_v4 = vmul.f32 1.442695, %v1129_v2 }
 0x465   : > { %v1134_v5 = vsel %vm863_vm2, %v1702_v3, 0.0 }
 0x466   : > { %1703 = vpow2.f32 %v1132_v4  ;;  %1135 = vadd.xlane.f32.xlu0 %v1134_v5 }
 0x467   : > { %1362 = vmatpush.bf16.msrb.mxu3 %v1660_v61 }
 0x468   : > { %v1253_v45 = vpop.f32.mrf.mxu2 }
 0x46b   : > { %1363 = vmatpush.bf16.msrb.mxu3 %v1659_v62 }
 0x46c   : > { %v1704_v6 = vpop.eup %1703 }
 0x46d   : > { %v1137_v7 = vsel %vm867_vm3, %v1704_v6, 0.0 }
 0x46e   : > { %1138 = vadd.xlane.f32.xlu1 %v1137_v7 }
 0x46f   : > { %1364 = vmatpush.bf16.msrb.mxu3 %v1658_v63 }
 0x4d9   : > { %v1136_v9 = vpop.xlane.xlu0 %1135 }
 0x4da   : > { %1705 = vrcp.f32 %v1136_v9  ;;  %v1151_v20 = vand.u32 2147483648, %v1136_v9  ;;  %vm1145_vm14 = vweird.f32 %v1136_v9  ;;  %v1149_v15 = vand.u32 2147483647, %v1136_v9 }
 0x4dc   : > { %v1152_v28 = vor.u32 1.1754944e-38, %v1151_v20  ;;  %vm1150_vm4 = vcmp.eq.f32.partialorder %v1149_v15, 8.507059e+37 }
 0x4e0   : > { %v1706_v10 = vpop.eup %1705 }
 0x4e1   : > { %v1141_v11 = vmul.f32 %v1706_v10, %v1136_v9  ;;  %v1139_v13 = vpop.xlane.xlu1 %1138  ;;  %vm1146_vm12 = vweird.f32 %v1706_v10 }
 0x4e2   : > { %1707 = vrcp.f32 %v1139_v13  ;;  %vm1147_vm15 = vmor %vm1145_vm14, %vm1146_vm12  ;;  %v1166_v23 = vand.u32 2147483648, %v1139_v13  ;;  %v1164_v27 = vand.u32 2147483647, %v1139_v13  ;;  %vm1160_vm5 = vweird.f32 %v1139_v13 }
 0x4e3   : > { %v1142_v14 = vsub.f32 1.0, %v1141_v11 }
 0x4e4   : > { %v1167_v30 = vor.u32 1.1754944e-38, %v1166_v23  ;;  %vm1165_vm7 = vcmp.eq.f32.partialorder %v1164_v27, 8.507059e+37 }
 0x4e5   : > { %v1143_v16 = vmul.f32 %v1706_v10, %v1142_v14 }
 0x4e7   : > { %v1144_v18 = vadd.f32 %v1706_v10, %v1143_v16  ;;  %v1683_v16 = vld [vmem:[%s2063_s14] ss:$0 sm:$0xff] }
 0x4e8   : > { %v1708_v17 = vpop.eup %1707 }
 0x4e9   : > { %v1156_v19 = vmul.f32 %v1708_v17, %v1139_v13  ;;  %v1148_v25 = vsel %vm1147_vm15, %v1706_v10, %v1144_v18  ;;  %vm1161_vm3 = vweird.f32 %v1708_v17  ;;  %v1684_v18 = vld [vmem:[%s2064_s15] ss:$0 sm:$0xff] }
 0x4ea   : > { %v1153_v22 = vsel %vm1150_vm4, %v1152_v28, %v1148_v25  ;;  %vm1162_vm6 = vmor %vm1160_vm5, %vm1161_vm3 }
 0x4eb   : > { %v1157_v21 = vsub.f32 1.0, %v1156_v19  ;;  %v1154_v33 = vmul.f32 %v1702_v3, %v1153_v22 }
 0x4ed   : > { %v1158_v26 = vmul.f32 %v1708_v17, %v1157_v21 }
 0x4ef   : > { %v1159_v29 = vadd.f32 %v1708_v17, %v1158_v26 }
 0x4f1   : > { %v1163_v31 = vsel %vm1162_vm6, %v1708_v17, %v1159_v29 }
 0x4f2   : > { %v1168_v32 = vsel %vm1165_vm7, %v1167_v30, %v1163_v31 }
 0x4f3   : > { %v1169_v34 = vmul.f32 %v1704_v6, %v1168_v32 }
 0x4f5   : > { %v1170_v24 = vpack.c.bf16 %v1169_v34, %v1154_v33 }
 0x4f7   : > { %1588 = vmatmul.msk.bf16.vlgmr.msra.gmra.mxu0 %vm863_vm2, %v1170_v24 }
 0x574   : > { %v1187_v36 = vpop.f32.mrf.mxu0 }
 0x57c   : > { %v1189_v37 = vpop.f32.mrf.mxu0 }
 0x57d   : > { %v1197_v38 = vpack.c.bf16 %v1189_v37, %v1187_v36 }
 0x57f   : > { %1601 = vmatmul.msk.bf16.vlgmr.msra.gmra.mxu1 %vm840_vm13, %v1197_v38 }
 0x5fc   : > { %v1222_v41 = vpop.f32.mrf.mxu1 }
 0x5fd   : > { %v1252_v42 = vadd.f32 %v1251_v39, %v1222_v41 }
 0x5ff   : > { %v1260_v43 = vadd.f32 %v1682_v40, %v1252_v42 }
 0x601   : > { %v1264_v44 = vsel %vm586_vm0, %v1260_v43, 0.0 }
 0x602   : > { %1265 = vadd.xlane.f32.xlu2 %v1264_v44 }
 0x604   : > { %v1224_v46 = vpop.f32.mrf.mxu1 }
 0x605   : > { %v1254_v47 = vadd.f32 %v1253_v45, %v1224_v46 }
 0x607   : > { %v1261_v48 = vadd.f32 %v1682_v40, %v1254_v47 }
 0x609   : > { %v1267_v49 = vsel %vm590_vm1, %v1261_v48, 0.0 }
 0x60a   : > { %1268 = vadd.xlane.f32.xlu1 %v1267_v49 }
 0x675   : > { %v1266_v50 = vpop.xlane.xlu2 %1265 }
 0x676   : > { %v1270_v51 = vmul.f32 %v1266_v50, %v1843_v12 }
 0x678   : > { %v1272_v52 = vsub.f32 %v1260_v43, %v1270_v51 }
 0x67a   : > { %v1274_v53 = vmul.f32 %v1272_v52, %v1272_v52 }
 0x67c   : > { %v1276_v54 = vsel %vm586_vm0, %v1274_v53, 0.0 }
 0x67d   : > { %v1269_v55 = vpop.xlane.xlu1 %1268  ;;  %1277 = vadd.xlane.f32.xlu0 %v1276_v54 }
 0x67e   : > { %v1271_v56 = vmul.f32 %v1269_v55, %v1843_v12 }
 0x680   : > { %v1273_v57 = vsub.f32 %v1261_v48, %v1271_v56 }
 0x682   : > { %v1275_v58 = vmul.f32 %v1273_v57, %v1273_v57 }
 0x684   : > { %v1279_v59 = vsel %vm590_vm1, %v1275_v58, 0.0 }
 0x685   : > { %1280 = vadd.xlane.f32.xlu2 %v1279_v59 }
 0x6f0   : > { %v1278_v0 = vpop.xlane.xlu0 %1277 }
 0x6f1   : > { %v1282_v1 = vmul.f32 %v1278_v0, %v1843_v12 }
 0x6f3   : > { %v1284_v2 = vadd.f32 1e-05, %v1282_v1 }
 0x6f5   : > { %1709 = vrsqrt.f32 %v1284_v2  ;;  %vm1292_vm2 = vweird.f32 %v1284_v2 }
 0x6f8   : > { %v1281_v3 = vpop.xlane.xlu2 %1280 }
 0x6f9   : > { %v1283_v4 = vmul.f32 %v1281_v3, %v1843_v12 }
 0x6fb   : > { %v1710_v5 = vpop.eup %1709  ;;  %v1285_v6 = vadd.f32 1e-05, %v1283_v4 }
 0x6fc   : > { %v1287_v7 = vmul.f32 %v1710_v5, %v1284_v2  ;;  %vm1293_vm13 = vweird.f32 %v1710_v5 }
 0x6fd   : > { %1711 = vrsqrt.f32 %v1285_v6  ;;  %vm1294_vm8 = vmor %vm1292_vm2, %vm1293_vm13  ;;  %vm1302_vm11 = vweird.f32 %v1285_v6 }
 0x6fe   : > { %v1288_v8 = vmul.f32 %v1710_v5, %v1287_v7 }
 0x700   : > { %v1289_v9 = vmul.f32 0.5, %v1288_v8 }
 0x702   : > { %v1290_v10 = vsub.f32 1.5, %v1289_v9 }
 0x703   : > { %v1712_v11 = vpop.eup %1711 }
 0x704   : > { %v1291_v13 = vmul.f32 %v1710_v5, %v1290_v10  ;;  %v1297_v14 = vmul.f32 %v1712_v11, %v1285_v6  ;;  %vm1303_vm10 = vweird.f32 %v1712_v11 }
 0x705   : > { %vm1304_vm12 = vmor %vm1302_vm11, %vm1303_vm10 }
 0x706   : > { %v1295_v17 = vsel %vm1294_vm8, %v1710_v5, %v1291_v13  ;;  %v1298_v12 = vmul.f32 %v1712_v11, %v1297_v14 }
 0x707   : > { %v1306_v19 = vmul.f32 %v1295_v17, %v1272_v52 }
 0x708   : > { %v1299_v20 = vmul.f32 0.5, %v1298_v12 }
 0x709   : > { %v1311_v15 = vmul.f32 %v1683_v16, %v1306_v19 }
 0x70a   : > { %v1300_v21 = vsub.f32 1.5, %v1299_v20 }
 0x70b   : > { %v1316_v23 = vadd.f32 %v1684_v18, %v1311_v15 }
 0x70c   : > { %v1301_v25 = vmul.f32 %v1712_v11, %v1300_v21 }
 0x70d   : > { %1319 = vst.msk [vmem:[%s576_s19 - $0x1] sm:$0xfe] %vm1318_vm9, %v1316_v23  ;;  %v1329_v26 = vpack.c.bf16 %v1316_v23, %v1316_v23 }
 0x70e   : > { %v1305_v27 = vsel %vm1304_vm12, %v1712_v11, %v1301_v25 }
 0x70f   : > { %v1307_v28 = vmul.f32 %v1305_v27, %v1273_v57  ;;  %1627 = vmatmul.msk.bf16.vlgmr.msrb.gmra.mxu3 %vm586_vm0, %v1329_v26 }
 0x711   : > { %v1312_v29 = vmul.f32 %v1683_v16, %v1307_v28 }
 0x713   : > { %v1317_v22 = vadd.f32 %v1684_v18, %v1312_v29 }
 0x715   : > { %1320 = vst.msk [vmem:[%s576_s19 + $0x7] sm:$0x1] %vm590_vm1, %v1317_v22 }
 0x792   : > { %v1366_v30 = vpop.f32.mrf.mxu3 }
 0x793   : > { %1370 = vst.msk [vmem:[%s579_s21] sm:$0x1] %vm590_vm1, %v1366_v30 }
 0x79a   : > { %v1368_v31 = vpop.f32.mrf.mxu3 }
 0x79b PF: > { %s29_s27 = sadd.s32 1, %s1719_s27  }
 0x79c   : > { %p26_p4 = scmp.ge.s32.totalorder %s29_s27, 4  }
 0x79e   :  { %28 = sbr.rel (!%p26_p4) target bundleno = 4 (0x4), region = 137 }

// kernel: coca_forward.5
= control target key start
LH: loop header
LB: loop body
LE: loop exit
PB: predicated region body
PF: predicated region fallthrough
CT: control target
= control target key end

     0   :  { %s2923_s25 = smov 0   ;;  %s2925_s26 = smov 0   ;;  %s3301_s0 = inlined_call_operand.vmem [shape: f32[2,5,192], index: 0, kind: input, shape index: {}]   ;;  %s3302_s1 = inlined_call_operand.vmem [shape: bf16[192,64], index: 1, kind: input, shape index: {}]   ;;  %s3303_s2 = inlined_call_operand.vmem [shape: f32[5,64], index: 2, kind: input, shape index: {}]   ;;  %s3304_s3 = inlined_call_operand.vmem [shape: f32[1,64], index: 3, kind: input, shape index: {}]   ;;  %s3305_s4 = inlined_call_operand.vmem [shape: f32[1,64], index: 4, kind: input, shape index: {}]   ;;  %s3306_s5 = inlined_call_operand.vmem [shape: f32[2,1,64], index: 5, kind: input, shape index: {}]   ;;  %s3307_s6 = inlined_call_operand.vmem [shape: f32[2,1,64], index: 6, kind: input, shape index: {}]   ;;  %s3308_s7 = inlined_call_operand.vmem [shape: bf16[2,2,64,32], index: 7, kind: input, shape index: {}]   ;;  %s3309_s8 = inlined_call_operand.vmem [shape: f32[2,2,1,32], index: 8, kind: input, shape index: {}]   ;;  %s3310_s9 = inlined_call_operand.vmem [shape: bf16[2,2,64,32], index: 9, kind: input, shape index: {}]   ;;  %s3311_s10 = inlined_call_operand.vmem [shape: f32[2,2,1,32], index: 10, kind: input, shape index: {}]   ;;  %s3312_s11 = inlined_call_operand.vmem [shape: bf16[2,2,64,32], index: 11, kind: input, shape index: {}]   ;;  %s3313_s12 = inlined_call_operand.vmem [shape: f32[2,2,1,32], index: 12, kind: input, shape index: {}]   ;;  %s3314_s13 = inlined_call_operand.vmem [shape: bf16[2,2,32,64], index: 13, kind: input, shape index: {}]   ;;  %s3315_s14 = inlined_call_operand.vmem [shape: f32[2,1,64], index: 14, kind: input, shape index: {}]   ;;  %s3316_s15 = inlined_call_operand.vmem [shape: f32[2,1,64], index: 15, kind: input, shape index: {}]   ;;  %s3317_s16 = inlined_call_operand.vmem [shape: f32[2,1,64], index: 16, kind: input, shape index: {}]   ;;  %s3318_s17 = inlined_call_operand.vmem [shape: bf16[2,64,256], index: 17, kind: input, shape index: {}]   ;;  %s3319_s18 = inlined_call_operand.vmem [shape: f32[2,1,256], index: 18, kind: input, shape index: {}]   ;;  %s3320_s19 = inlined_call_operand.vmem [shape: bf16[2,256,64], index: 19, kind: input, shape index: {}]   ;;  %s3321_s20 = inlined_call_operand.vmem [shape: f32[2,1,64], index: 20, kind: input, shape index: {}]   ;;  %s3322_s21 = inlined_call_operand.vmem [shape: f32[2,5,64], index: 21, kind: output, shape index: {}]  }
   0x1   :  { %3330 = sst [smem:[#allocation11_spill]] %s3301_s0  ;;  %s2927_s27 = smov 0  }
   0x2   :  { %3331 = sst [smem:[#allocation12_spill]] %s3302_s1 }
   0x3   :  { %3332 = sst [smem:[#allocation13_spill]] %s3303_s2  ;;  %s2921_s2 = smov 0  }
   0x4   :  { %3333 = sst [smem:[#allocation14_spill]] %s3304_s3  ;;  %s2929_s3 = smov 0  }
   0x5   :  { %3334 = sst [smem:[#allocation15_spill]] %s3305_s4 }
   0x6   :  { %3335 = sst [smem:[#allocation16_spill]] %s3306_s5 }
   0x7   :  { %3336 = sst [smem:[#allocation17_spill]] %s3307_s6 }
   0x8   :  { %3337 = sst [smem:[#allocation18_spill]] %s3308_s7 }
   0x9   :  { %3338 = sst [smem:[#allocation19_spill]] %s3309_s8 }
   0xa   :  { %3339 = sst [smem:[#allocation20_spill]] %s3310_s9 }
   0xb   :  { %3340 = sst [smem:[#allocation21_spill]] %s3311_s10 }
   0xc   :  { %3341 = sst [smem:[#allocation22_spill]] %s3312_s11 }
   0xd   :  { %3342 = sst [smem:[#allocation23_spill]] %s3313_s12 }
   0xe   :  { %3343 = sst [smem:[#allocation24_spill]] %s3314_s13 }
   0xf   :  { %3344 = sst [smem:[#allocation25_spill]] %s3315_s14 }
  0x10   :  { %3345 = sst [smem:[#allocation26_spill]] %s3316_s15 }
  0x11   :  { %3346 = sst [smem:[#allocation27_spill]] %s3320_s19 }
  0x12   :  { %3347 = sst [smem:[#allocation28_spill]] %s3321_s20 }
  0x13   :  { %3348 = sst [smem:[#allocation29_spill]] %s3322_s21 }
  0x14 LB: > { %3349 = sst [smem:[#allocation3_spill]] %s2790_s2  ;;  %s40_s28 = sadd.s32 1, %s2798_s26  ;;  %s2806_s3 = sphi %s2929_s3, %s31_s3   ;;  %s2802_s27 = sphi %s2927_s27, %s3394_s27   ;;  %s2798_s26 = sphi %s2925_s26, %s3393_s26   ;;  %s2794_s25 = sphi %s2923_s25, %s3392_s25   ;;  %s2790_s2 = sphi %s2921_s2, %s3391_s2  }
  0x15   : > { %3350 = sst [smem:[#allocation4_spill]] %s2798_s26  ;;  %s43_s29 = sadd.s32 1, %s2802_s27 }
  0x16   : > { %3351 = sst [smem:[#allocation5_spill]] %s2802_s27  ;;  %p41_p0 = scmp.ge.s32.totalorder %s40_s28, 2 }
  0x17   : > { %3352 = sst [smem:[#allocation6_spill]] %s2806_s3  ;;  %p2290_p1 = scmp.ge.s32.totalorder %s2806_s3, 1 }
  0x18   : > { %p743_p2 = scmp.lt.s32.totalorder %s2806_s3, 5  ;;  %s3396_s28 = smov (%p41_p0, %s40_s28), 0 }
  0x19   : > { %3353 = sst [smem:[#allocation7_spill]] %s3396_s28  ;;  %s3398_s29 = smov (!%p41_p0, %s43_s29), %s2802_s27 }
  0x1a   : > { %p744_p3 = pnand %p2290_p1, %p743_p2  ;;  %p45_p4 = scmp.ge.s32.totalorder %s3398_s29, 2 }
  0x1c   : > { %s3400_s29 = smov (%p45_p4, %s3398_s29), 0  ;;  %747 = sbr.rel (%p744_p3) target bundleno = 2724 (0xaa4), region = 104 }
  0x1d   : > { %3354 = sst [smem:[#allocation8_spill]] %s3400_s29 }
  0x21   : > { %p866_p5 = scmp.lt.s32.totalorder %s2794_s25, 1  ;;  %p871_p6 = scmp.lt.s32.totalorder %s2790_s2, 1 }
  0x22   : > { %s3355_s23 = sld [smem:[#allocation11_spill]] }
  0x23   : > { %s3402_s25 = smov (!%p866_p5, %s2794_s25), 1  ;;  %s3358_s7 = sld [smem:[#allocation18_spill]] }
  0x24   : > { %s2955_s0 = scalar_select %p871_p6, %s2790_s2, 1 }
  0x25   : > { %s2618_s4 = sshll.u32 %s3402_s25, 4  ;;  %s2309_s30 = sshll.u32 %s3402_s25, 3 }
  0x26   : > { %s2619_s21 = sshll.u32 %s2955_s0, 6  ;;  %s2977_s5 = sshll.u32 %s2955_s0, 1 }
  0x27   : > { %s3359_s8 = sld [smem:[#allocation19_spill]]  ;;  %s926_s26 = scalar_lea.vmem %s3319_s18, %s2977_s5 }
  0x28   : > { %s2960_s1 = scalar_lea.vmem %s3355_s23, %s2618_s4  ;;  %s3361_s9 = sld [smem:[#allocation20_spill]] }
  0x29   : > { %s2974_s25 = scalar_lea.vmem %s3358_s7, %s2619_s21  ;;  %s3362_s10 = sld [smem:[#allocation21_spill]] }
  0x2a   : > { %s3363_s11 = sld [smem:[#allocation22_spill]] }
  0x2b   : > { %s3364_s12 = sld [smem:[#allocation23_spill]] }
  0x2c   : > { %s3366_s13 = sld [smem:[#allocation24_spill]] }
  0x2d   : > { %s2983_s28 = scalar_lea.vmem %s3359_s8, %s2977_s5  ;;  %s2622_s8 = sshll.u32 %s2955_s0, 5 }
  0x2e   : > { %3360 = sst [smem:[#allocation9_spill]] %s2983_s28  ;;  %s2988_s29 = scalar_lea.vmem %s3361_s9, %s2619_s21 }
  0x2f   : > { %s2994_s23 = scalar_lea.vmem %s3362_s10, %s2977_s5  ;;  %s3369_s20 = sld [smem:[#allocation28_spill]] }
  0x30   : > { %s2999_s27 = scalar_lea.vmem %s3363_s11, %s2619_s21  ;;  %s3370_s2 = sld [smem:[#allocation27_spill]] }
  0x31   : > { %s3005_s7 = scalar_lea.vmem %s3364_s12, %s2977_s5  ;;  %s3371_s4 = sld [smem:[#allocation29_spill]] }
  0x32   : > { %3365 = sst [smem:[#allocation10_spill]] %s3005_s7  ;;  %s3011_s3 = scalar_lea.vmem %s3366_s13, %s2622_s8 }
  0x33   : > { %s3028_s7 = scalar_lea.vmem %s3318_s17, %s2619_s21  ;;  %s2624_s13 = sshll.u32 %s2955_s0, 7 }
  0x34   : > { %s3372_s21 = sld [smem:[#allocation3_spill]] }
  0x35   : > { %s934_s14 = scalar_lea.vmem %s3369_s20, %s2955_s0 }
  0x36   : > { %s3042_s15 = scalar_lea.vmem %s3370_s2, %s2624_s13 }
  0x37   : > { %s3047_s12 = scalar_lea.vmem %s3371_s4, %s2309_s30 }
  0x3a   : > { %p2310_p7 = scmp.ne.s32.totalorder %s3372_s21, 0 }
  0x3b   : > { %s3373_s8 = sld [smem:[#allocation12_spill]] (!%p2310_p7) }
  0x3c   : > { %943 = sbr.rel (%p2310_p7) target bundleno = 496 (0x1f0), region = 108  ;;  %s3374_s24 = sld [smem:[#allocation13_spill]] (!%p2310_p7) }
  0x3d   : > { %s3375_s22 = sld [smem:[#allocation14_spill]] (!%p2310_p7) }
  0x3e   : > { %s3376_s20 = sld [smem:[#allocation15_spill]] (!%p2310_p7) }
  0x41   : > { %v2632_v0 = vld [vmem:[%s3373_s8 + $0x38] sm:$0xff]  ;;  %v2631_v2 = vld [vmem:[%s3373_s8 + $0x30] sm:$0xff]  ;;  %v2630_v4 = vld [vmem:[%s3373_s8 + $0x28] sm:$0xff]  ;;  %vm1045_vm0 = vcmask 523264   ;;  %vm1077_vm1 = vcmask 520192   ;;  %v2808_v24 = vmov 64.0  }
  0x42   : > { %v2636_v1 = vld [vmem:[%s3373_s8 + $0x58] sm:$0xff]  ;;  %1049 = vmatpush.bf16.msra.mxu0 %v2632_v0  ;;  %v2635_v3 = vld [vmem:[%s3373_s8 + $0x50] sm:$0xff]  ;;  %v2634_v5 = vld [vmem:[%s3373_s8 + $0x48] sm:$0xff]  ;;  %2734 = vrcp.f32 %v2808_v24 }
  0x43   : > { %1066 = vmatpush.bf16.msra.mxu1 %v2636_v1  ;;  %v2629_v6 = vld [vmem:[%s3373_s8 + $0x20] sm:$0xff]  ;;  %v945_v8 = vld [vmem:[%s2960_s1 + $0x8] sm:$0x1f]  ;;  %v2628_v9 = vld [vmem:[%s3373_s8 + $0x18] sm:$0xff] }
  0x44   : > { %v2633_v7 = vld [vmem:[%s3373_s8 + $0x40] sm:$0xff]  ;;  %v971_v10 = vpack.c.bf16 %v945_v8, %v945_v8  ;;  %v2627_v11 = vld [vmem:[%s3373_s8 + $0x10] sm:$0xff]  ;;  %v2626_v12 = vld [vmem:[%s3373_s8 + $0x8] sm:$0xff] }
  0x45   : > { %v2625_v13 = vld [vmem:[%s3373_s8] sm:$0xff] }
  0x46   : > { %1050 = vmatpush.bf16.msra.mxu0 %v2631_v2  ;;  %v944_v14 = vld [vmem:[%s2960_s1] sm:$0x1f] }
  0x47   : > { %1067 = vmatpush.bf16.msra.mxu1 %v2635_v3  ;;  %v970_v15 = vpack.c.bf16 %v944_v14, %v944_v14  ;;  %v972_v18 = vld [vmem:[%s3374_s24] sm:$0x1f] }
  0x48   : > { %v2735_v25 = vpop.eup %2734  ;;  %v2732_v45 = vld [vmem:[%s3375_s22] ss:$0 sm:$0xff] }
  0x49   : > { %v1082_v26 = vmul.f32 64.0, %v2735_v25  ;;  %vm1086_vm2 = vweird.f32 %v2735_v25  ;;  %v2733_v47 = vld [vmem:[%s3376_s20] ss:$0 sm:$0xff] }
  0x4a   : > { %1051 = vmatpush.bf16.msra.mxu0 %v2630_v4 }
  0x4b   : > { %1068 = vmatpush.bf16.msra.mxu1 %v2634_v5  ;;  %v1083_v27 = vsub.f32 1.0, %v1082_v26 }
  0x4d   : > { %v1084_v28 = vmul.f32 %v2735_v25, %v1083_v27 }
  0x4e   : > { %1052 = vmatpush.bf16.msra.mxu0 %v2629_v6 }
  0x4f   : > { %1069 = vmatpush.bf16.msra.mxu1 %v2633_v7  ;;  %v1085_v29 = vadd.f32 %v2735_v25, %v1084_v28 }
  0x51   : > { %v1087_v30 = vsel %vm1086_vm2, %v2735_v25, %v1085_v29 }
  0x52   : > { %1053 = vmatpush.bf16.msra.mxu0 %v2628_v9  ;;  %2359 = vmatmul.msk.bf16.vlgmr.msra.gmra.mxu1 %vm1045_vm0, %v971_v10 }
  0x56   : > { %1054 = vmatpush.bf16.msra.mxu0 %v2627_v11 }
  0x5a   : > { %1055 = vmatpush.bf16.msra.mxu0 %v2626_v12 }
  0x5e   : > { %1056 = vmatpush.bf16.msra.mxu0 %v2625_v13 }
  0x61   : > { %1057 = vmatmul.bf16.vlgmr.msra.gmra.mxu0 %v970_v15 }
  0xcf   : > { %v1071_v16 = vpop.f32.mrf.mxu1 }
  0xd7   : > { %v1073_v17 = vpop.f32.mrf.mxu1 }
  0xde   : > { %v1058_v19 = vpop.f32.mrf.mxu0 }
  0xdf   : > { %v1059_v20 = vadd.f32 %v1058_v19, %v972_v18 }
  0xe1   : > { %v1072_v21 = vadd.f32 %v1071_v16, %v1059_v20 }
  0xe3   : > { %v1078_v22 = vsel %vm1077_vm1, %v1072_v21, 0.0 }
  0xe4   : > { %1079 = vadd.xlane.f32.xlu0 %v1078_v22 }
  0xe6   : > { %v1060_v23 = vpop.f32.mrf.mxu0 }
 0x157   : > { %v1080_v31 = vpop.xlane.xlu0 %1079 }
 0x158   : > { %v1088_v32 = vmul.f32 %v1087_v30, %v1080_v31 }
 0x15a   : > { %v1089_v33 = vsub.f32 %v1072_v21, %v1088_v32 }
 0x15c   : > { %v1090_v34 = vmul.f32 %v1089_v33, %v1089_v33 }
 0x15e   : > { %v1091_v35 = vsel %vm1077_vm1, %v1090_v34, 0.0 }
 0x15f   : > { %1092 = vadd.xlane.f32.xlu0 %v1091_v35 }
 0x1d2   : > { %v1093_v36 = vpop.xlane.xlu0 %1092 }
 0x1d3   : > { %v1094_v37 = vmul.f32 %v1093_v36, %v1087_v30 }
 0x1d5   : > { %v1095_v38 = vadd.f32 1e-05, %v1094_v37 }
 0x1d7   : > { %2736 = vrsqrt.f32 %v1095_v38  ;;  %vm1102_vm4 = vweird.f32 %v1095_v38 }
 0x1dd   : > { %v2737_v39 = vpop.eup %2736 }
 0x1de   : > { %v1097_v40 = vmul.f32 %v2737_v39, %v1095_v38  ;;  %vm1103_vm3 = vweird.f32 %v2737_v39 }
 0x1df   : > { %vm1104_vm5 = vmor %vm1102_vm4, %vm1103_vm3 }
 0x1e0   : > { %v1098_v41 = vmul.f32 %v2737_v39, %v1097_v40 }
 0x1e2   : > { %v1099_v42 = vmul.f32 0.5, %v1098_v41 }
 0x1e4   : > { %v1100_v43 = vsub.f32 1.5, %v1099_v42 }
 0x1e6   : > { %v1101_v44 = vmul.f32 %v2737_v39, %v1100_v43 }
 0x1e8   : > { %v1105_v46 = vsel %vm1104_vm5, %v2737_v39, %v1101_v44 }
 0x1e9   : > { %v1106_v48 = vmul.f32 %v1105_v46, %v1089_v33 }
 0x1eb   : > { %v1110_v49 = vmul.f32 %v2732_v45, %v1106_v48 }
 0x1ed   : > { %v1114_v50 = vadd.f32 %v2733_v47, %v1110_v49 }
 0x1ef   : > { %1115 = vst.msk [vmem:[#allocation2] sm:$0x1f] %vm1077_vm1, %v1114_v50 }
 0x1f0 PF: > { %vm1119_vm6 = vcmask 520192   ;;  %v2809_v53 = vmov 64.0   ;;  %v2640_v1 = vld [vmem:[%s2974_s25 + $0x18] sm:$0xff]  ;;  %v2639_v4 = vld [vmem:[%s2974_s25 + $0x10] sm:$0xff]  ;;  %v2638_v7 = vld [vmem:[%s2974_s25 + $0x8] sm:$0xff]  ;;  %s3377_s30 = sld [smem:[#allocation16_spill]]  ;;  %s3387_s20 = scalar_lea.vmem %s3317_s16, %s2955_s0 }
 0x1f1   : > { %2750 = vrcp.f32 %v2809_v53  ;;  %v2644_v2 = vld [vmem:[%s2988_s29 + $0x18] sm:$0xff]  ;;  %1202 = vmatpush.bf16.msra.mxu0 %v2640_v1  ;;  %v2643_v5 = vld [vmem:[%s2988_s29 + $0x10] sm:$0xff]  ;;  %v2642_v8 = vld [vmem:[%s2988_s29 + $0x8] sm:$0xff]  ;;  %s3379_s19 = sld [smem:[#allocation17_spill]]  ;;  %vm1194_vm11 = vcmask 523264   ;;  %vm1311_vm12 = vcmask 261120  }
 0x1f2   : > { %v2648_v3 = vld [vmem:[%s2999_s27 + $0x18] sm:$0xff]  ;;  %1251 = vmatpush.bf16.msra.mxu1 %v2644_v2  ;;  %v2647_v6 = vld [vmem:[%s2999_s27 + $0x10] sm:$0xff]  ;;  %v2646_v9 = vld [vmem:[%s2999_s27 + $0x8] sm:$0xff]  ;;  %s3381_s10 = sld [smem:[#allocation9_spill]]  ;;  %vm1363_vm13 = vcmask 1041408   ;;  %vm1364_vm14 = vcmask 1042432  }
 0x1f3   : > { %1300 = vmatpush.bf16.msra.mxu2 %v2648_v3  ;;  %v2637_v10 = vld [vmem:[%s2974_s25] sm:$0xff]  ;;  %v2654_v13 = vld [vmem:[%s2974_s25 + $0x38] sm:$0xff]  ;;  %v2653_v17 = vld [vmem:[%s2974_s25 + $0x30] sm:$0xff]  ;;  %s3382_s11 = sld [smem:[#allocation10_spill]]  ;;  %v2810_v45 = vmov 65535   ;;  %vm1332_vm15 = vcmask 36864  }
 0x1f4   : > { %v2641_v11 = vld [vmem:[%s2988_s29] sm:$0xff]  ;;  %v2662_v14 = vld [vmem:[%s2999_s27 + $0x38] sm:$0xff]  ;;  %v2661_v18 = vld [vmem:[%s2999_s27 + $0x30] sm:$0xff]  ;;  %v1365_v46 = vsel %vm1363_vm13, 4294967295, %v2810_v45  ;;  %vm1359_vm4 = vcmask 39936   ;;  %s3383_s24 = sld [smem:[#allocation25_spill]] }
 0x1f5   : > { %1203 = vmatpush.bf16.msra.mxu0 %v2639_v4  ;;  %v2645_v12 = vld [vmem:[%s2999_s27] sm:$0xff]  ;;  %v2652_v20 = vld [vmem:[%s2974_s25 + $0x28] sm:$0xff]  ;;  %v1366_v53 = vsel %vm1364_vm14, %v1365_v46, 0  ;;  %s3385_s21 = sld [smem:[#allocation26_spill]] }
 0x1f6   : > { %v3100_v51 = vld [vmem:[#allocation2] sm:$0x1f]  ;;  %1252 = vmatpush.bf16.msra.mxu1 %v2643_v5  ;;  %v2660_v21 = vld [vmem:[%s2999_s27 + $0x28] sm:$0xff]  ;;  %s3378_s4 = scalar_lea.vmem %s3377_s30, %s2955_s0  ;;  %s3389_s30 = sld [smem:[#allocation3_spill]] }
 0x1f7   : > { %v1120_v52 = vsel %vm1119_vm6, %v3100_v51, 0.0  ;;  %v2751_v54 = vpop.eup %2750  ;;  %1301 = vmatpush.bf16.msra.mxu2 %v2647_v6  ;;  %v2651_v22 = vld [vmem:[%s2974_s25 + $0x20] sm:$0xff]  ;;  %s3380_s6 = scalar_lea.vmem %s3379_s19, %s2955_s0 }
 0x1f8   : > { %1121 = vadd.xlane.f32.xlu0 %v1120_v52  ;;  %v1124_v55 = vmul.f32 64.0, %v2751_v54  ;;  %vm1128_vm7 = vweird.f32 %v2751_v54  ;;  %v2659_v23 = vld [vmem:[%s2999_s27 + $0x20] sm:$0xff] }
 0x1f9   : > { %1204 = vmatpush.bf16.msra.mxu0 %v2638_v7  ;;  %v2738_v30 = vld [vmem:[%s3378_s4] ss:$0 sm:$0xff] }
 0x1fa   : > { %v1125_v56 = vsub.f32 1.0, %v1124_v55  ;;  %1253 = vmatpush.bf16.msra.mxu1 %v2642_v8  ;;  %v2739_v32 = vld [vmem:[%s3380_s6] ss:$0 sm:$0xff]  ;;  %s3384_s1 = scalar_lea.vmem %s3383_s24, %s2955_s0 }
 0x1fb   : > { %1302 = vmatpush.bf16.msra.mxu2 %v2646_v9  ;;  %v2741_v37 = vld [vmem:[%s2994_s23] ss:$0 sm:$0xff]  ;;  %s3386_s22 = scalar_lea.vmem %s3385_s21, %s2955_s0 }
 0x1fc   : > { %v1126_v57 = vmul.f32 %v2751_v54, %v1125_v56  ;;  %v2740_v41 = vld [vmem:[%s3381_s10] ss:$0 sm:$0xff]  ;;  %p2615_p8 = scmp.ne.s32.totalorder %s3389_s30, 1 }
 0x1fd   : > { %1205 = vmatpush.bf16.msra.mxu0 %v2637_v10  ;;  %v2742_v43 = vld [vmem:[%s3382_s11] ss:$0 sm:$0xff] }
 0x1fe   : > { %v1127_v58 = vadd.f32 %v2751_v54, %v1126_v57  ;;  %1254 = vmatpush.bf16.msra.mxu1 %v2641_v11 }
 0x1ff   : > { %1303 = vmatpush.bf16.msra.mxu2 %v2645_v12  ;;  %v2658_v12 = vld [vmem:[%s2988_s29 + $0x38] sm:$0xff] }
 0x200   : > { %v3104_v59 = vsel %vm1128_vm7, %v2751_v54, %v1127_v58 }
 0x201   : > { %1430 = vmatpush.bf16.msrb.mxu0 %v2654_v13  ;;  %v2657_v13 = vld [vmem:[%s2988_s29 + $0x30] sm:$0xff] }
 0x203   : > { %1532 = vmatpush.bf16.msrb.mxu2 %v2662_v14  ;;  %v2656_v14 = vld [vmem:[%s2988_s29 + $0x28] sm:$0xff] }
 0x205   : > { %1431 = vmatpush.bf16.msrb.mxu0 %v2653_v17  ;;  %v2650_v17 = vld [vmem:[%s3011_s3 + $0x8] sm:$0xff] }
 0x207   : > { %1533 = vmatpush.bf16.msrb.mxu2 %v2661_v18 }
 0x209   : > { %1432 = vmatpush.bf16.msrb.mxu0 %v2652_v20 }
 0x20b   : > { %1534 = vmatpush.bf16.msrb.mxu2 %v2660_v21 }
 0x20d   : > { %1433 = vmatpush.bf16.msrb.mxu0 %v2651_v22 }
 0x20f   : > { %1535 = vmatpush.bf16.msrb.mxu2 %v2659_v23 }
 0x26b   : > { %v1122_v60 = vpop.xlane.xlu0 %1121 }
 0x26c   : > { %v1130_v61 = vmul.f32 %v3104_v59, %v1122_v60  ;;  %v2744_v60 = vld [vmem:[%s3382_s11 + $0x1] ss:$0 sm:$0xff] }
 0x26e   : > { %v1131_v62 = vsub.f32 %v3100_v51, %v1130_v61 }
 0x270   : > { %v1132_v63 = vmul.f32 %v1131_v62, %v1131_v62 }
 0x272   : > { %v1133_v0 = vsel %vm1119_vm6, %v1132_v63, 0.0 }
 0x273   : > { %1134 = vadd.xlane.f32.xlu0 %v1133_v0 }
 0x2e6   : > { %v1135_v15 = vpop.xlane.xlu0 %1134 }
 0x2e7   : > { %v1136_v16 = vmul.f32 %v1135_v15, %v3104_v59 }
 0x2e9   : > { %v1137_v19 = vadd.f32 1e-05, %v1136_v16  ;;  %v2655_v16 = vld [vmem:[%s2988_s29 + $0x20] sm:$0xff] }
 0x2eb   : > { %2752 = vrsqrt.f32 %v1137_v19  ;;  %vm1144_vm9 = vweird.f32 %v1137_v19 }
 0x2f1   : > { %v2753_v24 = vpop.eup %2752 }
 0x2f2   : > { %v1139_v25 = vmul.f32 %v2753_v24, %v1137_v19  ;;  %vm1145_vm8 = vweird.f32 %v2753_v24 }
 0x2f3   : > { %vm1146_vm10 = vmor %vm1144_vm9, %vm1145_vm8 }
 0x2f4   : > { %v1140_v26 = vmul.f32 %v2753_v24, %v1139_v25 }
 0x2f6   : > { %v1141_v27 = vmul.f32 0.5, %v1140_v26 }
 0x2f8   : > { %v1142_v28 = vsub.f32 1.5, %v1141_v27 }
 0x2fa   : > { %v1143_v29 = vmul.f32 %v2753_v24, %v1142_v28 }
 0x2fc   : > { %v1147_v31 = vsel %vm1146_vm10, %v2753_v24, %v1143_v29 }
 0x2fd   : > { %v1148_v33 = vmul.f32 %v1147_v31, %v1131_v62 }
 0x2ff   : > { %v1152_v34 = vmul.f32 %v2738_v30, %v1148_v33  ;;  %v2649_v30 = vld [vmem:[%s3011_s3] sm:$0xff] }
 0x301   : > { %v1156_v35 = vadd.f32 %v2739_v32, %v1152_v34  ;;  %v2745_v34 = vld [vmem:[%s2994_s23 + $0x1] ss:$0 sm:$0xff] }
 0x303   : > { %v3140_v36 = vpack.c.bf16 %v1156_v35, %v1156_v35 }
 0x305   : > { %2376 = vmatmul.msk.bf16.vlgmr.msra.gmra.mxu0 %vm1194_vm11, %v3140_v36  ;;  %2393 = vmatmul.msk.bf16.vlgmr.msra.gmra.mxu1 %vm1194_vm11, %v3140_v36 }
 0x306   : > { %2410 = vmatmul.msk.bf16.vlgmr.msra.gmra.mxu2 %vm1194_vm11, %v3140_v36 }
 0x307   : > { %1663 = vmatpush.bf16.msra.mxu2 %v2650_v17 }
 0x30b   : > { %1664 = vmatpush.bf16.msra.mxu2 %v2649_v30 }
 0x315   : > { %2438 = vmatmul.msk.bf16.vlgmr.msrb.gmra.mxu0 %vm1194_vm11, %v3140_v36 }
 0x316   : > { %2490 = vmatmul.msk.bf16.vlgmr.msrb.gmra.mxu2 %vm1194_vm11, %v3140_v36 }
 0x382   : > { %v1207_v38 = vpop.f32.mrf.mxu0  ;;  %v1256_v39 = vpop.f32.mrf.mxu1 }
 0x383   : > { %v1257_v40 = vadd.f32 %v2741_v37, %v1256_v39  ;;  %v1208_v47 = vadd.f32 %v2740_v41, %v1207_v38  ;;  %v2743_v38 = vld [vmem:[%s3381_s10 + $0x1] ss:$0 sm:$0xff] }
 0x385   : > { %v1310_v42 = vpack.c.bf16 %v1257_v40, %v1257_v40  ;;  %v1309_v55 = vpack.c.bf16 %v1208_v47, %v1208_v47 }
 0x387   : > { %v1316_v44 = vsel %vm1311_vm12, %v1310_v42, 0 }
 0x388   : > { %1325 = vmatpush.bf16.xpose.msra.mxu3 %v1316_v44 }
 0x389   : > { %v1305_v48 = vpop.f32.mrf.mxu2 }
 0x38a   : > { %v1306_v49 = vadd.f32 %v2742_v43, %v1305_v48  ;;  %v1209_v50 = vpop.f32.mrf.mxu0  ;;  %v1258_v52 = vpop.f32.mrf.mxu1 }
 0x38c   : > { %v1358_v54 = vpack.c.bf16 %v1306_v49, %v1306_v49 }
 0x38e   : > { %v1368_v56 = vand.u32 %v1366_v53, %v1358_v54 }
 0x38f   : > { %2411 = vmatmul.msk.bf16.vlgmr.msra.gmra.mxu3 %vm1311_vm12, %v1309_v55  ;;  %v2664_v55 = vld [vmem:[%s3011_s3 + $0x18] sm:$0xff] }
 0x390   : > { %1377 = vmatpush.bf16.msrb.mxu3 %v1368_v56  ;;  %1635 = vmatpush.bf16.msrb.mxu1 %v2664_v55  ;;  %v2747_v55 = vld [vmem:[%s3386_s22] ss:$0 sm:$0xff] }
 0x391   : > { %v1307_v57 = vpop.f32.mrf.mxu2 }
 0x392   : > { %v3157_v58 = vpop.f32.mrf.mxu0 }
 0x393   : > { %v1436_v41 = vadd.f32 %v2743_v38, %v3157_v58  ;;  %v2527_v38 = vld [vmem:[%s3028_s7 + $0x18] sm:$0xf0] }
 0x394   : > { %1481 = vmatpush.bf16.msra.mxu3 %v2658_v12 }
 0x395   : > { %v1541_v43 = vpack.c.bf16 %v1436_v41, %v1436_v41  ;;  %v2666_v41 = vld [vmem:[%s3028_s7 + $0x4] sm:$0xf0] }
 0x398   : > { %1482 = vmatpush.bf16.msra.mxu3 %v2657_v13 }
 0x399   : > { %v1537_v61 = vpop.f32.mrf.mxu2 }
 0x39a   : > { %v1538_v62 = vadd.f32 %v2744_v60, %v1537_v61  ;;  %v1437_v63 = vpop.f32.mrf.mxu0 }
 0x39c   : > { %v1588_v0 = vpack.c.bf16 %v1538_v62, %v1538_v62  ;;  %1483 = vmatpush.bf16.msra.mxu3 %v2656_v14 }
 0x39e   : > { %v1593_v1 = vand.u32 %v1588_v0, %v1366_v53 }
 0x3a0   : > { %1602 = vmatpush.bf16.msra.mxu0 %v1593_v1  ;;  %1484 = vmatpush.bf16.msra.mxu3 %v2655_v16 }
 0x3a1   : > { %v1539_v2 = vpop.f32.mrf.mxu2 }
 0x412   : > { %v1327_v3 = vpop.f32.mrf.mxu3 }
 0x413   : > { %v1331_v4 = vmul.f32 0.17677669, %v1327_v3 }
 0x415   : > { %v1333_v5 = vsel %vm1332_vm15, %v1331_v4, -inf }
 0x416   : > { %1334 = vmax.xlane.f32.xlu1 %v1333_v5 }
 0x41a   : > { %v1329_v6 = vpop.f32.mrf.mxu3 }
 0x41b   : > { %v2663_v6 = vld [vmem:[%s3011_s3 + $0x10] sm:$0xff] }
 0x41c   : > { %1636 = vmatpush.bf16.msrb.mxu1 %v2663_v6 }
 0x489   : > { %v1335_v7 = vpop.xlane.xlu1 %1334 }
 0x48a   : > { %v1336_v8 = vsub.f32 %v1331_v4, %v1335_v7 }
 0x48c   : > { %v1337_v9 = vmul.f32 1.442695, %v1336_v8 }
 0x48e   : > { %2754 = vpow2.f32 %v1337_v9 }
 0x494   : > { %v2755_v10 = vpop.eup %2754 }
 0x495   : > { %v1339_v11 = vsel %vm1332_vm15, %v2755_v10, 0.0 }
 0x496   : > { %1340 = vadd.xlane.f32.xlu1 %v1339_v11 }
 0x509   : > { %v1341_v15 = vpop.xlane.xlu1 %1340 }
 0x50a   : > { %2756 = vrcp.f32 %v1341_v15  ;;  %v1353_v21 = vand.u32 2147483648, %v1341_v15  ;;  %v1351_v23 = vand.u32 2147483647, %v1341_v15  ;;  %vm1347_vm1 = vweird.f32 %v1341_v15 }
 0x50c   : > { %v1354_v25 = vor.u32 1.1754944e-38, %v1353_v21  ;;  %vm1352_vm3 = vcmp.eq.f32.partialorder %v1351_v23, 8.507059e+37  ;;  %v2671_v23 = vld [vmem:[%s3028_s7 + $0x34] sm:$0xf] }
 0x510   : > { %v2757_v18 = vpop.eup %2756 }
 0x511   : > { %v1343_v19 = vmul.f32 %v2757_v18, %v1341_v15  ;;  %vm1348_vm0 = vweird.f32 %v2757_v18 }
 0x512   : > { %vm1349_vm2 = vmor %vm1347_vm1, %vm1348_vm0 }
 0x513   : > { %v1344_v20 = vsub.f32 1.0, %v1343_v19 }
 0x515   : > { %v1345_v22 = vmul.f32 %v2757_v18, %v1344_v20 }
 0x517   : > { %v1346_v24 = vadd.f32 %v2757_v18, %v1345_v22  ;;  %v2672_v22 = vld [vmem:[%s3028_s7 + $0x34] sm:$0xf0] }
 0x519   : > { %v1350_v26 = vsel %vm1349_vm2, %v2757_v18, %v1346_v24 }
 0x51a   : > { %v1355_v27 = vsel %vm1352_vm3, %v1354_v25, %v1350_v26  ;;  %v2543_v25 = vld [vmem:[%s3028_s7 + $0x38] sm:$0xf0] }
 0x51b   : > { %v1356_v28 = vmul.f32 %v2755_v10, %v1355_v27  ;;  %v2746_v10 = vld [vmem:[%s3384_s1] ss:$0 sm:$0xff]  ;;  %v2546_v26 = vor.u32 %v2671_v23, %v2543_v25 }
 0x51c   : > { %v2533_v27 = vld [vmem:[%s3028_s7 + $0x20] sm:$0xf] }
 0x51d   : > { %v1357_v29 = vpack.c.bf16 %v1356_v28, %v1356_v28  ;;  %1783 = vmatpush.bf16.msrb.mxu0 %v2546_v26  ;;  %v2670_v28 = vld [vmem:[%s3028_s7 + $0x24] sm:$0xf0]  ;;  %v2683_v26 = vld [vmem:[%s3042_s15 + $0x50] sm:$0xff] }
 0x51e   : > { %v2534_v30 = vor.u32 %v2670_v28, %v2533_v27 }
 0x51f   : > { %2412 = vmatmul.msk.bf16.vlgmr.msrb.gmra.mxu3 %vm1359_vm4, %v1357_v29  ;;  %v2669_v29 = vld [vmem:[%s3028_s7 + $0x24] sm:$0xf] }
 0x52f   : > { %2464 = vmatmul.msk.bf16.vlgmr.msra.gmra.mxu3 %vm1194_vm11, %v3140_v36 }
 0x5a2   : > { %v1379_v31 = vpop.f32.mrf.mxu3 }
 0x5a3   : > { %v1387_v32 = vpack.c.bf16 %v1379_v31, %v1379_v31  ;;  %v2535_v31 = vld [vmem:[%s3028_s7 + $0x28] sm:$0xf0] }
 0x5a5   : > { %2514 = vmatmul.msk.bf16.vlgmr.msra.gmra.mxu2 %vm1311_vm12, %v1387_v32  ;;  %v2538_v32 = vor.u32 %v2669_v29, %v2535_v31 }
 0x5a7   : > { %1784 = vmatpush.bf16.msrb.mxu0 %v2538_v32 }
 0x5aa   : > { %v1381_v33 = vpop.f32.mrf.mxu3 }
 0x5ab   : > { %v2525_v33 = vld [vmem:[%s3028_s7 + $0x10] sm:$0xf] }
 0x5b2   : > { %v1486_v35 = vpop.f32.mrf.mxu3 }
 0x5b3   : > { %v1487_v37 = vadd.f32 %v2745_v34, %v1486_v35  ;;  %v2668_v34 = vld [vmem:[%s3028_s7 + $0x14] sm:$0xf0]  ;;  %v2667_v35 = vld [vmem:[%s3028_s7 + $0x14] sm:$0xf] }
 0x5b5   : > { %v1542_v39 = vpack.c.bf16 %v1487_v37, %v1487_v37  ;;  %v2526_v37 = vor.u32 %v2668_v34, %v2525_v33 }
 0x5b7   : > { %v1547_v40 = vsel %vm1311_vm12, %v1542_v39, 0  ;;  %v2530_v39 = vor.u32 %v2667_v35, %v2527_v38  ;;  %v2682_v35 = vld [vmem:[%s3042_s15 + $0x48] sm:$0xff] }
 0x5b8   : > { %1556 = vmatpush.bf16.xpose.msrb.mxu3 %v1547_v40  ;;  %v2517_v40 = vld [vmem:[%s3028_s7] sm:$0xf] }
 0x5b9   : > { %1785 = vmatpush.bf16.msrb.mxu0 %v2530_v39 }
 0x5ba   : > { %v1488_v42 = vpop.f32.mrf.mxu3 }
 0x5bb   : > { %v2665_v42 = vld [vmem:[%s3028_s7 + $0x4] sm:$0xf] }
 0x5bf   : > { %2491 = vmatmul.msk.bf16.vlgmr.msrb.gmra.mxu3 %vm1311_vm12, %v1541_v43  ;;  %v2518_v43 = vor.u32 %v2666_v41, %v2517_v40  ;;  %v2675_v40 = vld [vmem:[%s3042_s15 + $0x10] sm:$0xff] }
 0x628   : > { %v1666_v36 = vpop.f32.mrf.mxu2 }
 0x630   : > { %v1668_v44 = vpop.f32.mrf.mxu2 }
 0x642   : > { %v1558_v45 = vpop.f32.mrf.mxu3 }
 0x643   : > { %v1562_v46 = vmul.f32 0.17677669, %v1558_v45 }
 0x645   : > { %v1563_v47 = vsel %vm1332_vm15, %v1562_v46, -inf }
 0x646   : > { %1564 = vmax.xlane.f32.xlu2 %v1563_v47 }
 0x64a   : > { %v1560_v48 = vpop.f32.mrf.mxu3 }
 0x6b9   : > { %v1565_v49 = vpop.xlane.xlu2 %1564 }
 0x6ba   : > { %v1566_v50 = vsub.f32 %v1562_v46, %v1565_v49 }
 0x6bc   : > { %v1567_v52 = vmul.f32 1.442695, %v1566_v50 }
 0x6be   : > { %2758 = vpow2.f32 %v1567_v52 }
 0x6c4   : > { %v2759_v53 = vpop.eup %2758 }
 0x6c5   : > { %v1569_v54 = vsel %vm1332_vm15, %v2759_v53, 0.0 }
 0x6c6   : > { %1570 = vadd.xlane.f32.xlu2 %v1569_v54 }
 0x739   : > { %v1571_v56 = vpop.xlane.xlu2 %1570 }
 0x73a   : > { %2760 = vrcp.f32 %v1571_v56  ;;  %v1583_v61 = vand.u32 2147483648, %v1571_v56  ;;  %v1581_v63 = vand.u32 2147483647, %v1571_v56  ;;  %vm1577_vm7 = vweird.f32 %v1571_v56 }
 0x73c   : > { %v1584_v1 = vor.u32 1.1754944e-38, %v1583_v61  ;;  %vm1582_vm9 = vcmp.eq.f32.partialorder %v1581_v63, 8.507059e+37  ;;  %v1717_v63 = vld [vmem:[%s926_s26] sm:$0x3] }
 0x740   : > { %v2761_v57 = vpop.eup %2760 }
 0x741   : > { %v1573_v58 = vmul.f32 %v2761_v57, %v1571_v56  ;;  %vm1578_vm5 = vweird.f32 %v2761_v57 }
 0x742   : > { %vm1579_vm8 = vmor %vm1577_vm7, %vm1578_vm5 }
 0x743   : > { %v1574_v60 = vsub.f32 1.0, %v1573_v58 }
 0x745   : > { %v1575_v62 = vmul.f32 %v2761_v57, %v1574_v60 }
 0x747   : > { %v1576_v0 = vadd.f32 %v2761_v57, %v1575_v62  ;;  %v2688_v62 = vld [vmem:[%s3042_s15 + $0x78] sm:$0xff] }
 0x748   : > { %2023 = vmatpush.bf16.msrb.mxu2 %v2688_v62 }
 0x749   : > { %v1580_v2 = vsel %vm1579_vm8, %v2761_v57, %v1576_v0  ;;  %v2748_v57 = vld [vmem:[%s3387_s20] ss:$0 sm:$0xff]  ;;  %v1720_v0 = vperm.slane %v1717_v63, 1 }
 0x74a   : > { %v1585_v3 = vsel %vm1582_vm9, %v1584_v1, %v1580_v2  ;;  %v2687_v1 = vld [vmem:[%s3042_s15 + $0x70] sm:$0xff]  ;;  %v2680_v2 = vld [vmem:[%s3042_s15 + $0x38] sm:$0xff] }
 0x74b   : > { %v1586_v4 = vmul.f32 %v2759_v53, %v1585_v3  ;;  %2010 = vmatpush.bf16.msra.mxu1 %v2680_v2 }
 0x74c   : > { %2024 = vmatpush.bf16.msrb.mxu2 %v2687_v1 }
 0x74d   : > { %v1587_v5 = vpack.c.bf16 %v1586_v4, %v1586_v4 }
 0x74f   : > { %2492 = vmatmul.msk.bf16.vlgmr.msra.gmra.mxu0 %vm1359_vm4, %v1587_v5  ;;  %v2686_v5 = vld [vmem:[%s3042_s15 + $0x68] sm:$0xff] }
 0x750   : > { %2025 = vmatpush.bf16.msrb.mxu2 %v2686_v5 }
 0x7cc   : > { %v1604_v7 = vpop.f32.mrf.mxu0 }
 0x7cd   : > { %v1613_v8 = vpack.c.bf16 %v1604_v7, %v1604_v7  ;;  %v1719_v7 = vperm.slane %v1717_v63, 0 }
 0x7cf   : > { %2505 = vmatmul.msk.bf16.vlgmr.msrb.gmra.mxu1 %vm1311_vm12, %v1613_v8  ;;  %v2679_v8 = vld [vmem:[%s3042_s15 + $0x30] sm:$0xff] }
 0x7d0   : > { %2011 = vmatpush.bf16.msra.mxu1 %v2679_v8 }
 0x7d4   : > { %v1606_v9 = vpop.f32.mrf.mxu0 }
 0x84c   : > { %v1638_v11 = vpop.f32.mrf.mxu1 }
 0x84d   : > { %v1667_v12 = vadd.f32 %v1666_v36, %v1638_v11  ;;  %v2519_v36 = vld [vmem:[%s3028_s7 + $0x8] sm:$0xf0] }
 0x84e   : > { %v2522_v44 = vor.u32 %v2665_v42, %v2519_v36 }
 0x84f   : > { %v1674_v13 = vadd.f32 %v2746_v10, %v1667_v12  ;;  %v2685_v10 = vld [vmem:[%s3042_s15 + $0x60] sm:$0xff] }
 0x850   : > { %1786 = vmatpush.bf16.msrb.mxu0 %v2522_v44  ;;  %2026 = vmatpush.bf16.msrb.mxu2 %v2685_v10  ;;  %v2681_v44 = vld [vmem:[%s3042_s15 + $0x40] sm:$0xff] }
 0x851   : > { %v3189_v14 = vadd.f32 %v1674_v13, %v3100_v51  ;;  %v2541_v51 = vld [vmem:[%s3028_s7 + $0x30] sm:$0xf] }
 0x852   : > { %v2542_v24 = vor.u32 %v2672_v22, %v2541_v51  ;;  %v2677_v22 = vld [vmem:[%s3042_s15 + $0x20] sm:$0xff] }
 0x853   : > { %v1678_v15 = vsel %vm1119_vm6, %v3189_v14, 0.0 }
 0x854   : > { %1679 = vadd.xlane.f32.xlu0 %v1678_v15  ;;  %v1640_v16 = vpop.f32.mrf.mxu1  ;;  %1770 = vmatpush.bf16.msra.mxu3 %v2542_v24  ;;  %v2678_v15 = vld [vmem:[%s3042_s15 + $0x28] sm:$0xff] }
 0x855   : > { %2012 = vmatpush.bf16.msra.mxu1 %v2678_v15 }
 0x858   : > { %1771 = vmatpush.bf16.msra.mxu3 %v2534_v30  ;;  %v2676_v30 = vld [vmem:[%s3042_s15 + $0x18] sm:$0xff] }
 0x859   : > { %2013 = vmatpush.bf16.msra.mxu1 %v2677_v22 }
 0x85c   : > { %1772 = vmatpush.bf16.msra.mxu3 %v2526_v37 }
 0x85d   : > { %2014 = vmatpush.bf16.msra.mxu1 %v2676_v30 }
 0x860   : > { %1773 = vmatpush.bf16.msra.mxu3 %v2518_v43 }
 0x861   : > { %2015 = vmatpush.bf16.msra.mxu1 %v2675_v40 }
 0x8c7   : > { %v1680_v17 = vpop.xlane.xlu0 %1679 }
 0x8c8   : > { %v1681_v18 = vmul.f32 %v1680_v17, %v3104_v59 }
 0x8ca   : > { %v1682_v19 = vsub.f32 %v3189_v14, %v1681_v18 }
 0x8cc   : > { %v1683_v20 = vmul.f32 %v1682_v19, %v1682_v19 }
 0x8ce   : > { %v1684_v21 = vsel %vm1119_vm6, %v1683_v20, 0.0 }
 0x8cf   : > { %1685 = vadd.xlane.f32.xlu1 %v1684_v21 }
 0x942   : > { %v1686_v45 = vpop.xlane.xlu1 %1685 }
 0x943   : > { %v1687_v46 = vmul.f32 %v1686_v45, %v3104_v59 }
 0x945   : > { %v1688_v47 = vadd.f32 1e-05, %v1687_v46 }
 0x947   : > { %2762 = vrsqrt.f32 %v1688_v47  ;;  %vm1695_vm12 = vweird.f32 %v1688_v47 }
 0x94d   : > { %v2763_v48 = vpop.eup %2762 }
 0x94e   : > { %v1690_v49 = vmul.f32 %v2763_v48, %v1688_v47  ;;  %vm1696_vm10 = vweird.f32 %v2763_v48 }
 0x94f   : > { %vm1697_vm13 = vmor %vm1695_vm12, %vm1696_vm10 }
 0x950   : > { %v1691_v50 = vmul.f32 %v2763_v48, %v1690_v49 }
 0x952   : > { %v1692_v52 = vmul.f32 0.5, %v1691_v50 }
 0x954   : > { %v1693_v53 = vsub.f32 1.5, %v1692_v52 }
 0x956   : > { %v1694_v54 = vmul.f32 %v2763_v48, %v1693_v53 }
 0x958   : > { %v1698_v59 = vsel %vm1697_vm13, %v2763_v48, %v1694_v54  ;;  %v2674_v48 = vld [vmem:[%s3042_s15 + $0x8] sm:$0xff] }
 0x959   : > { %v1699_v56 = vmul.f32 %v1698_v59, %v1682_v19  ;;  %v2684_v19 = vld [vmem:[%s3042_s15 + $0x58] sm:$0xff]  ;;  %2016 = vmatpush.bf16.msra.mxu1 %v2674_v48  ;;  %v2673_v59 = vld [vmem:[%s3042_s15] sm:$0xff] }
 0x95a   : > { %2027 = vmatpush.bf16.msrb.mxu2 %v2684_v19 }
 0x95b   : > { %v1703_v58 = vmul.f32 %v2747_v55, %v1699_v56 }
 0x95d   : > { %v1707_v60 = vadd.f32 %v2748_v57, %v1703_v58  ;;  %2017 = vmatpush.bf16.msra.mxu1 %v2673_v59 }
 0x95e   : > { %2028 = vmatpush.bf16.msrb.mxu2 %v2683_v26 }
 0x95f   : > { %v1716_v61 = vpack.c.bf16 %v1707_v60, %v1707_v60 }
 0x961   : > { %2547 = vmatmul.msk.bf16.vlgmr.msra.gmra.mxu3 %vm1194_vm11, %v1716_v61  ;;  %2548 = vmatmul.msk.bf16.vlgmr.msrb.gmra.mxu0 %vm1194_vm11, %v1716_v61 }
 0x962   : > { %2029 = vmatpush.bf16.msrb.mxu2 %v2682_v35 }
 0x966   : > { %2030 = vmatpush.bf16.msrb.mxu2 %v2681_v44 }
 0x9de   : > { %v1788_v3 = vpop.f32.mrf.mxu0 }
 0x9df   : > { %v3233_v4 = vadd.f32 %v1788_v3, %v1720_v0 }
 0x9e1   : > { %v3237_v6 = vmul.f32 0.70710677, %v3233_v4 }
 0x9e3   : > { %v1836_v9 = vmul.f32 %v3237_v6, %v3237_v6 }
 0x9e4   : > { %v1775_v11 = vpop.f32.mrf.mxu3 }
 0x9e5   : > { %v3243_v12 = vmin.f32 %v1836_v9, 16.0  ;;  %v3245_v13 = vadd.f32 %v1775_v11, %v1719_v7 }
 0x9e6   : > { %v1790_v16 = vpop.f32.mrf.mxu0 }
 0x9e7   : > { %v1838_v17 = vmul.f32 2.1237322e-06, %v3243_v12  ;;  %v1849_v18 = vmul.f32 3.8918573e-05, %v3243_v12  ;;  %v3252_v20 = vmul.f32 0.70710677, %v3245_v13 }
 0x9e8   : > { %v1792_v40 = vmul.f32 0.5, %v3245_v13 }
 0x9e9   : > { %v1839_v21 = vadd.f32 0.00028619796, %v1838_v17  ;;  %v1850_v51 = vadd.f32 0.001143296, %v1849_v18  ;;  %v1796_v23 = vmul.f32 %v3252_v20, %v3252_v20 }
 0x9eb   : > { %v1840_v24 = vmul.f32 %v1839_v21, %v3243_v12  ;;  %v1851_v25 = vmul.f32 %v1850_v51, %v3243_v12  ;;  %v1797_v27 = vmin.f32 %v1796_v23, 16.0 }
 0x9ec   : > { %v1777_v28 = vpop.f32.mrf.mxu3 }
 0x9ed   : > { %v1852_v29 = vadd.f32 0.014752088, %v1851_v25  ;;  %v1841_v31 = vadd.f32 0.0036580483, %v1840_v24  ;;  %v1798_v32 = vmul.f32 2.1237322e-06, %v1797_v27 }
 0x9ee   : > { %v1809_v33 = vmul.f32 3.8918573e-05, %v1797_v27 }
 0x9ef   : > { %v1853_v34 = vmul.f32 %v1852_v29, %v3243_v12  ;;  %v1799_v37 = vadd.f32 0.00028619796, %v1798_v32  ;;  %v1842_v41 = vmul.f32 %v1841_v31, %v3243_v12  ;;  %v1793_v31 = vmul.f32 0.5, %v3233_v4 }
 0x9f0   : > { %v1810_v38 = vadd.f32 0.001143296, %v1809_v33 }
 0x9f1   : > { %v1854_v39 = vadd.f32 0.112945676, %v1853_v34  ;;  %v1800_v42 = vmul.f32 %v1799_v37, %v1797_v27  ;;  %v1843_v49 = vadd.f32 0.05243302, %v1842_v41 }
 0x9f2   : > { %v1811_v43 = vmul.f32 %v1810_v38, %v1797_v27 }
 0x9f3   : > { %v1855_v36 = vmul.f32 %v1854_v39, %v3243_v12  ;;  %v1801_v47 = vadd.f32 0.0036580483, %v1800_v42  ;;  %v1844_v56 = vmul.f32 %v1843_v49, %v3243_v12 }
 0x9f4   : > { %v1812_v45 = vadd.f32 0.014752088, %v1811_v43 }
 0x9f5   : > { %v1856_v46 = vadd.f32 0.4994258, %v1855_v36  ;;  %v1802_v55 = vmul.f32 %v1801_v47, %v1797_v27  ;;  %v1845_v61 = vadd.f32 0.18741608, %v1844_v56 }
 0x9f6   : > { %v1813_v50 = vmul.f32 %v1812_v45, %v1797_v27 }
 0x9f7   : > { %v1857_v52 = vmul.f32 %v1856_v46, %v3243_v12  ;;  %v1803_v60 = vadd.f32 0.05243302, %v1802_v55  ;;  %v1846_v2 = vmul.f32 %v1845_v61, %v3243_v12 }
 0x9f8   : > { %v1814_v53 = vadd.f32 0.112945676, %v1813_v50 }
 0x9f9   : > { %v1858_v54 = vadd.f32 1.0, %v1857_v52  ;;  %v1804_v1 = vmul.f32 %v1803_v60, %v1797_v27  ;;  %v1847_v9 = vadd.f32 1.1283791, %v1846_v2 }
 0x9fa   : > { %v1815_v57 = vmul.f32 %v1814_v53, %v1797_v27 }
 0x9fb   : > { %2764 = vrcp.f32 %v1858_v54  ;;  %v1870_v7 = vand.u32 2147483648, %v1858_v54  ;;  %v1805_v8 = vadd.f32 0.18741608, %v1804_v1  ;;  %v1868_v11 = vand.u32 2147483647, %v1858_v54 }
 0x9fc   : > { %v1816_v58 = vadd.f32 0.4994258, %v1815_v57  ;;  %vm1864_vm14 = vweird.f32 %v1858_v54  ;;  %v1848_v21 = vmul.f32 %v1847_v9, %v3237_v6 }
 0x9fd   : > { %v1871_v17 = vor.u32 1.1754944e-38, %v1870_v7  ;;  %v1806_v18 = vmul.f32 %v1805_v8, %v1797_v27  ;;  %vm1869_vm0 = vcmp.eq.f32.partialorder %v1868_v11, 8.507059e+37 }
 0x9fe   : > { %v1817_v62 = vmul.f32 %v1816_v58, %v1797_v27 }
 0x9ff   : > { %v1807_v25 = vadd.f32 1.1283791, %v1806_v18 }
 0xa00   : > { %v1818_v63 = vadd.f32 1.0, %v1817_v62 }
 0xa01   : > { %v2765_v0 = vpop.eup %2764  ;;  %v1808_v6 = vmul.f32 %v1807_v25, %v3252_v20  ;;  %v2749_v20 = vld [vmem:[%s934_s14] ss:$0 sm:$0xff] }
 0xa02   : > { %v1860_v3 = vmul.f32 %v2765_v0, %v1858_v54  ;;  %2766 = vrcp.f32 %v1818_v63  ;;  %vm1865_vm11 = vweird.f32 %v2765_v0  ;;  %v1830_v24 = vand.u32 2147483648, %v1818_v63 }
 0xa03   : > { %vm1866_vm15 = vmor %vm1864_vm14, %vm1865_vm11  ;;  %v1828_v28 = vand.u32 2147483647, %v1818_v63  ;;  %vm1824_vm2 = vweird.f32 %v1818_v63 }
 0xa04   : > { %v1861_v5 = vsub.f32 1.0, %v1860_v3  ;;  %v1831_v27 = vor.u32 1.1754944e-38, %v1830_v24 }
 0xa05   : > { %vm1829_vm4 = vcmp.eq.f32.partialorder %v1828_v28, 8.507059e+37 }
 0xa06   : > { %v1862_v10 = vmul.f32 %v2765_v0, %v1861_v5 }
 0xa08   : > { %v2767_v15 = vpop.eup %2766  ;;  %v1863_v16 = vadd.f32 %v2765_v0, %v1862_v10 }
 0xa09   : > { %v1820_v19 = vmul.f32 %v2767_v15, %v1818_v63  ;;  %vm1825_vm1 = vweird.f32 %v2767_v15 }
 0xa0a   : > { %v1867_v51 = vsel %vm1866_vm15, %v2765_v0, %v1863_v16  ;;  %vm1826_vm3 = vmor %vm1824_vm2, %vm1825_vm1 }
 0xa0b   : > { %v1872_v12 = vsel %vm1869_vm0, %v1871_v17, %v1867_v51  ;;  %v1821_v22 = vsub.f32 1.0, %v1820_v19 }
 0xa0c   : > { %v1873_v23 = vmul.f32 %v1872_v12, %v1848_v21 }
 0xa0d   : > { %v1822_v26 = vmul.f32 %v2767_v15, %v1821_v22 }
 0xa0e   : > { %v2550_v29 = vclamps-f32 %v1873_v23, 1.0 }
 0xa0f   : > { %v1823_v30 = vadd.f32 %v2767_v15, %v1822_v26 }
 0xa10   : > { %v1877_v32 = vadd.f32 1.0, %v2550_v29 }
 0xa11   : > { %v1827_v33 = vsel %vm1826_vm3, %v2767_v15, %v1823_v30 }
 0xa12   : > { %v1879_v34 = vmul.f32 %v1877_v32, %v1793_v31  ;;  %v1832_v35 = vsel %vm1829_vm4, %v1831_v27, %v1827_v33 }
 0xa13   : > { %v1833_v37 = vmul.f32 %v1832_v35, %v1808_v6 }
 0xa14   : > { %v1913_v38 = vpack.c.bf16 %v1879_v34, %v1879_v34 }
 0xa15   : > { %v2549_v39 = vclamps-f32 %v1833_v37, 1.0 }
 0xa16   : > { %2031 = vmatmul.bf16.vlgmr.msrb.gmra.mxu2 %v1913_v38 }
 0xa17   : > { %v1876_v41 = vadd.f32 1.0, %v2549_v39 }
 0xa19   : > { %v1878_v42 = vmul.f32 %v1876_v41, %v1792_v40 }
 0xa1b   : > { %v1912_v43 = vpack.c.bf16 %v1878_v42, %v1878_v42 }
 0xa1d   : > { %2018 = vmatmul.bf16.vlgmr.msra.gmra.mxu1 %v1912_v43 }
 0xa99   : > { %v2032_v4 = vpop.f32.mrf.mxu2 }
 0xa9a   : > { %v2019_v36 = vpop.f32.mrf.mxu1 }
 0xa9b   : > { %v2033_v44 = vadd.f32 %v2032_v4, %v2019_v36 }
 0xa9d   : > { %v2036_v45 = vadd.f32 %v2033_v44, %v3189_v14 }
 0xa9e   : > { %2046 = sbr.rel (%p2615_p8) target bundleno = 2724 (0xaa4), region = 112 }
 0xa9f   : > { %v2041_v46 = vadd.f32 %v2749_v20, %v2036_v45 }
 0xaa1   : > { %2042 = vst.msk [vmem:[#allocation2] sm:$0x1f] %vm1119_vm6, %v2041_v46  ;;  %v2034_v47 = vpop.f32.mrf.mxu2 }
 0xaa2   : > { %v2021_v48 = vpop.f32.mrf.mxu1 }
 0xaa3   : > { %2047 = vst.msk [vmem:[%s3047_s12] sm:$0x1f] %vm1119_vm6, %v2041_v46 }
 0xaa4 PF: > { %s3390_s4 = sld [smem:[#allocation6_spill]] }
 0xaa5   : > { %s3391_s2 = sld [smem:[#allocation4_spill]] }
 0xaa6   : > { %s3392_s25 = sld [smem:[#allocation5_spill]] }
 0xaa7   : > { %s3393_s26 = sld [smem:[#allocation7_spill]] }
 0xaa8   : > { %s3394_s27 = sld [smem:[#allocation8_spill]] }
 0xaaa   : > { %s31_s3 = sadd.s32 1, %s3390_s4  }
 0xaab   : > { %p28_p9 = scmp.ge.s32.totalorder %s31_s3, 6  }
 0xaad   :  { %30 = sbr.rel (!%p28_p9) target bundleno = 20 (0x14), region = 197 }

// kernel: coca_forward.7
= control target key start
LH: loop header
LB: loop body
LE: loop exit
PB: predicated region body
PF: predicated region fallthrough
CT: control target
= control target key end

     0   :  { %s5610_s6 = smov 1   ;;  %s5611_s10 = smov 2   ;;  %s6656_s0 = inlined_call_operand.smem [shape: u32[40], index: -1, kind: input, shape index: {}] }
   0x1   :  { %s5660_s5 = sld [smem:[%s6656_s0]]   ;;  %s5612_s14 = smov 3  }
   0x2   :  { %s5665_s9 = sld [smem:[%s6656_s0 + %s5610_s6]]   ;;  %s5613_s18 = smov 4  }
   0x3   :  { %s5670_s13 = sld [smem:[%s6656_s0 + %s5611_s10]]   ;;  %s5614_s22 = smov 5  }
   0x4   :  { %s5675_s17 = sld [smem:[%s6656_s0 + %s5612_s14]]   ;;  %s5615_s26 = smov 6  }
   0x5   :  { %s5680_s21 = sld [smem:[%s6656_s0 + %s5613_s18]]   ;;  %s5616_s30 = smov 7  }
   0x6   :  { %s5685_s25 = sld [smem:[%s6656_s0 + %s5614_s22]]   ;;  %s5617_s4 = smov 8  }
   0x7   :  { %6677 = sst [smem:[#allocation3_spill]] %s5660_s5  ;;  %s5618_s10 = smov 9  }
   0x8   :  { %6678 = sst [smem:[#allocation4_spill]] %s5665_s9  ;;  %s5619_s15 = smov 10  }
   0x9   :  { %6679 = sst [smem:[#allocation5_spill]] %s5670_s13  ;;  %s5620_s20 = smov 11  }
   0xa   :  { %6680 = sst [smem:[#allocation6_spill]] %s5675_s17  ;;  %s5622_s1 = smov 13  }
   0xb   :  { %6681 = sst [smem:[#allocation7_spill]] %s5680_s21  ;;  %s5623_s7 = smov 14  }
   0xc   :  { %6682 = sst [smem:[#allocation8_spill]] %s5685_s25  ;;  %s5625_s22 = smov 16  }
   0xd   :  { %s5690_s29 = sld [smem:[%s6656_s0 + %s5615_s26]]   ;;  %s5621_s26 = smov 12  }
   0xe   :  { %s5695_s3 = sld [smem:[%s6656_s0 + %s5616_s30]]   ;;  %s5626_s28 = smov 17  }
   0xf   :  { %s5700_s8 = sld [smem:[%s6656_s0 + %s5617_s4]]   ;;  %s5859_s23 = smov 0  }
  0x10   :  { %s5705_s14 = sld [smem:[%s6656_s0 + %s5618_s10]]  }
  0x11   :  { %s5710_s19 = sld [smem:[%s6656_s0 + %s5619_s15]]   ;;  %s5624_s15 = smov 15  }
  0x12   :  { %s5715_s24 = sld [smem:[%s6656_s0 + %s5620_s20]]  }
  0x13   :  { %6683 = sst [smem:[#allocation9_spill]] %s5690_s29 }
  0x14   :  { %6684 = sst [smem:[#allocation10_spill]] %s5695_s3 }
  0x15   :  { %6685 = sst [smem:[#allocation11_spill]] %s5700_s8 }
  0x16   :  { %6686 = sst [smem:[#allocation12_spill]] %s5705_s14 }
  0x17   :  { %6687 = sst [smem:[#allocation13_spill]] %s5710_s19 }
  0x18   :  { %6688 = sst [smem:[#allocation14_spill]] %s5715_s24 }
  0x19   :  { %s5720_s30 = sld [smem:[%s6656_s0 + %s5621_s26]]   ;;  %s5861_s26 = smov 0  }
  0x1a   :  { %s5725_s6 = sld [smem:[%s6656_s0 + %s5622_s1]]   ;;  %s5865_s1 = smov 0  }
  0x1b   :  { %s5730_s12 = sld [smem:[%s6656_s0 + %s5623_s7]]   ;;  %s5627_s7 = smov 18  }
  0x1c   :  { %s5735_s20 = sld [smem:[%s6656_s0 + %s5624_s15]]   ;;  %s5628_s15 = smov 19  }
  0x1d   :  { %s5740_s27 = sld [smem:[%s6656_s0 + %s5625_s22]]   ;;  %s5629_s22 = smov 20  }
  0x1e   :  { %s5745_s4 = sld [smem:[%s6656_s0 + %s5626_s28]]   ;;  %s5630_s28 = smov 21  }
  0x1f   :  { %6689 = sst [smem:[#allocation15_spill]] %s5720_s30 }
  0x20   :  { %6690 = sst [smem:[#allocation16_spill]] %s5725_s6 }
  0x21   :  { %6691 = sst [smem:[#allocation17_spill]] %s5730_s12 }
  0x22   :  { %6692 = sst [smem:[#allocation18_spill]] %s5735_s20 }
  0x23   :  { %6693 = sst [smem:[#allocation19_spill]] %s5740_s27 }
  0x24   :  { %6694 = sst [smem:[#allocation20_spill]] %s5745_s4 }
  0x25   :  { %s5750_s12 = sld [smem:[%s6656_s0 + %s5627_s7]]   ;;  %s5631_s7 = smov 22  }
  0x26   :  { %s5755_s20 = sld [smem:[%s6656_s0 + %s5628_s15]]   ;;  %s5632_s15 = smov 23  }
  0x27   :  { %s5760_s27 = sld [smem:[%s6656_s0 + %s5629_s22]]   ;;  %s5633_s22 = smov 24  }
  0x28   :  { %s5765_s4 = sld [smem:[%s6656_s0 + %s5630_s28]]   ;;  %s5634_s28 = smov 25  }
  0x2b   :  { %6695 = sst [smem:[#allocation21_spill]] %s5750_s12 }
  0x2c   :  { %6696 = sst [smem:[#allocation22_spill]] %s5755_s20 }
  0x2d   :  { %6697 = sst [smem:[#allocation23_spill]] %s5760_s27 }
  0x2e   :  { %6698 = sst [smem:[#allocation24_spill]] %s5765_s4 }
  0x2f   :  { %s5770_s12 = sld [smem:[%s6656_s0 + %s5631_s7]]   ;;  %s5635_s7 = smov 26  }
  0x30   :  { %s5775_s20 = sld [smem:[%s6656_s0 + %s5632_s15]]   ;;  %s5636_s15 = smov 27  }
  0x31   :  { %s5780_s27 = sld [smem:[%s6656_s0 + %s5633_s22]]   ;;  %s5637_s22 = smov 28  }
  0x32   :  { %s5785_s4 = sld [smem:[%s6656_s0 + %s5634_s28]]   ;;  %s5638_s28 = smov 29  }
  0x35   :  { %6699 = sst [smem:[#allocation25_spill]] %s5770_s12 }
  0x36   :  { %6700 = sst [smem:[#allocation26_spill]] %s5775_s20 }
  0x37   :  { %6701 = sst [smem:[#allocation27_spill]] %s5780_s27 }
  0x38   :  { %6702 = sst [smem:[#allocation28_spill]] %s5785_s4 }
  0x39   :  { %s5790_s12 = sld [smem:[%s6656_s0 + %s5635_s7]]   ;;  %s5639_s7 = smov 30  }
  0x3a   :  { %s5795_s20 = sld [smem:[%s6656_s0 + %s5636_s15]]   ;;  %s5640_s15 = smov 31  }
  0x3b   :  { %s5800_s27 = sld [smem:[%s6656_s0 + %s5637_s22]]   ;;  %s5641_s22 = smov 32  }
  0x3c   :  { %s5805_s4 = sld [smem:[%s6656_s0 + %s5638_s28]]   ;;  %s5642_s28 = smov 33  }
  0x3f   :  { %6703 = sst [smem:[#allocation29_spill]] %s5790_s12 }
  0x40   :  { %6704 = sst [smem:[#allocation30_spill]] %s5795_s20 }
  0x41   :  { %6705 = sst [smem:[#allocation31_spill]] %s5800_s27 }
  0x42   :  { %6706 = sst [smem:[#allocation32_spill]] %s5805_s4 }
  0x43   :  { %s5810_s12 = sld [smem:[%s6656_s0 + %s5639_s7]]   ;;  %s5643_s7 = smov 34  }
  0x44   :  { %s5815_s20 = sld [smem:[%s6656_s0 + %s5640_s15]]   ;;  %s5644_s15 = smov 35  }
  0x45   :  { %s5820_s27 = sld [smem:[%s6656_s0 + %s5641_s22]]   ;;  %s5645_s22 = smov 36  }
  0x46   :  { %s5825_s4 = sld [smem:[%s6656_s0 + %s5642_s28]]   ;;  %s5646_s28 = smov 37  }
  0x49   :  { %6707 = sst [smem:[#allocation33_spill]] %s5810_s12 }
  0x4a   :  { %6708 = sst [smem:[#allocation34_spill]] %s5815_s20 }
  0x4b   :  { %6709 = sst [smem:[#allocation35_spill]] %s5820_s27 }
  0x4c   :  { %6710 = sst [smem:[#allocation36_spill]] %s5825_s4 }
  0x4d   :  { %s5830_s12 = sld [smem:[%s6656_s0 + %s5643_s7]]   ;;  %s5647_s7 = smov 38  }
  0x4e   :  { %s5835_s20 = sld [smem:[%s6656_s0 + %s5644_s15]]   ;;  %s5648_s15 = smov 39  }
  0x4f   :  { %s5840_s27 = sld [smem:[%s6656_s0 + %s5645_s22]]   ;;  %s5857_s22 = smov 0  }
  0x50   :  { %s5845_s4 = sld [smem:[%s6656_s0 + %s5646_s28]]   ;;  %s5863_s28 = smov 0  }
  0x53   :  { %6711 = sst [smem:[#allocation37_spill]] %s5830_s12 }
  0x54   :  { %6712 = sst [smem:[#allocation38_spill]] %s5835_s20 }
  0x55   :  { %6713 = sst [smem:[#allocation39_spill]] %s5840_s27 }
  0x56   :  { %6714 = sst [smem:[#allocation40_spill]] %s5845_s4 }
  0x57   :  { %s5850_s12 = sld [smem:[%s6656_s0 + %s5647_s7]]  }
  0x58   :  { %s5855_s20 = sld [smem:[%s6656_s0 + %s5648_s15]]  }
  0x5d   :  { %6715 = sst [smem:[#allocation41_spill]] %s5850_s12 }
  0x5e   :  { %6716 = sst [smem:[#allocation42_spill]] %s5855_s20 }
  0x5f LB: > { %6717 = sst [smem:[#allocation43_spill]] %s5592_s22  ;;  %s98_s0 = sadd.s32 1, %s5600_s26  ;;  %s5608_s1 = sphi %s5865_s1, %s89_s1   ;;  %s5604_s28 = sphi %s5863_s28, %s6831_s28   ;;  %s5600_s26 = sphi %s5861_s26, %s6830_s26   ;;  %s5596_s23 = sphi %s5859_s23, %s6829_s23   ;;  %s5592_s22 = sphi %s5857_s22, %s6828_s22  }
  0x60   : > { %6718 = sst [smem:[#allocation44_spill]] %s5600_s26  ;;  %s101_s2 = sadd.s32 1, %s5604_s28 }
  0x61   : > { %6719 = sst [smem:[#allocation45_spill]] %s5604_s28  ;;  %p99_p0 = scmp.ge.s32.totalorder %s98_s0, 2 }
  0x62   : > { %6720 = sst [smem:[#allocation46_spill]] %s5608_s1  ;;  %p4693_p1 = scmp.ge.s32.totalorder %s5608_s1, 1 }
  0x63   : > { %p1402_p2 = scmp.lt.s32.totalorder %s5608_s1, 5  ;;  %s6833_s0 = smov (%p99_p0, %s98_s0), 0 }
  0x64   : > { %6721 = sst [smem:[#allocation47_spill]] %s6833_s0  ;;  %s6835_s2 = smov (!%p99_p0, %s101_s2), %s5604_s28 }
  0x65   : > { %p1403_p3 = pnand %p4693_p1, %p1402_p2  ;;  %p103_p4 = scmp.ge.s32.totalorder %s6835_s2, 2 }
  0x67   : > { %s6837_s2 = smov (%p103_p4, %s6835_s2), 0  ;;  %1406 = sbr.rel (%p1403_p3) target bundleno = 4873 (0x1309), region = 176 }
  0x68   : > { %6722 = sst [smem:[#allocation48_spill]] %s6837_s2 }
  0x6c   : > { %p1636_p5 = scmp.lt.s32.totalorder %s5596_s23, 1  ;;  %s6723_s5 = sld [smem:[#allocation3_spill]] }
  0x6d   : > { %s6724_s9 = sld [smem:[#allocation4_spill]]  ;;  %p1645_p6 = scmp.lt.s32.totalorder %s5592_s22, 1 }
  0x6e   : > { %s6727_s21 = sld [smem:[#allocation7_spill]]  ;;  %s6839_s23 = smov (!%p1636_p5, %s5596_s23), 1 }
  0x6f   : > { %s6728_s25 = sld [smem:[#allocation8_spill]]  ;;  %s6660_s10 = sshll.u32 %s6839_s23, 4 }
  0x70   : > { %s6729_s29 = sld [smem:[#allocation9_spill]]  ;;  %s4696_s11 = sshll.u32 %s6839_s23, 3 }
  0x71   : > { %s6730_s3 = sld [smem:[#allocation10_spill]] }
  0x72   : > { %s6731_s8 = sld [smem:[#allocation11_spill]]  ;;  %s5900_s15 = scalar_lea.vmem %s6723_s5, %s6660_s10 }
  0x73   : > { %s6732_s14 = sld [smem:[#allocation12_spill]]  ;;  %s5903_s16 = scalar_lea.vmem %s6724_s9, %s4696_s11 }
  0x74   : > { %6733 = sst [smem:[#allocation49_spill]] %s6839_s23 }
  0x75   : > { %s5893_s7 = scalar_select %p1645_p6, %s5592_s22, 1 }
  0x76   : > { %s6735_s19 = sld [smem:[#allocation13_spill]] }
  0x77   : > { %6737 = sst [smem:[#allocation50_spill]] %s5900_s15  ;;  %s5910_s26 = sshll.u32 %s5893_s7, 6 }
  0x78   : > { %6739 = sst [smem:[#allocation51_spill]] %s5903_s16  ;;  %s5913_s4 = sshll.u32 %s5893_s7, 1 }
  0x79   : > { %s6740_s18 = sld [smem:[#allocation17_spill]]  ;;  %s5917_s10 = scalar_lea.vmem %s6727_s21, %s5910_s26 }
  0x7a   : > { %s6742_s1 = sld [smem:[#allocation19_spill]]  ;;  %s5921_s2 = scalar_lea.vmem %s6728_s25, %s5913_s4 }
  0x7b   : > { %6744 = sst [smem:[#allocation52_spill]] %s5917_s10  ;;  %s5925_s9 = scalar_lea.vmem %s6729_s29, %s5910_s26 }
  0x7c   : > { %6746 = sst [smem:[#allocation53_spill]] %s5921_s2  ;;  %s5929_s12 = scalar_lea.vmem %s6730_s3, %s5913_s4 }
  0x7d   : > { %6748 = sst [smem:[#allocation54_spill]] %s5925_s9  ;;  %s5933_s17 = scalar_lea.vmem %s6731_s8, %s5910_s26 }
  0x7e   : > { %6750 = sst [smem:[#allocation55_spill]] %s5929_s12  ;;  %s5937_s21 = scalar_lea.vmem %s6732_s14, %s5913_s4 }
  0x7f   : > { %6752 = sst [smem:[#allocation56_spill]] %s5933_s17  ;;  %s5270_s25 = sshll.u32 %s5893_s7, 5 }
  0x80   : > { %s6753_s13 = sld [smem:[#allocation25_spill]]  ;;  %s5943_s29 = scalar_lea.vmem %s6735_s19, %s5270_s25 }
  0x81   : > { %6754 = sst [smem:[#allocation57_spill]] %s5937_s21  ;;  %s5951_s17 = scalar_lea.vmem %s6740_s18, %s5910_s26 }
  0x82   : > { %s6755_s10 = sld [smem:[#allocation26_spill]]  ;;  %s5272_s23 = sshll.u32 %s5893_s7, 7 }
  0x83   : > { %s6756_s2 = sld [smem:[#allocation27_spill]]  ;;  %s5957_s24 = scalar_lea.vmem %s6742_s1, %s5272_s23 }
  0x84   : > { %6757 = sst [smem:[#allocation58_spill]] %s5943_s29 }
  0x85   : > { %s6758_s9 = sld [smem:[#allocation28_spill]] }
  0x86   : > { %s6759_s12 = sld [smem:[#allocation29_spill]] }
  0x87   : > { %s6760_s8 = sld [smem:[#allocation30_spill]] }
  0x88   : > { %6761 = sst [smem:[#allocation59_spill]] %s5951_s17  ;;  %s5975_s19 = scalar_lea.vmem %s6755_s10, %s5913_s4 }
  0x89   : > { %s6762_s14 = sld [smem:[#allocation31_spill]]  ;;  %s5979_s3 = scalar_lea.vmem %s6756_s2, %s5910_s26 }
  0x8a   : > { %s6763_s20 = sld [smem:[#allocation32_spill]] }
  0x8b   : > { %s6764_s15 = sld [smem:[#allocation33_spill]]  ;;  %s5983_s28 = scalar_lea.vmem %s6758_s9, %s5913_s4 }
  0x8c   : > { %6765 = sst [smem:[#allocation60_spill]] %s5957_s24  ;;  %s5971_s24 = scalar_lea.vmem %s6753_s13, %s5910_s26 }
  0x8d   : > { %s6766_s29 = sld [smem:[#allocation34_spill]]  ;;  %s5987_s5 = scalar_lea.vmem %s6759_s12, %s5910_s26 }
  0x8e   : > { %s6767_s30 = sld [smem:[#allocation35_spill]]  ;;  %s5991_s22 = scalar_lea.vmem %s6760_s8, %s5913_s4 }
  0x8f   : > { %s6768_s6 = sld [smem:[#allocation36_spill]]  ;;  %s5994_s18 = scalar_lea.vmem %s6762_s14, %s5270_s25 }
  0x90   : > { %s6769_s17 = sld [smem:[#allocation37_spill]]  ;;  %s1755_s27 = scalar_lea.vmem %s6763_s20, %s5893_s7 }
  0x91   : > { %s6770_s21 = sld [smem:[#allocation38_spill]]  ;;  %s1758_s0 = scalar_lea.vmem %s6764_s15, %s5893_s7 }
  0x92   : > { %s6771_s1 = sld [smem:[#allocation49_spill]] }
  0x93   : > { %6772 = sst [smem:[#allocation49_spill]] %s5971_s24  ;;  %s1761_s16 = scalar_lea.vmem %s6766_s29, %s5893_s7 }
  0x94   : > { %s6773_s11 = sld [smem:[#allocation42_spill]]  ;;  %s6004_s13 = scalar_lea.vmem %s6767_s30, %s5910_s26 }
  0x95   : > { %6774 = sst [smem:[#allocation61_spill]] %s5975_s19  ;;  %s1770_s24 = scalar_lea.vmem %s6768_s6, %s5913_s4 }
  0x96   : > { %6775 = sst [smem:[#allocation62_spill]] %s5979_s3  ;;  %s6009_s10 = scalar_lea.vmem %s6769_s17, %s5272_s23 }
  0x97   : > { %s1778_s19 = scalar_lea.vmem %s6770_s21, %s5893_s7  ;;  %s6777_s9 = sld [smem:[#allocation43_spill]] }
  0x98   : > { %s6776_s2 = sshll.u32 %s6771_s1, 4 }
  0x9a   : > { %s6016_s3 = scalar_lea.vmem %s6773_s11, %s6776_s2 }
  0x9d   : > { %p4731_p7 = scmp.ne.s32.totalorder %s6777_s9, 0 }
  0x9e   : > { %s6778_s12 = sld [smem:[#allocation50_spill]] (!%p4731_p7) }
  0x9f   : > { %1788 = sbr.rel (%p4731_p7) target bundleno = 167 (0xa7), region = 180 }
  0xa4   : > { %v1789_v0 = vld [vmem:[%s6778_s12] sm:$0xff]  ;;  %vm1791_vm0 = vcmask 523264   ;;  %v1790_v1 = vld [vmem:[%s6778_s12 + $0x8] sm:$0x7f]  ;;  %vm1793_vm1 = vcmask 522240  }
  0xa5   : > { %1792 = vst.msk [vmem:[#allocation2] sm:$0xff] %vm1791_vm0, %v1789_v0 }
  0xa6   : > { %1794 = vst.msk [vmem:[#allocation2 + $0x8] sm:$0x7f] %vm1793_vm1, %v1790_v1 }
  0xa7 PF: > { %vm1808_vm2 = vcmask 523264   ;;  %vm1812_vm3 = vcmask 522240   ;;  %v5649_v6 = vmov 64.0   ;;  %s6779_s17 = sld [smem:[#allocation52_spill]]  ;;  %vm2107_vm11 = vcmask 1046528  }
  0xa8   : > { %5496 = vrcp.f32 %v5649_v6  ;;  %s6780_s21 = sld [smem:[#allocation56_spill]]  ;;  %vm2108_vm12 = vcmask 1047552   ;;  %vm2027_vm13 = vcmask 261120   ;;  %vm2052_vm15 = vcmask 121856  }
  0xa9   : > { %s6781_s25 = sld [smem:[#allocation54_spill]]  ;;  %vm2056_vm1 = vcmask 120832  }
  0xaa   : > { %s6782_s29 = sld [smem:[#allocation5_spill]] }
  0xab   : > { %s6783_s8 = sld [smem:[#allocation6_spill]] }
  0xac   : > { %v6021_v2 = vld [vmem:[#allocation2] sm:$0xff]  ;;  %s6786_s6 = sld [smem:[#allocation57_spill]] }
  0xad   : > { %v6023_v3 = vld [vmem:[#allocation2 + $0x8] sm:$0x7f]  ;;  %v1809_v4 = vsel %vm1808_vm2, %v6021_v2, 0.0  ;;  %v5283_v23 = vld [vmem:[%s6779_s17 + $0x18] sm:$0xff]  ;;  %v5282_v26 = vld [vmem:[%s6779_s17 + $0x10] sm:$0xff]  ;;  %s6787_s20 = sld [smem:[#allocation55_spill]] }
  0xae   : > { %v1813_v5 = vsel %vm1812_vm3, %v6023_v3, 0.0  ;;  %1810 = vadd.xlane.f32.xlu0 %v1809_v4  ;;  %v5497_v7 = vpop.eup %5496  ;;  %v5291_v24 = vld [vmem:[%s6780_s21 + $0x18] sm:$0xff]  ;;  %1915 = vmatpush.bf16.msra.mxu1 %v5283_v23  ;;  %v5290_v27 = vld [vmem:[%s6780_s21 + $0x10] sm:$0xff]  ;;  %v5281_v29 = vld [vmem:[%s6779_s17 + $0x8] sm:$0xff]  ;;  %s6788_s23 = sld [smem:[#allocation53_spill]] }
  0xaf   : > { %v1817_v8 = vmul.f32 64.0, %v5497_v7  ;;  %vm1821_vm4 = vweird.f32 %v5497_v7  ;;  %v5297_v25 = vld [vmem:[%s6779_s17 + $0x38] sm:$0xff]  ;;  %2015 = vmatpush.bf16.msra.mxu2 %v5291_v24  ;;  %v5296_v28 = vld [vmem:[%s6779_s17 + $0x30] sm:$0xff]  ;;  %v5289_v30 = vld [vmem:[%s6780_s21 + $0x8] sm:$0xff]  ;;  %s6789_s26 = sld [smem:[#allocation58_spill]] }
  0xb0   : > { %2175 = vmatpush.bf16.msra.mxu0 %v5297_v25  ;;  %v5295_v31 = vld [vmem:[%s6779_s17 + $0x28] sm:$0xff]  ;;  %v5280_v34 = vld [vmem:[%s6779_s17] sm:$0xff]  ;;  %v5287_v38 = vld [vmem:[%s6781_s25 + $0x18] sm:$0xff]  ;;  %s6784_s14 = scalar_lea.vmem %s6782_s29, %s5893_s7  ;;  %s6790_s15 = sld [smem:[#allocation14_spill]] }
  0xb1   : > { %v1818_v9 = vsub.f32 1.0, %v1817_v8  ;;  %v5288_v35 = vld [vmem:[%s6780_s21] sm:$0xff]  ;;  %v5286_v41 = vld [vmem:[%s6781_s25 + $0x10] sm:$0xff]  ;;  %v5285_v45 = vld [vmem:[%s6781_s25 + $0x8] sm:$0xff]  ;;  %s6785_s30 = scalar_lea.vmem %s6783_s8, %s5893_s7  ;;  %s6792_s11 = sld [smem:[#allocation59_spill]] }
  0xb2   : > { %1916 = vmatpush.bf16.msra.mxu1 %v5282_v26  ;;  %v5294_v36 = vld [vmem:[%s6779_s17 + $0x20] sm:$0xff]  ;;  %v5299_v8 = vld [vmem:[%s6781_s25 + $0x28] sm:$0xff]  ;;  %s6793_s2 = sld [smem:[#allocation15_spill]] }
  0xb3   : > { %v1819_v10 = vmul.f32 %v5497_v7, %v1818_v9  ;;  %2016 = vmatpush.bf16.msra.mxu2 %v5290_v27  ;;  %v5284_v48 = vld [vmem:[%s6781_s25] sm:$0xff]  ;;  %s6794_s9 = sld [smem:[#allocation16_spill]] }
  0xb4   : > { %2176 = vmatpush.bf16.msra.mxu0 %v5296_v28  ;;  %v5470_v57 = vld [vmem:[%s6784_s14] ss:$0 sm:$0xff]  ;;  %s6796_s17 = sld [smem:[#allocation18_spill]] }
  0xb5   : > { %v1820_v11 = vadd.f32 %v5497_v7, %v1819_v10  ;;  %v5471_v61 = vld [vmem:[%s6785_s30] ss:$0 sm:$0xff]  ;;  %s6800_s8 = sld [smem:[#allocation51_spill]] }
  0xb6   : > { %1814 = vadd.xlane.f32.xlu0 %v1813_v5  ;;  %1917 = vmatpush.bf16.msra.mxu1 %v5281_v29  ;;  %v5301_v5 = vld [vmem:[%s6781_s25 + $0x38] sm:$0xff]  ;;  %v5298_v9 = vld [vmem:[%s6781_s25 + $0x20] sm:$0xff]  ;;  %s6791_s1 = scalar_lea.vmem %s6790_s15, %s5893_s7  ;;  %s6803_s14 = sld [smem:[#allocation20_spill]] }
  0xb7   : > { %v6029_v12 = vsel %vm1821_vm4, %v5497_v7, %v1820_v11  ;;  %2017 = vmatpush.bf16.msra.mxu2 %v5289_v30  ;;  %v5300_v7 = vld [vmem:[%s6781_s25 + $0x30] sm:$0xff]  ;;  %v5475_v24 = vld [vmem:[%s6787_s20] ss:$0 sm:$0xff]  ;;  %v5305_v29 = vld [vmem:[%s6780_s21 + $0x38] sm:$0xff]  ;;  %s6798_s25 = sld [smem:[#allocation60_spill]] }
  0xb8   : > { %2177 = vmatpush.bf16.msra.mxu0 %v5295_v31  ;;  %v5472_v30 = vld [vmem:[%s6788_s23] ss:$0 sm:$0xff]  ;;  %s6795_s12 = scalar_lea.vmem %s6793_s2, %s5893_s7  ;;  %s6812_s2 = sld [smem:[#allocation22_spill]] }
  0xba   : > { %1918 = vmatpush.bf16.msra.mxu1 %v5280_v34  ;;  %s6799_s29 = scalar_lea.vmem %s6796_s17, %s5913_s4  ;;  %s6815_s17 = sld [smem:[#allocation61_spill]] }
  0xbb   : > { %2018 = vmatpush.bf16.msra.mxu2 %v5288_v35  ;;  %s6823_s4 = sld [smem:[#allocation43_spill]] }
  0xbc   : > { %2178 = vmatpush.bf16.msra.mxu0 %v5294_v36  ;;  %s6804_s30 = scalar_lea.vmem %s6803_s14, %s5893_s7 }
  0xbe   : > { %1965 = vmatpush.bf16.msrb.mxu1 %v5287_v38  ;;  %v5476_v38 = vld [vmem:[%s6787_s20 + $0x1] ss:$0 sm:$0xff]  ;;  %s6806_s20 = sld [smem:[#allocation23_spill]] }
  0xc1   : > { %p5246_p8 = scmp.ne.s32.totalorder %s6823_s4, 1 }
  0xc2   : > { %1966 = vmatpush.bf16.msrb.mxu1 %v5286_v41 }
  0xc6   : > { %1967 = vmatpush.bf16.msrb.mxu1 %v5285_v45  ;;  %v1797_v45 = vlaneseq }
  0xca   : > { %1968 = vmatpush.bf16.msrb.mxu1 %v5284_v48 }
 0x121   : > { %v1811_v13 = vpop.xlane.xlu0 %1810 }
 0x122   : > { %v1823_v14 = vmul.f32 %v6029_v12, %v1811_v13 }
 0x124   : > { %v6033_v15 = vsub.f32 %v6021_v2, %v1823_v14  ;;  %v5474_v14 = vld [vmem:[%s6786_s6] ss:$0 sm:$0xff] }
 0x126   : > { %v1827_v16 = vmul.f32 %v6033_v15, %v6033_v15 }
 0x128   : > { %v1829_v17 = vsel %vm1808_vm2, %v1827_v16, 0.0 }
 0x129   : > { %1830 = vadd.xlane.f32.xlu1 %v1829_v17  ;;  %v1815_v18 = vpop.xlane.xlu0 %1814 }
 0x12a   : > { %v1824_v19 = vmul.f32 %v6029_v12, %v1815_v18 }
 0x12c   : > { %v6040_v20 = vsub.f32 %v6023_v3, %v1824_v19 }
 0x12e   : > { %v1828_v21 = vmul.f32 %v6040_v20, %v6040_v20 }
 0x130   : > { %v1832_v22 = vsel %vm1812_vm3, %v1828_v21, 0.0 }
 0x131   : > { %1833 = vadd.xlane.f32.xlu1 %v1832_v22 }
 0x19c   : > { %v1831_v32 = vpop.xlane.xlu1 %1830 }
 0x19d   : > { %v1835_v33 = vmul.f32 %v1831_v32, %v6029_v12 }
 0x19f   : > { %v1837_v37 = vadd.f32 1e-05, %v1835_v33  ;;  %v5304_v33 = vld [vmem:[%s6780_s21 + $0x30] sm:$0xff] }
 0x1a1   : > { %5498 = vrsqrt.f32 %v1837_v37  ;;  %vm1845_vm6 = vweird.f32 %v1837_v37 }
 0x1a4   : > { %v1834_v39 = vpop.xlane.xlu1 %1833 }
 0x1a5   : > { %v1836_v40 = vmul.f32 %v1834_v39, %v6029_v12  ;;  %v5302_v39 = vld [vmem:[%s6780_s21 + $0x20] sm:$0xff] }
 0x1a7   : > { %v5499_v42 = vpop.eup %5498  ;;  %v1838_v43 = vadd.f32 1e-05, %v1836_v40 }
 0x1a8   : > { %v1840_v44 = vmul.f32 %v5499_v42, %v1837_v37  ;;  %vm1846_vm5 = vweird.f32 %v5499_v42  ;;  %v5303_v37 = vld [vmem:[%s6780_s21 + $0x28] sm:$0xff]  ;;  %s6797_s21 = scalar_lea.vmem %s6794_s9, %s5893_s7 }
 0x1a9   : > { %5500 = vrsqrt.f32 %v1838_v43  ;;  %vm1847_vm7 = vmor %vm1845_vm6, %vm1846_vm5  ;;  %vm1855_vm9 = vweird.f32 %v1838_v43 }
 0x1aa   : > { %v1841_v46 = vmul.f32 %v5499_v42, %v1840_v44 }
 0x1ac   : > { %v1842_v47 = vmul.f32 0.5, %v1841_v46  ;;  %v1798_v46 = vshrl.u32 %v1797_v45, 7 }
 0x1ae   : > { %v1843_v49 = vsub.f32 1.5, %v1842_v47  ;;  %v1801_v47 = vand.u32 127, %v1797_v45 }
 0x1af   : > { %v5501_v50 = vpop.eup %5500 }
 0x1b0   : > { %v1844_v51 = vmul.f32 %v5499_v42, %v1843_v49  ;;  %v1850_v52 = vmul.f32 %v5501_v50, %v1838_v43  ;;  %vm1856_vm8 = vweird.f32 %v5501_v50  ;;  %vm1802_vm14 = vcmp.le.s32.totalorder %v1801_v47, %v1798_v46 }
 0x1b1   : > { %vm1857_vm10 = vmor %vm1855_vm9, %vm1856_vm8  ;;  %v5651_v49 = vmov -1e+09  }
 0x1b2   : > { %v1851_v53 = vmul.f32 %v5501_v50, %v1850_v52  ;;  %v1848_v54 = vsel %vm1847_vm7, %v5499_v42, %v1844_v51  ;;  %v1799_v52 = vadd.s32 8, %v1798_v46 }
 0x1b3   : > { %v1859_v58 = vmul.f32 %v1848_v54, %v6033_v15  ;;  %v5650_v15 = vmov 65535  }
 0x1b4   : > { %v1852_v55 = vmul.f32 0.5, %v1851_v53  ;;  %v2109_v16 = vsel %vm2107_vm11, 4294967295, %v5650_v15  ;;  %vm1803_vm0 = vcmp.le.s32.totalorder %v1801_v47, %v1799_v52  ;;  %v5293_v47 = vld [vmem:[%s6789_s26 + $0x8] sm:$0xff] }
 0x1b5   : > { %v1864_v62 = vmul.f32 %v5470_v57, %v1859_v58  ;;  %v2110_v21 = vsel %vm2108_vm12, %v2109_v16, 0 }
 0x1b6   : > { %v1853_v56 = vsub.f32 1.5, %v1852_v55 }
 0x1b7   : > { %v1869_v1 = vadd.f32 %v5471_v61, %v1864_v62 }
 0x1b8   : > { %v1854_v59 = vmul.f32 %v5501_v50, %v1853_v56  ;;  %v6096_v56 = vsel %vm1803_vm0, 0.0, %v5651_v49 }
 0x1ba   : > { %v1858_v60 = vsel %vm1857_vm10, %v5501_v50, %v1854_v59  ;;  %v6092_v50 = vsel %vm1802_vm14, 0.0, %v5651_v49 }
 0x1bb   : > { %v1860_v63 = vmul.f32 %v1858_v60, %v6040_v20 }
 0x1bd   : > { %v1865_v0 = vmul.f32 %v5470_v57, %v1860_v63 }
 0x1bf   : > { %v1870_v4 = vadd.f32 %v5471_v61, %v1865_v0  ;;  %v5477_v61 = vld [vmem:[%s6786_s6 + $0x1] ss:$0 sm:$0xff]  ;;  %s6805_s6 = sld [smem:[#allocation62_spill]] }
 0x1c1   : > { %v1879_v6 = vpack.c.bf16 %v1870_v4, %v1869_v1 }
 0x1c3   : > { %4748 = vmatmul.msk.bf16.vlgmr.msra.gmra.mxu1 %vm1808_vm2, %v1879_v6  ;;  %4782 = vmatmul.msk.bf16.vlgmr.msra.gmra.mxu2 %vm1808_vm2, %v1879_v6 }
 0x1c4   : > { %4810 = vmatmul.msk.bf16.vlgmr.msra.gmra.mxu0 %vm1808_vm2, %v1879_v6  ;;  %2227 = vmatpush.bf16.msra.mxu1 %v5301_v5 }
 0x1c8   : > { %2228 = vmatpush.bf16.msra.mxu1 %v5300_v7 }
 0x1cc   : > { %2229 = vmatpush.bf16.msra.mxu1 %v5299_v8 }
 0x1d0   : > { %2230 = vmatpush.bf16.msra.mxu1 %v5298_v9 }
 0x1d3   : > { %4765 = vmatmul.msk.bf16.vlgmr.msrb.gmra.mxu1 %vm1808_vm2, %v1879_v6 }
 0x1e3   : > { %4836 = vmatmul.msk.bf16.vlgmr.msra.gmra.mxu1 %vm1808_vm2, %v1879_v6 }
 0x240   : > { %v1920_v10 = vpop.f32.mrf.mxu1 }
 0x241   : > { %v1921_v35 = vadd.f32 %v5472_v30, %v1920_v10 }
 0x246   : > { %v2020_v11 = vpop.f32.mrf.mxu2 }
 0x247   : > { %v2021_v18 = vadd.f32 %v5474_v14, %v2020_v11 }
 0x248   : > { %v1922_v13 = vpop.f32.mrf.mxu1 }
 0x249   : > { %v1923_v32 = vadd.f32 %v5472_v30, %v1922_v13 }
 0x24b   : > { %v2025_v36 = vpack.c.bf16 %v1923_v32, %v1921_v35 }
 0x24e   : > { %v2022_v17 = vpop.f32.mrf.mxu2 }
 0x24f   : > { %v2023_v19 = vadd.f32 %v5474_v14, %v2022_v17 }
 0x250   : > { %v1970_v20 = vpop.f32.mrf.mxu1 }
 0x251   : > { %v2103_v22 = vpack.c.bf16 %v2023_v19, %v2021_v18  ;;  %v1971_v26 = vadd.f32 %v5475_v24, %v1970_v20 }
 0x253   : > { %v2112_v23 = vand.u32 %v2110_v21, %v2103_v22 }
 0x255   : > { %2121 = vmatpush.bf16.msra.mxu3 %v2112_v23 }
 0x258   : > { %v1972_v25 = vpop.f32.mrf.mxu1 }
 0x259   : > { %v1973_v27 = vadd.f32 %v5475_v24, %v1972_v25 }
 0x25b   : > { %v2026_v28 = vpack.c.bf16 %v1973_v27, %v1971_v26 }
 0x25d   : > { %v2032_v31 = vsel %vm2027_vm13, %v2026_v28, 0 }
 0x25e   : > { %2041 = vmatpush.bf16.xpose.msrb.mxu2 %v2032_v31 }
 0x260   : > { %v2232_v34 = vpop.f32.mrf.mxu1 }
 0x261   : > { %v2233_v41 = vadd.f32 %v5476_v38, %v2232_v34 }
 0x265   : > { %4783 = vmatmul.msk.bf16.vlgmr.msrb.gmra.mxu2 %vm2027_vm13, %v2025_v36 }
 0x266   : > { %2279 = vmatpush.bf16.msra.mxu2 %v5305_v29 }
 0x268   : > { %v2234_v40 = vpop.f32.mrf.mxu1 }
 0x269   : > { %v2235_v42 = vadd.f32 %v5476_v38, %v2234_v40  ;;  %v2180_v40 = vpop.f32.mrf.mxu0 }
 0x26a   : > { %2280 = vmatpush.bf16.msra.mxu2 %v5304_v33 }
 0x26b   : > { %v2290_v43 = vpack.c.bf16 %v2235_v42, %v2233_v41 }
 0x26d   : > { %v2295_v44 = vsel %vm2027_vm13, %v2290_v43, 0  ;;  %v5473_v43 = vld [vmem:[%s6788_s23 + $0x1] ss:$0 sm:$0xff]  ;;  %s6807_s23 = sld [smem:[#allocation24_spill]] }
 0x26e   : > { %2281 = vmatpush.bf16.msra.mxu2 %v5303_v37  ;;  %2304 = vmatpush.bf16.xpose.msrb.mxu3 %v2295_v44  ;;  %v2181_v45 = vadd.f32 %v5473_v43, %v2180_v40  ;;  %v5478_v40 = vld [vmem:[%s6791_s1] ss:$0 sm:$0xff]  ;;  %s6810_s1 = sld [smem:[#allocation49_spill]] }
 0x271   : > { %v2182_v42 = vpop.f32.mrf.mxu0 }
 0x272   : > { %2282 = vmatpush.bf16.msra.mxu2 %v5302_v39  ;;  %v2183_v44 = vadd.f32 %v5473_v43, %v2182_v42 }
 0x273   : > { %s6809_s15 = scalar_lea.vmem %s6807_s23, %s5893_s7 }
 0x274   : > { %v2289_v46 = vpack.c.bf16 %v2183_v44, %v2181_v45 }
 0x275   : > { %4862 = vmatmul.msk.bf16.vlgmr.msra.gmra.mxu2 %vm1808_vm2, %v1879_v6 }
 0x276   : > { %2441 = vmatpush.bf16.msrb.mxu2 %v5293_v47 }
 0x2e8   : > { %v2043_v48 = vpop.f32.mrf.mxu2 }
 0x2e9   : > { %v2048_v51 = vmul.f32 0.17677669, %v2043_v48  ;;  %v5292_v48 = vld [vmem:[%s6789_s26] sm:$0xff] }
 0x2ea   : > { %2442 = vmatpush.bf16.msrb.mxu2 %v5292_v48 }
 0x2eb   : > { %v2050_v53 = vadd.f32 %v2048_v51, %v6092_v50 }
 0x2ed   : > { %v2053_v54 = vsel %vm2052_vm15, %v2050_v53, -inf }
 0x2ee   : > { %2054 = vmax.xlane.f32.xlu2 %v2053_v54 }
 0x2f0   : > { %v2045_v55 = vpop.f32.mrf.mxu2 }
 0x2f1   : > { %v2049_v57 = vmul.f32 0.17677669, %v2045_v55 }
 0x2f3   : > { %v2051_v58 = vadd.f32 %v2049_v57, %v6096_v56 }
 0x2f5   : > { %v2057_v59 = vsel %vm2056_vm1, %v2051_v58, -inf }
 0x2f6   : > { %2058 = vmax.xlane.f32.xlu2 %v2057_v59 }
 0x2f8   : > { %v2284_v60 = vpop.f32.mrf.mxu2 }
 0x2f9   : > { %v2285_v63 = vadd.f32 %v5477_v61, %v2284_v60 }
 0x300   : > { %v2286_v62 = vpop.f32.mrf.mxu2 }
 0x301   : > { %v2287_v0 = vadd.f32 %v5477_v61, %v2286_v62 }
 0x303   : > { %v2364_v1 = vpack.c.bf16 %v2287_v0, %v2285_v63 }
 0x305   : > { %v2369_v4 = vand.u32 %v2364_v1, %v2110_v21 }
 0x307   : > { %2378 = vmatpush.bf16.msrb.mxu0 %v2369_v4 }
 0x361   : > { %v2055_v5 = vpop.xlane.xlu2 %2054 }
 0x362   : > { %v2060_v6 = vsub.f32 %v2050_v53, %v2055_v5 }
 0x364   : > { %v2062_v7 = vmul.f32 1.442695, %v2060_v6 }
 0x366   : > { %5502 = vpow2.f32 %v2062_v7 }
 0x369   : > { %v2059_v8 = vpop.xlane.xlu2 %2058 }
 0x36a   : > { %v2061_v9 = vsub.f32 %v2051_v58, %v2059_v8 }
 0x36c   : > { %v5503_v10 = vpop.eup %5502  ;;  %v2064_v11 = vmul.f32 1.442695, %v2061_v9 }
 0x36d   : > { %v2066_v13 = vsel %vm2052_vm15, %v5503_v10, 0.0 }
 0x36e   : > { %5504 = vpow2.f32 %v2064_v11  ;;  %2067 = vadd.xlane.f32.xlu0 %v2066_v13 }
 0x374   : > { %v5505_v14 = vpop.eup %5504 }
 0x375   : > { %v2069_v15 = vsel %vm2056_vm1, %v5505_v14, 0.0 }
 0x376   : > { %2070 = vadd.xlane.f32.xlu1 %v2069_v15 }
 0x3e1   : > { %v2068_v16 = vpop.xlane.xlu0 %2067 }
 0x3e2   : > { %5506 = vrcp.f32 %v2068_v16  ;;  %v2083_v25 = vand.u32 2147483648, %v2068_v16  ;;  %vm2077_vm5 = vweird.f32 %v2068_v16  ;;  %v2081_v26 = vand.u32 2147483647, %v2068_v16 }
 0x3e4   : > { %v2084_v32 = vor.u32 1.1754944e-38, %v2083_v25  ;;  %vm2082_vm8 = vcmp.eq.f32.partialorder %v2081_v26, 8.507059e+37 }
 0x3e8   : > { %v5507_v17 = vpop.eup %5506 }
 0x3e9   : > { %v2073_v18 = vmul.f32 %v5507_v17, %v2068_v16  ;;  %v2071_v19 = vpop.xlane.xlu1 %2070  ;;  %vm2078_vm4 = vweird.f32 %v5507_v17 }
 0x3ea   : > { %5508 = vrcp.f32 %v2071_v19  ;;  %vm2079_vm6 = vmor %vm2077_vm5, %vm2078_vm4  ;;  %v2098_v28 = vand.u32 2147483648, %v2071_v19  ;;  %v2096_v30 = vand.u32 2147483647, %v2071_v19  ;;  %vm2092_vm9 = vweird.f32 %v2071_v19 }
 0x3eb   : > { %v2074_v20 = vsub.f32 1.0, %v2073_v18 }
 0x3ec   : > { %v2099_v34 = vor.u32 1.1754944e-38, %v2098_v28  ;;  %vm2097_vm11 = vcmp.eq.f32.partialorder %v2096_v30, 8.507059e+37 }
 0x3ed   : > { %v2075_v21 = vmul.f32 %v5507_v17, %v2074_v20 }
 0x3ef   : > { %v2076_v23 = vadd.f32 %v5507_v17, %v2075_v21 }
 0x3f0   : > { %v5509_v22 = vpop.eup %5508 }
 0x3f1   : > { %v2088_v24 = vmul.f32 %v5509_v22, %v2071_v19  ;;  %vm2093_vm7 = vweird.f32 %v5509_v22  ;;  %v2080_v31 = vsel %vm2079_vm6, %v5507_v17, %v2076_v23 }
 0x3f2   : > { %vm2094_vm10 = vmor %vm2092_vm9, %vm2093_vm7  ;;  %v2085_v35 = vsel %vm2082_vm8, %v2084_v32, %v2080_v31 }
 0x3f3   : > { %v2089_v27 = vsub.f32 1.0, %v2088_v24  ;;  %v2086_v38 = vmul.f32 %v5503_v10, %v2085_v35  ;;  %v5306_v35 = vld [vmem:[%s6789_s26 + $0x10] sm:$0xff] }
 0x3f5   : > { %v2090_v29 = vmul.f32 %v5509_v22, %v2089_v27 }
 0x3f7   : > { %v2091_v33 = vadd.f32 %v5509_v22, %v2090_v29 }
 0x3f9   : > { %v2095_v36 = vsel %vm2094_vm10, %v5509_v22, %v2091_v33 }
 0x3fa   : > { %v2100_v37 = vsel %vm2097_vm11, %v2099_v34, %v2095_v36  ;;  %v5307_v34 = vld [vmem:[%s6789_s26 + $0x18] sm:$0xff]  ;;  %s6808_s26 = scalar_lea.vmem %s6806_s20, %s5893_s7 }
 0x3fb   : > { %v2101_v39 = vmul.f32 %v5505_v14, %v2100_v37  ;;  %2412 = vmatpush.bf16.msrb.mxu1 %v5307_v34 }
 0x3fd   : > { %v2102_v41 = vpack.c.bf16 %v2101_v39, %v2086_v38 }
 0x3ff   : > { %4784 = vmatmul.msk.bf16.vlgmr.msra.gmra.mxu3 %vm2052_vm15, %v2102_v41  ;;  %2413 = vmatpush.bf16.msrb.mxu1 %v5306_v35 }
 0x40f   : > { %4863 = vmatmul.msk.bf16.vlgmr.msrb.gmra.mxu3 %vm2027_vm13, %v2289_v46 }
 0x482   : > { %v2123_v49 = vpop.f32.mrf.mxu3 }
 0x48a   : > { %v2125_v51 = vpop.f32.mrf.mxu3 }
 0x48b   : > { %v2132_v52 = vpack.c.bf16 %v2125_v51, %v2123_v49 }
 0x48d   : > { %4886 = vmatmul.msk.bf16.vlgmr.msrb.gmra.mxu2 %vm2027_vm13, %v2132_v52 }
 0x492   : > { %v2306_v53 = vpop.f32.mrf.mxu3 }
 0x493   : > { %v2311_v54 = vmul.f32 0.17677669, %v2306_v53 }
 0x495   : > { %v2313_v55 = vadd.f32 %v2311_v54, %v6092_v50 }
 0x497   : > { %v2315_v57 = vsel %vm2052_vm15, %v2313_v55, -inf }
 0x498   : > { %2316 = vmax.xlane.f32.xlu2 %v2315_v57 }
 0x49a   : > { %v2308_v58 = vpop.f32.mrf.mxu3 }
 0x49b   : > { %v2312_v59 = vmul.f32 0.17677669, %v2308_v58 }
 0x49d   : > { %v2314_v60 = vadd.f32 %v2312_v59, %v6096_v56 }
 0x49f   : > { %v2318_v61 = vsel %vm2056_vm1, %v2314_v60, -inf }
 0x4a0   : > { %2319 = vmax.xlane.f32.xlu0 %v2318_v61 }
 0x50b   : > { %v2317_v62 = vpop.xlane.xlu2 %2316 }
 0x50c   : > { %v2321_v63 = vsub.f32 %v2313_v55, %v2317_v62  ;;  %v4913_v62 = vld [vmem:[%s6792_s11 + $0x30] sm:$0xf] }
 0x50e   : > { %v2323_v0 = vmul.f32 1.442695, %v2321_v63  ;;  %v5315_v63 = vld [vmem:[%s6792_s11 + $0x34] sm:$0xf0] }
 0x510   : > { %5510 = vpow2.f32 %v2323_v0  ;;  %v2444_v39 = vpop.f32.mrf.mxu2  ;;  %v5314_v0 = vld [vmem:[%s6792_s11 + $0x34] sm:$0xf] }
 0x513   : > { %v2320_v1 = vpop.xlane.xlu0 %2319 }
 0x514   : > { %v2322_v4 = vsub.f32 %v2314_v60, %v2320_v1  ;;  %v4914_v1 = vor.u32 %v5315_v63, %v4913_v62 }
 0x516   : > { %v5511_v5 = vpop.eup %5510  ;;  %v2325_v6 = vmul.f32 1.442695, %v2322_v4  ;;  %v4915_v4 = vld [vmem:[%s6792_s11 + $0x38] sm:$0xf0]  ;;  %2575 = vmatpush.bf16.msra.mxu3 %v4914_v1 }
 0x517   : > { %v2327_v50 = vsel %vm2052_vm15, %v5511_v5, 0.0 }
 0x518   : > { %5512 = vpow2.f32 %v2325_v6  ;;  %2328 = vadd.xlane.f32.xlu1 %v2327_v50  ;;  %v2446_v46 = vpop.f32.mrf.mxu2  ;;  %v4905_v6 = vld [vmem:[%s6792_s11 + $0x20] sm:$0xf]  ;;  %v5313_v50 = vld [vmem:[%s6792_s11 + $0x24] sm:$0xf0] }
 0x51e   : > { %v5513_v7 = vpop.eup %5512 }
 0x51f   : > { %v2330_v8 = vsel %vm2056_vm1, %v5513_v7, 0.0 }
 0x520   : > { %2331 = vadd.xlane.f32.xlu2 %v2330_v8  ;;  %v4906_v8 = vor.u32 %v5313_v50, %v4905_v6 }
 0x522   : > { %2576 = vmatpush.bf16.msra.mxu3 %v4906_v8  ;;  %v5330_v8 = vld [vmem:[%s6798_s25 + $0x70] sm:$0xff] }
 0x58b   : > { %v2329_v56 = vpop.xlane.xlu1 %2328 }
 0x58c   : > { %5514 = vrcp.f32 %v2329_v56  ;;  %v2344_v18 = vand.u32 2147483648, %v2329_v56  ;;  %vm2338_vm14 = vweird.f32 %v2329_v56  ;;  %v2342_v19 = vand.u32 2147483647, %v2329_v56 }
 0x58e   : > { %v2345_v25 = vor.u32 1.1754944e-38, %v2344_v18  ;;  %vm2343_vm4 = vcmp.eq.f32.partialorder %v2342_v19, 8.507059e+37  ;;  %v4889_v19 = vld [vmem:[%s6792_s11] sm:$0xf] }
 0x592   : > { %v5515_v9 = vpop.eup %5514 }
 0x593   : > { %v2334_v10 = vmul.f32 %v5515_v9, %v2329_v56  ;;  %v2332_v11 = vpop.xlane.xlu2 %2331  ;;  %vm2339_vm12 = vweird.f32 %v5515_v9  ;;  %v4907_v56 = vld [vmem:[%s6792_s11 + $0x28] sm:$0xf0] }
 0x594   : > { %5516 = vrcp.f32 %v2332_v11  ;;  %vm2340_vm0 = vmor %vm2338_vm14, %vm2339_vm12  ;;  %v2359_v21 = vand.u32 2147483648, %v2332_v11  ;;  %v2357_v24 = vand.u32 2147483647, %v2332_v11  ;;  %vm2353_vm5 = vweird.f32 %v2332_v11 }
 0x595   : > { %v2335_v13 = vsub.f32 1.0, %v2334_v10  ;;  %v4897_v10 = vld [vmem:[%s6792_s11 + $0x10] sm:$0xf] }
 0x596   : > { %v2360_v27 = vor.u32 1.1754944e-38, %v2359_v21  ;;  %vm2358_vm7 = vcmp.eq.f32.partialorder %v2357_v24, 8.507059e+37  ;;  %v5308_v21 = vld [vmem:[%s6792_s11 + $0x4] sm:$0xf]  ;;  %v4891_v24 = vld [vmem:[%s6792_s11 + $0x8] sm:$0xf0] }
 0x597   : > { %v2336_v14 = vmul.f32 %v5515_v9, %v2335_v13  ;;  %v5310_v13 = vld [vmem:[%s6792_s11 + $0x14] sm:$0xf] }
 0x599   : > { %v2337_v16 = vadd.f32 %v5515_v9, %v2336_v14 }
 0x59a   : > { %v5517_v15 = vpop.eup %5516 }
 0x59b   : > { %v2349_v17 = vmul.f32 %v5517_v15, %v2332_v11  ;;  %v2341_v22 = vsel %vm2340_vm0, %v5515_v9, %v2337_v16  ;;  %vm2354_vm1 = vweird.f32 %v5517_v15  ;;  %v5311_v11 = vld [vmem:[%s6792_s11 + $0x14] sm:$0xf0] }
 0x59c   : > { %vm2355_vm6 = vmor %vm2353_vm5, %vm2354_vm1  ;;  %v2346_v28 = vsel %vm2343_vm4, %v2345_v25, %v2341_v22  ;;  %v4898_v14 = vor.u32 %v5311_v11, %v4897_v10  ;;  %v4894_v25 = vor.u32 %v5308_v21, %v4891_v24 }
 0x59d   : > { %v2350_v20 = vsub.f32 1.0, %v2349_v17  ;;  %v2347_v31 = vmul.f32 %v5511_v5, %v2346_v28  ;;  %v4918_v5 = vor.u32 %v5314_v0, %v4915_v4  ;;  %v5331_v0 = vld [vmem:[%s6798_s25 + $0x78] sm:$0xff] }
 0x59e   : > { %2577 = vmatpush.bf16.msra.mxu3 %v4898_v14  ;;  %2919 = vmatpush.bf16.msra.mxu2 %v5331_v0  ;;  %v5326_v0 = vld [vmem:[%s6798_s25 + $0x50] sm:$0xff] }
 0x59f   : > { %v2351_v23 = vmul.f32 %v5517_v15, %v2350_v20  ;;  %2589 = vmatpush.bf16.msra.mxu0 %v4918_v5  ;;  %v5309_v20 = vld [vmem:[%s6792_s11 + $0x4] sm:$0xf0] }
 0x5a1   : > { %v2352_v26 = vadd.f32 %v5517_v15, %v2351_v23  ;;  %v4890_v23 = vor.u32 %v5309_v20, %v4889_v19  ;;  %v5329_v19 = vld [vmem:[%s6798_s25 + $0x68] sm:$0xff] }
 0x5a2   : > { %2920 = vmatpush.bf16.msra.mxu2 %v5330_v8 }
 0x5a3   : > { %v2356_v29 = vsel %vm2355_vm6, %v5517_v15, %v2352_v26  ;;  %v4899_v15 = vld [vmem:[%s6792_s11 + $0x18] sm:$0xf0]  ;;  %2578 = vmatpush.bf16.msra.mxu3 %v4890_v23 }
 0x5a4   : > { %v2361_v30 = vsel %vm2358_vm7, %v2360_v27, %v2356_v29  ;;  %v4902_v17 = vor.u32 %v5310_v13, %v4899_v15  ;;  %v5323_v13 = vld [vmem:[%s6798_s25 + $0x38] sm:$0xff] }
 0x5a5   : > { %v2362_v32 = vmul.f32 %v5513_v7, %v2361_v30  ;;  %v5312_v7 = vld [vmem:[%s6792_s11 + $0x24] sm:$0xf]  ;;  %2905 = vmatpush.bf16.msra.mxu1 %v5323_v13  ;;  %s6811_s11 = sld [smem:[#allocation21_spill]] }
 0x5a6   : > { %v4910_v9 = vor.u32 %v5312_v7, %v4907_v56  ;;  %2921 = vmatpush.bf16.msra.mxu2 %v5329_v19 }
 0x5a7   : > { %v2363_v33 = vpack.c.bf16 %v2362_v32, %v2347_v31 }
 0x5a8   : > { %2590 = vmatpush.bf16.msra.mxu0 %v4910_v9 }
 0x5a9   : > { %4864 = vmatmul.msk.bf16.vlgmr.msrb.gmra.mxu0 %vm2052_vm15, %v2363_v33 }
 0x5ab   : > { %s6813_s9 = scalar_lea.vmem %s6811_s11, %s5893_s7 }
 0x5ac   : > { %2591 = vmatpush.bf16.msra.mxu0 %v4902_v17 }
 0x5b0   : > { %2592 = vmatpush.bf16.msra.mxu0 %v4894_v25  ;;  %v5322_v25 = vld [vmem:[%s6798_s25 + $0x30] sm:$0xff] }
 0x5b1   : > { %2906 = vmatpush.bf16.msra.mxu1 %v5322_v25  ;;  %v5318_v25 = vld [vmem:[%s6798_s25 + $0x10] sm:$0xff] }
 0x626   : > { %v2380_v36 = vpop.f32.mrf.mxu0 }
 0x62e   : > { %v2382_v37 = vpop.f32.mrf.mxu0 }
 0x62f   : > { %v2390_v38 = vpack.c.bf16 %v2382_v37, %v2380_v36 }
 0x631   : > { %4877 = vmatmul.msk.bf16.vlgmr.msrb.gmra.mxu1 %vm2027_vm13, %v2390_v38 }
 0x6ae   : > { %v2415_v41 = vpop.f32.mrf.mxu1 }
 0x6af   : > { %v2445_v42 = vadd.f32 %v2444_v39, %v2415_v41  ;;  %v5479_v41 = vld [vmem:[%s6795_s12] ss:$0 sm:$0xff]  ;;  %s6814_s12 = scalar_lea.vmem %s6812_s2, %s5893_s7  ;;  %s6824_s7 = sld [smem:[#allocation41_spill]] (!%p5246_p8) }
 0x6b1   : > { %v2453_v43 = vadd.f32 %v5478_v40, %v2445_v42 }
 0x6b3   : > { %v6123_v44 = vadd.f32 %v2453_v43, %v6021_v2 }
 0x6b5   : > { %v2459_v45 = vsel %vm1808_vm2, %v6123_v44, 0.0 }
 0x6b6   : > { %v2417_v47 = vpop.f32.mrf.mxu1  ;;  %2460 = vadd.xlane.f32.xlu0 %v2459_v45 }
 0x6b7   : > { %v2447_v48 = vadd.f32 %v2446_v46, %v2417_v47  ;;  %v5480_v46 = vld [vmem:[%s6797_s21] ss:$0 sm:$0xff] }
 0x6b9   : > { %v2454_v49 = vadd.f32 %v5478_v40, %v2447_v48 }
 0x6bb   : > { %v6128_v51 = vadd.f32 %v2454_v49, %v6023_v3 }
 0x6bd   : > { %v2462_v52 = vsel %vm1812_vm3, %v6128_v51, 0.0 }
 0x6be   : > { %2463 = vadd.xlane.f32.xlu1 %v2462_v52 }
 0x729   : > { %v2461_v2 = vpop.xlane.xlu0 %2460 }
 0x72a   : > { %v2465_v53 = vmul.f32 %v2461_v2, %v6029_v12 }
 0x72c   : > { %v6134_v54 = vsub.f32 %v6123_v44, %v2465_v53 }
 0x72e   : > { %v2469_v55 = vmul.f32 %v6134_v54, %v6134_v54 }
 0x730   : > { %v2471_v57 = vsel %vm1808_vm2, %v2469_v55, 0.0 }
 0x731   : > { %v2464_v3 = vpop.xlane.xlu1 %2463  ;;  %2472 = vadd.xlane.f32.xlu2 %v2471_v57 }
 0x732   : > { %v2466_v58 = vmul.f32 %v2464_v3, %v6029_v12 }
 0x734   : > { %v6141_v59 = vsub.f32 %v6128_v51, %v2466_v58 }
 0x736   : > { %v2470_v60 = vmul.f32 %v6141_v59, %v6141_v59 }
 0x738   : > { %v2474_v61 = vsel %vm1812_vm3, %v2470_v60, 0.0 }
 0x739   : > { %2475 = vadd.xlane.f32.xlu0 %v2474_v61 }
 0x7a4   : > { %v2473_v16 = vpop.xlane.xlu2 %2472 }
 0x7a5   : > { %v2477_v18 = vmul.f32 %v2473_v16, %v6029_v12 }
 0x7a7   : > { %v2479_v22 = vadd.f32 1e-05, %v2477_v18 }
 0x7a9   : > { %5518 = vrsqrt.f32 %v2479_v22  ;;  %vm2487_vm8 = vweird.f32 %v2479_v22 }
 0x7ac   : > { %v2476_v26 = vpop.xlane.xlu0 %2475 }
 0x7ad   : > { %v2478_v27 = vmul.f32 %v2476_v26, %v6029_v12 }
 0x7af   : > { %v5519_v28 = vpop.eup %5518  ;;  %v2480_v29 = vadd.f32 1e-05, %v2478_v27 }
 0x7b0   : > { %v2482_v30 = vmul.f32 %v5519_v28, %v2479_v22  ;;  %vm2488_vm15 = vweird.f32 %v5519_v28 }
 0x7b1   : > { %5520 = vrsqrt.f32 %v2480_v29  ;;  %vm2489_vm9 = vmor %vm2487_vm8, %vm2488_vm15  ;;  %vm2497_vm11 = vweird.f32 %v2480_v29 }
 0x7b2   : > { %v2483_v31 = vmul.f32 %v5519_v28, %v2482_v30 }
 0x7b4   : > { %v2484_v32 = vmul.f32 0.5, %v2483_v31 }
 0x7b6   : > { %v2485_v33 = vsub.f32 1.5, %v2484_v32 }
 0x7b7   : > { %v5521_v34 = vpop.eup %5520 }
 0x7b8   : > { %v2486_v35 = vmul.f32 %v5519_v28, %v2485_v33  ;;  %v2492_v36 = vmul.f32 %v5521_v34, %v2480_v29  ;;  %vm2498_vm10 = vweird.f32 %v5521_v34 }
 0x7b9   : > { %vm2499_vm12 = vmor %vm2497_vm11, %vm2498_vm10 }
 0x7ba   : > { %v2493_v37 = vmul.f32 %v5521_v34, %v2492_v36  ;;  %v2490_v38 = vsel %vm2489_vm9, %v5519_v28, %v2486_v35 }
 0x7bb   : > { %v2501_v42 = vmul.f32 %v2490_v38, %v6134_v54  ;;  %v2522_v54 = vld [vmem:[%s6799_s29] sm:$0x3] }
 0x7bc   : > { %v2494_v39 = vmul.f32 0.5, %v2493_v37  ;;  %v2525_v55 = vperm.slane %v2522_v54, 1 }
 0x7bd   : > { %v2506_v47 = vmul.f32 %v5479_v41, %v2501_v42 }
 0x7be   : > { %v2495_v40 = vsub.f32 1.5, %v2494_v39  ;;  %v5321_v39 = vld [vmem:[%s6798_s25 + $0x28] sm:$0xff] }
 0x7bf   : > { %v2511_v52 = vadd.f32 %v5480_v46, %v2506_v47  ;;  %2907 = vmatpush.bf16.msra.mxu1 %v5321_v39 }
 0x7c0   : > { %v2496_v43 = vmul.f32 %v5521_v34, %v2495_v40 }
 0x7c2   : > { %v2500_v45 = vsel %vm2499_vm12, %v5521_v34, %v2496_v43  ;;  %v5328_v34 = vld [vmem:[%s6798_s25 + $0x60] sm:$0xff] }
 0x7c3   : > { %v2502_v48 = vmul.f32 %v2500_v45, %v6141_v59  ;;  %v2524_v59 = vperm.slane %v2522_v54, 0  ;;  %2922 = vmatpush.bf16.msra.mxu2 %v5328_v34  ;;  %v5320_v54 = vld [vmem:[%s6798_s25 + $0x20] sm:$0xff] }
 0x7c4   : > { %2908 = vmatpush.bf16.msra.mxu1 %v5320_v54  ;;  %v6277_v54 = vld [vmem:[%s6800_s8] sm:$0xff] }
 0x7c5   : > { %v2507_v49 = vmul.f32 %v5479_v41, %v2502_v48  ;;  %v5327_v48 = vld [vmem:[%s6798_s25 + $0x58] sm:$0xff] }
 0x7c7   : > { %v2512_v2 = vadd.f32 %v5480_v46, %v2507_v49  ;;  %2923 = vmatpush.bf16.msra.mxu2 %v5327_v48 }
 0x7c9   : > { %v2521_v53 = vpack.c.bf16 %v2512_v2, %v2511_v52 }
 0x7cb   : > { %4919 = vmatmul.msk.bf16.vlgmr.msra.gmra.mxu3 %vm1808_vm2, %v2521_v53  ;;  %4920 = vmatmul.msk.bf16.vlgmr.msra.gmra.mxu0 %vm1808_vm2, %v2521_v53 }
 0x7cc   : > { %2924 = vmatpush.bf16.msra.mxu2 %v5326_v0  ;;  %v3000_v0 = vsel %vm1808_vm2, %v6277_v54, 0.0 }
 0x7cd   : > { %3001 = vadd.xlane.f32.xlu0 %v3000_v0 }
 0x848   : > { %v2594_v57 = vpop.f32.mrf.mxu0 }
 0x849   : > { %v6177_v3 = vadd.f32 %v2594_v57, %v2525_v55 }
 0x84b   : > { %v6180_v58 = vmul.f32 0.70710677, %v6177_v3 }
 0x84d   : > { %v2647_v60 = vmul.f32 %v6180_v58, %v6180_v58 }
 0x84e   : > { %v2580_v61 = vpop.f32.mrf.mxu3 }
 0x84f   : > { %v6184_v62 = vmin.f32 %v2647_v60, 16.0  ;;  %v6186_v63 = vadd.f32 %v2580_v61, %v2524_v59 }
 0x850   : > { %v2596_v1 = vpop.f32.mrf.mxu0 }
 0x851   : > { %v2649_v4 = vmul.f32 2.1237322e-06, %v6184_v62  ;;  %v2660_v5 = vmul.f32 3.8918573e-05, %v6184_v62  ;;  %v6191_v6 = vadd.f32 %v2596_v1, %v2525_v55  ;;  %v6194_v50 = vmul.f32 0.70710677, %v6186_v63 }
 0x853   : > { %v2661_v7 = vadd.f32 0.001143296, %v2660_v5  ;;  %v2650_v56 = vadd.f32 0.00028619796, %v2649_v4  ;;  %v2607_v9 = vmul.f32 %v6194_v50, %v6194_v50  ;;  %v6200_v10 = vmul.f32 0.70710677, %v6191_v6 }
 0x855   : > { %v2662_v11 = vmul.f32 %v2661_v7, %v6184_v62  ;;  %v6204_v14 = vmin.f32 %v2607_v9, 16.0  ;;  %v2727_v15 = vmul.f32 %v6200_v10, %v6200_v10  ;;  %v2651_v20 = vmul.f32 %v2650_v56, %v6184_v62  ;;  %v5319_v56 = vld [vmem:[%s6798_s25 + $0x18] sm:$0xff] }
 0x856   : > { %v2582_v16 = vpop.f32.mrf.mxu3  ;;  %2909 = vmatpush.bf16.msra.mxu1 %v5319_v56 }
 0x857   : > { %v2663_v17 = vadd.f32 0.014752088, %v2662_v11  ;;  %v6208_v18 = vadd.f32 %v2582_v16, %v2524_v59  ;;  %v2620_v21 = vmul.f32 3.8918573e-05, %v6204_v14  ;;  %v6213_v22 = vmin.f32 %v2727_v15, 16.0  ;;  %v5325_v15 = vld [vmem:[%s6798_s25 + $0x48] sm:$0xff] }
 0x858   : > { %v2609_v26 = vmul.f32 2.1237322e-06, %v6204_v14  ;;  %v2652_v32 = vadd.f32 0.0036580483, %v2651_v20  ;;  %2925 = vmatpush.bf16.msra.mxu2 %v5325_v15 }
 0x859   : > { %v2664_v23 = vmul.f32 %v2663_v17, %v6184_v62  ;;  %v6217_v24 = vmul.f32 0.70710677, %v6208_v18  ;;  %v2621_v27 = vadd.f32 0.001143296, %v2620_v21  ;;  %v2729_v28 = vmul.f32 2.1237322e-06, %v6213_v22 }
 0x85a   : > { %v2740_v30 = vmul.f32 3.8918573e-05, %v6213_v22  ;;  %v2610_v40 = vadd.f32 0.00028619796, %v2609_v26  ;;  %v2653_v49 = vmul.f32 %v2652_v32, %v6184_v62  ;;  %2910 = vmatpush.bf16.msra.mxu1 %v5318_v25 }
 0x85b   : > { %v2665_v29 = vadd.f32 0.112945676, %v2664_v23  ;;  %v2687_v31 = vmul.f32 %v6217_v24, %v6217_v24  ;;  %v2622_v33 = vmul.f32 %v2621_v27, %v6204_v14  ;;  %v2730_v36 = vadd.f32 0.00028619796, %v2729_v28 }
 0x85c   : > { %v2741_v37 = vadd.f32 0.001143296, %v2740_v30  ;;  %v2611_v55 = vmul.f32 %v2610_v40, %v6204_v14  ;;  %v2654_v5 = vadd.f32 0.05243302, %v2653_v49  ;;  %v5316_v49 = vld [vmem:[%s6798_s25] sm:$0xff] }
 0x85d   : > { %v2666_v35 = vmul.f32 %v2665_v29, %v6184_v62  ;;  %v6228_v38 = vmin.f32 %v2687_v31, 16.0  ;;  %v2623_v41 = vadd.f32 0.014752088, %v2622_v33  ;;  %v2731_v2 = vmul.f32 %v2730_v36, %v6213_v22  ;;  %v5324_v31 = vld [vmem:[%s6798_s25 + $0x40] sm:$0xff]  ;;  %v5317_v36 = vld [vmem:[%s6798_s25 + $0x8] sm:$0xff] }
 0x85e   : > { %v2742_v43 = vmul.f32 %v2741_v37, %v6213_v22  ;;  %v2612_v9 = vadd.f32 0.0036580483, %v2611_v55  ;;  %v2655_v19 = vmul.f32 %v2654_v5, %v6184_v62  ;;  %2926 = vmatpush.bf16.msra.mxu2 %v5324_v31  ;;  %2911 = vmatpush.bf16.msra.mxu1 %v5317_v36 }
 0x85f   : > { %v2667_v42 = vadd.f32 0.4994258, %v2666_v35  ;;  %v2624_v45 = vmul.f32 %v2623_v41, %v6204_v14  ;;  %v2689_v46 = vmul.f32 2.1237322e-06, %v6228_v38  ;;  %v2700_v47 = vmul.f32 3.8918573e-05, %v6228_v38 }
 0x860   : > { %v2743_v53 = vadd.f32 0.014752088, %v2742_v43  ;;  %v2732_v7 = vadd.f32 0.0036580483, %v2731_v2  ;;  %v2613_v26 = vmul.f32 %v2612_v9, %v6204_v14  ;;  %v2656_v34 = vadd.f32 0.18741608, %v2655_v19 }
 0x861   : > { %v2668_v52 = vmul.f32 %v2667_v42, %v6184_v62  ;;  %v2625_v57 = vadd.f32 0.112945676, %v2624_v45  ;;  %v2701_v59 = vadd.f32 0.001143296, %v2700_v47  ;;  %v2690_v4 = vadd.f32 0.00028619796, %v2689_v46 }
 0x862   : > { %v2744_v61 = vmul.f32 %v2743_v53, %v6213_v22  ;;  %v2733_v20 = vmul.f32 %v2732_v7, %v6213_v22  ;;  %v2614_v39 = vadd.f32 0.05243302, %v2613_v26  ;;  %v2657_v47 = vmul.f32 %v2656_v34, %v6184_v62  ;;  %2912 = vmatpush.bf16.msra.mxu1 %v5316_v49 }
 0x863   : > { %v6241_v60 = vadd.f32 1.0, %v2668_v52  ;;  %v2626_v1 = vmul.f32 %v2625_v57, %v6204_v14  ;;  %v2702_v8 = vmul.f32 %v2701_v59, %v6228_v38  ;;  %v2691_v17 = vmul.f32 %v2690_v4, %v6228_v38 }
 0x864   : > { %v2745_v13 = vadd.f32 0.112945676, %v2744_v61  ;;  %v2734_v35 = vadd.f32 0.05243302, %v2733_v20  ;;  %v2615_v53 = vmul.f32 %v2614_v39, %v6204_v14  ;;  %v2658_v5 = vadd.f32 1.1283791, %v2657_v47 }
 0x865   : > { %5522 = vrcp.f32 %v6241_v60  ;;  %v2627_v11 = vadd.f32 0.4994258, %v2626_v1  ;;  %v2703_v23 = vadd.f32 0.014752088, %v2702_v8  ;;  %v2692_v33 = vadd.f32 0.0036580483, %v2691_v17 }
 0x866   : > { %v2746_v21 = vmul.f32 %v2745_v13, %v6213_v22  ;;  %v2735_v48 = vmul.f32 %v2734_v35, %v6213_v22  ;;  %v2679_v55 = vand.u32 2147483647, %v6241_v60  ;;  %v2681_v57 = vand.u32 2147483648, %v6241_v60 }
 0x867   : > { %v2628_v16 = vmul.f32 %v2627_v11, %v6204_v14  ;;  %v2704_v30 = vmul.f32 %v2703_v23, %v6228_v38  ;;  %v2693_v45 = vmul.f32 %v2692_v33, %v6228_v38  ;;  %vm2675_vm0 = vweird.f32 %v6241_v60 }
 0x868   : > { %v2747_v29 = vadd.f32 0.4994258, %v2746_v21  ;;  %v2736_v4 = vadd.f32 0.18741608, %v2735_v48  ;;  %v2616_v8 = vadd.f32 0.18741608, %v2615_v53  ;;  %v2659_v20 = vmul.f32 %v2658_v5, %v6180_v58 }
 0x869   : > { %v6257_v27 = vadd.f32 1.0, %v2628_v16  ;;  %v2705_v41 = vadd.f32 0.112945676, %v2704_v30  ;;  %v2694_v59 = vadd.f32 0.05243302, %v2693_v45  ;;  %v2682_v9 = vor.u32 1.1754944e-38, %v2681_v57 }
 0x86a   : > { %v2748_v40 = vmul.f32 %v2747_v29, %v6213_v22  ;;  %vm2680_vm4 = vcmp.eq.f32.partialorder %v2679_v55, 8.507059e+37  ;;  %v2737_v17 = vmul.f32 %v2736_v4, %v6213_v22  ;;  %v2617_v21 = vmul.f32 %v2616_v8, %v6204_v14 }
 0x86b   : > { %v5523_v28 = vpop.eup %5522  ;;  %5524 = vrcp.f32 %v6257_v27  ;;  %v2706_v46 = vmul.f32 %v2705_v41, %v6228_v38  ;;  %vm2635_vm5 = vweird.f32 %v6257_v27  ;;  %v2639_v25 = vand.u32 2147483647, %v6257_v27 }
 0x86c   : > { %v2671_v32 = vmul.f32 %v5523_v28, %v6241_v60  ;;  %v6265_v43 = vadd.f32 1.0, %v2748_v40  ;;  %vm2676_vm14 = vweird.f32 %v5523_v28  ;;  %v2695_v60 = vmul.f32 %v2694_v59, %v6228_v38 }
 0x86d   : > { %v2707_v61 = vadd.f32 0.4994258, %v2706_v46  ;;  %vm2677_vm1 = vmor %vm2675_vm0, %vm2676_vm14  ;;  %v2641_v29 = vand.u32 2147483648, %v6257_v27  ;;  %v2738_v31 = vadd.f32 1.1283791, %v2737_v17  ;;  %vm2640_vm8 = vcmp.eq.f32.partialorder %v2639_v25, 8.507059e+37 }
 0x86e   : > { %v2672_v37 = vsub.f32 1.0, %v2671_v32  ;;  %5526 = vrcp.f32 %v6265_v43  ;;  %v2761_v22 = vand.u32 2147483648, %v6265_v43  ;;  %v2696_v30 = vadd.f32 0.18741608, %v2695_v60 }
 0x86f   : > { %v2708_v56 = vmul.f32 %v2707_v61, %v6228_v38  ;;  %v2759_v14 = vand.u32 2147483647, %v6265_v43  ;;  %v2618_v32 = vadd.f32 1.1283791, %v2617_v21  ;;  %vm2755_vm9 = vweird.f32 %v6265_v43 }
 0x870   : > { %v2673_v42 = vmul.f32 %v5523_v28, %v2672_v37  ;;  %v2642_v39 = vor.u32 1.1754944e-38, %v2641_v29  ;;  %v2762_v40 = vor.u32 1.1754944e-38, %v2761_v22  ;;  %v2697_v41 = vmul.f32 %v2696_v30, %v6228_v38  ;;  %v5481_v29 = vld [vmem:[%s6804_s30] ss:$0 sm:$0xff] }
 0x871   : > { %v6272_v52 = vpop.eup %5524  ;;  %v2709_v15 = vadd.f32 1.0, %v2708_v56  ;;  %vm2760_vm11 = vcmp.eq.f32.partialorder %v2759_v14, 8.507059e+37  ;;  %v2619_v48 = vmul.f32 %v2618_v32, %v6194_v50  ;;  %v2600_v38 = vmul.f32 0.5, %v6177_v3 }
 0x872   : > { %v2674_v2 = vadd.f32 %v5523_v28, %v2673_v42  ;;  %v2631_v62 = vmul.f32 %v6272_v52, %v6257_v27  ;;  %vm2636_vm6 = vweird.f32 %v6272_v52  ;;  %v2739_v27 = vmul.f32 %v2738_v31, %v6200_v10 }
 0x873   : > { %5528 = vrcp.f32 %v2709_v15  ;;  %vm6302_vm15 = vmor %vm2635_vm5, %vm2636_vm6  ;;  %v2719_v53 = vand.u32 2147483647, %v2709_v15  ;;  %v2721_v55 = vand.u32 2147483648, %v2709_v15  ;;  %v2602_v10 = vmul.f32 0.5, %v6191_v6 }
 0x874   : > { %v2632_v1 = vsub.f32 1.0, %v2631_v62  ;;  %v2678_v7 = vsel %vm2677_vm1, %v5523_v28, %v2674_v2  ;;  %v5527_v13 = vpop.eup %5526  ;;  %vm2715_vm14 = vweird.f32 %v2709_v15  ;;  %v2599_v3 = vmul.f32 0.5, %v6186_v63 }
 0x875   : > { %v2683_v16 = vsel %vm2680_vm4, %v2682_v9, %v2678_v7  ;;  %v2751_v19 = vmul.f32 %v5527_v13, %v6265_v43  ;;  %vm2756_vm7 = vweird.f32 %v5527_v13  ;;  %v2698_v43 = vadd.f32 1.1283791, %v2697_v41 }
 0x876   : > { %v2633_v11 = vmul.f32 %v6272_v52, %v2632_v1  ;;  %v2684_v28 = vmul.f32 %v2683_v16, %v2659_v20  ;;  %vm2757_vm10 = vmor %vm2755_vm9, %vm2756_vm7  ;;  %v2722_v4 = vor.u32 1.1754944e-38, %v2721_v55  ;;  %vm2720_vm1 = vcmp.eq.f32.partialorder %v2719_v53, 8.507059e+37 }
 0x877   : > { %v2752_v26 = vsub.f32 1.0, %v2751_v19  ;;  %v2699_v50 = vmul.f32 %v2698_v43, %v6217_v24  ;;  %v2601_v6 = vmul.f32 0.5, %v6208_v18  ;;  %v3002_v19 = vpop.xlane.xlu0 %3001 }
 0x878   : > { %v2634_v23 = vadd.f32 %v6272_v52, %v2633_v11  ;;  %v4922_v37 = vclamps-f32 %v2684_v28, 1.0  ;;  %v3003_v20 = vmul.f32 %v3002_v19, %v6029_v12  ;;  %v5332_v19 = vld [vmem:[%s6810_s1] sm:$0xff] }
 0x879   : > { %v2753_v58 = vmul.f32 %v5527_v13, %v2752_v26  ;;  %v5529_v36 = vpop.eup %5528 }
 0x87a   : > { %v2638_v34 = vsel %vm6302_vm15, %v6272_v52, %v2634_v23  ;;  %v2711_v45 = vmul.f32 %v5529_v36, %v2709_v15  ;;  %v2768_v2 = vadd.f32 1.0, %v4922_v37  ;;  %vm2716_vm12 = vweird.f32 %v5529_v36 }
 0x87b   : > { %v2754_v35 = vadd.f32 %v5527_v13, %v2753_v58  ;;  %v2643_v46 = vsel %vm2640_vm8, %v2642_v39, %v2638_v34  ;;  %vm2717_vm0 = vmor %vm2715_vm14, %vm2716_vm12  ;;  %v3004_v21 = vsub.f32 %v6277_v54, %v3003_v20  ;;  %v5339_v39 = vld [vmem:[%s6805_s6 + $0x18] sm:$0xff]  ;;  %v5346_v20 = vld [vmem:[%s6810_s1 + $0x20] sm:$0xff]  ;;  %vm3265_vm12 = vcmask 1043456  }
 0x87c   : > { %v2712_v52 = vsub.f32 1.0, %v2711_v45  ;;  %v2644_v57 = vmul.f32 %v2643_v46, %v2619_v48  ;;  %v2772_v1 = vmul.f32 %v2768_v2, %v2600_v38  ;;  %3128 = vmatpush.bf16.msrb.mxu0 %v5339_v39  ;;  %v5482_v45 = vld [vmem:[%s6808_s26] ss:$0 sm:$0xff]  ;;  %v5337_v46 = vld [vmem:[%s6805_s6 + $0x8] sm:$0xff]  ;;  %vm3210_vm14 = vcmask 64512  }
 0x87d   : > { %v2758_v42 = vsel %vm2757_vm10, %v5527_v13, %v2754_v35  ;;  %v3005_v23 = vmul.f32 %v3004_v21, %v3004_v21  ;;  %v5484_v39 = vld [vmem:[%s6813_s9] ss:$0 sm:$0xff] }
 0x87e   : > { %v2763_v47 = vsel %vm2760_vm11, %v2762_v40, %v2758_v42  ;;  %v2713_v59 = vmul.f32 %v5529_v36, %v2712_v52  ;;  %v4921_v5 = vclamps-f32 %v2644_v57, 1.0  ;;  %v5483_v52 = vld [vmem:[%s6809_s15] ss:$0 sm:$0xff] }
 0x87f   : > { %v2764_v49 = vmul.f32 %v2763_v47, %v2739_v27  ;;  %v3006_v25 = vsel %vm1808_vm2, %v3005_v23, 0.0 }
 0x880   : > { %v2714_v0 = vadd.f32 %v5529_v36, %v2713_v59  ;;  %v2767_v13 = vadd.f32 1.0, %v4921_v5  ;;  %3007 = vadd.xlane.f32.xlu0 %v3006_v25  ;;  %v5335_v5 = vld [vmem:[%s6810_s1 + $0x18] sm:$0xff] }
 0x881   : > { %v4924_v62 = vclamps-f32 %v2764_v49, 1.0  ;;  %v5336_v49 = vld [vmem:[%s6805_s6] sm:$0xff]  ;;  %3074 = vmatpush.bf16.msrb.mxu3 %v5335_v5 }
 0x882   : > { %v2718_v8 = vsel %vm2717_vm0, %v5529_v36, %v2714_v0  ;;  %v2771_v24 = vmul.f32 %v2767_v13, %v2599_v3  ;;  %v5347_v3 = vld [vmem:[%s6810_s1 + $0x28] sm:$0xff]  ;;  %v5489_v5 = vld [vmem:[%s5991_s22] ss:$0 sm:$0xff]  ;;  %vm3214_vm0 = vcmask 63488  }
 0x883   : > { %v2770_v61 = vadd.f32 1.0, %v4924_v62  ;;  %v2723_v56 = vsel %vm2720_vm1, %v2722_v4, %v2718_v8  ;;  %v5334_v8 = vld [vmem:[%s6810_s1 + $0x10] sm:$0xff] }
 0x884   : > { %v2724_v11 = vmul.f32 %v2723_v56, %v2699_v50  ;;  %v5348_v56 = vld [vmem:[%s6810_s1 + $0x30] sm:$0xff] }
 0x885   : > { %v2774_v7 = vmul.f32 %v2770_v61, %v2602_v10  ;;  %3075 = vmatpush.bf16.msrb.mxu3 %v5334_v8 }
 0x886   : > { %v4923_v60 = vclamps-f32 %v2724_v11, 1.0 }
 0x887   : > { %v2808_v9 = vpack.c.bf16 %v2774_v7, %v2772_v1  ;;  %v5349_v7 = vld [vmem:[%s6810_s1 + $0x38] sm:$0xff] }
 0x888   : > { %v2769_v15 = vadd.f32 1.0, %v4923_v60  ;;  %3330 = vmatpush.bf16.msrb.mxu2 %v5349_v7  ;;  %v5333_v60 = vld [vmem:[%s6810_s1 + $0x8] sm:$0xff] }
 0x889   : > { %2927 = vmatmul.bf16.vlgmr.msra.gmra.mxu2 %v2808_v9  ;;  %v5486_v9 = vld [vmem:[%s5983_s28] ss:$0 sm:$0xff]  ;;  %3076 = vmatpush.bf16.msrb.mxu3 %v5333_v60 }
 0x88a   : > { %v2773_v16 = vmul.f32 %v2769_v15, %v2601_v6 }
 0x88c   : > { %v2807_v17 = vpack.c.bf16 %v2773_v16, %v2771_v24  ;;  %3331 = vmatpush.bf16.msrb.mxu2 %v5348_v56 }
 0x88d   : > { %3077 = vmatpush.bf16.msrb.mxu3 %v5332_v19 }
 0x88e   : > { %2913 = vmatmul.bf16.vlgmr.msra.gmra.mxu1 %v2807_v17 }
 0x890   : > { %3332 = vmatpush.bf16.msrb.mxu2 %v5347_v3 }
 0x894   : > { %3333 = vmatpush.bf16.msrb.mxu2 %v5346_v20 }
 0x90b   : > { %v2914_v63 = vpop.f32.mrf.mxu1 }
 0x90c   : > { %v2928_v26 = vpop.f32.mrf.mxu2 }
 0x90d   : > { %v2929_v28 = vadd.f32 %v2928_v26, %v2914_v63  ;;  %v5342_v26 = vld [vmem:[%s5987_s5 + $0x10] sm:$0xff] }
 0x90f   : > { %v2933_v18 = vadd.f32 %v2929_v28, %v6123_v44  ;;  %v3008_v44 = vpop.xlane.xlu0 %3007 }
 0x910   : > { %v3009_v34 = vmul.f32 %v3008_v44, %v6029_v12 }
 0x911   : > { %v6325_v22 = vadd.f32 %v5481_v29, %v2933_v18  ;;  %v5341_v18 = vld [vmem:[%s5987_s5 + $0x8] sm:$0xff] }
 0x912   : > { %v3010_v35 = vadd.f32 1e-05, %v3009_v34 }
 0x913   : > { %v2944_v31 = vsel %vm1808_vm2, %v6325_v22, 0.0  ;;  %v2916_v54 = vpop.f32.mrf.mxu1 }
 0x914   : > { %v2930_v30 = vpop.f32.mrf.mxu2  ;;  %2945 = vadd.xlane.f32.xlu1 %v2944_v31  ;;  %5530 = vrsqrt.f32 %v3010_v35  ;;  %vm3017_vm4 = vweird.f32 %v3010_v35 }
 0x915   : > { %v2931_v58 = vadd.f32 %v2930_v30, %v2916_v54  ;;  %v5340_v54 = vld [vmem:[%s5987_s5] sm:$0xff] }
 0x917   : > { %v2934_v14 = vadd.f32 %v2931_v58, %v6128_v51  ;;  %v5338_v51 = vld [vmem:[%s6805_s6 + $0x10] sm:$0xff] }
 0x918   : > { %3129 = vmatpush.bf16.msrb.mxu0 %v5338_v51 }
 0x919   : > { %v6330_v32 = vadd.f32 %v5481_v29, %v2934_v14 }
 0x91a   : > { %v5531_v36 = vpop.eup %5530 }
 0x91b   : > { %v2947_v33 = vsel %vm1812_vm3, %v6330_v32, 0.0  ;;  %v3012_v37 = vmul.f32 %v5531_v36, %v3010_v35  ;;  %vm3018_vm5 = vweird.f32 %v5531_v36 }
 0x91c   : > { %2948 = vadd.xlane.f32.xlu2 %v2947_v33  ;;  %vm3019_vm6 = vmor %vm3017_vm4, %vm3018_vm5  ;;  %3130 = vmatpush.bf16.msrb.mxu0 %v5337_v46 }
 0x91d   : > { %v3013_v40 = vmul.f32 %v5531_v36, %v3012_v37 }
 0x91f   : > { %v3014_v41 = vmul.f32 0.5, %v3013_v40 }
 0x920   : > { %3131 = vmatpush.bf16.msrb.mxu0 %v5336_v49  ;;  %v5353_v49 = vld [vmem:[%s6805_s6 + $0x38] sm:$0xff] }
 0x921   : > { %v3015_v27 = vsub.f32 1.5, %v3014_v41 }
 0x923   : > { %v3016_v42 = vmul.f32 %v5531_v36, %v3015_v27  ;;  %v5485_v27 = vld [vmem:[%s6814_s12] ss:$0 sm:$0xff] }
 0x925   : > { %v3020_v47 = vsel %vm3019_vm6, %v5531_v36, %v3016_v42 }
 0x926   : > { %v3021_v48 = vmul.f32 %v3020_v47, %v3004_v21  ;;  %v5343_v21 = vld [vmem:[%s5987_s5 + $0x18] sm:$0xff] }
 0x927   : > { %3177 = vmatpush.bf16.msra.mxu3 %v5343_v21 }
 0x928   : > { %v3025_v2 = vmul.f32 %v5482_v45, %v3021_v48 }
 0x92a   : > { %v3029_v43 = vadd.f32 %v5483_v52, %v3025_v2  ;;  %v5352_v2 = vld [vmem:[%s6805_s6 + $0x30] sm:$0xff] }
 0x92b   : > { %3178 = vmatpush.bf16.msra.mxu3 %v5342_v26 }
 0x92c   : > { %v6345_v53 = vpack.c.bf16 %v3029_v43, %v3029_v43  ;;  %v5351_v43 = vld [vmem:[%s6805_s6 + $0x28] sm:$0xff] }
 0x92e   : > { %5022 = vmatmul.msk.bf16.vlgmr.msrb.gmra.mxu0 %vm1808_vm2, %v6345_v53 }
 0x92f   : > { %3179 = vmatpush.bf16.msra.mxu3 %v5341_v18 }
 0x933   : > { %3180 = vmatpush.bf16.msra.mxu3 %v5340_v54 }
 0x987   : > { %v2946_v55 = vpop.xlane.xlu1 %2945 }
 0x988   : > { %v2950_v57 = vmul.f32 %v2946_v55, %v6029_v12  ;;  %v5350_v55 = vld [vmem:[%s6805_s6 + $0x20] sm:$0xff] }
 0x98a   : > { %v6351_v62 = vsub.f32 %v6325_v22, %v2950_v57  ;;  %v5357_v57 = vld [vmem:[%s5987_s5 + $0x38] sm:$0xff] }
 0x98c   : > { %v2954_v59 = vmul.f32 %v6351_v62, %v6351_v62 }
 0x98e   : > { %v2956_v38 = vsel %vm1808_vm2, %v2954_v59, 0.0  ;;  %v5355_v59 = vld [vmem:[%s5987_s5 + $0x28] sm:$0xff] }
 0x98f   : > { %2957 = vadd.xlane.f32.xlu1 %v2956_v38  ;;  %v2949_v10 = vpop.xlane.xlu2 %2948  ;;  %v5354_v38 = vld [vmem:[%s5987_s5 + $0x20] sm:$0xff] }
 0x990   : > { %v2951_v61 = vmul.f32 %v2949_v10, %v6029_v12 }
 0x992   : > { %v6358_v0 = vsub.f32 %v6330_v32, %v2951_v61  ;;  %v5487_v61 = vld [vmem:[%s6815_s17] ss:$0 sm:$0xff] }
 0x994   : > { %v2955_v1 = vmul.f32 %v6358_v0, %v6358_v0 }
 0x996   : > { %v2959_v50 = vsel %vm1812_vm3, %v2955_v1, 0.0 }
 0x997   : > { %2960 = vadd.xlane.f32.xlu2 %v2959_v50 }
 0x9ab   : > { %v3133_v4 = vpop.f32.mrf.mxu0 }
 0x9ac   : > { %v3134_v11 = vadd.f32 %v5486_v9, %v3133_v4 }
 0x9ae   : > { %v3187_v24 = vpack.c.bf16 %v3134_v11, %v3134_v11 }
 0x9b0   : > { %v3192_v17 = vsel %vm2027_vm13, %v3187_v24, 0 }
 0x9b1   : > { %3201 = vmatpush.bf16.xpose.msra.mxu0 %v3192_v17 }
 0x9b3   : > { %v3135_v13 = vpop.f32.mrf.mxu0 }
 0x9b4   : > { %v5490_v13 = vld [vmem:[%s5983_s28 + $0x1] ss:$0 sm:$0xff] }
 0x9b9   : > { %3433 = vmatpush.bf16.msrb.mxu0 %v5357_v57 }
 0xa02   : > { %v2958_v6 = vpop.xlane.xlu1 %2957 }
 0xa03   : > { %v2962_v15 = vmul.f32 %v2958_v6, %v6029_v12 }
 0xa05   : > { %v2964_v16 = vadd.f32 1e-05, %v2962_v15 }
 0xa07   : > { %5532 = vrsqrt.f32 %v2964_v16  ;;  %vm2972_vm15 = vweird.f32 %v2964_v16 }
 0xa0a   : > { %v2961_v23 = vpop.xlane.xlu2 %2960 }
 0xa0b   : > { %v2963_v25 = vmul.f32 %v2961_v23, %v6029_v12  ;;  %v5491_v23 = vld [vmem:[%s5991_s22 + $0x1] ss:$0 sm:$0xff] }
 0xa0d   : > { %v5533_v63 = vpop.eup %5532  ;;  %v2965_v28 = vadd.f32 1e-05, %v2963_v25 }
 0xa0e   : > { %v2967_v29 = vmul.f32 %v5533_v63, %v2964_v16  ;;  %vm2973_vm7 = vweird.f32 %v5533_v63 }
 0xa0f   : > { %5534 = vrsqrt.f32 %v2965_v28  ;;  %vm2974_vm8 = vmor %vm2972_vm15, %vm2973_vm7  ;;  %vm2982_vm10 = vweird.f32 %v2965_v28 }
 0xa10   : > { %v2968_v30 = vmul.f32 %v5533_v63, %v2967_v29 }
 0xa12   : > { %v2969_v31 = vmul.f32 0.5, %v2968_v30 }
 0xa14   : > { %v2970_v58 = vsub.f32 1.5, %v2969_v31 }
 0xa15   : > { %v5535_v14 = vpop.eup %5534 }
 0xa16   : > { %v2971_v33 = vmul.f32 %v5533_v63, %v2970_v58  ;;  %v2977_v44 = vmul.f32 %v5535_v14, %v2965_v28  ;;  %vm2983_vm9 = vweird.f32 %v5535_v14 }
 0xa17   : > { %vm2984_vm11 = vmor %vm2982_vm10, %vm2983_vm9 }
 0xa18   : > { %v2978_v34 = vmul.f32 %v5535_v14, %v2977_v44  ;;  %v2975_v35 = vsel %vm2974_vm8, %v5533_v63, %v2971_v33 }
 0xa19   : > { %v2986_v40 = vmul.f32 %v2975_v35, %v6351_v62  ;;  %v5356_v62 = vld [vmem:[%s5987_s5 + $0x30] sm:$0xff] }
 0xa1a   : > { %v2979_v36 = vmul.f32 0.5, %v2978_v34  ;;  %3434 = vmatpush.bf16.msrb.mxu0 %v5356_v62 }
 0xa1b   : > { %v2991_v42 = vmul.f32 %v5484_v39, %v2986_v40 }
 0xa1c   : > { %v2980_v37 = vsub.f32 1.5, %v2979_v36 }
 0xa1d   : > { %v2996_v47 = vadd.f32 %v5485_v27, %v2991_v42 }
 0xa1e   : > { %v2981_v51 = vmul.f32 %v5535_v14, %v2980_v37  ;;  %3435 = vmatpush.bf16.msrb.mxu0 %v5355_v59 }
 0xa20   : > { %v2985_v41 = vsel %vm2984_vm11, %v5535_v14, %v2981_v51 }
 0xa21   : > { %v2987_v45 = vmul.f32 %v2985_v41, %v6358_v0 }
 0xa22   : > { %3436 = vmatpush.bf16.msrb.mxu0 %v5354_v38 }
 0xa23   : > { %v2992_v46 = vmul.f32 %v5484_v39, %v2987_v45 }
 0xa25   : > { %v2997_v48 = vadd.f32 %v5485_v27, %v2992_v46 }
 0xa27   : > { %v3038_v52 = vpack.c.bf16 %v2997_v48, %v2996_v47 }
 0xa29   : > { %5005 = vmatmul.msk.bf16.vlgmr.msrb.gmra.mxu3 %vm1808_vm2, %v3038_v52  ;;  %5067 = vmatmul.msk.bf16.vlgmr.msrb.gmra.mxu2 %vm1808_vm2, %v3038_v52 }
 0xa2a   : > { %3382 = vmatpush.bf16.msrb.mxu3 %v5353_v49 }
 0xa2e   : > { %3383 = vmatpush.bf16.msrb.mxu3 %v5352_v2 }
 0xa32   : > { %3384 = vmatpush.bf16.msrb.mxu3 %v5351_v43 }
 0xa36   : > { %3385 = vmatpush.bf16.msrb.mxu3 %v5350_v55 }
 0xa39   : > { %5039 = vmatmul.msk.bf16.vlgmr.msra.gmra.mxu3 %vm1808_vm2, %v6345_v53 }
 0xa49   : > { %5093 = vmatmul.msk.bf16.vlgmr.msrb.gmra.mxu3 %vm1808_vm2, %v6345_v53 }
 0xaac   : > { %v3079_v10 = vpop.f32.mrf.mxu3 }
 0xaad   : > { %v3080_v1 = vadd.f32 %v5487_v61, %v3079_v10 }
 0xab4   : > { %v3081_v0 = vpop.f32.mrf.mxu3 }
 0xab5   : > { %v3082_v50 = vadd.f32 %v5487_v61, %v3081_v0 }
 0xab7   : > { %v3186_v4 = vpack.c.bf16 %v3082_v50, %v3080_v1  ;;  %v3335_v1 = vpop.f32.mrf.mxu2 }
 0xab9   : > { %5040 = vmatmul.msk.bf16.vlgmr.msra.gmra.mxu0 %vm2027_vm13, %v3186_v4 }
 0xabc   : > { %v3182_v7 = vpop.f32.mrf.mxu3 }
 0xabd   : > { %v3183_v8 = vadd.f32 %v5489_v5, %v3182_v7  ;;  %v5488_v5 = vld [vmem:[%s6815_s17 + $0x1] ss:$0 sm:$0xff] }
 0xabf   : > { %v3261_v56 = vpack.c.bf16 %v3183_v8, %v3183_v8  ;;  %v3337_v4 = vpop.f32.mrf.mxu2  ;;  %v3336_v8 = vadd.f32 %v5488_v5, %v3335_v1 }
 0xac0   : > { %v3338_v7 = vadd.f32 %v5488_v5, %v3337_v4 }
 0xac1   : > { %v3267_v9 = vsel %vm3265_vm12, %v3261_v56, 0 }
 0xac2   : > { %3276 = vmatpush.bf16.msrb.mxu1 %v3267_v9  ;;  %v3442_v56 = vpack.c.bf16 %v3338_v7, %v3336_v8  ;;  %v5345_v9 = vld [vmem:[%s5994_s18 + $0x8] sm:$0xff] }
 0xac3   : > { %3592 = vmatpush.bf16.msra.mxu0 %v5345_v9 }
 0xac4   : > { %v3184_v11 = vpop.f32.mrf.mxu3 }
 0xac5   : > { %v5344_v11 = vld [vmem:[%s5994_s18] sm:$0xff] }
 0xac7   : > { %3593 = vmatpush.bf16.msra.mxu0 %v5344_v11 }
 0xac9   : > { %5119 = vmatmul.msk.bf16.vlgmr.msrb.gmra.mxu0 %vm1808_vm2, %v6345_v53 }
 0xacc   : > { %v3387_v60 = vpop.f32.mrf.mxu3 }
 0xacd   : > { %v3388_v3 = vadd.f32 %v5490_v13, %v3387_v60 }
 0xacf   : > { %v3443_v6 = vpack.c.bf16 %v3388_v3, %v3388_v3 }
 0xad1   : > { %v3448_v15 = vsel %vm2027_vm13, %v3443_v6, 0 }
 0xad2   : > { %3457 = vmatpush.bf16.xpose.msra.mxu1 %v3448_v15 }
 0xad4   : > { %v3389_v24 = vpop.f32.mrf.mxu3 }
 0xb36   : > { %v3203_v16 = vpop.f32.mrf.mxu0 }
 0xb37   : > { %v3208_v17 = vmul.f32 0.17677669, %v3203_v16 }
 0xb39   : > { %v3211_v19 = vsel %vm3210_vm14, %v3208_v17, -inf }
 0xb3a   : > { %3212 = vmax.xlane.f32.xlu1 %v3211_v19 }
 0xb3e   : > { %v3205_v20 = vpop.f32.mrf.mxu0 }
 0xb3f   : > { %v3209_v21 = vmul.f32 0.17677669, %v3205_v20 }
 0xb41   : > { %v3215_v53 = vsel %vm3214_vm0, %v3209_v21, -inf }
 0xb42   : > { %3216 = vmax.xlane.f32.xlu2 %v3215_v53 }
 0xb46   : > { %v3438_v25 = vpop.f32.mrf.mxu0 }
 0xb47   : > { %v3439_v26 = vadd.f32 %v5491_v23, %v3438_v25 }
 0xb49   : > { %v3515_v63 = vpack.c.bf16 %v3439_v26, %v3439_v26 }
 0xb4b   : > { %v3520_v28 = vsel %vm3265_vm12, %v3515_v63, 0 }
 0xb4c   : > { %3529 = vmatpush.bf16.msra.mxu2 %v3520_v28 }
 0xb4e   : > { %v3440_v29 = vpop.f32.mrf.mxu0 }
 0xbad   : > { %v3213_v18 = vpop.xlane.xlu1 %3212 }
 0xbae   : > { %v3218_v30 = vsub.f32 %v3208_v17, %v3213_v18 }
 0xbb0   : > { %v3220_v31 = vmul.f32 1.442695, %v3218_v30 }
 0xbb2   : > { %5536 = vpow2.f32 %v3220_v31 }
 0xbb5   : > { %v3217_v54 = vpop.xlane.xlu2 %3216 }
 0xbb6   : > { %v3219_v58 = vsub.f32 %v3209_v21, %v3217_v54 }
 0xbb8   : > { %v5537_v14 = vpop.eup %5536  ;;  %v3222_v33 = vmul.f32 1.442695, %v3219_v58 }
 0xbb9   : > { %v3224_v44 = vsel %vm3210_vm14, %v5537_v14, 0.0 }
 0xbba   : > { %5538 = vpow2.f32 %v3222_v33  ;;  %3225 = vadd.xlane.f32.xlu0 %v3224_v44 }
 0xbc0   : > { %v5539_v34 = vpop.eup %5538 }
 0xbc1   : > { %v3227_v35 = vsel %vm3214_vm0, %v5539_v34, 0.0 }
 0xbc2   : > { %3228 = vadd.xlane.f32.xlu1 %v3227_v35 }
 0xc2d   : > { %v3226_v36 = vpop.xlane.xlu0 %3225 }
 0xc2e   : > { %5540 = vrcp.f32 %v3226_v36  ;;  %v3241_v46 = vand.u32 2147483648, %v3226_v36  ;;  %vm3235_vm4 = vweird.f32 %v3226_v36  ;;  %v3239_v47 = vand.u32 2147483647, %v3226_v36 }
 0xc30   : > { %v3242_v55 = vor.u32 1.1754944e-38, %v3241_v46  ;;  %vm3240_vm7 = vcmp.eq.f32.partialorder %v3239_v47, 8.507059e+37 }
 0xc34   : > { %v5541_v37 = vpop.eup %5540 }
 0xc35   : > { %v3231_v39 = vmul.f32 %v5541_v37, %v3226_v36  ;;  %v3229_v40 = vpop.xlane.xlu1 %3228  ;;  %vm3236_vm1 = vweird.f32 %v5541_v37 }
 0xc36   : > { %5542 = vrcp.f32 %v3229_v40  ;;  %vm3237_vm5 = vmor %vm3235_vm4, %vm3236_vm1  ;;  %v3256_v49 = vand.u32 2147483648, %v3229_v40  ;;  %v3254_v43 = vand.u32 2147483647, %v3229_v40  ;;  %vm3250_vm15 = vweird.f32 %v3229_v40 }
 0xc37   : > { %v3232_v51 = vsub.f32 1.0, %v3231_v39 }
 0xc38   : > { %v3257_v59 = vor.u32 1.1754944e-38, %v3256_v49  ;;  %vm3255_vm9 = vcmp.eq.f32.partialorder %v3254_v43, 8.507059e+37 }
 0xc39   : > { %v3233_v41 = vmul.f32 %v5541_v37, %v3232_v51 }
 0xc3b   : > { %v3234_v42 = vadd.f32 %v5541_v37, %v3233_v41 }
 0xc3c   : > { %v5543_v27 = vpop.eup %5542 }
 0xc3d   : > { %v3246_v45 = vmul.f32 %v5543_v27, %v3229_v40  ;;  %v3238_v52 = vsel %vm3237_vm5, %v5541_v37, %v3234_v42  ;;  %vm3251_vm6 = vweird.f32 %v5543_v27 }
 0xc3e   : > { %v3243_v62 = vsel %vm3240_vm7, %v3242_v55, %v3238_v52  ;;  %vm3252_vm8 = vmor %vm3250_vm15, %vm3251_vm6  ;;  %v5359_v55 = vld [vmem:[%s5994_s18 + $0x18] sm:$0xff] }
 0xc3f   : > { %v3247_v48 = vsub.f32 1.0, %v3246_v45  ;;  %v3244_v61 = vmul.f32 %v5537_v14, %v3243_v62  ;;  %3563 = vmatpush.bf16.msra.mxu3 %v5359_v55 }
 0xc41   : > { %v3248_v2 = vmul.f32 %v5543_v27, %v3247_v48 }
 0xc43   : > { %v3249_v57 = vadd.f32 %v5543_v27, %v3248_v2 }
 0xc45   : > { %v3253_v38 = vsel %vm3252_vm8, %v5543_v27, %v3249_v57  ;;  %v5358_v57 = vld [vmem:[%s5994_s18 + $0x10] sm:$0xff] }
 0xc46   : > { %v3258_v10 = vsel %vm3255_vm9, %v3257_v59, %v3253_v38  ;;  %3564 = vmatpush.bf16.msra.mxu3 %v5358_v57 }
 0xc47   : > { %v3259_v0 = vmul.f32 %v5539_v34, %v3258_v10 }
 0xc49   : > { %v3260_v50 = vpack.c.bf16 %v3259_v0, %v3244_v61  ;;  %v5492_v61 = vld [vmem:[%s1755_s27] ss:$0 sm:$0xff] }
 0xc4b   : > { %5041 = vmatmul.msk.bf16.vlgmr.msrb.gmra.mxu1 %vm3210_vm14, %v3260_v50 }
 0xc5b   : > { %5120 = vmatmul.msk.bf16.vlgmr.msra.gmra.mxu1 %vm2027_vm13, %v3442_v56 }
 0xcc8   : > { %v3278_v13 = vpop.f32.mrf.mxu1 }
 0xcd0   : > { %v3280_v60 = vpop.f32.mrf.mxu1 }
 0xcd1   : > { %v3287_v3 = vpack.c.bf16 %v3280_v60, %v3278_v13 }
 0xcd3   : > { %5143 = vmatmul.msk.bf16.vlgmr.msra.gmra.mxu0 %vm2027_vm13, %v3287_v3 }
 0xcd8   : > { %v3459_v6 = vpop.f32.mrf.mxu1 }
 0xcd9   : > { %v3464_v15 = vmul.f32 0.17677669, %v3459_v6 }
 0xcdb   : > { %v3466_v24 = vsel %vm3210_vm14, %v3464_v15, -inf }
 0xcdc   : > { %3467 = vmax.xlane.f32.xlu2 %v3466_v24 }
 0xce0   : > { %v3461_v16 = vpop.f32.mrf.mxu1 }
 0xce1   : > { %v3465_v17 = vmul.f32 0.17677669, %v3461_v16 }
 0xce3   : > { %v3469_v19 = vsel %vm3214_vm0, %v3465_v17, -inf }
 0xce4   : > { %3470 = vmax.xlane.f32.xlu0 %v3469_v19 }
 0xd4f   : > { %v3468_v20 = vpop.xlane.xlu2 %3467 }
 0xd50   : > { %v3472_v21 = vsub.f32 %v3464_v15, %v3468_v20  ;;  %v3595_v10 = vpop.f32.mrf.mxu0  ;;  %v5170_v20 = vld [vmem:[%s6004_s13 + $0x30] sm:$0xf] }
 0xd52   : > { %v3474_v53 = vmul.f32 1.442695, %v3472_v21  ;;  %v5367_v21 = vld [vmem:[%s6004_s13 + $0x34] sm:$0xf0] }
 0xd54   : > { %5544 = vpow2.f32 %v3474_v53  ;;  %v5366_v53 = vld [vmem:[%s6004_s13 + $0x34] sm:$0xf] }
 0xd57   : > { %v3471_v23 = vpop.xlane.xlu0 %3470 }
 0xd58   : > { %v3473_v25 = vsub.f32 %v3465_v17, %v3471_v23  ;;  %v3597_v7 = vpop.f32.mrf.mxu0  ;;  %v5171_v23 = vor.u32 %v5367_v21, %v5170_v20 }
 0xd5a   : > { %v5545_v26 = vpop.eup %5544  ;;  %v3476_v63 = vmul.f32 1.442695, %v3473_v25  ;;  %v5172_v25 = vld [vmem:[%s6004_s13 + $0x38] sm:$0xf0]  ;;  %3726 = vmatpush.bf16.msrb.mxu1 %v5171_v23 }
 0xd5b   : > { %v3478_v28 = vsel %vm3210_vm14, %v5545_v26, 0.0 }
 0xd5c   : > { %5546 = vpow2.f32 %v3476_v63  ;;  %3479 = vadd.xlane.f32.xlu1 %v3478_v28  ;;  %v5162_v63 = vld [vmem:[%s6004_s13 + $0x20] sm:$0xf]  ;;  %v5365_v28 = vld [vmem:[%s6004_s13 + $0x24] sm:$0xf0] }
 0xd62   : > { %v5547_v29 = vpop.eup %5546 }
 0xd63   : > { %v3481_v18 = vsel %vm3214_vm0, %v5547_v29, 0.0 }
 0xd64   : > { %3482 = vadd.xlane.f32.xlu2 %v3481_v18  ;;  %v5163_v18 = vor.u32 %v5365_v28, %v5162_v63 }
 0xd66   : > { %3727 = vmatpush.bf16.msrb.mxu1 %v5163_v18  ;;  %v5374_v18 = vld [vmem:[%s6009_s10 + $0x30] sm:$0xff] }
 0xdcf   : > { %v3480_v30 = vpop.xlane.xlu1 %3479 }
 0xdd0   : > { %5548 = vrcp.f32 %v3480_v30  ;;  %v3495_v36 = vand.u32 2147483648, %v3480_v30  ;;  %vm3489_vm11 = vweird.f32 %v3480_v30  ;;  %v3493_v37 = vand.u32 2147483647, %v3480_v30 }
 0xdd2   : > { %v3496_v42 = vor.u32 1.1754944e-38, %v3495_v36  ;;  %vm3494_vm1 = vcmp.eq.f32.partialorder %v3493_v37, 8.507059e+37  ;;  %v5146_v37 = vld [vmem:[%s6004_s13] sm:$0xf] }
 0xdd6   : > { %v5549_v31 = vpop.eup %5548 }
 0xdd7   : > { %v3485_v54 = vmul.f32 %v5549_v31, %v3480_v30  ;;  %v3483_v58 = vpop.xlane.xlu2 %3482  ;;  %vm3490_vm10 = vweird.f32 %v5549_v31  ;;  %v5164_v30 = vld [vmem:[%s6004_s13 + $0x28] sm:$0xf0] }
 0xdd8   : > { %5550 = vrcp.f32 %v3483_v58  ;;  %vm3491_vm12 = vmor %vm3489_vm11, %vm3490_vm10  ;;  %v3510_v40 = vand.u32 2147483648, %v3483_v58  ;;  %v3508_v27 = vand.u32 2147483647, %v3483_v58  ;;  %vm3504_vm4 = vweird.f32 %v3483_v58 }
 0xdd9   : > { %v3486_v14 = vsub.f32 1.0, %v3485_v54  ;;  %v5154_v54 = vld [vmem:[%s6004_s13 + $0x10] sm:$0xf] }
 0xdda   : > { %v3511_v47 = vor.u32 1.1754944e-38, %v3510_v40  ;;  %vm3509_vm6 = vcmp.eq.f32.partialorder %v3508_v27, 8.507059e+37  ;;  %v5360_v40 = vld [vmem:[%s6004_s13 + $0x4] sm:$0xf]  ;;  %v5148_v27 = vld [vmem:[%s6004_s13 + $0x8] sm:$0xf0] }
 0xddb   : > { %v3487_v33 = vmul.f32 %v5549_v31, %v3486_v14  ;;  %v5362_v14 = vld [vmem:[%s6004_s13 + $0x14] sm:$0xf] }
 0xddd   : > { %v3488_v34 = vadd.f32 %v5549_v31, %v3487_v33 }
 0xdde   : > { %v5551_v44 = vpop.eup %5550 }
 0xddf   : > { %v3500_v35 = vmul.f32 %v5551_v44, %v3483_v58  ;;  %v3492_v51 = vsel %vm3491_vm12, %v5549_v31, %v3488_v34  ;;  %vm3505_vm0 = vweird.f32 %v5551_v44  ;;  %v5363_v58 = vld [vmem:[%s6004_s13 + $0x14] sm:$0xf0] }
 0xde0   : > { %v3497_v46 = vsel %vm3494_vm1, %v3496_v42, %v3492_v51  ;;  %vm3506_vm5 = vmor %vm3504_vm4, %vm3505_vm0  ;;  %v5155_v33 = vor.u32 %v5363_v58, %v5154_v54  ;;  %v5151_v42 = vor.u32 %v5360_v40, %v5148_v27 }
 0xde1   : > { %v3501_v39 = vsub.f32 1.0, %v3500_v35  ;;  %v3498_v52 = vmul.f32 %v5545_v26, %v3497_v46  ;;  %v5175_v26 = vor.u32 %v5366_v53, %v5172_v25  ;;  %v5375_v53 = vld [vmem:[%s6009_s10 + $0x38] sm:$0xff] }
 0xde2   : > { %3728 = vmatpush.bf16.msrb.mxu1 %v5155_v33  ;;  %4056 = vmatpush.bf16.msrb.mxu3 %v5375_v53  ;;  %v5370_v53 = vld [vmem:[%s6009_s10 + $0x10] sm:$0xff] }
 0xde3   : > { %v3502_v41 = vmul.f32 %v5551_v44, %v3501_v39  ;;  %3740 = vmatpush.bf16.msrb.mxu2 %v5175_v26  ;;  %v5361_v39 = vld [vmem:[%s6004_s13 + $0x4] sm:$0xf0] }
 0xde5   : > { %v3503_v45 = vadd.f32 %v5551_v44, %v3502_v41  ;;  %v5147_v41 = vor.u32 %v5361_v39, %v5146_v37  ;;  %v5373_v37 = vld [vmem:[%s6009_s10 + $0x28] sm:$0xff] }
 0xde6   : > { %4057 = vmatpush.bf16.msrb.mxu3 %v5374_v18 }
 0xde7   : > { %v3507_v48 = vsel %vm3506_vm5, %v5551_v44, %v3503_v45  ;;  %v5156_v44 = vld [vmem:[%s6004_s13 + $0x18] sm:$0xf0]  ;;  %3729 = vmatpush.bf16.msrb.mxu1 %v5147_v41 }
 0xde8   : > { %v3512_v49 = vsel %vm3509_vm6, %v3511_v47, %v3507_v48  ;;  %v5159_v35 = vor.u32 %v5362_v14, %v5156_v44  ;;  %v5383_v14 = vld [vmem:[%s6009_s10 + $0x78] sm:$0xff] }
 0xde9   : > { %v3513_v2 = vmul.f32 %v5547_v29, %v3512_v49  ;;  %v5364_v29 = vld [vmem:[%s6004_s13 + $0x24] sm:$0xf]  ;;  %4070 = vmatpush.bf16.msrb.mxu0 %v5383_v14 }
 0xdea   : > { %v5167_v31 = vor.u32 %v5364_v29, %v5164_v30  ;;  %4058 = vmatpush.bf16.msrb.mxu3 %v5373_v37 }
 0xdeb   : > { %v3514_v43 = vpack.c.bf16 %v3513_v2, %v3498_v52 }
 0xdec   : > { %3741 = vmatpush.bf16.msrb.mxu2 %v5167_v31 }
 0xded   : > { %5121 = vmatmul.msk.bf16.vlgmr.msra.gmra.mxu2 %vm3210_vm14, %v3514_v43 }
 0xdf0   : > { %3742 = vmatpush.bf16.msrb.mxu2 %v5159_v35 }
 0xdf4   : > { %3743 = vmatpush.bf16.msrb.mxu2 %v5151_v42  ;;  %v5382_v42 = vld [vmem:[%s6009_s10 + $0x70] sm:$0xff] }
 0xdf5   : > { %4071 = vmatpush.bf16.msrb.mxu0 %v5382_v42  ;;  %v5378_v42 = vld [vmem:[%s6009_s10 + $0x50] sm:$0xff] }
 0xe70   : > { %v3531_v62 = vpop.f32.mrf.mxu2 }
 0xe78   : > { %v3533_v59 = vpop.f32.mrf.mxu2 }
 0xe79   : > { %v3541_v38 = vpack.c.bf16 %v3533_v59, %v3531_v62 }
 0xe7b   : > { %5134 = vmatmul.msk.bf16.vlgmr.msra.gmra.mxu3 %vm2027_vm13, %v3541_v38 }
 0xefe   : > { %v3566_v0 = vpop.f32.mrf.mxu3 }
 0xeff   : > { %v3596_v1 = vadd.f32 %v3595_v10, %v3566_v0  ;;  %v5493_v0 = vld [vmem:[%s1758_s0] ss:$0 sm:$0xff]  ;;  %s6826_s0 = sld [smem:[#allocation40_spill]] (!%p5246_p8) }
 0xf01   : > { %v3604_v50 = vadd.f32 %v5492_v61, %v3596_v1 }
 0xf03   : > { %v6433_v4 = vadd.f32 %v3604_v50, %v6325_v22 }
 0xf05   : > { %v3610_v5 = vsel %vm1808_vm2, %v6433_v4, 0.0 }
 0xf06   : > { %v3568_v8 = vpop.f32.mrf.mxu3  ;;  %3611 = vadd.xlane.f32.xlu0 %v3610_v5 }
 0xf07   : > { %v3598_v56 = vadd.f32 %v3597_v7, %v3568_v8  ;;  %v5494_v7 = vld [vmem:[%s1761_s16] ss:$0 sm:$0xff] }
 0xf09   : > { %v3605_v9 = vadd.f32 %v5492_v61, %v3598_v56 }
 0xf0b   : > { %v6438_v11 = vadd.f32 %v3605_v9, %v6330_v32 }
 0xf0d   : > { %v3613_v13 = vsel %vm1812_vm3, %v6438_v11, 0.0 }
 0xf0e   : > { %3614 = vadd.xlane.f32.xlu1 %v3613_v13 }
 0xf79   : > { %v3612_v22 = vpop.xlane.xlu0 %3611 }
 0xf7a   : > { %v3616_v60 = vmul.f32 %v3612_v22, %v6029_v12 }
 0xf7c   : > { %v6444_v3 = vsub.f32 %v6433_v4, %v3616_v60 }
 0xf7e   : > { %v3620_v6 = vmul.f32 %v6444_v3, %v6444_v3 }
 0xf80   : > { %v3622_v15 = vsel %vm1808_vm2, %v3620_v6, 0.0 }
 0xf81   : > { %v3615_v32 = vpop.xlane.xlu1 %3614  ;;  %3623 = vadd.xlane.f32.xlu2 %v3622_v15 }
 0xf82   : > { %v3617_v24 = vmul.f32 %v3615_v32, %v6029_v12 }
 0xf84   : > { %v6451_v16 = vsub.f32 %v6438_v11, %v3617_v24 }
 0xf86   : > { %v3621_v17 = vmul.f32 %v6451_v16, %v6451_v16 }
 0xf88   : > { %v3625_v19 = vsel %vm1812_vm3, %v3621_v17, 0.0 }
 0xf89   : > { %3626 = vadd.xlane.f32.xlu0 %v3625_v19 }
 0xff4   : > { %v3624_v34 = vpop.xlane.xlu2 %3623 }
 0xff5   : > { %v3628_v36 = vmul.f32 %v3624_v34, %v6029_v12 }
 0xff7   : > { %v3630_v51 = vadd.f32 1e-05, %v3628_v36 }
 0xff9   : > { %5552 = vrsqrt.f32 %v3630_v51  ;;  %vm3638_vm14 = vweird.f32 %v3630_v51 }
 0xffc   : > { %v3627_v45 = vpop.xlane.xlu0 %3626 }
 0xffd   : > { %v3629_v46 = vmul.f32 %v3627_v45, %v6029_v12 }
 0xfff   : > { %v5553_v47 = vpop.eup %5552  ;;  %v3631_v48 = vadd.f32 1e-05, %v3629_v46 }
0x1000   : > { %v3633_v49 = vmul.f32 %v5553_v47, %v3630_v51  ;;  %vm3639_vm13 = vweird.f32 %v5553_v47 }
0x1001   : > { %5554 = vrsqrt.f32 %v3631_v48  ;;  %vm3640_vm7 = vmor %vm3638_vm14, %vm3639_vm13  ;;  %vm3648_vm8 = vweird.f32 %v3631_v48 }
0x1002   : > { %v3634_v52 = vmul.f32 %v5553_v47, %v3633_v49 }
0x1004   : > { %v3635_v2 = vmul.f32 0.5, %v3634_v52 }
0x1006   : > { %v3636_v43 = vsub.f32 1.5, %v3635_v2 }
0x1007   : > { %v5555_v55 = vpop.eup %5554 }
0x1008   : > { %v3637_v57 = vmul.f32 %v5553_v47, %v3636_v43  ;;  %v3643_v62 = vmul.f32 %v5555_v55, %v3631_v48  ;;  %vm3649_vm15 = vweird.f32 %v5555_v55 }
0x1009   : > { %vm3650_vm9 = vmor %vm3648_vm8, %vm3649_vm15 }
0x100a   : > { %v3644_v59 = vmul.f32 %v5555_v55, %v3643_v62  ;;  %v3641_v38 = vsel %vm3640_vm7, %v5553_v47, %v3637_v57 }
0x100b   : > { %v3652_v1 = vmul.f32 %v3641_v38, %v6444_v3  ;;  %v3673_v3 = vld [vmem:[%s1770_s24] sm:$0x3] }
0x100c   : > { %v3645_v10 = vmul.f32 0.5, %v3644_v59  ;;  %v3675_v6 = vperm.slane %v3673_v3, 0 }
0x100d   : > { %v3657_v8 = vmul.f32 %v5493_v0, %v3652_v1 }
0x100e   : > { %v3646_v61 = vsub.f32 1.5, %v3645_v10  ;;  %v5381_v10 = vld [vmem:[%s6009_s10 + $0x68] sm:$0xff] }
0x100f   : > { %v3662_v13 = vadd.f32 %v5494_v7, %v3657_v8  ;;  %4072 = vmatpush.bf16.msrb.mxu0 %v5381_v10 }
0x1010   : > { %v3647_v50 = vmul.f32 %v5555_v55, %v3646_v61 }
0x1012   : > { %v3651_v5 = vsel %vm3650_vm9, %v5555_v55, %v3647_v50  ;;  %v5372_v55 = vld [vmem:[%s6009_s10 + $0x20] sm:$0xff] }
0x1013   : > { %v3653_v56 = vmul.f32 %v3651_v5, %v6451_v16  ;;  %v3676_v16 = vperm.slane %v3673_v3, 1  ;;  %4059 = vmatpush.bf16.msrb.mxu3 %v5372_v55  ;;  %v5380_v3 = vld [vmem:[%s6009_s10 + $0x60] sm:$0xff] }
0x1014   : > { %4073 = vmatpush.bf16.msrb.mxu0 %v5380_v3 }
0x1015   : > { %v3658_v9 = vmul.f32 %v5493_v0, %v3653_v56  ;;  %v5371_v56 = vld [vmem:[%s6009_s10 + $0x18] sm:$0xff] }
0x1017   : > { %v3663_v22 = vadd.f32 %v5494_v7, %v3658_v9  ;;  %4060 = vmatpush.bf16.msrb.mxu3 %v5371_v56 }
0x1019   : > { %v3672_v60 = vpack.c.bf16 %v3663_v22, %v3662_v13 }
0x101b   : > { %5176 = vmatmul.msk.bf16.vlgmr.msrb.gmra.mxu1 %vm1808_vm2, %v3672_v60  ;;  %5177 = vmatmul.msk.bf16.vlgmr.msrb.gmra.mxu2 %vm1808_vm2, %v3672_v60 }
0x101c   : > { %4061 = vmatpush.bf16.msrb.mxu3 %v5370_v53 }
0x1098   : > { %v3731_v15 = vpop.f32.mrf.mxu1 }
0x1099   : > { %v6487_v32 = vadd.f32 %v3731_v15, %v3675_v6 }
0x109b   : > { %v6490_v24 = vmul.f32 0.70710677, %v6487_v32 }
0x109d   : > { %v3758_v17 = vmul.f32 %v6490_v24, %v6490_v24 }
0x109e   : > { %v3745_v19 = vpop.f32.mrf.mxu2 }
0x109f   : > { %v6494_v20 = vmin.f32 %v3758_v17, 16.0  ;;  %v6496_v21 = vadd.f32 %v3745_v19, %v3676_v16 }
0x10a0   : > { %v3733_v23 = vpop.f32.mrf.mxu1 }
0x10a1   : > { %v3760_v25 = vmul.f32 2.1237322e-06, %v6494_v20  ;;  %v3771_v26 = vmul.f32 3.8918573e-05, %v6494_v20  ;;  %v6501_v63 = vadd.f32 %v3733_v23, %v3675_v6  ;;  %v6504_v28 = vmul.f32 0.70710677, %v6496_v21 }
0x10a3   : > { %v3772_v29 = vadd.f32 0.001143296, %v3771_v26  ;;  %v3761_v30 = vadd.f32 0.00028619796, %v3760_v25  ;;  %v3798_v31 = vmul.f32 %v6504_v28, %v6504_v28  ;;  %v6510_v54 = vmul.f32 0.70710677, %v6501_v63 }
0x10a5   : > { %v3773_v58 = vmul.f32 %v3772_v29, %v6494_v20  ;;  %v6514_v33 = vmin.f32 %v3798_v31, 16.0  ;;  %v3838_v44 = vmul.f32 %v6510_v54, %v6510_v54  ;;  %v3762_v39 = vmul.f32 %v3761_v30, %v6494_v20  ;;  %v5379_v30 = vld [vmem:[%s6009_s10 + $0x58] sm:$0xff] }
0x10a6   : > { %v3747_v34 = vpop.f32.mrf.mxu2  ;;  %4074 = vmatpush.bf16.msrb.mxu0 %v5379_v30 }
0x10a7   : > { %v3774_v35 = vadd.f32 0.014752088, %v3773_v58  ;;  %v6518_v36 = vadd.f32 %v3747_v34, %v3676_v16  ;;  %v3811_v40 = vmul.f32 3.8918573e-05, %v6514_v33  ;;  %v6523_v51 = vmin.f32 %v3838_v44, 16.0  ;;  %v5369_v44 = vld [vmem:[%s6009_s10 + $0x8] sm:$0xff] }
0x10a8   : > { %v3800_v45 = vmul.f32 2.1237322e-06, %v6514_v33  ;;  %v3763_v2 = vadd.f32 0.0036580483, %v3762_v39  ;;  %4062 = vmatpush.bf16.msrb.mxu3 %v5369_v44 }
0x10a9   : > { %v3775_v41 = vmul.f32 %v3774_v35, %v6494_v20  ;;  %v6527_v27 = vmul.f32 0.70710677, %v6518_v36  ;;  %v3812_v46 = vadd.f32 0.001143296, %v3811_v40  ;;  %v3840_v47 = vmul.f32 2.1237322e-06, %v6523_v51 }
0x10aa   : > { %v3851_v49 = vmul.f32 3.8918573e-05, %v6523_v51  ;;  %v3801_v61 = vadd.f32 0.00028619796, %v3800_v45  ;;  %v3764_v9 = vmul.f32 %v3763_v2, %v6494_v20  ;;  %4075 = vmatpush.bf16.msrb.mxu0 %v5378_v42 }
0x10ab   : > { %v3776_v48 = vadd.f32 0.112945676, %v3775_v41  ;;  %v3878_v52 = vmul.f32 %v6527_v27, %v6527_v27  ;;  %v3813_v43 = vmul.f32 %v3812_v46, %v6514_v33  ;;  %v3841_v62 = vadd.f32 0.00028619796, %v3840_v47 }
0x10ac   : > { %v3852_v59 = vadd.f32 0.001143296, %v3851_v49  ;;  %v3802_v6 = vmul.f32 %v3801_v61, %v6514_v33  ;;  %v3765_v26 = vadd.f32 0.05243302, %v3764_v9  ;;  %v5376_v9 = vld [vmem:[%s6009_s10 + $0x40] sm:$0xff] }
0x10ad   : > { %v3777_v57 = vmul.f32 %v3776_v48, %v6494_v20  ;;  %v6538_v38 = vmin.f32 %v3878_v52, 16.0  ;;  %v3814_v0 = vadd.f32 0.014752088, %v3813_v43  ;;  %v3842_v22 = vmul.f32 %v3841_v62, %v6523_v51  ;;  %v5368_v52 = vld [vmem:[%s6009_s10] sm:$0xff]  ;;  %v5377_v62 = vld [vmem:[%s6009_s10 + $0x48] sm:$0xff] }
0x10ae   : > { %v3853_v50 = vmul.f32 %v3852_v59, %v6523_v51  ;;  %v3803_v31 = vadd.f32 0.0036580483, %v3802_v6  ;;  %v3766_v37 = vmul.f32 %v3765_v26, %v6494_v20  ;;  %4063 = vmatpush.bf16.msrb.mxu3 %v5368_v52  ;;  %4076 = vmatpush.bf16.msrb.mxu0 %v5377_v62 }
0x10af   : > { %v3778_v1 = vadd.f32 0.4994258, %v3777_v57  ;;  %v3815_v5 = vmul.f32 %v3814_v0, %v6514_v33  ;;  %v3880_v7 = vmul.f32 2.1237322e-06, %v6538_v38  ;;  %v3891_v8 = vmul.f32 3.8918573e-05, %v6538_v38 }
0x10b0   : > { %v3854_v60 = vadd.f32 0.014752088, %v3853_v50  ;;  %v3843_v29 = vadd.f32 0.0036580483, %v3842_v22  ;;  %v3804_v45 = vmul.f32 %v3803_v31, %v6514_v33  ;;  %v3767_v55 = vadd.f32 0.18741608, %v3766_v37 }
0x10b1   : > { %v3779_v13 = vmul.f32 %v3778_v1, %v6494_v20  ;;  %v3816_v15 = vadd.f32 0.112945676, %v3815_v5  ;;  %v3892_v16 = vadd.f32 0.001143296, %v3891_v8  ;;  %v3881_v25 = vadd.f32 0.00028619796, %v3880_v7 }
0x10b2   : > { %v3855_v19 = vmul.f32 %v3854_v60, %v6523_v51  ;;  %v3844_v39 = vmul.f32 %v3843_v29, %v6523_v51  ;;  %v3805_v10 = vadd.f32 0.05243302, %v3804_v45  ;;  %v3768_v8 = vmul.f32 %v3767_v55, %v6494_v20  ;;  %4077 = vmatpush.bf16.msrb.mxu0 %v5376_v9 }
0x10b3   : > { %v6551_v17 = vadd.f32 1.0, %v3779_v13  ;;  %v3817_v23 = vmul.f32 %v3816_v15, %v6514_v33  ;;  %v3893_v18 = vmul.f32 %v3892_v16, %v6538_v38  ;;  %v3882_v35 = vmul.f32 %v3881_v25, %v6538_v38 }
0x10b4   : > { %v3856_v14 = vadd.f32 0.112945676, %v3855_v19  ;;  %v3845_v57 = vadd.f32 0.05243302, %v3844_v39  ;;  %v3806_v60 = vmul.f32 %v3805_v10, %v6514_v33 }
0x10b5   : > { %5556 = vrcp.f32 %v6551_v17  ;;  %v3818_v58 = vadd.f32 0.4994258, %v3817_v23  ;;  %v3894_v41 = vadd.f32 0.014752088, %v3893_v18  ;;  %v3883_v43 = vadd.f32 0.0036580483, %v3882_v35 }
0x10b6   : > { %v3857_v40 = vmul.f32 %v3856_v14, %v6523_v51  ;;  %v3846_v56 = vmul.f32 %v3845_v57, %v6523_v51  ;;  %v3792_v3 = vand.u32 2147483648, %v6551_v17  ;;  %vm3786_vm11 = vweird.f32 %v6551_v17 }
0x10b7   : > { %v3819_v34 = vmul.f32 %v3818_v58, %v6514_v33  ;;  %v3895_v49 = vmul.f32 %v3894_v41, %v6538_v38  ;;  %v3884_v5 = vmul.f32 %v3883_v43, %v6538_v38  ;;  %v3790_v15 = vand.u32 2147483647, %v6551_v17 }
0x10b8   : > { %v3858_v48 = vadd.f32 0.4994258, %v3857_v40  ;;  %v3847_v53 = vadd.f32 0.18741608, %v3846_v56  ;;  %v3769_v23 = vadd.f32 1.1283791, %v3768_v8 }
0x10b9   : > { %v6567_v46 = vadd.f32 1.0, %v3819_v34  ;;  %v3896_v0 = vadd.f32 0.112945676, %v3895_v49  ;;  %v3885_v20 = vadd.f32 0.05243302, %v3884_v5  ;;  %v3793_v18 = vor.u32 1.1754944e-38, %v3792_v3 }
0x10ba   : > { %v3859_v61 = vmul.f32 %v3858_v48, %v6523_v51  ;;  %v3807_v26 = vadd.f32 0.18741608, %v3806_v60  ;;  %vm3791_vm0 = vcmp.eq.f32.partialorder %v3790_v15, 8.507059e+37  ;;  %v3770_v35 = vmul.f32 %v3769_v23, %v6490_v24 }
0x10bb   : > { %v5557_v47 = vpop.eup %5556  ;;  %5558 = vrcp.f32 %v6567_v46  ;;  %v3897_v7 = vmul.f32 %v3896_v0, %v6538_v38  ;;  %v3886_v58 = vmul.f32 %v3885_v20, %v6538_v38  ;;  %vm3826_vm1 = vweird.f32 %v6567_v46 }
0x10bc   : > { %v3782_v2 = vmul.f32 %v5557_v47, %v6551_v17  ;;  %v6575_v50 = vadd.f32 1.0, %v3859_v61  ;;  %vm3787_vm10 = vweird.f32 %v5557_v47  ;;  %v3848_v17 = vmul.f32 %v3847_v53, %v6523_v51 }
0x10bd   : > { %v3898_v16 = vadd.f32 0.4994258, %v3897_v7  ;;  %vm3788_vm12 = vmor %vm3786_vm11, %vm3787_vm10  ;;  %v3808_v37 = vmul.f32 %v3807_v26, %v6514_v33  ;;  %v3830_v40 = vand.u32 2147483647, %v6567_v46  ;;  %v3832_v45 = vand.u32 2147483648, %v6567_v46 }
0x10be   : > { %v3783_v59 = vsub.f32 1.0, %v3782_v2  ;;  %5560 = vrcp.f32 %v6575_v50  ;;  %v3887_v51 = vadd.f32 0.18741608, %v3886_v58  ;;  %v3849_v48 = vadd.f32 1.1283791, %v3848_v17 }
0x10bf   : > { %v3899_v29 = vmul.f32 %v3898_v16, %v6538_v38  ;;  %v3870_v24 = vand.u32 2147483647, %v6575_v50  ;;  %v3809_v33 = vadd.f32 1.1283791, %v3808_v37  ;;  %vm3831_vm13 = vcmp.eq.f32.partialorder %v3830_v40, 8.507059e+37 }
0x10c0   : > { %v3784_v1 = vmul.f32 %v5557_v47, %v3783_v59  ;;  %vm3866_vm14 = vweird.f32 %v6575_v50  ;;  %v3833_v62 = vor.u32 1.1754944e-38, %v3832_v45  ;;  %v3888_v10 = vmul.f32 %v3887_v51, %v6538_v38  ;;  %v5495_v37 = vld [vmem:[%s1778_s19] ss:$0 sm:$0xff]  ;;  %s6825_s19 = sld [smem:[#allocation39_spill]] (!%p5246_p8) }
0x10c1   : > { %v5559_v13 = vpop.eup %5558  ;;  %v3900_v14 = vadd.f32 1.0, %v3899_v29  ;;  %vm3871_vm15 = vcmp.eq.f32.partialorder %v3870_v24, 8.507059e+37  ;;  %v3810_v7 = vmul.f32 %v3809_v33, %v6504_v28  ;;  %v3750_v38 = vmul.f32 0.5, %v6487_v32 }
0x10c2   : > { %v3785_v22 = vadd.f32 %v5557_v47, %v3784_v1  ;;  %v3822_v6 = vmul.f32 %v5559_v13, %v6567_v46  ;;  %vm3827_vm4 = vweird.f32 %v5559_v13  ;;  %v3850_v46 = vmul.f32 %v3849_v48, %v6510_v54 }
0x10c3   : > { %5562 = vrcp.f32 %v3900_v14  ;;  %vm6601_vm6 = vmor %vm3826_vm1, %vm3827_vm4  ;;  %v3752_v54 = vmul.f32 0.5, %v6501_v63  ;;  %vm3906_vm9 = vweird.f32 %v3900_v14  ;;  %v3751_v63 = vmul.f32 0.5, %v6496_v21 }
0x10c4   : > { %v3823_v19 = vsub.f32 1.0, %v3822_v6  ;;  %v3789_v25 = vsel %vm3788_vm12, %v5557_v47, %v3785_v22  ;;  %v5561_v31 = vpop.eup %5560  ;;  %v3872_v47 = vand.u32 2147483648, %v6575_v50  ;;  %v3912_v22 = vand.u32 2147483648, %v3900_v14 }
0x10c5   : > { %v3794_v44 = vsel %vm3791_vm0, %v3793_v18, %v3789_v25  ;;  %v3862_v34 = vmul.f32 %v5561_v31, %v6575_v50  ;;  %vm3867_vm5 = vweird.f32 %v5561_v31  ;;  %v3889_v50 = vadd.f32 1.1283791, %v3888_v10 }
0x10c6   : > { %v3824_v30 = vmul.f32 %v5559_v13, %v3823_v19  ;;  %v3795_v42 = vmul.f32 %v3794_v44, %v3770_v35  ;;  %vm3868_vm7 = vmor %vm3866_vm14, %vm3867_vm5  ;;  %v3873_v59 = vor.u32 1.1754944e-38, %v3872_v47  ;;  %v3913_v19 = vor.u32 1.1754944e-38, %v3912_v22 }
0x10c7   : > { %v3863_v41 = vsub.f32 1.0, %v3862_v34  ;;  %v3890_v28 = vmul.f32 %v3889_v50, %v6527_v27 }
0x10c8   : > { %v3825_v39 = vadd.f32 %v5559_v13, %v3824_v30  ;;  %v5178_v57 = vclamps-f32 %v3795_v42, 1.0 }
0x10c9   : > { %v3864_v49 = vmul.f32 %v5561_v31, %v3863_v41  ;;  %v5563_v55 = vpop.eup %5562 }
0x10ca   : > { %v3829_v2 = vsel %vm6601_vm6, %v5559_v13, %v3825_v39  ;;  %v3902_v0 = vmul.f32 %v5563_v55, %v3900_v14  ;;  %v3918_v9 = vadd.f32 1.0, %v5178_v57  ;;  %v3910_v13 = vand.u32 2147483647, %v3900_v14 }
0x10cb   : > { %v3865_v43 = vadd.f32 %v5561_v31, %v3864_v49  ;;  %v3834_v1 = vsel %vm3831_vm13, %v3833_v62, %v3829_v2  ;;  %vm3907_vm8 = vweird.f32 %v5563_v55 }
0x10cc   : > { %v3903_v56 = vsub.f32 1.0, %v3902_v0  ;;  %v3835_v60 = vmul.f32 %v3834_v1, %v3810_v7  ;;  %v3922_v16 = vmul.f32 %v3918_v9, %v3750_v38  ;;  %vm3908_vm10 = vmor %vm3906_vm9, %vm3907_vm8  ;;  %vm3911_vm11 = vcmp.eq.f32.partialorder %v3910_v13, 8.507059e+37 }
0x10cd   : > { %v3869_v61 = vsel %vm3868_vm7, %v5561_v31, %v3865_v43  ;;  %v3753_v31 = vmul.f32 0.5, %v6518_v36 }
0x10ce   : > { %v3874_v5 = vsel %vm3871_vm15, %v3873_v59, %v3869_v61  ;;  %v3904_v6 = vmul.f32 %v5563_v55, %v3903_v56  ;;  %v5179_v53 = vclamps-f32 %v3835_v60, 1.0 }
0x10cf   : > { %v3875_v8 = vmul.f32 %v3874_v5, %v3850_v46 }
0x10d0   : > { %v3905_v20 = vadd.f32 %v5563_v55, %v3904_v6  ;;  %v3919_v32 = vadd.f32 1.0, %v5179_v53 }
0x10d1   : > { %v5180_v3 = vclamps-f32 %v3875_v8, 1.0 }
0x10d2   : > { %v3909_v25 = vsel %vm3908_vm10, %v5563_v55, %v3905_v20  ;;  %v3923_v27 = vmul.f32 %v3919_v32, %v3751_v63 }
0x10d3   : > { %v3920_v15 = vadd.f32 1.0, %v5180_v3  ;;  %v3914_v26 = vsel %vm3911_vm11, %v3913_v19, %v3909_v25 }
0x10d4   : > { %v3915_v18 = vmul.f32 %v3914_v26, %v3890_v28 }
0x10d5   : > { %v3924_v23 = vmul.f32 %v3920_v15, %v3752_v54 }
0x10d6   : > { %v5181_v30 = vclamps-f32 %v3915_v18, 1.0 }
0x10d7   : > { %v3958_v29 = vpack.c.bf16 %v3924_v23, %v3922_v16 }
0x10d8   : > { %v3921_v58 = vadd.f32 1.0, %v5181_v30 }
0x10d9   : > { %4064 = vmatmul.bf16.vlgmr.msrb.gmra.mxu3 %v3958_v29 }
0x10da   : > { %v3925_v14 = vmul.f32 %v3921_v58, %v3753_v31 }
0x10dc   : > { %v3959_v44 = vpack.c.bf16 %v3925_v14, %v3923_v27 }
0x10de   : > { %4078 = vmatmul.bf16.vlgmr.msrb.gmra.mxu0 %v3959_v44 }
0x115b   : > { %v4079_v34 = vpop.f32.mrf.mxu0 }
0x115c   : > { %v4065_v17 = vpop.f32.mrf.mxu3 }
0x115d   : > { %v4080_v35 = vadd.f32 %v4079_v34, %v4065_v17 }
0x115f   : > { %v4084_v39 = vadd.f32 %v4080_v35, %v6433_v4 }
0x1161   : > { %v4090_v40 = vadd.f32 %v5495_v37, %v4084_v39 }
0x1163   : > { %4092 = vst.msk [vmem:[#allocation2] sm:$0xff] %vm1808_vm2, %v4090_v40  ;;  %v4081_v42 = vpop.f32.mrf.mxu0 }
0x1164   : > { %v4067_v41 = vpop.f32.mrf.mxu3 }
0x1165   : > { %v4082_v21 = vadd.f32 %v4081_v42, %v4067_v41 }
0x1167   : > { %v4085_v36 = vadd.f32 %v4082_v21, %v6438_v11  ;;  %4097 = sbr.rel (%p5246_p8) target bundleno = 4873 (0x1309), region = 184 }
0x1169   : > { %v4091_v45 = vadd.f32 %v5495_v37, %v4085_v36 }
0x116b   : > { %4093 = vst.msk [vmem:[#allocation2 + $0x8] sm:$0x7f] %vm1812_vm3, %v4091_v45 }
0x116c   : > { %v4100_v47 = vsel %vm1808_vm2, %v4090_v40, 0.0  ;;  %v4103_v4 = vsel %vm1812_vm3, %v4091_v45, 0.0  ;;  %v5387_v57 = vld [vmem:[%s6824_s7 + $0x18] sm:$0xff]  ;;  %v5386_v62 = vld [vmem:[%s6824_s7 + $0x10] sm:$0xff]  ;;  %v5385_v59 = vld [vmem:[%s6824_s7 + $0x8] sm:$0xff] }
0x116d   : > { %4101 = vadd.xlane.f32.xlu0 %v4100_v47  ;;  %4194 = vmatpush.bf16.msra.mxu0 %v5387_v57  ;;  %v5384_v46 = vld [vmem:[%s6824_s7] sm:$0xff] }
0x116e   : > { %v5564_v20 = vld [vmem:[%s6825_s19] ss:$0 sm:$0xff] }
0x116f   : > { %v5565_v23 = vld [vmem:[%s6826_s0] ss:$0 sm:$0xff] }
0x1171   : > { %4195 = vmatpush.bf16.msra.mxu0 %v5386_v62 }
0x1175   : > { %4104 = vadd.xlane.f32.xlu0 %v4103_v4  ;;  %4196 = vmatpush.bf16.msra.mxu0 %v5385_v59 }
0x1179   : > { %4197 = vmatpush.bf16.msra.mxu0 %v5384_v46 }
0x11e0   : > { %v4102_v51 = vpop.xlane.xlu0 %4101 }
0x11e1   : > { %v4106_v48 = vmul.f32 %v4102_v51, %v6029_v12 }
0x11e3   : > { %v4108_v49 = vsub.f32 %v4090_v40, %v4106_v48 }
0x11e5   : > { %v4110_v11 = vmul.f32 %v4108_v49, %v4108_v49 }
0x11e7   : > { %v4112_v24 = vsel %vm1808_vm2, %v4110_v11, 0.0 }
0x11e8   : > { %4113 = vadd.xlane.f32.xlu1 %v4112_v24  ;;  %v4105_v33 = vpop.xlane.xlu0 %4104 }
0x11e9   : > { %v4107_v52 = vmul.f32 %v4105_v33, %v6029_v12 }
0x11eb   : > { %v4109_v2 = vsub.f32 %v4091_v45, %v4107_v52 }
0x11ed   : > { %v4111_v43 = vmul.f32 %v4109_v2, %v4109_v2 }
0x11ef   : > { %v4115_v55 = vsel %vm1812_vm3, %v4111_v43, 0.0 }
0x11f0   : > { %4116 = vadd.xlane.f32.xlu1 %v4115_v55 }
0x125b   : > { %v4114_v10 = vpop.xlane.xlu1 %4113 }
0x125c   : > { %v4118_v61 = vmul.f32 %v4114_v10, %v6029_v12 }
0x125e   : > { %v4120_v0 = vadd.f32 1e-05, %v4118_v61 }
0x1260   : > { %5566 = vrsqrt.f32 %v4120_v0  ;;  %vm4128_vm12 = vweird.f32 %v4120_v0 }
0x1263   : > { %v4117_v1 = vpop.xlane.xlu1 %4116 }
0x1264   : > { %v4119_v5 = vmul.f32 %v4117_v1, %v6029_v12 }
0x1266   : > { %v5567_v7 = vpop.eup %5566  ;;  %v4121_v8 = vadd.f32 1e-05, %v4119_v5 }
0x1267   : > { %v4123_v56 = vmul.f32 %v5567_v7, %v4120_v0  ;;  %vm4129_vm3 = vweird.f32 %v5567_v7 }
0x1268   : > { %5568 = vrsqrt.f32 %v4121_v8  ;;  %vm4130_vm0 = vmor %vm4128_vm12, %vm4129_vm3  ;;  %vm4138_vm4 = vweird.f32 %v4121_v8 }
0x1269   : > { %v4124_v9 = vmul.f32 %v5567_v7, %v4123_v56 }
0x126b   : > { %v4125_v50 = vmul.f32 0.5, %v4124_v9 }
0x126d   : > { %v4126_v13 = vsub.f32 1.5, %v4125_v50 }
0x126e   : > { %v5569_v22 = vpop.eup %5568 }
0x126f   : > { %v4127_v60 = vmul.f32 %v5567_v7, %v4126_v13  ;;  %v4133_v3 = vmul.f32 %v5569_v22, %v4121_v8  ;;  %vm4139_vm1 = vweird.f32 %v5569_v22 }
0x1270   : > { %vm4140_vm5 = vmor %vm4138_vm4, %vm4139_vm1 }
0x1271   : > { %v4134_v6 = vmul.f32 %v5569_v22, %v4133_v3  ;;  %v4131_v54 = vsel %vm4130_vm0, %v5567_v7, %v4127_v60 }
0x1272   : > { %v4142_v12 = vmul.f32 %v4131_v54, %v4108_v49 }
0x1273   : > { %v4135_v38 = vmul.f32 0.5, %v4134_v6 }
0x1274   : > { %v4147_v53 = vmul.f32 %v5564_v20, %v4142_v12 }
0x1275   : > { %v4136_v15 = vsub.f32 1.5, %v4135_v38 }
0x1276   : > { %v4152_v26 = vadd.f32 %v5565_v23, %v4147_v53 }
0x1277   : > { %v4137_v16 = vmul.f32 %v5569_v22, %v4136_v15 }
0x1279   : > { %v4141_v28 = vsel %vm4140_vm5, %v5569_v22, %v4137_v16 }
0x127a   : > { %v4143_v19 = vmul.f32 %v4141_v28, %v4109_v2 }
0x127c   : > { %v4148_v25 = vmul.f32 %v5564_v20, %v4143_v19 }
0x127e   : > { %v4153_v29 = vadd.f32 %v5565_v23, %v4148_v25 }
0x1280   : > { %v4162_v18 = vpack.c.bf16 %v4153_v29, %v4152_v26 }
0x1282   : > { %5263 = vmatmul.msk.bf16.vlgmr.msra.gmra.mxu0 %vm1808_vm2, %v4162_v18 }
0x12ff   : > { %v4199_v32 = vpop.f32.mrf.mxu0 }
0x1300   : > { %4204 = vst [vmem:[%s6016_s3] sm:$0xff] %v4199_v32 }
0x1307   : > { %v4201_v30 = vpop.f32.mrf.mxu0 }
0x1308   : > { %4205 = vst [vmem:[%s6016_s3 + $0x8] sm:$0x7f] %v4201_v30 }
0x1309 PF: > { %s6827_s27 = sld [smem:[#allocation46_spill]] }
0x130a   : > { %s6828_s22 = sld [smem:[#allocation44_spill]] }
0x130b   : > { %s6829_s23 = sld [smem:[#allocation45_spill]] }
0x130c   : > { %s6830_s26 = sld [smem:[#allocation47_spill]] }
0x130d   : > { %s6831_s28 = sld [smem:[#allocation48_spill]] }
0x130f   : > { %s89_s1 = sadd.s32 1, %s6827_s27  }
0x1310   : > { %p86_p9 = scmp.ge.s32.totalorder %s89_s1, 6  }
0x1312   :  { %88 = sbr.rel (!%p86_p9) target bundleno = 95 (0x5f), region = 372 }

</bundles_post_ra>
